<compile_context>
chip_gen: v6e
topology: v6e:2x2x1
jax: 0.10.0
libtpu: 0.0.40
codegen_flags: <defaults>
</compile_context>

<pallas_src>
import jax
import jax.numpy as jnp
from jax.experimental import pallas as pl
from jax.experimental.pallas import tpu as pltpu

# ---------------- problem sizes (module defaults, TPU-tile friendly) ---------
B = 256            # batch
G = 256            # n_genes
CH = 128           # n_context_hidden
H1, H2 = 256, 128  # hidden_dims
L = 128            # n_latent
LN_EPS = 1e-5      # PyTorch nn.LayerNorm default


def _batch_tile() -> int:
    """Single batch tile on single-TC chips; 2-way split on dual-TC chips."""
    try:
        kind = jax.devices()[0].device_kind.lower()
    except Exception:
        kind = ""
    dual_tc = any(t in kind for t in ("v7", "v4", "v5p"))
    if dual_tc and (B // 2) % 8 == 0:
        return B // 2
    return B


TB = _batch_tile()


# ---------------- in-kernel helpers ------------------------------------------
def _standardize(h):
    """LayerNorm without affine (affine folded into the following Linear)."""
    m = jnp.mean(h, axis=-1, keepdims=True)
    m2 = jnp.mean(h * h, axis=-1, keepdims=True)
    return (h - m) * jax.lax.rsqrt(m2 - m * m + LN_EPS)


def _ln(h, gamma, beta):
    """LayerNorm over the last axis; two independent reductions (E[x], E[x^2])."""
    m = jnp.mean(h, axis=-1, keepdims=True)
    m2 = jnp.mean(h * h, axis=-1, keepdims=True)
    return (h - m) * jax.lax.rsqrt(m2 - m * m + LN_EPS) * gamma + beta


def encoder_kernel(
    x_ref,                                 # [TB, G]   bf16
    cw1_ref, cw2_ref,                      # context-net weights (bf16), cw1 has LN0 folded
    ew1_ref, ew2_ref,                      # encoder weights     (bf16)
    wmulv_ref,                             # fused mu|logvar head weight (bf16) [H2, 2L]
    vec_ref,                               # packed parameter rows [12, 256] f32
    eps_ref,                               # [TB, L]   bf16  N(0,1) noise
    mu_ref, lv_ref, z_ref,                 # [TB, L] f32 each
):
    x = x_ref[...].astype(jnp.float32)     # bf16 -> f32 for LN / elementwise math

    # ---- packed parameter rows (static slices, broadcast over batch) --------
    gw_sig = vec_ref[0:1, :]               # sigmoid(global_weights), precomputed
    cb2    = vec_ref[1:2, :]
    eb1    = vec_ref[2:3, :]
    eln1_g = vec_ref[3:4, :]
    eln1_b = vec_ref[4:5, :]
    bmulv  = vec_ref[5:6, :]               # bmu | blv   (2L = 256)
    cb1    = vec_ref[6:7, :CH]             # cln0 affine already folded into cw1/cb1
    cln1_g = vec_ref[7:8, :CH]
    cln1_b = vec_ref[8:9, :CH]
    eb2    = vec_ref[9:10, :H2]
    eln2_g = vec_ref[10:11, :H2]
    eln2_b = vec_ref[11:12, :H2]

    # ---------------- GeneImportanceModule ----------------------------------
    # context_net: LN -> Linear -> LN -> ReLU -> (Dropout=id) -> Linear -> Sigmoid
    h = _standardize(x)                    # LN0 affine folded into cw1/cb1
    h = jnp.dot(h.astype(jnp.bfloat16), cw1_ref[...],
                preferred_element_type=jnp.float32) + cb1
    h = jnp.maximum(_ln(h, cln1_g, cln1_b), 0.0)
    h = jnp.dot(h.astype(jnp.bfloat16), cw2_ref[...],
                preferred_element_type=jnp.float32) + cb2
    context_w = jax.nn.sigmoid(h)                        # [TB, G]

    embedded = x * (1.0 + gw_sig * context_w)            # preprocess(): x + x*importance

    # ---------------- encoder MLP: (Linear -> LN -> ReLU -> Dropout) x 2 ----
    h = jnp.dot(embedded.astype(jnp.bfloat16), ew1_ref[...],
                preferred_element_type=jnp.float32) + eb1
    h = jnp.maximum(_ln(h, eln1_g, eln1_b), 0.0)

    h = jnp.dot(h.astype(jnp.bfloat16), ew2_ref[...],
                preferred_element_type=jnp.float32) + eb2
    h = jnp.maximum(_ln(h, eln2_g, eln2_b), 0.0)

    # ---------------- fused mu/logvar head + reparameterization -------------
    ml = jnp.dot(h.astype(jnp.bfloat16), wmulv_ref[...],
                 preferred_element_type=jnp.float32) + bmulv      # [TB, 2L]
    mu = jnp.clip(ml[:, :L], -20.0, 20.0)
    lv = jnp.clip(ml[:, L:], -20.0, 20.0)

    std = jnp.exp(0.5 * jnp.minimum(lv, 2.0))            # lv already >= -20
    z = mu + eps_ref[...].astype(jnp.float32) * std

    mu_ref[...] = mu
    lv_ref[...] = lv
    z_ref[...] = z


# ---------------- parameter construction / packing ---------------------------
def init_params(key):
    """Deterministic synthetic parameter init (PyTorch-like uniform +/- 1/sqrt(fan_in))."""
    ks = jax.random.split(key, 6)

    def lin(k, fin, fout):
        k1, k2 = jax.random.split(k)
        bound = 1.0 / jnp.sqrt(fin)
        w = jax.random.uniform(k1, (fin, fout), jnp.float32, -bound, bound)
        b = jax.random.uniform(k2, (1, fout), jnp.float32, -bound, bound)
        return w, b

    p = {}
    # GeneImportanceModule
    p["gw"] = jnp.ones((1, G), jnp.float32)              # nn.Parameter(torch.ones(n_genes))
    p["cln0_g"] = jnp.ones((1, G), jnp.float32)
    p["cln0_b"] = jnp.zeros((1, G), jnp.float32)
    p["cw1"], p["cb1"] = lin(ks[0], G, CH)
    p["cln1_g"] = jnp.ones((1, CH), jnp.float32)
    p["cln1_b"] = jnp.zeros((1, CH), jnp.float32)
    p["cw2"], p["cb2"] = lin(ks[1], CH, G)
    # encoder layer 1
    p["ew1"], p["eb1"] = lin(ks[2], G, H1)
    p["eln1_g"] = jnp.ones((1, H1), jnp.float32)
    p["eln1_b"] = jnp.zeros((1, H1), jnp.float32)
    # encoder layer 2
    p["ew2"], p["eb2"] = lin(ks[3], H1, H2)
    p["eln2_g"] = jnp.ones((1, H2), jnp.float32)
    p["eln2_b"] = jnp.zeros((1, H2), jnp.float32)
    # heads
    p["wmu"], p["bmu"] = lin(ks[4], H2, L)
    p["wlv"], p["blv"] = lin(ks[5], H2, L)
    return p


def pack_params(p):
    """Fold LN0 affine into cw1/cb1 (f32), fuse mu/logvar head, cast to bf16,
    pack every [1, D] row into one [12, 256] f32 operand."""
    bf16 = lambda w: w.astype(jnp.bfloat16)

    # LN0 affine fold (in f32, cast to bf16 afterwards — single rounding).
    cw1_folded = p["cln0_g"].reshape(G, 1) * p["cw1"]               # [G, CH]
    cb1_folded = p["cln0_b"] @ p["cw1"] + p["cb1"]                  # [1, CH]

    wmulv = jnp.concatenate([p["wmu"], p["wlv"]], axis=1)           # [H2, 2L]
    bmulv = jnp.concatenate([p["bmu"], p["blv"]], axis=1)           # [1, 2L]

    def pad256(v):                                                  # [1, D<=256] -> [1, 256]
        return jnp.pad(v, ((0, 0), (0, 256 - v.shape[1])))

    vecs = jnp.concatenate([
        jax.nn.sigmoid(p["gw"]),                                    # 0: precomputed sigmoid
        p["cb2"],                                                   # 1
        p["eb1"],                                                   # 2
        p["eln1_g"],                                                # 3
        p["eln1_b"],                                                # 4
        bmulv,                                                      # 5
        pad256(cb1_folded),                                         # 6
        pad256(p["cln1_g"]),                                        # 7
        pad256(p["cln1_b"]),                                        # 8
        pad256(p["eb2"]),                                           # 9
        pad256(p["eln2_g"]),                                        # 10
        pad256(p["eln2_b"]),                                        # 11
    ], axis=0).astype(jnp.float32)                                  # [12, 256]

    return {
        "cw1": bf16(cw1_folded), "cw2": bf16(p["cw2"]),
        "ew1": bf16(p["ew1"]), "ew2": bf16(p["ew2"]),
        "wmulv": bf16(wmulv),
        "vecs": vecs,
    }


# ---------------- pallas_call wrapper -----------------------------------------
@jax.jit
def encoder_forward(x_bf16, packed, eps_bf16):
    grid = (B // TB,)
    resident = lambda shape: pl.BlockSpec(shape, lambda i: (0, 0))   # VMEM-resident
    out_spec = pl.BlockSpec((TB, L), lambda i: (i, 0))
    mu, lv, z = pl.pallas_call(
        encoder_kernel,
        out_shape=(
            jax.ShapeDtypeStruct((B, L), jnp.float32),
            jax.ShapeDtypeStruct((B, L), jnp.float32),
            jax.ShapeDtypeStruct((B, L), jnp.float32),
        ),
        grid=grid,
        in_specs=[
            pl.BlockSpec((TB, G), lambda i: (i, 0)),                 # x (batch-tiled, bf16)
            resident((G, CH)),                                       # cw1 (LN0 folded)
            resident((CH, G)),                                       # cw2
            resident((G, H1)),                                       # ew1
            resident((H1, H2)),                                      # ew2
            resident((H2, 2 * L)),                                   # wmulv
            resident((12, 256)),                                     # packed vectors
            pl.BlockSpec((TB, L), lambda i: (i, 0)),                 # eps (batch-tiled, bf16)
        ],
        out_specs=(out_spec, out_spec, out_spec),
        compiler_params=pltpu.CompilerParams(
            dimension_semantics=("parallel",)),
    )(x_bf16, packed["cw1"], packed["cw2"], packed["ew1"], packed["ew2"],
      packed["wmulv"], packed["vecs"], eps_bf16)
    return {"mu": mu, "logvar": lv, "z": z}


# ---------------- pure-JAX f32 reference (eval mode) --------------------------
def reference_forward(x, p, eps):
    def ln(h, g, b):
        m = h.mean(-1, keepdims=True)
        v = ((h - m) ** 2).mean(-1, keepdims=True)
        return (h - m) / jnp.sqrt(v + LN_EPS) * g + b

    h = ln(x, p["cln0_g"], p["cln0_b"])
    h = h @ p["cw1"] + p["cb1"]
    h = jnp.maximum(ln(h, p["cln1_g"], p["cln1_b"]), 0.0)
    h = h @ p["cw2"] + p["cb2"]
    context_w = jax.nn.sigmoid(h)
    importance = jax.nn.sigmoid(p["gw"]) * context_w
    embedded = x + x * importance

    h = embedded @ p["ew1"] + p["eb1"]
    h = jnp.maximum(ln(h, p["eln1_g"], p["eln1_b"]), 0.0)
    h = h @ p["ew2"] + p["eb2"]
    h = jnp.maximum(ln(h, p["eln2_g"], p["eln2_b"]), 0.0)

    mu = jnp.clip(h @ p["wmu"] + p["bmu"], -20.0, 20.0)
    lv = jnp.clip(h @ p["wlv"] + p["blv"], -20.0, 20.0)
    std = jnp.exp(0.5 * jnp.clip(lv, -20.0, 2.0))
    z = mu + eps * std
    return {"mu": mu, "logvar": lv, "z": z}


if __name__ == "__main__":
    key = jax.random.PRNGKey(0)
    kx, kp, ke = jax.random.split(key, 3)

    x = jax.random.normal(kx, (B, G), jnp.float32)
    params = init_params(kp)
    packed = pack_params(params)
    # eps ~ N(0,1): equivalent of torch.randn_like(std), generated outside the
    # kernel so the kernel stays deterministic given its inputs.
    eps = jax.random.normal(ke, (B, L), jnp.float32)

    # bf16 I/O (halves x/eps HBM traffic); math inside the kernel stays f32.
    x_bf16 = x.astype(jnp.bfloat16)
    eps_bf16 = eps.astype(jnp.bfloat16)

    out = encoder_forward(x_bf16, packed, eps_bf16)
    jax.block_until_ready(out)

    assert out["mu"].shape == (B, L)
    assert out["logvar"].shape == (B, L)
    assert out["z"].shape == (B, L)
    assert bool(jnp.all(jnp.isfinite(out["z"])))

    # Correctness vs f32 reference fed the same bf16-rounded inputs (so the
    # residual error is only the bf16 MXU operands, as in the original kernel).
    ref = reference_forward(x_bf16.astype(jnp.float32), params,
                            eps_bf16.astype(jnp.float32))
    for k in ("mu", "logvar", "z"):
        max_diff = float(jnp.max(jnp.abs(out[k] - ref[k])))
        assert max_diff < 0.2, f"{k} mismatch: max|diff|={max_diff}"

    print("KERNEL_OK")
</pallas_src>

<mosaic_0001>
module attributes {stable_mosaic.version = 11 : i64} {
  func.func @encoder_kernel(%arg0: i32, %arg1: memref<256x256xbf16, #tpu.memory_space<vmem>>, %arg2: memref<256x128xbf16, #tpu.memory_space<vmem>>, %arg3: memref<128x256xbf16, #tpu.memory_space<vmem>>, %arg4: memref<256x256xbf16, #tpu.memory_space<vmem>>, %arg5: memref<256x128xbf16, #tpu.memory_space<vmem>>, %arg6: memref<128x256xbf16, #tpu.memory_space<vmem>>, %arg7: memref<12x256xf32, #tpu.memory_space<vmem>>, %arg8: memref<256x128xbf16, #tpu.memory_space<vmem>>, %arg9: memref<256x128xf32, #tpu.memory_space<vmem>>, %arg10: memref<256x128xf32, #tpu.memory_space<vmem>>, %arg11: memref<256x128xf32, #tpu.memory_space<vmem>>) attributes {dimension_semantics = [#tpu.dimension_semantics<parallel>], iteration_bounds = array<i64: 1>, scalar_prefetch = 0 : i64, scratch_operands = 0 : i64, tpu.core_type = #tpu.core_type<tc>, window_params = [{transform_indices = @transform_0, window_bounds = array<i64: 256, 256>}, {pipeline_mode = #tpu.pipeline_mode<synchronous>, transform_indices = @transform_1, window_bounds = array<i64: 256, 128>}, {pipeline_mode = #tpu.pipeline_mode<synchronous>, transform_indices = @transform_2, window_bounds = array<i64: 128, 256>}, {pipeline_mode = #tpu.pipeline_mode<synchronous>, transform_indices = @transform_3, window_bounds = array<i64: 256, 256>}, {pipeline_mode = #tpu.pipeline_mode<synchronous>, transform_indices = @transform_4, window_bounds = array<i64: 256, 128>}, {pipeline_mode = #tpu.pipeline_mode<synchronous>, transform_indices = @transform_5, window_bounds = array<i64: 128, 256>}, {pipeline_mode = #tpu.pipeline_mode<synchronous>, transform_indices = @transform_6, window_bounds = array<i64: 12, 256>}, {transform_indices = @transform_7, window_bounds = array<i64: 256, 128>}, {transform_indices = @transform_8, window_bounds = array<i64: 256, 128>}, {transform_indices = @transform_9, window_bounds = array<i64: 256, 128>}, {transform_indices = @transform_10, window_bounds = array<i64: 256, 128>}]} {
    %c0 = arith.constant 0 : index
    %c0_0 = arith.constant 0 : index
    %0 = vector.load %arg1[%c0, %c0_0] : memref<256x256xbf16, #tpu.memory_space<vmem>>, vector<256x256xbf16>
    %1 = arith.extf %0 : vector<256x256xbf16> to vector<256x256xf32>
    %c0_1 = arith.constant 0 : index
    %c0_2 = arith.constant 0 : index
    %2 = vector.load %arg7[%c0_1, %c0_2] : memref<12x256xf32, #tpu.memory_space<vmem>>, vector<1x256xf32>
    %c1 = arith.constant 1 : index
    %c0_3 = arith.constant 0 : index
    %3 = vector.load %arg7[%c1, %c0_3] : memref<12x256xf32, #tpu.memory_space<vmem>>, vector<1x256xf32>
    %c2 = arith.constant 2 : index
    %c0_4 = arith.constant 0 : index
    %4 = vector.load %arg7[%c2, %c0_4] : memref<12x256xf32, #tpu.memory_space<vmem>>, vector<1x256xf32>
    %c3 = arith.constant 3 : index
    %c0_5 = arith.constant 0 : index
    %5 = vector.load %arg7[%c3, %c0_5] : memref<12x256xf32, #tpu.memory_space<vmem>>, vector<1x256xf32>
    %c4 = arith.constant 4 : index
    %c0_6 = arith.constant 0 : index
    %6 = vector.load %arg7[%c4, %c0_6] : memref<12x256xf32, #tpu.memory_space<vmem>>, vector<1x256xf32>
    %c5 = arith.constant 5 : index
    %c0_7 = arith.constant 0 : index
    %7 = vector.load %arg7[%c5, %c0_7] : memref<12x256xf32, #tpu.memory_space<vmem>>, vector<1x256xf32>
    %c6 = arith.constant 6 : index
    %c0_8 = arith.constant 0 : index
    %8 = vector.load %arg7[%c6, %c0_8] : memref<12x256xf32, #tpu.memory_space<vmem>>, vector<1x128xf32>
    %c7 = arith.constant 7 : index
    %c0_9 = arith.constant 0 : index
    %9 = vector.load %arg7[%c7, %c0_9] : memref<12x256xf32, #tpu.memory_space<vmem>>, vector<1x128xf32>
    %c8 = arith.constant 8 : index
    %c0_10 = arith.constant 0 : index
    %10 = vector.load %arg7[%c8, %c0_10] : memref<12x256xf32, #tpu.memory_space<vmem>>, vector<1x128xf32>
    %c9 = arith.constant 9 : index
    %c0_11 = arith.constant 0 : index
    %11 = vector.load %arg7[%c9, %c0_11] : memref<12x256xf32, #tpu.memory_space<vmem>>, vector<1x128xf32>
    %c10 = arith.constant 10 : index
    %c0_12 = arith.constant 0 : index
    %12 = vector.load %arg7[%c10, %c0_12] : memref<12x256xf32, #tpu.memory_space<vmem>>, vector<1x128xf32>
    %c11 = arith.constant 11 : index
    %c0_13 = arith.constant 0 : index
    %13 = vector.load %arg7[%c11, %c0_13] : memref<12x256xf32, #tpu.memory_space<vmem>>, vector<1x128xf32>
    %cst = arith.constant dense<0.000000e+00> : vector<256xf32>
    %14 = vector.multi_reduction <add>, %1, %cst [1] : vector<256x256xf32> to vector<256xf32>
    %15 = vector.shape_cast %14 : vector<256xf32> to vector<256x1xf32>
    %cst_14 = arith.constant 2.560000e+02 : f32
    %16 = vector.broadcast %cst_14 : f32 to vector<256x1xf32>
    %17 = arith.divf %15, %16 : vector<256x1xf32>
    %18 = arith.mulf %1, %1 : vector<256x256xf32>
    %cst_15 = arith.constant dense<0.000000e+00> : vector<256xf32>
    %19 = vector.multi_reduction <add>, %18, %cst_15 [1] : vector<256x256xf32> to vector<256xf32>
    %20 = vector.shape_cast %19 : vector<256xf32> to vector<256x1xf32>
    %cst_16 = arith.constant 2.560000e+02 : f32
    %21 = vector.broadcast %cst_16 : f32 to vector<256x1xf32>
    %22 = arith.divf %20, %21 : vector<256x1xf32>
    %23 = vector.broadcast %17 : vector<256x1xf32> to vector<256x256xf32>
    %24 = arith.subf %1, %23 : vector<256x256xf32>
    %25 = arith.mulf %17, %17 : vector<256x1xf32>
    %26 = arith.subf %22, %25 : vector<256x1xf32>
    %cst_17 = arith.constant 9.99999974E-6 : f32
    %27 = vector.broadcast %cst_17 : f32 to vector<256x1xf32>
    %28 = arith.addf %26, %27 : vector<256x1xf32>
    %29 = math.rsqrt %28 : vector<256x1xf32>
    %30 = vector.broadcast %29 : vector<256x1xf32> to vector<256x256xf32>
    %31 = arith.mulf %24, %30 : vector<256x256xf32>
    %32 = arith.truncf %31 : vector<256x256xf32> to vector<256x256xbf16>
    %c0_18 = arith.constant 0 : index
    %c0_19 = arith.constant 0 : index
    %33 = vector.load %arg2[%c0_18, %c0_19] : memref<256x128xbf16, #tpu.memory_space<vmem>>, vector<256x128xbf16>
    %cst_20 = arith.constant dense<0.000000e+00> : vector<256x128xf32>
    %34 = tpu.matmul %32, %33, %cst_20 {dimension_numbers = #tpu.dot_dimension_numbers<[1], [0], [0], [1], [0, 0, 1, 1], [], []>} : vector<256x256xbf16>, vector<256x128xbf16>, vector<256x128xf32> -> vector<256x128xf32>
    %35 = vector.broadcast %8 : vector<1x128xf32> to vector<256x128xf32>
    %36 = arith.addf %34, %35 : vector<256x128xf32>
    %cst_21 = arith.constant dense<0.000000e+00> : vector<256xf32>
    %37 = vector.multi_reduction <add>, %36, %cst_21 [1] : vector<256x128xf32> to vector<256xf32>
    %38 = vector.shape_cast %37 : vector<256xf32> to vector<256x1xf32>
    %cst_22 = arith.constant 1.280000e+02 : f32
    %39 = vector.broadcast %cst_22 : f32 to vector<256x1xf32>
    %40 = arith.divf %38, %39 : vector<256x1xf32>
    %41 = arith.mulf %36, %36 : vector<256x128xf32>
    %cst_23 = arith.constant dense<0.000000e+00> : vector<256xf32>
    %42 = vector.multi_reduction <add>, %41, %cst_23 [1] : vector<256x128xf32> to vector<256xf32>
    %43 = vector.shape_cast %42 : vector<256xf32> to vector<256x1xf32>
    %cst_24 = arith.constant 1.280000e+02 : f32
    %44 = vector.broadcast %cst_24 : f32 to vector<256x1xf32>
    %45 = arith.divf %43, %44 : vector<256x1xf32>
    %46 = vector.broadcast %40 : vector<256x1xf32> to vector<256x128xf32>
    %47 = arith.subf %36, %46 : vector<256x128xf32>
    %48 = arith.mulf %40, %40 : vector<256x1xf32>
    %49 = arith.subf %45, %48 : vector<256x1xf32>
    %cst_25 = arith.constant 9.99999974E-6 : f32
    %50 = vector.broadcast %cst_25 : f32 to vector<256x1xf32>
    %51 = arith.addf %49, %50 : vector<256x1xf32>
    %52 = math.rsqrt %51 : vector<256x1xf32>
    %53 = vector.broadcast %52 : vector<256x1xf32> to vector<256x128xf32>
    %54 = arith.mulf %47, %53 : vector<256x128xf32>
    %55 = vector.broadcast %9 : vector<1x128xf32> to vector<256x128xf32>
    %56 = arith.mulf %54, %55 : vector<256x128xf32>
    %57 = vector.broadcast %10 : vector<1x128xf32> to vector<256x128xf32>
    %58 = arith.addf %56, %57 : vector<256x128xf32>
    %cst_26 = arith.constant 0.000000e+00 : f32
    %59 = vector.broadcast %cst_26 : f32 to vector<256x128xf32>
    %60 = arith.maximumf %58, %59 : vector<256x128xf32>
    %61 = arith.truncf %60 : vector<256x128xf32> to vector<256x128xbf16>
    %c0_27 = arith.constant 0 : index
    %c0_28 = arith.constant 0 : index
    %62 = vector.load %arg3[%c0_27, %c0_28] : memref<128x256xbf16, #tpu.memory_space<vmem>>, vector<128x256xbf16>
    %cst_29 = arith.constant dense<0.000000e+00> : vector<256x256xf32>
    %63 = tpu.matmul %61, %62, %cst_29 {dimension_numbers = #tpu.dot_dimension_numbers<[1], [0], [0], [1], [0, 0, 1, 1], [], []>} : vector<256x128xbf16>, vector<128x256xbf16>, vector<256x256xf32> -> vector<256x256xf32>
    %64 = vector.broadcast %3 : vector<1x256xf32> to vector<256x256xf32>
    %65 = arith.addf %63, %64 : vector<256x256xf32>
    %66 = arith.negf %65 : vector<256x256xf32>
    %67 = math.exp %66 : vector<256x256xf32>
    %cst_30 = arith.constant 1.000000e+00 : f32
    %68 = vector.broadcast %cst_30 : f32 to vector<256x256xf32>
    %69 = arith.addf %68, %67 : vector<256x256xf32>
    %70 = arith.divf %68, %69 : vector<256x256xf32>
    %71 = vector.broadcast %2 : vector<1x256xf32> to vector<256x256xf32>
    %72 = arith.mulf %71, %70 : vector<256x256xf32>
    %cst_31 = arith.constant 1.000000e+00 : f32
    %73 = vector.broadcast %cst_31 : f32 to vector<256x256xf32>
    %74 = arith.addf %73, %72 : vector<256x256xf32>
    %75 = arith.mulf %1, %74 : vector<256x256xf32>
    %76 = arith.truncf %75 : vector<256x256xf32> to vector<256x256xbf16>
    %c0_32 = arith.constant 0 : index
    %c0_33 = arith.constant 0 : index
    %77 = vector.load %arg4[%c0_32, %c0_33] : memref<256x256xbf16, #tpu.memory_space<vmem>>, vector<256x256xbf16>
    %cst_34 = arith.constant dense<0.000000e+00> : vector<256x256xf32>
    %78 = tpu.matmul %76, %77, %cst_34 {dimension_numbers = #tpu.dot_dimension_numbers<[1], [0], [0], [1], [0, 0, 1, 1], [], []>} : vector<256x256xbf16>, vector<256x256xbf16>, vector<256x256xf32> -> vector<256x256xf32>
    %79 = vector.broadcast %4 : vector<1x256xf32> to vector<256x256xf32>
    %80 = arith.addf %78, %79 : vector<256x256xf32>
    %cst_35 = arith.constant dense<0.000000e+00> : vector<256xf32>
    %81 = vector.multi_reduction <add>, %80, %cst_35 [1] : vector<256x256xf32> to vector<256xf32>
    %82 = vector.shape_cast %81 : vector<256xf32> to vector<256x1xf32>
    %cst_36 = arith.constant 2.560000e+02 : f32
    %83 = vector.broadcast %cst_36 : f32 to vector<256x1xf32>
    %84 = arith.divf %82, %83 : vector<256x1xf32>
    %85 = arith.mulf %80, %80 : vector<256x256xf32>
    %cst_37 = arith.constant dense<0.000000e+00> : vector<256xf32>
    %86 = vector.multi_reduction <add>, %85, %cst_37 [1] : vector<256x256xf32> to vector<256xf32>
    %87 = vector.shape_cast %86 : vector<256xf32> to vector<256x1xf32>
    %cst_38 = arith.constant 2.560000e+02 : f32
    %88 = vector.broadcast %cst_38 : f32 to vector<256x1xf32>
    %89 = arith.divf %87, %88 : vector<256x1xf32>
    %90 = vector.broadcast %84 : vector<256x1xf32> to vector<256x256xf32>
    %91 = arith.subf %80, %90 : vector<256x256xf32>
    %92 = arith.mulf %84, %84 : vector<256x1xf32>
    %93 = arith.subf %89, %92 : vector<256x1xf32>
    %cst_39 = arith.constant 9.99999974E-6 : f32
    %94 = vector.broadcast %cst_39 : f32 to vector<256x1xf32>
    %95 = arith.addf %93, %94 : vector<256x1xf32>
    %96 = math.rsqrt %95 : vector<256x1xf32>
    %97 = vector.broadcast %96 : vector<256x1xf32> to vector<256x256xf32>
    %98 = arith.mulf %91, %97 : vector<256x256xf32>
    %99 = vector.broadcast %5 : vector<1x256xf32> to vector<256x256xf32>
    %100 = arith.mulf %98, %99 : vector<256x256xf32>
    %101 = vector.broadcast %6 : vector<1x256xf32> to vector<256x256xf32>
    %102 = arith.addf %100, %101 : vector<256x256xf32>
    %cst_40 = arith.constant 0.000000e+00 : f32
    %103 = vector.broadcast %cst_40 : f32 to vector<256x256xf32>
    %104 = arith.maximumf %102, %103 : vector<256x256xf32>
    %105 = arith.truncf %104 : vector<256x256xf32> to vector<256x256xbf16>
    %c0_41 = arith.constant 0 : index
    %c0_42 = arith.constant 0 : index
    %106 = vector.load %arg5[%c0_41, %c0_42] : memref<256x128xbf16, #tpu.memory_space<vmem>>, vector<256x128xbf16>
    %cst_43 = arith.constant dense<0.000000e+00> : vector<256x128xf32>
    %107 = tpu.matmul %105, %106, %cst_43 {dimension_numbers = #tpu.dot_dimension_numbers<[1], [0], [0], [1], [0, 0, 1, 1], [], []>} : vector<256x256xbf16>, vector<256x128xbf16>, vector<256x128xf32> -> vector<256x128xf32>
    %108 = vector.broadcast %11 : vector<1x128xf32> to vector<256x128xf32>
    %109 = arith.addf %107, %108 : vector<256x128xf32>
    %cst_44 = arith.constant dense<0.000000e+00> : vector<256xf32>
    %110 = vector.multi_reduction <add>, %109, %cst_44 [1] : vector<256x128xf32> to vector<256xf32>
    %111 = vector.shape_cast %110 : vector<256xf32> to vector<256x1xf32>
    %cst_45 = arith.constant 1.280000e+02 : f32
    %112 = vector.broadcast %cst_45 : f32 to vector<256x1xf32>
    %113 = arith.divf %111, %112 : vector<256x1xf32>
    %114 = arith.mulf %109, %109 : vector<256x128xf32>
    %cst_46 = arith.constant dense<0.000000e+00> : vector<256xf32>
    %115 = vector.multi_reduction <add>, %114, %cst_46 [1] : vector<256x128xf32> to vector<256xf32>
    %116 = vector.shape_cast %115 : vector<256xf32> to vector<256x1xf32>
    %cst_47 = arith.constant 1.280000e+02 : f32
    %117 = vector.broadcast %cst_47 : f32 to vector<256x1xf32>
    %118 = arith.divf %116, %117 : vector<256x1xf32>
    %119 = vector.broadcast %113 : vector<256x1xf32> to vector<256x128xf32>
    %120 = arith.subf %109, %119 : vector<256x128xf32>
    %121 = arith.mulf %113, %113 : vector<256x1xf32>
    %122 = arith.subf %118, %121 : vector<256x1xf32>
    %cst_48 = arith.constant 9.99999974E-6 : f32
    %123 = vector.broadcast %cst_48 : f32 to vector<256x1xf32>
    %124 = arith.addf %122, %123 : vector<256x1xf32>
    %125 = math.rsqrt %124 : vector<256x1xf32>
    %126 = vector.broadcast %125 : vector<256x1xf32> to vector<256x128xf32>
    %127 = arith.mulf %120, %126 : vector<256x128xf32>
    %128 = vector.broadcast %12 : vector<1x128xf32> to vector<256x128xf32>
    %129 = arith.mulf %127, %128 : vector<256x128xf32>
    %130 = vector.broadcast %13 : vector<1x128xf32> to vector<256x128xf32>
    %131 = arith.addf %129, %130 : vector<256x128xf32>
    %cst_49 = arith.constant 0.000000e+00 : f32
    %132 = vector.broadcast %cst_49 : f32 to vector<256x128xf32>
    %133 = arith.maximumf %131, %132 : vector<256x128xf32>
    %134 = arith.truncf %133 : vector<256x128xf32> to vector<256x128xbf16>
    %c0_50 = arith.constant 0 : index
    %c0_51 = arith.constant 0 : index
    %135 = vector.load %arg6[%c0_50, %c0_51] : memref<128x256xbf16, #tpu.memory_space<vmem>>, vector<128x256xbf16>
    %cst_52 = arith.constant dense<0.000000e+00> : vector<256x256xf32>
    %136 = tpu.matmul %134, %135, %cst_52 {dimension_numbers = #tpu.dot_dimension_numbers<[1], [0], [0], [1], [0, 0, 1, 1], [], []>} : vector<256x128xbf16>, vector<128x256xbf16>, vector<256x256xf32> -> vector<256x256xf32>
    %137 = vector.broadcast %7 : vector<1x256xf32> to vector<256x256xf32>
    %138 = arith.addf %136, %137 : vector<256x256xf32>
    %139 = vector.extract_strided_slice %138 {offsets = [0, 0], sizes = [256, 128], strides = [1, 1]} : vector<256x256xf32> to vector<256x128xf32>
    %cst_53 = arith.constant -2.000000e+01 : f32
    %cst_54 = arith.constant 2.000000e+01 : f32
    %140 = vector.broadcast %cst_53 : f32 to vector<256x128xf32>
    %141 = arith.maximumf %140, %139 : vector<256x128xf32>
    %142 = vector.broadcast %cst_54 : f32 to vector<256x128xf32>
    %143 = arith.minimumf %142, %141 : vector<256x128xf32>
    %144 = vector.extract_strided_slice %138 {offsets = [0, 128], sizes = [256, 128], strides = [1, 1]} : vector<256x256xf32> to vector<256x128xf32>
    %cst_55 = arith.constant -2.000000e+01 : f32
    %cst_56 = arith.constant 2.000000e+01 : f32
    %145 = vector.broadcast %cst_55 : f32 to vector<256x128xf32>
    %146 = arith.maximumf %145, %144 : vector<256x128xf32>
    %147 = vector.broadcast %cst_56 : f32 to vector<256x128xf32>
    %148 = arith.minimumf %147, %146 : vector<256x128xf32>
    %cst_57 = arith.constant 2.000000e+00 : f32
    %149 = vector.broadcast %cst_57 : f32 to vector<256x128xf32>
    %150 = arith.minimumf %148, %149 : vector<256x128xf32>
    %cst_58 = arith.constant 5.000000e-01 : f32
    %151 = vector.broadcast %cst_58 : f32 to vector<256x128xf32>
    %152 = arith.mulf %151, %150 : vector<256x128xf32>
    %153 = math.exp %152 : vector<256x128xf32>
    %c0_59 = arith.constant 0 : index
    %c0_60 = arith.constant 0 : index
    %154 = vector.load %arg8[%c0_59, %c0_60] : memref<256x128xbf16, #tpu.memory_space<vmem>>, vector<256x128xbf16>
    %155 = arith.extf %154 : vector<256x128xbf16> to vector<256x128xf32>
    %156 = arith.mulf %155, %153 : vector<256x128xf32>
    %157 = arith.addf %143, %156 : vector<256x128xf32>
    %c0_61 = arith.constant 0 : index
    %c0_62 = arith.constant 0 : index
    %158 = vector.load %arg9[%c0_61, %c0_62] : memref<256x128xf32, #tpu.memory_space<vmem>>, vector<256x128xf32>
    tpu.vector_store %arg9[%c0_61, %c0_62], %143 {strides = array<i32>} : memref<256x128xf32, #tpu.memory_space<vmem>>, vector<256x128xf32>,
    %c0_63 = arith.constant 0 : index
    %c0_64 = arith.constant 0 : index
    %159 = vector.load %arg10[%c0_63, %c0_64] : memref<256x128xf32, #tpu.memory_space<vmem>>, vector<256x128xf32>
    tpu.vector_store %arg10[%c0_63, %c0_64], %148 {strides = array<i32>} : memref<256x128xf32, #tpu.memory_space<vmem>>, vector<256x128xf32>,
    %c0_65 = arith.constant 0 : index
    %c0_66 = arith.constant 0 : index
    %160 = vector.load %arg11[%c0_65, %c0_66] : memref<256x128xf32, #tpu.memory_space<vmem>>, vector<256x128xf32>
    tpu.vector_store %arg11[%c0_65, %c0_66], %157 {strides = array<i32>} : memref<256x128xf32, #tpu.memory_space<vmem>>, vector<256x128xf32>,
    return
  }
  func.func @transform_0(%arg0: i32) -> (i32, i32) {
    %c0_i32 = arith.constant 0 : i32
    %c0_i32_0 = arith.constant 0 : i32
    return %arg0, %c0_i32 : i32, i32
  }
  func.func @transform_1(%arg0: i32) -> (i32, i32) {
    %c0_i32 = arith.constant 0 : i32
    %c0_i32_0 = arith.constant 0 : i32
    %c0_i32_1 = arith.constant 0 : i32
    return %c0_i32, %c0_i32_0 : i32, i32
  }
  func.func @transform_2(%arg0: i32) -> (i32, i32) {
    %c0_i32 = arith.constant 0 : i32
    %c0_i32_0 = arith.constant 0 : i32
    %c0_i32_1 = arith.constant 0 : i32
    return %c0_i32, %c0_i32_0 : i32, i32
  }
  func.func @transform_3(%arg0: i32) -> (i32, i32) {
    %c0_i32 = arith.constant 0 : i32
    %c0_i32_0 = arith.constant 0 : i32
    %c0_i32_1 = arith.constant 0 : i32
    return %c0_i32, %c0_i32_0 : i32, i32
  }
  func.func @transform_4(%arg0: i32) -> (i32, i32) {
    %c0_i32 = arith.constant 0 : i32
    %c0_i32_0 = arith.constant 0 : i32
    %c0_i32_1 = arith.constant 0 : i32
    return %c0_i32, %c0_i32_0 : i32, i32
  }
  func.func @transform_5(%arg0: i32) -> (i32, i32) {
    %c0_i32 = arith.constant 0 : i32
    %c0_i32_0 = arith.constant 0 : i32
    %c0_i32_1 = arith.constant 0 : i32
    return %c0_i32, %c0_i32_0 : i32, i32
  }
  func.func @transform_6(%arg0: i32) -> (i32, i32) {
    %c0_i32 = arith.constant 0 : i32
    %c0_i32_0 = arith.constant 0 : i32
    %c0_i32_1 = arith.constant 0 : i32
    return %c0_i32, %c0_i32_0 : i32, i32
  }
  func.func @transform_7(%arg0: i32) -> (i32, i32) {
    %c0_i32 = arith.constant 0 : i32
    %c0_i32_0 = arith.constant 0 : i32
    return %arg0, %c0_i32 : i32, i32
  }
  func.func @transform_8(%arg0: i32) -> (i32, i32) {
    %c0_i32 = arith.constant 0 : i32
    %c0_i32_0 = arith.constant 0 : i32
    return %arg0, %c0_i32 : i32, i32
  }
  func.func @transform_9(%arg0: i32) -> (i32, i32) {
    %c0_i32 = arith.constant 0 : i32
    %c0_i32_0 = arith.constant 0 : i32
    return %arg0, %c0_i32 : i32, i32
  }
  func.func @transform_10(%arg0: i32) -> (i32, i32) {
    %c0_i32 = arith.constant 0 : i32
    %c0_i32_0 = arith.constant 0 : i32
    return %arg0, %c0_i32 : i32, i32
  }
}

</mosaic_0001>

<bundles_post_ra>
// kernel: encoder_forward.1
= control target key start
LH: loop header
LB: loop body
LE: loop exit
PB: predicated region body
PF: predicated region fallthrough
CT: control target
= control target key end

     0   :  { %16 = vsyncpa [#allocation3], 0  ;;  %s9916_s0 = inlined_call_operand.hbm [shape: bf16[256,256], index: 0, kind: input, shape index: {}]   ;;  %s9917_s1 = inlined_call_operand.hbm [shape: bf16[256,128], index: 1, kind: input, shape index: {}]   ;;  %s9918_s2 = inlined_call_operand.hbm [shape: bf16[128,256], index: 2, kind: input, shape index: {}]   ;;  %s9919_s3 = inlined_call_operand.hbm [shape: bf16[256,256], index: 3, kind: input, shape index: {}]   ;;  %s9920_s4 = inlined_call_operand.hbm [shape: bf16[256,128], index: 4, kind: input, shape index: {}]   ;;  %s9921_s5 = inlined_call_operand.hbm [shape: bf16[128,256], index: 5, kind: input, shape index: {}]   ;;  %s9922_s6 = inlined_call_operand.hbm [shape: f32[12,256], index: 6, kind: input, shape index: {}]   ;;  %s9923_s7 = inlined_call_operand.hbm [shape: bf16[256,128], index: 7, kind: input, shape index: {}]   ;;  %s9924_s8 = inlined_call_operand.hbm [shape: f32[256,128], index: 8, kind: output, shape index: {0}]   ;;  %s9925_s9 = inlined_call_operand.hbm [shape: f32[256,128], index: 9, kind: output, shape index: {1}]   ;;  %s9926_s10 = inlined_call_operand.hbm [shape: f32[256,128], index: 10, kind: output, shape index: {2}]  }
   0x1   :  { %17 = vsyncpa [#allocation6], 0 }
   0x2   :  { %18 = vsyncpa [#allocation9], 0 }
   0x3   :  { %19 = vsyncpa [#allocation12], 0 }
   0x4   :  { %20 = vsyncpa [#allocation15], 0 }
   0x5   :  { %21 = vsyncpa [#allocation4], 0 }
   0x6   :  { %22 = vsyncpa [#allocation18], 0  ;;  %s6969_s13 = smov [#allocation5]  }
   0x7   :  { %s40_s14 = sshll.u32 %s6969_s13, 4  ;;  %s41_s14 = int_to_ptr.vmem [resolvable:$true] %s40_s14 }
   0x8   :  { %s6743_s15 = scalar_lea.vmem %s41_s14, 2048  ;;  %p6748_p1 = scmp.lt.s32.totalorder %s41_s14, %s41_s14 }
   0x9   :  { %p6744_p0 = scmp.ne.s32.totalorder %s41_s14, %s6743_s15  ;;  %p6749_p2 = scmp.lt.s32.totalorder %s6743_s15, %s6743_s15 }
   0xb   :  { %p6750_p3 = por %p6749_p2, %p6748_p1 }
   0xd   :  { %p6751_p4 = pnand %p6750_p3, %p6744_p0 }
   0xf   :  { %6754 = shalt.err (!%p6751_p4)
}
  0x10   :  { %s6970_s16 = smov 64   ;;  %s6971_s17 = smov 4  }
  0x11   :  { %46 = dma.hbm_to_vmem [thread:$0]  %s9917_s1, 2048, %s41_s14, [#allocation6], %s6970_s16, %s6970_s16, %s6971_s17  }
  0x12   :  { %s6972_s20 = smov [#allocation8]   ;;  %s6973_s22 = smov [#allocation11]  }
  0x13   :  { %s64_s21 = sshll.u32 %s6972_s20, 4  ;;  %s88_s23 = sshll.u32 %s6973_s22, 4  ;;  %s65_s21 = int_to_ptr.vmem [resolvable:$true] %s64_s21  ;;  %s89_s23 = int_to_ptr.vmem [resolvable:$true] %s88_s23 }
  0x14   :  { %s6763_s24 = scalar_lea.vmem %s65_s21, 4096  ;;  %p6768_p6 = scmp.lt.s32.totalorder %s65_s21, %s65_s21 }
  0x15   :  { %p6764_p5 = scmp.ne.s32.totalorder %s65_s21, %s6763_s24  ;;  %p6769_p7 = scmp.lt.s32.totalorder %s6763_s24, %s6763_s24 }
  0x17   :  { %p6770_p8 = por %p6769_p7, %p6768_p6 }
  0x19   :  { %p6771_p9 = pnand %p6770_p8, %p6764_p5 }
  0x1b   :  { %6774 = shalt.err (!%p6771_p9)
}
  0x1c   :  { %s6974_s25 = smov 128   ;;  %s6975_s26 = smov 8  }
  0x1d   :  { %70 = dma.hbm_to_vmem [thread:$0]  %s9919_s3, 4096, %s65_s21, [#allocation9], %s6974_s25, %s6974_s25, %s6975_s26  }
  0x1e   :  { %s6783_s1 = scalar_lea.vmem %s89_s23, 2048  ;;  %p6788_p11 = scmp.lt.s32.totalorder %s89_s23, %s89_s23 }
  0x1f   :  { %p6784_p10 = scmp.ne.s32.totalorder %s89_s23, %s6783_s1  ;;  %p6789_p12 = scmp.lt.s32.totalorder %s6783_s1, %s6783_s1 }
  0x21   :  { %p6790_p13 = por %p6789_p12, %p6788_p11 }
  0x23   :  { %p6791_p0 = pnand %p6790_p13, %p6784_p10 }
  0x25   :  { %6794 = shalt.err (!%p6791_p0)
}
  0x26   :  { %94 = dma.hbm_to_vmem [thread:$0]  %s9921_s5, 2048, %s89_s23, [#allocation12], %s6974_s25, %s6974_s25, %s6975_s26  }
  0x27   :  { %s6976_s11 = smov [#allocation2]   ;;  %s6977_s13 = smov [#allocation7]  }
  0x28   :  { %s28_s12 = sshll.u32 %s6976_s11, 4  ;;  %s52_s3 = sshll.u32 %s6977_s13, 4  ;;  %s29_s12 = int_to_ptr.vmem [resolvable:$true] %s28_s12  ;;  %s53_s3 = int_to_ptr.vmem [resolvable:$true] %s52_s3 }
  0x29   :  { %s6803_s14 = scalar_lea.vmem %s29_s12, 4096  ;;  %p6808_p2 = scmp.lt.s32.totalorder %s29_s12, %s29_s12 }
  0x2a   :  { %p6804_p1 = scmp.ne.s32.totalorder %s29_s12, %s6803_s14  ;;  %p6809_p3 = scmp.lt.s32.totalorder %s6803_s14, %s6803_s14 }
  0x2c   :  { %p6810_p4 = por %p6809_p3, %p6808_p2 }
  0x2e   :  { %p6811_p5 = pnand %p6810_p4, %p6804_p1 }
  0x30   :  { %6814 = shalt.err (!%p6811_p5)
}
  0x31   :  { %34 = dma.hbm_to_vmem [thread:$0]  %s9916_s0, 4096, %s29_s12, [#allocation3], %s6974_s25, %s6974_s25, %s6975_s26  }
  0x32   :  { %s6823_s5 = scalar_lea.vmem %s53_s3, 2048  ;;  %p6828_p7 = scmp.lt.s32.totalorder %s53_s3, %s53_s3 }
  0x33   :  { %p6824_p6 = scmp.ne.s32.totalorder %s53_s3, %s6823_s5  ;;  %p6829_p8 = scmp.lt.s32.totalorder %s6823_s5, %s6823_s5 }
  0x35   :  { %p6830_p9 = por %p6829_p8, %p6828_p7 }
  0x37   :  { %p6831_p10 = pnand %p6830_p9, %p6824_p6 }
  0x39   :  { %6834 = shalt.err (!%p6831_p10)
}
  0x3a   :  { %58 = dma.hbm_to_vmem [thread:$0]  %s9918_s2, 2048, %s53_s3, [#allocation6], %s6974_s25, %s6974_s25, %s6975_s26  }
  0x3b   :  { %s6978_s21 = smov [#allocation10]   ;;  %s6979_s23 = smov [#allocation13]  }
  0x3c   :  { %s76_s22 = sshll.u32 %s6978_s21, 4  ;;  %s100_s0 = sshll.u32 %s6979_s23, 4  ;;  %s77_s22 = int_to_ptr.vmem [resolvable:$true] %s76_s22  ;;  %s101_s0 = int_to_ptr.vmem [resolvable:$true] %s100_s0 }
  0x3d   :  { %s6843_s24 = scalar_lea.vmem %s77_s22, 2048  ;;  %p6848_p12 = scmp.lt.s32.totalorder %s77_s22, %s77_s22 }
  0x3e   :  { %p6844_p11 = scmp.ne.s32.totalorder %s77_s22, %s6843_s24  ;;  %p6849_p13 = scmp.lt.s32.totalorder %s6843_s24, %s6843_s24 }
  0x40   :  { %p6850_p0 = por %p6849_p13, %p6848_p12 }
  0x42   :  { %p6851_p1 = pnand %p6850_p0, %p6844_p11 }
  0x44   :  { %6854 = shalt.err (!%p6851_p1)
}
  0x45   :  { %82 = dma.hbm_to_vmem [thread:$0]  %s9920_s4, 2048, %s77_s22, [#allocation9], %s6970_s16, %s6970_s16, %s6971_s17  }
  0x46   :  { %s6863_s2 = scalar_lea.vmem %s101_s0, 512  ;;  %p6868_p3 = scmp.lt.s32.totalorder %s101_s0, %s101_s0 }
  0x47   :  { %p6864_p2 = scmp.ne.s32.totalorder %s101_s0, %s6863_s2  ;;  %p6869_p4 = scmp.lt.s32.totalorder %s6863_s2, %s6863_s2 }
  0x49   :  { %p6870_p5 = por %p6869_p4, %p6868_p3 }
  0x4b   :  { %p6871_p6 = pnand %p6870_p5, %p6864_p2 }
  0x4d   :  { %6874 = shalt.err (!%p6871_p6)
}
  0x4e   :  { %s6980_s1 = smov 256   ;;  %s6981_s29 = smov 16  }
  0x4f   :  { %106 = dma.hbm_to_vmem [thread:$0]  %s9922_s6, 512, %s101_s0, [#allocation12], %s6980_s1, %s6980_s1, %s6981_s29  }
  0x50   :  { %s6982_s12 = smov [#allocation14]  }
  0x51   :  { %s112_s13 = sshll.u32 %s6982_s12, 4  ;;  %s113_s13 = int_to_ptr.vmem [resolvable:$true] %s112_s13 }
  0x52   :  { %s6883_s3 = scalar_lea.vmem %s113_s13, 2048  ;;  %p6888_p8 = scmp.lt.s32.totalorder %s113_s13, %s113_s13 }
  0x53   :  { %p6884_p7 = scmp.ne.s32.totalorder %s113_s13, %s6883_s3  ;;  %p6889_p9 = scmp.lt.s32.totalorder %s6883_s3, %s6883_s3 }
  0x55   :  { %p6890_p10 = por %p6889_p9, %p6888_p8 }
  0x57   :  { %p6891_p11 = pnand %p6890_p10, %p6884_p7 }
  0x59   :  { %6894 = shalt.err (!%p6891_p11)
}
  0x5a   :  { %118 = dma.hbm_to_vmem [thread:$0]  %s9923_s7, 2048, %s113_s13, [#allocation15], %s6970_s16, %s6970_s16, %s6971_s17  }
  0x5b   :  { %6955 = dma.done.wait [#allocation3], 4096  }
  0x5c   :  { %6956 = vsyncadd [#allocation3], 4294963200 }
  0x5d   :  { %6957 = dma.done.wait [#allocation6], 4096  }
  0x5e   :  { %6958 = vsyncadd [#allocation6], 4294963200 }
  0x5f   :  { %6959 = dma.done.wait [#allocation9], 6144  }
  0x60   :  { %6960 = vsyncadd [#allocation9], 4294961152 }
  0x61   :  { %6961 = dma.done.wait [#allocation12], 2560  }
  0x62   :  { %6962 = vsyncadd [#allocation12], 4294964736 }
  0x63   :  { %6963 = dma.done.wait [#allocation15], 2048  }
  0x64   :  { %6964 = vsyncadd [#allocation15], 4294965248  ;;  %v144_v0 = vld [vmem:[#allocation2] sm:$0xff]  ;;  %v145_v1 = vld [vmem:[#allocation2 + $0x8] sm:$0xff]  ;;  %s6984_s6 = smov [#allocation16]   ;;  %s6985_s16 = smov [#allocation17]  }
  0x65   :  { %v7087_v2 = vunpack.c.l.bf16 %v144_v0  ;;  %v7089_v3 = vunpack.c.h.bf16 %v144_v0  ;;  %v7091_v4 = vunpack.c.l.bf16 %v145_v1  ;;  %v7093_v5 = vunpack.c.h.bf16 %v145_v1  ;;  %v146_v6 = vld [vmem:[#allocation2 + $0x10] sm:$0xff]  ;;  %v147_v12 = vld [vmem:[#allocation2 + $0x18] sm:$0xff]  ;;  %v148_v23 = vld [vmem:[#allocation2 + $0x20] sm:$0xff]  ;;  %s5423_s7 = sshll.u32 %s6984_s6, 4  ;;  %s5435_s17 = sshll.u32 %s6985_s16, 4  ;;  %s5424_s7 = int_to_ptr.vmem [resolvable:$true] %s5423_s7  ;;  %s5436_s17 = int_to_ptr.vmem [resolvable:$true] %s5435_s17 }
  0x66   :  { %v7107_v15 = vunpack.c.l.bf16 %v146_v6  ;;  %v7109_v16 = vunpack.c.h.bf16 %v146_v6  ;;  %v7111_v18 = vunpack.c.l.bf16 %v147_v12  ;;  %v7113_v19 = vunpack.c.h.bf16 %v147_v12  ;;  %v149_v24 = vld [vmem:[#allocation2 + $0x28] sm:$0xff]  ;;  %v6031_v28 = vld [vmem:[#allocation5 + $0x78] sm:$0xff]   ;;  %v150_v36 = vld [vmem:[#allocation2 + $0x30] sm:$0xff]  ;;  %s6895_s15 = scalar_lea.vmem %s5424_s7, 4096  ;;  %p6900_p13 = scmp.lt.s32.totalorder %s5424_s7, %s5424_s7 }
  0x67   :  { %10046 = vst [vmem:[#allocation27_spill] sm:$0xff] %v7087_v2  ;;  %10047 = vst [vmem:[#allocation28_spill] sm:$0xff] %v7089_v3  ;;  %v257_v7 = vadd.f32 %v7089_v3, %v7087_v2  ;;  %v386_v8 = vmul.f32 %v7087_v2, %v7087_v2  ;;  %v387_v9 = vmul.f32 %v7089_v3, %v7089_v3  ;;  %v7127_v30 = vunpack.c.l.bf16 %v148_v23  ;;  %v6032_v32 = vld [vmem:[#allocation5 + $0x38] sm:$0xff]   ;;  %v6033_v37 = vld [vmem:[#allocation5 + $0x70] sm:$0xff]   ;;  %p6896_p12 = scmp.ne.s32.totalorder %s5424_s7, %s6895_s15  ;;  %p6901_p0 = scmp.lt.s32.totalorder %s6895_s15, %s6895_s15 }
  0x68   :  { %10048 = vst [vmem:[#allocation29_spill] sm:$0xff] %v7091_v4  ;;  %10049 = vst [vmem:[#allocation30_spill] sm:$0xff] %v7093_v5  ;;  %v388_v10 = vmul.f32 %v7091_v4, %v7091_v4  ;;  %v389_v11 = vmul.f32 %v7093_v5, %v7093_v5  ;;  %v260_v14 = vadd.f32 %v7093_v5, %v7091_v4  ;;  %v7129_v31 = vunpack.c.h.bf16 %v148_v23  ;;  %v6034_v41 = vld [vmem:[#allocation5 + $0x30] sm:$0xff]   ;;  %v151_v42 = vld [vmem:[#allocation2 + $0x38] sm:$0xff] }
  0x69   :  { %258 = vadd.xlane.f32.xlu0 %v257_v7  ;;  %v450_v13 = vadd.f32 %v387_v9, %v386_v8  ;;  %v263_v20 = vadd.f32 %v7109_v16, %v7107_v15  ;;  %v390_v21 = vmul.f32 %v7107_v15, %v7107_v15  ;;  %v391_v22 = vmul.f32 %v7109_v16, %v7109_v16  ;;  %v6035_v46 = vld [vmem:[#allocation5 + $0x68] sm:$0xff]   ;;  %v152_v54 = vld [vmem:[#allocation2 + $0x40] sm:$0xff]  ;;  %v6039_v7 = vld [vmem:[#allocation5 + $0x58] sm:$0xff]   ;;  %p6902_p1 = por %p6901_p0, %p6900_p13 }
  0x6a   :  { %v453_v17 = vadd.f32 %v389_v11, %v388_v10  ;;  %v266_v25 = vadd.f32 %v7113_v19, %v7111_v18  ;;  %v392_v26 = vmul.f32 %v7111_v18, %v7111_v18  ;;  %v393_v27 = vmul.f32 %v7113_v19, %v7113_v19  ;;  %10050 = vst [vmem:[#allocation31_spill] sm:$0xff] %v7127_v30  ;;  %v6036_v50 = vld [vmem:[#allocation5 + $0x28] sm:$0xff]   ;;  %v6037_v55 = vld [vmem:[#allocation5 + $0x60] sm:$0xff]   ;;  %v6040_v8 = vld [vmem:[#allocation5 + $0x18] sm:$0xff]  }
  0x6b   :  { %451 = vadd.xlane.f32.xlu1 %v450_v13  ;;  %v456_v29 = vadd.f32 %v391_v22, %v390_v21  ;;  %5773 = vmatprep.subr.bf16.mxu0 %v6031_v28  ;;  %v7131_v34 = vunpack.c.l.bf16 %v149_v24  ;;  %v7133_v35 = vunpack.c.h.bf16 %v149_v24  ;;  %v269_v38 = vadd.f32 %v7129_v31, %v7127_v30  ;;  %v6038_v59 = vld [vmem:[#allocation5 + $0x20] sm:$0xff]   ;;  %v153_v60 = vld [vmem:[#allocation2 + $0x48] sm:$0xff]  ;;  %v154_v12 = vld [vmem:[#allocation2 + $0x50] sm:$0xff]  ;;  %p6903_p2 = pnand %p6902_p1, %p6896_p12 }
  0x6c   :  { %5997 = vmatprep.subr.bf16.mxu1 %v6031_v28  ;;  %v459_v33 = vadd.f32 %v393_v27, %v392_v26  ;;  %5774 = vmatpush3.bf16.msra.mxu0 %v6032_v32  ;;  %v394_v39 = vmul.f32 %v7127_v30, %v7127_v30  ;;  %v395_v40 = vmul.f32 %v7129_v31, %v7129_v31  ;;  %v7147_v48 = vunpack.c.l.bf16 %v150_v36  ;;  %v155_v21 = vld [vmem:[#allocation2 + $0x58] sm:$0xff]  ;;  %v6042_v22 = vld [vmem:[#allocation5 + $0x10] sm:$0xff]  }
  0x6d   :  { %261 = vadd.xlane.f32.xlu0 %v260_v14  ;;  %10051 = vst [vmem:[#allocation32_spill] sm:$0xff] %v7131_v34  ;;  %10052 = vst [vmem:[#allocation33_spill] sm:$0xff] %v7133_v35  ;;  %6005 = vmatpush3.bf16.msra.mxu1 %v6032_v32  ;;  %v272_v43 = vadd.f32 %v7133_v35, %v7131_v34  ;;  %v396_v44 = vmul.f32 %v7131_v34, %v7131_v34  ;;  %v7149_v49 = vunpack.c.h.bf16 %v150_v36  ;;  %v6044_v32 = vld [vmem:[#allocation5 + $0x8] sm:$0xff]  }
  0x6e   :  { %5775 = vmatprep.subr.bf16.mxu0 %v6033_v37  ;;  %5998 = vmatprep.subr.bf16.mxu1 %v6033_v37  ;;  %v397_v45 = vmul.f32 %v7133_v35, %v7133_v35  ;;  %v462_v47 = vadd.f32 %v395_v40, %v394_v39  ;;  %10053 = vst [vmem:[#allocation34_spill] sm:$0xff] %v7147_v48  ;;  %v7151_v52 = vunpack.c.l.bf16 %v151_v42  ;;  %v7153_v53 = vunpack.c.h.bf16 %v151_v42  ;;  %v6045_v42 = vld [vmem:[#allocation5 + $0x40] sm:$0xff]  }
  0x6f   :  { %454 = vadd.xlane.f32.xlu1 %v453_v17  ;;  %10054 = vst [vmem:[#allocation35_spill] sm:$0xff] %v7149_v49  ;;  %v275_v56 = vadd.f32 %v7149_v49, %v7147_v48  ;;  %v398_v57 = vmul.f32 %v7147_v48, %v7147_v48  ;;  %v399_v58 = vmul.f32 %v7149_v49, %v7149_v49  ;;  %v7167_v1 = vunpack.c.l.bf16 %v152_v54 }
  0x70   :  { %5776 = vmatpush3.bf16.msra.mxu0 %v6034_v41  ;;  %v465_v51 = vadd.f32 %v397_v45, %v396_v44  ;;  %10055 = vst [vmem:[#allocation36_spill] sm:$0xff] %v7151_v52  ;;  %10056 = vst [vmem:[#allocation37_spill] sm:$0xff] %v7153_v53  ;;  %v278_v61 = vadd.f32 %v7153_v53, %v7151_v52  ;;  %v400_v62 = vmul.f32 %v7151_v52, %v7151_v52  ;;  %v6046_v44 = vld [vmem:[#allocation5] sm:$0xff]  }
  0x71   :  { %264 = vadd.xlane.f32.xlu0 %v263_v20  ;;  %6006 = vmatpush3.bf16.msra.mxu1 %v6034_v41  ;;  %v401_v63 = vmul.f32 %v7153_v53, %v7153_v53  ;;  %v468_v0 = vadd.f32 %v399_v58, %v398_v57  ;;  %10057 = vst [vmem:[#allocation38_spill] sm:$0xff] %v7167_v1  ;;  %v7169_v6 = vunpack.c.h.bf16 %v152_v54  ;;  %v7171_v10 = vunpack.c.l.bf16 %v153_v60  ;;  %v6041_v20 = vld [vmem:[#allocation5 + $0x50] sm:$0xff]  }
  0x72   :  { %5777 = vmatprep.subr.bf16.mxu0 %v6035_v46  ;;  %5999 = vmatprep.subr.bf16.mxu1 %v6035_v46  ;;  %v7173_v11 = vunpack.c.h.bf16 %v153_v60  ;;  %v402_v14 = vmul.f32 %v7167_v1, %v7167_v1  ;;  %v7187_v27 = vunpack.c.l.bf16 %v154_v12  ;;  %v7189_v28 = vunpack.c.h.bf16 %v154_v12  ;;  %v158_v58 = vld [vmem:[#allocation2 + $0x70] sm:$0xff] }
  0x73   :  { %267 = vadd.xlane.f32.xlu1 %v266_v25  ;;  %10058 = vst [vmem:[#allocation39_spill] sm:$0xff] %v7169_v6  ;;  %v471_v9 = vadd.f32 %v401_v63, %v400_v62  ;;  %10059 = vst [vmem:[#allocation40_spill] sm:$0xff] %v7171_v10  ;;  %v281_v13 = vadd.f32 %v7169_v6, %v7167_v1  ;;  %v403_v17 = vmul.f32 %v7169_v6, %v7169_v6  ;;  %v159_v62 = vld [vmem:[#allocation2 + $0x78] sm:$0xff] }
  0x74   :  { %5778 = vmatpush3.bf16.msra.mxu0 %v6036_v50  ;;  %10060 = vst [vmem:[#allocation41_spill] sm:$0xff] %v7173_v11  ;;  %v284_v23 = vadd.f32 %v7173_v11, %v7171_v10  ;;  %v404_v24 = vmul.f32 %v7171_v10, %v7171_v10  ;;  %v405_v25 = vmul.f32 %v7173_v11, %v7173_v11  ;;  %10061 = vst [vmem:[#allocation42_spill] sm:$0xff] %v7187_v27 }
  0x75   :  { %457 = vadd.xlane.f32.xlu0 %v456_v29  ;;  %6007 = vmatpush3.bf16.msra.mxu1 %v6036_v50  ;;  %v474_v26 = vadd.f32 %v403_v17, %v402_v14  ;;  %10062 = vst [vmem:[#allocation43_spill] sm:$0xff] %v7189_v28  ;;  %v6043_v29 = vld [vmem:[#allocation5 + $0x48] sm:$0xff]   ;;  %v7191_v36 = vunpack.c.l.bf16 %v155_v21  ;;  %v7193_v37 = vunpack.c.h.bf16 %v155_v21  ;;  %v287_v39 = vadd.f32 %v7189_v28, %v7187_v27 }
  0x76   :  { %5779 = vmatprep.subr.bf16.mxu0 %v6037_v55  ;;  %6000 = vmatprep.subr.bf16.mxu1 %v6037_v55  ;;  %v406_v40 = vmul.f32 %v7187_v27, %v7187_v27  ;;  %v407_v41 = vmul.f32 %v7189_v28, %v7189_v28  ;;  %v7229_v12 = vunpack.c.h.bf16 %v158_v58  ;;  %v7231_v14 = vunpack.c.l.bf16 %v159_v62 }
  0x77   :  { %460 = vadd.xlane.f32.xlu1 %v459_v33  ;;  %v477_v33 = vadd.f32 %v405_v25, %v404_v24  ;;  %10063 = vst [vmem:[#allocation44_spill] sm:$0xff] %v7191_v36  ;;  %10064 = vst [vmem:[#allocation45_spill] sm:$0xff] %v7193_v37  ;;  %v290_v45 = vadd.f32 %v7193_v37, %v7191_v36  ;;  %v408_v46 = vmul.f32 %v7191_v36, %v7191_v36 }
  0x78   :  { %5780 = vmatpush3.bf16.msra.mxu0 %v6038_v59  ;;  %v480_v50 = vadd.f32 %v407_v41, %v406_v40  ;;  %10070 = vst [vmem:[#allocation51_spill] sm:$0xff] %v7229_v12  ;;  %10071 = vst [vmem:[#allocation52_spill] sm:$0xff] %v7231_v14  ;;  %v7233_v17 = vunpack.c.h.bf16 %v159_v62  ;;  %v416_v25 = vmul.f32 %v7231_v14, %v7231_v14 }
  0x79   :  { %270 = vadd.xlane.f32.xlu0 %v269_v38  ;;  %6008 = vmatpush3.bf16.msra.mxu1 %v6038_v59  ;;  %v156_v38 = vld [vmem:[#allocation2 + $0x60] sm:$0xff] }
  0x7a   :  { %5781 = vmatprep.subr.bf16.mxu0 %v6039_v7  ;;  %6001 = vmatprep.subr.bf16.mxu1 %v6039_v7  ;;  %v7209_v54 = vunpack.c.h.bf16 %v156_v38  ;;  %10072 = vst [vmem:[#allocation53_spill] sm:$0xff] %v7233_v17  ;;  %v302_v24 = vadd.f32 %v7233_v17, %v7231_v14 }
  0x7b   :  { %273 = vadd.xlane.f32.xlu1 %v272_v43  ;;  %v157_v43 = vld [vmem:[#allocation2 + $0x68] sm:$0xff] }
  0x7c   :  { %5782 = vmatpush3.bf16.msra.mxu0 %v6040_v8  ;;  %10066 = vst [vmem:[#allocation47_spill] sm:$0xff] %v7209_v54  ;;  %v7213_v57 = vunpack.c.h.bf16 %v157_v43 }
  0x7d   :  { %463 = vadd.xlane.f32.xlu0 %v462_v47  ;;  %6009 = vmatpush3.bf16.msra.mxu1 %v6040_v8  ;;  %v409_v47 = vmul.f32 %v7193_v37, %v7193_v37 }
  0x7e   :  { %5783 = vmatprep.subr.bf16.mxu0 %v6041_v20  ;;  %6002 = vmatprep.subr.bf16.mxu1 %v6041_v20  ;;  %10068 = vst [vmem:[#allocation49_spill] sm:$0xff] %v7213_v57  ;;  %v413_v7 = vmul.f32 %v7213_v57, %v7213_v57 }
  0x7f   :  { %466 = vadd.xlane.f32.xlu1 %v465_v51  ;;  %v7207_v51 = vunpack.c.l.bf16 %v156_v38  ;;  %v483_v55 = vadd.f32 %v409_v47, %v408_v46 }
  0x80   :  { %5784 = vmatpush3.bf16.msra.mxu0 %v6042_v22 }
  0x81   :  { %276 = vadd.xlane.f32.xlu0 %v275_v56  ;;  %6010 = vmatpush3.bf16.msra.mxu1 %v6042_v22  ;;  %10065 = vst [vmem:[#allocation46_spill] sm:$0xff] %v7207_v51  ;;  %v7211_v56 = vunpack.c.l.bf16 %v157_v43  ;;  %v293_v59 = vadd.f32 %v7209_v54, %v7207_v51  ;;  %v410_v60 = vmul.f32 %v7207_v51, %v7207_v51 }
  0x82   :  { %5785 = vmatprep.subr.bf16.mxu0 %v6043_v29  ;;  %6003 = vmatprep.subr.bf16.mxu1 %v6043_v29  ;;  %v415_v22 = vmul.f32 %v7229_v12, %v7229_v12  ;;  %v161_v29 = vld [vmem:[#allocation2 + $0x88] sm:$0xff] }
  0x83   :  { %279 = vadd.xlane.f32.xlu1 %v278_v61  ;;  %10067 = vst [vmem:[#allocation48_spill] sm:$0xff] %v7211_v56  ;;  %v411_v61 = vmul.f32 %v7209_v54, %v7209_v54  ;;  %v296_v63 = vadd.f32 %v7213_v57, %v7211_v56  ;;  %v7251_v40 = vunpack.c.l.bf16 %v161_v29  ;;  %v7253_v41 = vunpack.c.h.bf16 %v161_v29 }
  0x84   :  { %5786 = vmatpush3.bf16.msra.mxu0 %v6044_v32 }
  0x85   :  { %469 = vadd.xlane.f32.xlu0 %v468_v0  ;;  %6011 = vmatpush3.bf16.msra.mxu1 %v6044_v32  ;;  %v412_v0 = vmul.f32 %v7211_v56, %v7211_v56  ;;  %v486_v8 = vadd.f32 %v411_v61, %v410_v60  ;;  %10075 = vst [vmem:[#allocation56_spill] sm:$0xff] %v7251_v40  ;;  %10076 = vst [vmem:[#allocation57_spill] sm:$0xff] %v7253_v41 }
  0x86   :  { %5787 = vmatprep.subr.bf16.mxu0 %v6045_v42  ;;  %6004 = vmatprep.subr.bf16.mxu1 %v6045_v42  ;;  %v308_v46 = vadd.f32 %v7253_v41, %v7251_v40  ;;  %v420_v47 = vmul.f32 %v7251_v40, %v7251_v40 }
  0x87   :  { %472 = vadd.xlane.f32.xlu1 %v471_v9  ;;  %v7227_v9 = vunpack.c.l.bf16 %v158_v58 }
  0x88   :  { %5788 = vmatpush3.bf16.msra.mxu0 %v6046_v44 }
  0x89   :  { %282 = vadd.xlane.f32.xlu0 %v281_v13  ;;  %6012 = vmatpush3.bf16.msra.mxu1 %v6046_v44  ;;  %10069 = vst [vmem:[#allocation50_spill] sm:$0xff] %v7227_v9  ;;  %v489_v13 = vadd.f32 %v413_v7, %v412_v0  ;;  %v299_v20 = vadd.f32 %v7229_v12, %v7227_v9 }
  0x8a   :  { %v414_v21 = vmul.f32 %v7227_v9, %v7227_v9 }
  0x8b   :  { %285 = vadd.xlane.f32.xlu1 %v284_v23  ;;  %v160_v23 = vld [vmem:[#allocation2 + $0x80] sm:$0xff] }
  0x8c   :  { %v492_v32 = vadd.f32 %v415_v22, %v414_v21  ;;  %v7249_v38 = vunpack.c.h.bf16 %v160_v23 }
  0x8d   :  { %475 = vadd.xlane.f32.xlu0 %v474_v26  ;;  %v417_v26 = vmul.f32 %v7233_v17, %v7233_v17 }
  0x8e   :  { %10074 = vst [vmem:[#allocation55_spill] sm:$0xff] %v7249_v38  ;;  %v419_v44 = vmul.f32 %v7249_v38, %v7249_v38 }
  0x8f   :  { %478 = vadd.xlane.f32.xlu1 %v477_v33  ;;  %v7247_v33 = vunpack.c.l.bf16 %v160_v23  ;;  %v165_v23 = vld [vmem:[#allocation2 + $0xa8] sm:$0xff] }
  0x91   :  { %288 = vadd.xlane.f32.xlu0 %v287_v39  ;;  %10073 = vst [vmem:[#allocation54_spill] sm:$0xff] %v7247_v33  ;;  %v495_v39 = vadd.f32 %v417_v26, %v416_v25  ;;  %v305_v42 = vadd.f32 %v7249_v38, %v7247_v33  ;;  %v418_v43 = vmul.f32 %v7247_v33, %v7247_v33 }
  0x93   :  { %291 = vadd.xlane.f32.xlu1 %v290_v45  ;;  %v162_v45 = vld [vmem:[#allocation2 + $0x90] sm:$0xff]  ;;  %v498_v58 = vadd.f32 %v419_v44, %v418_v43 }
  0x94   :  { %v7269_v60 = vunpack.c.h.bf16 %v162_v45 }
  0x95   :  { %481 = vadd.xlane.f32.xlu0 %v480_v50  ;;  %v421_v50 = vmul.f32 %v7253_v41, %v7253_v41 }
  0x96   :  { %10078 = vst [vmem:[#allocation59_spill] sm:$0xff] %v7269_v60 }
  0x97   :  { %484 = vadd.xlane.f32.xlu1 %v483_v55  ;;  %v163_v55 = vld [vmem:[#allocation2 + $0x98] sm:$0xff]  ;;  %v501_v61 = vadd.f32 %v421_v50, %v420_v47 }
  0x98   :  { %v7271_v62 = vunpack.c.l.bf16 %v163_v55 }
  0x99   :  { %294 = vadd.xlane.f32.xlu0 %v293_v59  ;;  %v7267_v59 = vunpack.c.l.bf16 %v162_v45  ;;  %v166_v45 = vld [vmem:[#allocation2 + $0xb0] sm:$0xff] }
  0x9a   :  { %10079 = vst [vmem:[#allocation60_spill] sm:$0xff] %v7271_v62  ;;  %v424_v21 = vmul.f32 %v7271_v62, %v7271_v62 }
  0x9b   :  { %297 = vadd.xlane.f32.xlu1 %v296_v63  ;;  %10077 = vst [vmem:[#allocation58_spill] sm:$0xff] %v7267_v59  ;;  %v7273_v63 = vunpack.c.h.bf16 %v163_v55  ;;  %v311_v0 = vadd.f32 %v7269_v60, %v7267_v59  ;;  %v422_v7 = vmul.f32 %v7267_v59, %v7267_v59  ;;  %v167_v55 = vld [vmem:[#allocation2 + $0xb8] sm:$0xff] }
  0x9d   :  { %487 = vadd.xlane.f32.xlu0 %v486_v8  ;;  %10080 = vst [vmem:[#allocation61_spill] sm:$0xff] %v7273_v63  ;;  %v423_v8 = vmul.f32 %v7269_v60, %v7269_v60  ;;  %v425_v22 = vmul.f32 %v7273_v63, %v7273_v63 }
  0x9f   :  { %490 = vadd.xlane.f32.xlu1 %v489_v13  ;;  %v164_v13 = vld [vmem:[#allocation2 + $0xa0] sm:$0xff]  ;;  %v507_v29 = vadd.f32 %v425_v22, %v424_v21 }
  0xa0   :  { %v7287_v25 = vunpack.c.l.bf16 %v164_v13  ;;  %v7289_v26 = vunpack.c.h.bf16 %v164_v13  ;;  %v7313_v13 = vunpack.c.h.bf16 %v167_v55 }
  0xa1   :  { %300 = vadd.xlane.f32.xlu0 %v299_v20  ;;  %v314_v20 = vadd.f32 %v7273_v63, %v7271_v62 }
  0xa2   :  { %10081 = vst [vmem:[#allocation62_spill] sm:$0xff] %v7287_v25  ;;  %10082 = vst [vmem:[#allocation63_spill] sm:$0xff] %v7289_v26  ;;  %v426_v43 = vmul.f32 %v7287_v25, %v7287_v25  ;;  %v427_v44 = vmul.f32 %v7289_v26, %v7289_v26 }
  0xa3   :  { %303 = vadd.xlane.f32.xlu1 %v302_v24  ;;  %v504_v24 = vadd.f32 %v423_v8, %v422_v7  ;;  %v7311_v8 = vunpack.c.l.bf16 %v167_v55  ;;  %10088 = vst [vmem:[#allocation69_spill] sm:$0xff] %v7313_v13 }
  0xa5   :  { %493 = vadd.xlane.f32.xlu0 %v492_v32  ;;  %v7291_v32 = vunpack.c.l.bf16 %v165_v23  ;;  %10087 = vst [vmem:[#allocation68_spill] sm:$0xff] %v7311_v8 }
  0xa7   :  { %496 = vadd.xlane.f32.xlu1 %v495_v39  ;;  %10083 = vst [vmem:[#allocation64_spill] sm:$0xff] %v7291_v32  ;;  %v7293_v39 = vunpack.c.h.bf16 %v165_v23  ;;  %v428_v47 = vmul.f32 %v7291_v32, %v7291_v32  ;;  %v168_v23 = vld [vmem:[#allocation2 + $0xc0] sm:$0xff] }
  0xa9   :  { %306 = vadd.xlane.f32.xlu0 %v305_v42  ;;  %10084 = vst [vmem:[#allocation65_spill] sm:$0xff] %v7293_v39  ;;  %v317_v42 = vadd.f32 %v7289_v26, %v7287_v25  ;;  %v429_v50 = vmul.f32 %v7293_v39, %v7293_v39 }
  0xab   :  { %309 = vadd.xlane.f32.xlu1 %v308_v46  ;;  %v320_v46 = vadd.f32 %v7293_v39, %v7291_v32  ;;  %v513_v7 = vadd.f32 %v429_v50, %v428_v47 }
  0xad   :  { %499 = vadd.xlane.f32.xlu0 %v498_v58  ;;  %v510_v58 = vadd.f32 %v427_v44, %v426_v43  ;;  %v169_v43 = vld [vmem:[#allocation2 + $0xc8] sm:$0xff] }
  0xae   :  { %v7331_v50 = vunpack.c.l.bf16 %v169_v43  ;;  %v7333_v55 = vunpack.c.h.bf16 %v169_v43 }
  0xaf   :  { %502 = vadd.xlane.f32.xlu1 %v501_v61  ;;  %v7307_v61 = vunpack.c.l.bf16 %v166_v45 }
  0xb0   :  { %10091 = vst [vmem:[#allocation72_spill] sm:$0xff] %v7331_v50  ;;  %10092 = vst [vmem:[#allocation73_spill] sm:$0xff] %v7333_v55 }
  0xb1   :  { %312 = vadd.xlane.f32.xlu0 %v311_v0  ;;  %10085 = vst [vmem:[#allocation66_spill] sm:$0xff] %v7307_v61  ;;  %v7309_v0 = vunpack.c.h.bf16 %v166_v45  ;;  %v430_v21 = vmul.f32 %v7307_v61, %v7307_v61  ;;  %v7327_v45 = vunpack.c.l.bf16 %v168_v23 }
  0xb3   :  { %315 = vadd.xlane.f32.xlu1 %v314_v20  ;;  %10086 = vst [vmem:[#allocation67_spill] sm:$0xff] %v7309_v0  ;;  %v323_v20 = vadd.f32 %v7309_v0, %v7307_v61  ;;  %v431_v22 = vmul.f32 %v7309_v0, %v7309_v0  ;;  %10089 = vst [vmem:[#allocation70_spill] sm:$0xff] %v7327_v45 }
  0xb5   :  { %505 = vadd.xlane.f32.xlu0 %v504_v24  ;;  %v326_v24 = vadd.f32 %v7313_v13, %v7311_v8  ;;  %v516_v44 = vadd.f32 %v431_v22, %v430_v21  ;;  %v170_v21 = vld [vmem:[#allocation2 + $0xd0] sm:$0xff]  ;;  %v332_v22 = vadd.f32 %v7333_v55, %v7331_v50 }
  0xb6   :  { %v7347_v43 = vunpack.c.l.bf16 %v170_v21 }
  0xb7   :  { %508 = vadd.xlane.f32.xlu1 %v507_v29  ;;  %v432_v29 = vmul.f32 %v7311_v8, %v7311_v8 }
  0xb8   :  { %10093 = vst [vmem:[#allocation74_spill] sm:$0xff] %v7347_v43 }
  0xb9   :  { %318 = vadd.xlane.f32.xlu0 %v317_v42  ;;  %v433_v42 = vmul.f32 %v7313_v13, %v7313_v13 }
  0xbb   :  { %321 = vadd.xlane.f32.xlu1 %v320_v46  ;;  %v7329_v46 = vunpack.c.h.bf16 %v168_v23  ;;  %v519_v47 = vadd.f32 %v433_v42, %v432_v29  ;;  %v436_v23 = vmul.f32 %v7331_v50, %v7331_v50  ;;  %v171_v29 = vld [vmem:[#allocation2 + $0xd8] sm:$0xff] }
  0xbd   :  { %511 = vadd.xlane.f32.xlu0 %v510_v58  ;;  %10090 = vst [vmem:[#allocation71_spill] sm:$0xff] %v7329_v46  ;;  %v329_v58 = vadd.f32 %v7329_v46, %v7327_v45 }
  0xbf   :  { %514 = vadd.xlane.f32.xlu1 %v513_v7  ;;  %v434_v7 = vmul.f32 %v7327_v45, %v7327_v45 }
  0xc1   :  { %324 = vadd.xlane.f32.xlu0 %v323_v20  ;;  %v435_v20 = vmul.f32 %v7329_v46, %v7329_v46  ;;  %v7351_v46 = vunpack.c.l.bf16 %v171_v29 }
  0xc3   :  { %327 = vadd.xlane.f32.xlu1 %v326_v24  ;;  %v437_v24 = vmul.f32 %v7333_v55, %v7333_v55  ;;  %v522_v42 = vadd.f32 %v435_v20, %v434_v7  ;;  %10095 = vst [vmem:[#allocation76_spill] sm:$0xff] %v7351_v46  ;;  %v438_v55 = vmul.f32 %v7347_v43, %v7347_v43  ;;  %v172_v7 = vld [vmem:[#allocation2 + $0xe0] sm:$0xff] }
  0xc5   :  { %517 = vadd.xlane.f32.xlu0 %v516_v44  ;;  %v7349_v44 = vunpack.c.h.bf16 %v170_v21  ;;  %v525_v45 = vadd.f32 %v437_v24, %v436_v23  ;;  %v440_v21 = vmul.f32 %v7351_v46, %v7351_v46  ;;  %v173_v23 = vld [vmem:[#allocation2 + $0xe8] sm:$0xff] }
  0xc7   :  { %520 = vadd.xlane.f32.xlu1 %v519_v47  ;;  %10094 = vst [vmem:[#allocation75_spill] sm:$0xff] %v7349_v44  ;;  %v7353_v47 = vunpack.c.h.bf16 %v171_v29  ;;  %v335_v50 = vadd.f32 %v7349_v44, %v7347_v43  ;;  %v7367_v29 = vunpack.c.l.bf16 %v172_v7  ;;  %v7371_v43 = vunpack.c.l.bf16 %v173_v23 }
  0xc9   :  { %330 = vadd.xlane.f32.xlu0 %v329_v58  ;;  %10096 = vst [vmem:[#allocation77_spill] sm:$0xff] %v7353_v47  ;;  %v439_v58 = vmul.f32 %v7349_v44, %v7349_v44  ;;  %v338_v20 = vadd.f32 %v7353_v47, %v7351_v46  ;;  %10097 = vst [vmem:[#allocation78_spill] sm:$0xff] %v7367_v29 }
  0xca   :  { %10099 = vst [vmem:[#allocation80_spill] sm:$0xff] %v7371_v43 }
  0xcb   :  { %333 = vadd.xlane.f32.xlu1 %v332_v22  ;;  %v441_v22 = vmul.f32 %v7353_v47, %v7353_v47  ;;  %v528_v24 = vadd.f32 %v439_v58, %v438_v55  ;;  %v442_v47 = vmul.f32 %v7367_v29, %v7367_v29  ;;  %v174_v55 = vld [vmem:[#allocation2 + $0xf0] sm:$0xff] }
  0xcd   :  { %523 = vadd.xlane.f32.xlu0 %v522_v42  ;;  %v7369_v42 = vunpack.c.h.bf16 %v172_v7  ;;  %v531_v44 = vadd.f32 %v441_v22, %v440_v21  ;;  %v444_v7 = vmul.f32 %v7371_v43, %v7371_v43  ;;  %v175_v21 = vld [vmem:[#allocation2 + $0xf8] sm:$0xff] }
  0xcf   :  { %526 = vadd.xlane.f32.xlu1 %v525_v45  ;;  %10098 = vst [vmem:[#allocation79_spill] sm:$0xff] %v7369_v42  ;;  %v7373_v45 = vunpack.c.h.bf16 %v173_v23  ;;  %v341_v46 = vadd.f32 %v7369_v42, %v7367_v29  ;;  %v7387_v23 = vunpack.c.l.bf16 %v174_v55  ;;  %v7391_v29 = vunpack.c.l.bf16 %v175_v21 }
  0xd1   :  { %336 = vadd.xlane.f32.xlu0 %v335_v50  ;;  %10100 = vst [vmem:[#allocation81_spill] sm:$0xff] %v7373_v45  ;;  %v443_v50 = vmul.f32 %v7369_v42, %v7369_v42  ;;  %v344_v58 = vadd.f32 %v7373_v45, %v7371_v43  ;;  %10101 = vst [vmem:[#allocation82_spill] sm:$0xff] %v7387_v23 }
  0xd2   :  { %10103 = vst [vmem:[#allocation84_spill] sm:$0xff] %v7391_v29 }
  0xd3   :  { %339 = vadd.xlane.f32.xlu1 %v338_v20  ;;  %v445_v20 = vmul.f32 %v7373_v45, %v7373_v45  ;;  %v534_v22 = vadd.f32 %v443_v50, %v442_v47  ;;  %v446_v45 = vmul.f32 %v7387_v23, %v7387_v23  ;;  %v448_v50 = vmul.f32 %v7391_v29, %v7391_v29 }
  0xd5   :  { %529 = vadd.xlane.f32.xlu0 %v528_v24  ;;  %v7389_v24 = vunpack.c.h.bf16 %v174_v55  ;;  %v537_v42 = vadd.f32 %v445_v20, %v444_v7 }
  0xd7   :  { %532 = vadd.xlane.f32.xlu1 %v531_v44  ;;  %10102 = vst [vmem:[#allocation83_spill] sm:$0xff] %v7389_v24  ;;  %v7393_v44 = vunpack.c.h.bf16 %v175_v21  ;;  %v347_v43 = vadd.f32 %v7389_v24, %v7387_v23 }
  0xd9   :  { %342 = vadd.xlane.f32.xlu0 %v341_v46  ;;  %10104 = vst [vmem:[#allocation85_spill] sm:$0xff] %v7393_v44  ;;  %v447_v46 = vmul.f32 %v7389_v24, %v7389_v24  ;;  %v350_v47 = vadd.f32 %v7393_v44, %v7391_v29  ;;  %v449_v55 = vmul.f32 %v7393_v44, %v7393_v44 }
  0xdb   :  { %345 = vadd.xlane.f32.xlu1 %v344_v58  ;;  %v540_v58 = vadd.f32 %v447_v46, %v446_v45  ;;  %v543_v7 = vadd.f32 %v449_v55, %v448_v50 }
  0xdd   :  { %535 = vadd.xlane.f32.xlu0 %v534_v22 }
  0xdf   :  { %538 = vadd.xlane.f32.xlu1 %v537_v42 }
  0xe1   :  { %348 = vadd.xlane.f32.xlu0 %v347_v43 }
  0xe3   :  { %351 = vadd.xlane.f32.xlu1 %v350_v47 }
  0xe5   :  { %541 = vadd.xlane.f32.xlu0 %v540_v58 }
  0xe7   :  { %544 = vadd.xlane.f32.xlu1 %v543_v7 }
  0xf2   :  { %v259_v20 = vpop.xlane.xlu0 %258 }
  0xf3   :  { %v7407_v21 = vmul.f32 0.00390625, %v259_v20 }
  0xf4   :  { %v452_v22 = vpop.xlane.xlu1 %451 }
  0xf5   :  { %v546_v42 = vmul.f32 0.00390625, %v452_v22  ;;  %v642_v24 = vmul.f32 %v7407_v21, %v7407_v21 }
  0xf6   :  { %v262_v23 = vpop.xlane.xlu0 %261 }
  0xf7   :  { %v674_v61 = vsub.f32 %v546_v42, %v642_v24  ;;  %v355_v29 = vmul.f32 0.00390625, %v262_v23 }
  0xf8   :  { %v455_v13 = vpop.xlane.xlu1 %454 }
  0xf9   :  { %v706_v8 = vadd.f32 1e-05, %v674_v61  ;;  %v547_v44 = vmul.f32 0.00390625, %v455_v13  ;;  %v643_v43 = vmul.f32 %v355_v29, %v355_v29  ;;  %v580_v39 = vsub.f32 %v7091_v4, %v355_v29 }
  0xfa   :  { %v265_v45 = vpop.xlane.xlu0 %264 }
  0xfb   :  { %v675_v46 = vsub.f32 %v547_v44, %v643_v43  ;;  %v7411_v47 = vmul.f32 0.00390625, %v265_v45  ;;  %6159 = vrsqrt.f32 %v706_v8 }
  0xfc   :  { %v268_v50 = vpop.xlane.xlu1 %267 }
  0xfd   :  { %v707_v55 = vadd.f32 1e-05, %v675_v46  ;;  %v7413_v58 = vmul.f32 0.00390625, %v268_v50  ;;  %v644_v7 = vmul.f32 %v7411_v47, %v7411_v47 }
  0xfe   :  { %v458_v20 = vpop.xlane.xlu0 %457 }
  0xff   :  { %6161 = vrsqrt.f32 %v707_v55  ;;  %v548_v24 = vmul.f32 0.00390625, %v458_v20  ;;  %v645_v61 = vmul.f32 %v7413_v58, %v7413_v58 }
 0x100   :  { %v461_v23 = vpop.xlane.xlu1 %460 }
 0x101   :  { %v676_v22 = vsub.f32 %v548_v24, %v644_v7  ;;  %v549_v13 = vmul.f32 0.00390625, %v461_v23 }
 0x102   :  { %v271_v44 = vpop.xlane.xlu0 %270 }
 0x103   :  { %v708_v42 = vadd.f32 1e-05, %v676_v22  ;;  %v677_v43 = vsub.f32 %v549_v13, %v645_v61  ;;  %v7419_v45 = vmul.f32 0.00390625, %v271_v44 }
 0x104   :  { %v274_v8 = vpop.xlane.xlu1 %273 }
 0x105   :  { %6163 = vrsqrt.f32 %v708_v42  ;;  %v709_v46 = vadd.f32 1e-05, %v677_v43  ;;  %v7421_v50 = vmul.f32 0.00390625, %v274_v8  ;;  %v646_v55 = vmul.f32 %v7419_v45, %v7419_v45 }
 0x106   :  { %v464_v20 = vpop.xlane.xlu0 %463  ;;  %v579_v43 = vsub.f32 %v7089_v3, %v7407_v21 }
 0x107   :  { %6165 = vrsqrt.f32 %v709_v46  ;;  %v550_v7 = vmul.f32 0.00390625, %v464_v20  ;;  %v647_v23 = vmul.f32 %v7421_v50, %v7421_v50  ;;  %v581_v20 = vsub.f32 %v7093_v5, %v355_v29 }
 0x108   :  { %v467_v24 = vpop.xlane.xlu1 %466  ;;  %v6160_v61 = vpop.eup %6159  ;;  %v583_v5 = vsub.f32 %v7109_v16, %v7411_v47 }
 0x109   :  { %v678_v0 = vsub.f32 %v550_v7, %v646_v55  ;;  %v551_v22 = vmul.f32 0.00390625, %v467_v24  ;;  %v578_v55 = vsub.f32 %v7087_v2, %v7407_v21  ;;  %v771_v24 = vmul.f32 %v6160_v61, %v579_v43 }
 0x10a   :  { %v277_v13 = vpop.xlane.xlu0 %276 }
 0x10b   :  { %v710_v44 = vadd.f32 1e-05, %v678_v0  ;;  %v679_v25 = vsub.f32 %v551_v22, %v647_v23  ;;  %v7427_v42 = vmul.f32 0.00390625, %v277_v13  ;;  %v770_v4 = vmul.f32 %v6160_v61, %v578_v55 }
 0x10c   :  { %v6162_v8 = vpop.eup %6161  ;;  %v280_v46 = vpop.xlane.xlu1 %279 }
 0x10d   :  { %6167 = vrsqrt.f32 %v710_v44  ;;  %v711_v7 = vadd.f32 1e-05, %v679_v25  ;;  %v7435_v32 = vmul.f32 0.00390625, %v280_v46  ;;  %v648_v0 = vmul.f32 %v7427_v42, %v7427_v42 }
 0x10e   :  { %v470_v23 = vpop.xlane.xlu0 %469  ;;  %v773_v22 = vmul.f32 %v6162_v8, %v581_v20  ;;  %v772_v13 = vmul.f32 %v6162_v8, %v580_v39  ;;  %v585_v8 = vsub.f32 %v7113_v19, %v7413_v58 }
 0x10f   :  { %6169 = vrsqrt.f32 %v711_v7  ;;  %v552_v3 = vmul.f32 0.00390625, %v470_v23  ;;  %v649_v21 = vmul.f32 %v7435_v32, %v7435_v32 }
 0x110   :  { %v473_v26 = vpop.xlane.xlu1 %472  ;;  %v835_v59 = vpack.c.bf16 %v773_v22, %v771_v24  ;;  %v834_v25 = vpack.c.bf16 %v772_v13, %v770_v4  ;;  %v582_v4 = vsub.f32 %v7107_v15, %v7411_v47 }
 0x111   :  { %v680_v29 = vsub.f32 %v552_v3, %v648_v0  ;;  %v553_v44 = vmul.f32 0.00390625, %v473_v26  ;;  %v584_v3 = vsub.f32 %v7111_v18, %v7413_v58 }
 0x112   :  { %v6164_v43 = vpop.eup %6163  ;;  %1026 = vmatprep.mubr.bf16.mxu0 %v835_v59  ;;  %v283_v46 = vpop.xlane.xlu0 %282 }
 0x113   :  { %v712_v2 = vadd.f32 1e-05, %v680_v29  ;;  %v681_v20 = vsub.f32 %v553_v44, %v649_v21  ;;  %1027 = vmatmul.mubr.bf16.vlgmr.msra.gmra.mxu0 %v834_v25  ;;  %v7443_v39 = vmul.f32 0.00390625, %v283_v46  ;;  %v775_v55 = vmul.f32 %v6164_v43, %v583_v5 }
 0x114   :  { %v6166_v61 = vpop.eup %6165  ;;  %v286_v26 = vpop.xlane.xlu1 %285  ;;  %v774_v29 = vmul.f32 %v6164_v43, %v582_v4  ;;  %v589_v4 = vsub.f32 %v7133_v35, %v7421_v50 }
 0x115   :  { %6171 = vrsqrt.f32 %v712_v2  ;;  %v713_v59 = vadd.f32 1e-05, %v681_v20  ;;  %v7451_v7 = vmul.f32 0.00390625, %v286_v26  ;;  %v650_v24 = vmul.f32 %v7443_v39, %v7443_v39 }
 0x116   :  { %v476_v0 = vpop.xlane.xlu0 %475  ;;  %v777_v23 = vmul.f32 %v6166_v61, %v585_v8  ;;  %v776_v22 = vmul.f32 %v6166_v61, %v584_v3  ;;  %v587_v20 = vsub.f32 %v7129_v31, %v7419_v45  ;;  %v588_v3 = vsub.f32 %v7131_v34, %v7421_v50 }
 0x117   :  { %6173 = vrsqrt.f32 %v713_v59  ;;  %v554_v13 = vmul.f32 0.00390625, %v476_v0  ;;  %v651_v47 = vmul.f32 %v7451_v7, %v7451_v7 }
 0x118   :  { %v479_v21 = vpop.xlane.xlu1 %478  ;;  %v837_v58 = vpack.c.bf16 %v777_v23, %v775_v55  ;;  %v836_v25 = vpack.c.bf16 %v776_v22, %v774_v29  ;;  %v586_v55 = vsub.f32 %v7127_v30, %v7419_v45 }
 0x119   :  { %v682_v44 = vsub.f32 %v554_v13, %v650_v24  ;;  %v555_v2 = vmul.f32 0.00390625, %v479_v21 }
 0x11a   :  { %v6168_v5 = vpop.eup %6167  ;;  %1034 = vmatprep.mubr.bf16.mxu0 %v837_v58  ;;  %v289_v46 = vpop.xlane.xlu0 %288 }
 0x11b   :  { %v714_v26 = vadd.f32 1e-05, %v682_v44  ;;  %v683_v8 = vsub.f32 %v555_v2, %v651_v47  ;;  %1035 = vmatmul.mubr.bf16.gmra.mxu0 %v836_v25  ;;  %v7459_v61 = vmul.f32 0.00390625, %v289_v46  ;;  %v779_v0 = vmul.f32 %v6168_v5, %v587_v20 }
 0x11c   :  { %v6170_v43 = vpop.eup %6169  ;;  %v292_v59 = vpop.xlane.xlu1 %291  ;;  %v778_v44 = vmul.f32 %v6168_v5, %v586_v55  ;;  %v593_v55 = vsub.f32 %v7153_v53, %v7435_v32 }
 0x11d   :  { %6175 = vrsqrt.f32 %v714_v26  ;;  %v715_v24 = vadd.f32 1e-05, %v683_v8  ;;  %v7467_v23 = vmul.f32 0.00390625, %v292_v59  ;;  %v652_v22 = vmul.f32 %v7459_v61, %v7459_v61 }
 0x11e   :  { %v482_v13 = vpop.xlane.xlu0 %481  ;;  %v781_v29 = vmul.f32 %v6170_v43, %v589_v4  ;;  %v780_v21 = vmul.f32 %v6170_v43, %v588_v3  ;;  %v591_v8 = vsub.f32 %v7149_v49, %v7427_v42  ;;  %v592_v3 = vsub.f32 %v7151_v52, %v7435_v32 }
 0x11f   :  { %6177 = vrsqrt.f32 %v715_v24  ;;  %v556_v58 = vmul.f32 0.00390625, %v482_v13  ;;  %v653_v45 = vmul.f32 %v7467_v23, %v7467_v23 }
 0x120   :  { %v485_v47 = vpop.xlane.xlu1 %484  ;;  %v839_v50 = vpack.c.bf16 %v781_v29, %v779_v0  ;;  %v838_v46 = vpack.c.bf16 %v780_v21, %v778_v44  ;;  %v590_v0 = vsub.f32 %v7147_v48, %v7427_v42 }
 0x121   :  { %v684_v2 = vsub.f32 %v556_v58, %v652_v22  ;;  %v557_v25 = vmul.f32 0.00390625, %v485_v47 }
 0x122   :  { %v6172_v20 = vpop.eup %6171  ;;  %1042 = vmatprep.mubr.bf16.mxu0 %v839_v50  ;;  %v295_v26 = vpop.xlane.xlu0 %294 }
 0x123   :  { %v716_v59 = vadd.f32 1e-05, %v684_v2  ;;  %v685_v4 = vsub.f32 %v557_v25, %v653_v45  ;;  %1043 = vmatmul.mubr.bf16.gmra.mxu0 %v838_v46  ;;  %v7475_v43 = vmul.f32 0.00390625, %v295_v26  ;;  %v783_v13 = vmul.f32 %v6172_v20, %v591_v8 }
 0x124   :  { %v6174_v5 = vpop.eup %6173  ;;  %v298_v24 = vpop.xlane.xlu1 %297  ;;  %v782_v2 = vmul.f32 %v6172_v20, %v590_v0  ;;  %v597_v0 = vsub.f32 %v7173_v11, %v7451_v7 }
 0x125   :  { %6179 = vrsqrt.f32 %v716_v59  ;;  %v717_v22 = vadd.f32 1e-05, %v685_v4  ;;  %v7483_v29 = vmul.f32 0.00390625, %v298_v24  ;;  %v654_v21 = vmul.f32 %v7475_v43, %v7475_v43 }
 0x126   :  { %v488_v58 = vpop.xlane.xlu0 %487  ;;  %v785_v44 = vmul.f32 %v6174_v5, %v593_v55  ;;  %v784_v47 = vmul.f32 %v6174_v5, %v592_v3  ;;  %v595_v4 = vsub.f32 %v7169_v6, %v7443_v39  ;;  %v596_v3 = vsub.f32 %v7171_v10, %v7451_v7 }
 0x127   :  { %6181 = vrsqrt.f32 %v717_v22  ;;  %v558_v50 = vmul.f32 0.00390625, %v488_v58  ;;  %v655_v42 = vmul.f32 %v7483_v29, %v7483_v29 }
 0x128   :  { %v491_v45 = vpop.xlane.xlu1 %490  ;;  %v841_v32 = vpack.c.bf16 %v785_v44, %v783_v13  ;;  %v840_v26 = vpack.c.bf16 %v784_v47, %v782_v2  ;;  %v594_v13 = vsub.f32 %v7167_v1, %v7443_v39 }
 0x129   :  { %v686_v25 = vsub.f32 %v558_v50, %v654_v21  ;;  %v559_v46 = vmul.f32 0.00390625, %v491_v45 }
 0x12a   :  { %v6176_v8 = vpop.eup %6175  ;;  %1050 = vmatprep.mubr.bf16.mxu0 %v841_v32  ;;  %v301_v59 = vpop.xlane.xlu0 %300 }
 0x12b   :  { %v718_v24 = vadd.f32 1e-05, %v686_v25  ;;  %v687_v55 = vsub.f32 %v559_v46, %v655_v42  ;;  %1051 = vmatmul.mubr.bf16.gmra.mxu0 %v840_v26  ;;  %v7491_v5 = vmul.f32 0.00390625, %v301_v59  ;;  %v787_v58 = vmul.f32 %v6176_v8, %v595_v4 }
 0x12c   :  { %v6178_v20 = vpop.eup %6177  ;;  %v304_v22 = vpop.xlane.xlu1 %303  ;;  %v786_v25 = vmul.f32 %v6176_v8, %v594_v13  ;;  %v600_v13 = vsub.f32 %v7191_v36, %v7467_v23 }
 0x12d   :  { %6183 = vrsqrt.f32 %v718_v24  ;;  %v719_v21 = vadd.f32 1e-05, %v687_v55  ;;  %v7499_v44 = vmul.f32 0.00390625, %v304_v22  ;;  %v656_v47 = vmul.f32 %v7491_v5, %v7491_v5 }
 0x12e   :  { %v494_v50 = vpop.xlane.xlu0 %493  ;;  %v789_v2 = vmul.f32 %v6178_v20, %v597_v0  ;;  %v788_v45 = vmul.f32 %v6178_v20, %v596_v3  ;;  %v599_v55 = vsub.f32 %v7189_v28, %v7459_v61  ;;  %v598_v3 = vsub.f32 %v7187_v27, %v7459_v61 }
 0x12f   :  { %6185 = vrsqrt.f32 %v719_v21  ;;  %v560_v32 = vmul.f32 0.00390625, %v494_v50  ;;  %v657_v39 = vmul.f32 %v7499_v44, %v7499_v44  ;;  %v601_v21 = vsub.f32 %v7193_v37, %v7467_v23 }
 0x130   :  { %v497_v42 = vpop.xlane.xlu1 %496  ;;  %v843_v7 = vpack.c.bf16 %v789_v2, %v787_v58  ;;  %v842_v59 = vpack.c.bf16 %v788_v45, %v786_v25 }
 0x131   :  { %v688_v46 = vsub.f32 %v560_v32, %v656_v47  ;;  %v561_v26 = vmul.f32 0.00390625, %v497_v42 }
 0x132   :  { %v6180_v4 = vpop.eup %6179  ;;  %1058 = vmatprep.mubr.bf16.mxu0 %v843_v7  ;;  %v307_v24 = vpop.xlane.xlu0 %306 }
 0x133   :  { %v720_v22 = vadd.f32 1e-05, %v688_v46  ;;  %v689_v0 = vsub.f32 %v561_v26, %v657_v39  ;;  %1059 = vmatmul.mubr.bf16.gmra.mxu0 %v842_v59  ;;  %v7507_v20 = vmul.f32 0.00390625, %v307_v24  ;;  %v791_v2 = vmul.f32 %v6180_v4, %v599_v55 }
 0x134   :  { %v6182_v8 = vpop.eup %6181  ;;  %v310_v58 = vpop.xlane.xlu1 %309  ;;  %v790_v42 = vmul.f32 %v6180_v4, %v598_v3  ;;  %v604_v3 = vsub.f32 %v7211_v56, %v7483_v29 }
 0x135   :  { %6187 = vrsqrt.f32 %v720_v22  ;;  %v721_v47 = vadd.f32 1e-05, %v689_v0  ;;  %v7515_v50 = vmul.f32 0.00390625, %v310_v58  ;;  %v658_v45 = vmul.f32 %v7507_v20, %v7507_v20 }
 0x136   :  { %v500_v32 = vpop.xlane.xlu0 %499  ;;  %v793_v25 = vmul.f32 %v6182_v8, %v601_v21  ;;  %v792_v7 = vmul.f32 %v6182_v8, %v600_v13  ;;  %v603_v0 = vsub.f32 %v7209_v54, %v7475_v43  ;;  %v605_v13 = vsub.f32 %v7213_v57, %v7483_v29 }
 0x137   :  { %6189 = vrsqrt.f32 %v721_v47  ;;  %v562_v61 = vmul.f32 0.00390625, %v500_v32  ;;  %v659_v23 = vmul.f32 %v7515_v50, %v7515_v50 }
 0x138   :  { %v503_v46 = vpop.xlane.xlu1 %502  ;;  %v845_v39 = vpack.c.bf16 %v793_v25, %v791_v2  ;;  %v844_v26 = vpack.c.bf16 %v792_v7, %v790_v42  ;;  %v602_v2 = vsub.f32 %v7207_v51, %v7475_v43 }
 0x139   :  { %v690_v59 = vsub.f32 %v562_v61, %v658_v45  ;;  %v563_v24 = vmul.f32 0.00390625, %v503_v46 }
 0x13a   :  { %v6184_v22 = vpop.eup %6183  ;;  %1066 = vmatprep.mubr.bf16.mxu0 %v845_v39  ;;  %v313_v55 = vpop.xlane.xlu0 %312 }
 0x13b   :  { %v722_v58 = vadd.f32 1e-05, %v690_v59  ;;  %v691_v21 = vsub.f32 %v563_v24, %v659_v23  ;;  %1067 = vmatmul.mubr.bf16.gmra.mxu0 %v844_v26  ;;  %v7523_v4 = vmul.f32 0.00390625, %v313_v55  ;;  %v795_v32 = vmul.f32 %v6184_v22, %v603_v0 }
 0x13c   :  { %v6186_v8 = vpop.eup %6185  ;;  %v316_v47 = vpop.xlane.xlu1 %315  ;;  %v794_v26 = vmul.f32 %v6184_v22, %v602_v2  ;;  %v609_v2 = vsub.f32 %v7233_v17, %v7499_v44 }
 0x13d   :  { %6191 = vrsqrt.f32 %v722_v58  ;;  %v723_v45 = vadd.f32 1e-05, %v691_v21  ;;  %v7531_v25 = vmul.f32 0.00390625, %v316_v47  ;;  %v660_v42 = vmul.f32 %v7523_v4, %v7523_v4 }
 0x13e   :  { %v506_v7 = vpop.xlane.xlu0 %505  ;;  %v797_v61 = vmul.f32 %v6186_v8, %v605_v13  ;;  %v796_v46 = vmul.f32 %v6186_v8, %v604_v3  ;;  %v607_v21 = vsub.f32 %v7229_v12, %v7491_v5  ;;  %v608_v3 = vsub.f32 %v7231_v14, %v7499_v44 }
 0x13f   :  { %6193 = vrsqrt.f32 %v723_v45  ;;  %v564_v39 = vmul.f32 0.00390625, %v506_v7  ;;  %v661_v43 = vmul.f32 %v7531_v25, %v7531_v25 }
 0x140   :  { %v509_v59 = vpop.xlane.xlu1 %508  ;;  %v847_v29 = vpack.c.bf16 %v797_v61, %v795_v32  ;;  %v846_v55 = vpack.c.bf16 %v796_v46, %v794_v26  ;;  %v606_v32 = vsub.f32 %v7227_v9, %v7491_v5 }
 0x141   :  { %v692_v23 = vsub.f32 %v564_v39, %v660_v42  ;;  %v565_v24 = vmul.f32 0.00390625, %v509_v59 }
 0x142   :  { %v6188_v0 = vpop.eup %6187  ;;  %1074 = vmatprep.mubr.bf16.mxu0 %v847_v29  ;;  %v319_v58 = vpop.xlane.xlu0 %318 }
 0x143   :  { %v724_v47 = vadd.f32 1e-05, %v692_v23  ;;  %v693_v13 = vsub.f32 %v565_v24, %v661_v43  ;;  %1075 = vmatmul.mubr.bf16.gmra.mxu0 %v846_v55  ;;  %v7539_v8 = vmul.f32 0.00390625, %v319_v58  ;;  %v799_v7 = vmul.f32 %v6188_v0, %v607_v21 }
 0x144   :  { %v6190_v22 = vpop.eup %6189  ;;  %v322_v45 = vpop.xlane.xlu1 %321  ;;  %v798_v23 = vmul.f32 %v6188_v0, %v606_v32  ;;  %v613_v32 = vsub.f32 %v7253_v41, %v7515_v50 }
 0x145   :  { %6195 = vrsqrt.f32 %v724_v47  ;;  %v725_v42 = vadd.f32 1e-05, %v693_v13  ;;  %v7547_v61 = vmul.f32 0.00390625, %v322_v45  ;;  %v662_v46 = vmul.f32 %v7539_v8, %v7539_v8 }
 0x146   :  { %v512_v39 = vpop.xlane.xlu0 %511  ;;  %v801_v26 = vmul.f32 %v6190_v22, %v609_v2  ;;  %v800_v59 = vmul.f32 %v6190_v22, %v608_v3  ;;  %v611_v22 = vsub.f32 %v7249_v38, %v7507_v20  ;;  %v612_v3 = vsub.f32 %v7251_v40, %v7515_v50 }
 0x147   :  { %6197 = vrsqrt.f32 %v725_v42  ;;  %v566_v29 = vmul.f32 0.00390625, %v512_v39  ;;  %v663_v5 = vmul.f32 %v7547_v61, %v7547_v61  ;;  %v610_v42 = vsub.f32 %v7247_v33, %v7507_v20 }
 0x148   :  { %v515_v43 = vpop.xlane.xlu1 %514  ;;  %v849_v44 = vpack.c.bf16 %v801_v26, %v799_v7  ;;  %v848_v58 = vpack.c.bf16 %v800_v59, %v798_v23 }
 0x149   :  { %v694_v24 = vsub.f32 %v566_v29, %v662_v46  ;;  %v567_v55 = vmul.f32 0.00390625, %v515_v43 }
 0x14a   :  { %v6192_v21 = vpop.eup %6191  ;;  %1082 = vmatprep.mubr.bf16.mxu0 %v849_v44  ;;  %v325_v47 = vpop.xlane.xlu0 %324 }
 0x14b   :  { %v726_v13 = vadd.f32 1e-05, %v694_v24  ;;  %v695_v45 = vsub.f32 %v567_v55, %v663_v5  ;;  %1083 = vmatmul.mubr.bf16.gmra.mxu0 %v848_v58  ;;  %v7553_v14 = vmul.f32 0.00390625, %v325_v47  ;;  %v803_v46 = vmul.f32 %v6192_v21, %v611_v22 }
 0x14c   :  { %v6194_v0 = vpop.eup %6193  ;;  %v328_v2 = vpop.xlane.xlu1 %327  ;;  %v802_v44 = vmul.f32 %v6192_v21, %v610_v42 }
 0x14d   :  { %6199 = vrsqrt.f32 %v726_v13  ;;  %v727_v7 = vadd.f32 1e-05, %v695_v45  ;;  %v7563_v39 = vmul.f32 0.00390625, %v328_v2  ;;  %v664_v26 = vmul.f32 %v7553_v14, %v7553_v14 }
 0x14e   :  { %v518_v59 = vpop.xlane.xlu0 %517  ;;  %v805_v29 = vmul.f32 %v6194_v0, %v613_v32  ;;  %v804_v23 = vmul.f32 %v6194_v0, %v612_v3  ;;  %v615_v45 = vsub.f32 %v7269_v60, %v7523_v4  ;;  %v616_v3 = vsub.f32 %v7271_v62, %v7531_v25 }
 0x14f   :  { %6201 = vrsqrt.f32 %v727_v7  ;;  %v568_v43 = vmul.f32 0.00390625, %v518_v59  ;;  %v665_v20 = vmul.f32 %v7563_v39, %v7563_v39  ;;  %v617_v32 = vsub.f32 %v7273_v63, %v7531_v25  ;;  %v10105_v7 = vld [vmem:[#allocation58_spill] sm:$0xff] }
 0x150   :  { %v521_v24 = vpop.xlane.xlu1 %520  ;;  %v851_v5 = vpack.c.bf16 %v805_v29, %v803_v46  ;;  %v850_v58 = vpack.c.bf16 %v804_v23, %v802_v44  ;;  %v614_v46 = vsub.f32 %v10105_v7, %v7523_v4 }
 0x151   :  { %v696_v50 = vsub.f32 %v568_v43, %v664_v26  ;;  %v569_v55 = vmul.f32 0.00390625, %v521_v24 }
 0x152   :  { %v6196_v47 = vpop.eup %6195  ;;  %1090 = vmatprep.mubr.bf16.mxu1 %v851_v5  ;;  %v331_v13 = vpop.xlane.xlu0 %330 }
 0x153   :  { %v728_v22 = vadd.f32 1e-05, %v696_v50  ;;  %v697_v2 = vsub.f32 %v569_v55, %v665_v20  ;;  %1091 = vmatmul.mubr.bf16.vlgmr.msra.gmra.mxu1 %v850_v58  ;;  %v7571_v0 = vmul.f32 0.00390625, %v331_v13  ;;  %v807_v59 = vmul.f32 %v6196_v47, %v615_v45 }
 0x154   :  { %v6198_v21 = vpop.eup %6197  ;;  %v334_v42 = vpop.xlane.xlu1 %333  ;;  %v806_v50 = vmul.f32 %v6196_v47, %v614_v46 }
 0x155   :  { %6203 = vrsqrt.f32 %v728_v22  ;;  %v729_v26 = vadd.f32 1e-05, %v697_v2  ;;  %v7579_v29 = vmul.f32 0.00390625, %v334_v42  ;;  %v666_v23 = vmul.f32 %v7571_v0, %v7571_v0  ;;  %v10106_v2 = vld [vmem:[#allocation63_spill] sm:$0xff] }
 0x156   :  { %v524_v43 = vpop.xlane.xlu0 %523  ;;  %v809_v44 = vmul.f32 %v6198_v21, %v617_v32  ;;  %v808_v24 = vmul.f32 %v6198_v21, %v616_v3  ;;  %v619_v42 = vsub.f32 %v10106_v2, %v7539_v8  ;;  %v10107_v3 = vld [vmem:[#allocation64_spill] sm:$0xff] }
 0x157   :  { %6205 = vrsqrt.f32 %v729_v26  ;;  %v570_v5 = vmul.f32 0.00390625, %v524_v43  ;;  %v667_v4 = vmul.f32 %v7579_v29, %v7579_v29  ;;  %v620_v46 = vsub.f32 %v10107_v3, %v7547_v61  ;;  %v10108_v26 = vld [vmem:[#allocation65_spill] sm:$0xff]  ;;  %v10109_v43 = vld [vmem:[#allocation62_spill] sm:$0xff] }
 0x158   :  { %v527_v20 = vpop.xlane.xlu1 %526  ;;  %v853_v25 = vpack.c.bf16 %v809_v44, %v807_v59  ;;  %v852_v13 = vpack.c.bf16 %v808_v24, %v806_v50  ;;  %v621_v59 = vsub.f32 %v10108_v26, %v7547_v61  ;;  %v618_v44 = vsub.f32 %v10109_v43, %v7539_v8  ;;  %v10110_v43 = vld [vmem:[#allocation67_spill] sm:$0xff] }
 0x159   :  { %v698_v55 = vsub.f32 %v570_v5, %v666_v23  ;;  %v571_v58 = vmul.f32 0.00390625, %v527_v20  ;;  %v623_v26 = vsub.f32 %v10110_v43, %v7553_v14 }
 0x15a   :  { %v6200_v45 = vpop.eup %6199  ;;  %1098 = vmatprep.mubr.bf16.mxu1 %v853_v25  ;;  %v337_v22 = vpop.xlane.xlu0 %336 }
 0x15b   :  { %v730_v62 = vadd.f32 1e-05, %v698_v55  ;;  %v699_v32 = vsub.f32 %v571_v58, %v667_v4  ;;  %1099 = vmatmul.mubr.bf16.gmra.mxu1 %v852_v13  ;;  %v7587_v21 = vmul.f32 0.00390625, %v337_v22  ;;  %v811_v5 = vmul.f32 %v6200_v45, %v619_v42 }
 0x15c   :  { %v6202_v47 = vpop.eup %6201  ;;  %v340_v23 = vpop.xlane.xlu1 %339  ;;  %v810_v13 = vmul.f32 %v6200_v45, %v618_v44 }
 0x15d   :  { %6207 = vrsqrt.f32 %v730_v62  ;;  %v731_v24 = vadd.f32 1e-05, %v699_v32  ;;  %v7595_v50 = vmul.f32 0.00390625, %v340_v23  ;;  %v668_v20 = vmul.f32 %v7587_v21, %v7587_v21 }
 0x15e   :  { %v530_v25 = vpop.xlane.xlu0 %529  ;;  %v813_v55 = vmul.f32 %v6202_v47, %v621_v59  ;;  %v812_v4 = vmul.f32 %v6202_v47, %v620_v46  ;;  %v10111_v46 = vld [vmem:[#allocation68_spill] sm:$0xff] }
 0x15f   :  { %6209 = vrsqrt.f32 %v731_v24  ;;  %v572_v58 = vmul.f32 0.00390625, %v530_v25  ;;  %v669_v8 = vmul.f32 %v7595_v50, %v7595_v50  ;;  %v624_v44 = vsub.f32 %v10111_v46, %v7563_v39  ;;  %v10112_v24 = vld [vmem:[#allocation69_spill] sm:$0xff]  ;;  %v10113_v25 = vld [vmem:[#allocation66_spill] sm:$0xff] }
 0x160   :  { %v533_v22 = vpop.xlane.xlu1 %532  ;;  %v855_v61 = vpack.c.bf16 %v813_v55, %v811_v5  ;;  %v854_v32 = vpack.c.bf16 %v812_v4, %v810_v13  ;;  %v625_v5 = vsub.f32 %v10112_v24, %v7563_v39  ;;  %v622_v55 = vsub.f32 %v10113_v25, %v7553_v14  ;;  %v10114_v25 = vld [vmem:[#allocation71_spill] sm:$0xff] }
 0x161   :  { %v700_v3 = vsub.f32 %v572_v58, %v668_v20  ;;  %v573_v62 = vmul.f32 0.00390625, %v533_v22  ;;  %v627_v24 = vsub.f32 %v10114_v25, %v7571_v0 }
 0x162   :  { %v6204_v42 = vpop.eup %6203  ;;  %1106 = vmatprep.mubr.bf16.mxu1 %v855_v61  ;;  %v343_v23 = vpop.xlane.xlu0 %342 }
 0x163   :  { %v732_v2 = vadd.f32 1e-05, %v700_v3  ;;  %v701_v59 = vsub.f32 %v573_v62, %v669_v8  ;;  %1107 = vmatmul.mubr.bf16.gmra.mxu1 %v854_v32  ;;  %v7603_v47 = vmul.f32 0.00390625, %v343_v23  ;;  %v815_v58 = vmul.f32 %v6204_v42, %v623_v26 }
 0x164   :  { %v6206_v45 = vpop.eup %6205  ;;  %v346_v20 = vpop.xlane.xlu1 %345  ;;  %v814_v32 = vmul.f32 %v6204_v42, %v622_v55 }
 0x165   :  { %6211 = vrsqrt.f32 %v732_v2  ;;  %v733_v4 = vadd.f32 1e-05, %v701_v59  ;;  %v7611_v13 = vmul.f32 0.00390625, %v346_v20  ;;  %v670_v3 = vmul.f32 %v7603_v47, %v7603_v47 }
 0x166   :  { %v536_v22 = vpop.xlane.xlu0 %535  ;;  %v817_v61 = vmul.f32 %v6206_v45, %v625_v5  ;;  %v816_v8 = vmul.f32 %v6206_v45, %v624_v44  ;;  %v10115_v44 = vld [vmem:[#allocation72_spill] sm:$0xff] }
 0x167   :  { %6213 = vrsqrt.f32 %v733_v4  ;;  %v574_v62 = vmul.f32 0.00390625, %v536_v22  ;;  %v671_v14 = vmul.f32 %v7611_v13, %v7611_v13  ;;  %v628_v55 = vsub.f32 %v10115_v44, %v7579_v29  ;;  %v10116_v4 = vld [vmem:[#allocation73_spill] sm:$0xff]  ;;  %v10117_v22 = vld [vmem:[#allocation70_spill] sm:$0xff] }
 0x168   :  { %v539_v23 = vpop.xlane.xlu1 %538  ;;  %v857_v39 = vpack.c.bf16 %v817_v61, %v815_v58  ;;  %v856_v59 = vpack.c.bf16 %v816_v8, %v814_v32  ;;  %v629_v58 = vsub.f32 %v10116_v4, %v7579_v29  ;;  %v626_v61 = vsub.f32 %v10117_v22, %v7571_v0 }
 0x169   :  { %v702_v46 = vsub.f32 %v574_v62, %v670_v3  ;;  %v575_v2 = vmul.f32 0.00390625, %v539_v23 }
 0x16a   :  { %v6208_v26 = vpop.eup %6207  ;;  %1114 = vmatprep.mubr.bf16.mxu1 %v857_v39  ;;  %v349_v20 = vpop.xlane.xlu0 %348 }
 0x16b   :  { %v734_v43 = vadd.f32 1e-05, %v702_v46  ;;  %v703_v5 = vsub.f32 %v575_v2, %v671_v14  ;;  %1115 = vmatmul.mubr.bf16.gmra.mxu1 %v856_v59  ;;  %v7619_v45 = vmul.f32 0.00390625, %v349_v20  ;;  %v819_v62 = vmul.f32 %v6208_v26, %v627_v24 }
 0x16c   :  { %v6210_v42 = vpop.eup %6209  ;;  %v352_v3 = vpop.xlane.xlu1 %351  ;;  %v818_v59 = vmul.f32 %v6208_v26, %v626_v61 }
 0x16d   :  { %6215 = vrsqrt.f32 %v734_v43  ;;  %v735_v8 = vadd.f32 1e-05, %v703_v5  ;;  %v385_v32 = vmul.f32 0.00390625, %v352_v3  ;;  %v672_v46 = vmul.f32 %v7619_v45, %v7619_v45  ;;  %v10118_v43 = vld [vmem:[#allocation74_spill] sm:$0xff]  ;;  %v10119_v5 = vld [vmem:[#allocation75_spill] sm:$0xff] }
 0x16e   :  { %v542_v23 = vpop.xlane.xlu0 %541  ;;  %v821_v39 = vmul.f32 %v6210_v42, %v629_v58  ;;  %v820_v14 = vmul.f32 %v6210_v42, %v628_v55  ;;  %v630_v24 = vsub.f32 %v10118_v43, %v7587_v21  ;;  %v631_v3 = vsub.f32 %v10119_v5, %v7587_v21  ;;  %v10120_v58 = vld [vmem:[#allocation76_spill] sm:$0xff]  ;;  %v10121_v55 = vld [vmem:[#allocation77_spill] sm:$0xff] }
 0x16f   :  { %6217 = vrsqrt.f32 %v735_v8  ;;  %v576_v2 = vmul.f32 0.00390625, %v542_v23  ;;  %v673_v25 = vmul.f32 %v385_v32, %v385_v32  ;;  %v632_v42 = vsub.f32 %v10120_v58, %v7595_v50 }
 0x170   :  { %v545_v20 = vpop.xlane.xlu1 %544  ;;  %v859_v44 = vpack.c.bf16 %v821_v39, %v819_v62  ;;  %v858_v7 = vpack.c.bf16 %v820_v14, %v818_v59  ;;  %v633_v26 = vsub.f32 %v10121_v55, %v7595_v50  ;;  %v10123_v50 = vld [vmem:[#allocation79_spill] sm:$0xff] }
 0x171   :  { %v704_v29 = vsub.f32 %v576_v2, %v672_v46  ;;  %v577_v4 = vmul.f32 0.00390625, %v545_v20  ;;  %v10122_v20 = vld [vmem:[#allocation78_spill] sm:$0xff] }
 0x172   :  { %v6212_v0 = vpop.eup %6211  ;;  %1122 = vmatprep.mubr.bf16.mxu1 %v859_v44  ;;  %v634_v43 = vsub.f32 %v10122_v20, %v7603_v47  ;;  %v10129_v20 = vld [vmem:[#allocation85_spill] sm:$0xff] }
 0x173   :  { %v736_v61 = vadd.f32 1e-05, %v704_v29  ;;  %v705_v8 = vsub.f32 %v577_v4, %v673_v25  ;;  %1123 = vmatmul.mubr.bf16.gmra.mxu1 %v858_v7  ;;  %v823_v46 = vmul.f32 %v6212_v0, %v631_v3  ;;  %v822_v23 = vmul.f32 %v6212_v0, %v630_v24  ;;  %v10124_v7 = vld [vmem:[#allocation80_spill] sm:$0xff]  ;;  %v10125_v4 = vld [vmem:[#allocation81_spill] sm:$0xff] }
 0x174   :  { %v6214_v62 = vpop.eup %6213  ;;  %v635_v29 = vsub.f32 %v10123_v50, %v7603_v47  ;;  %v636_v25 = vsub.f32 %v10124_v7, %v7611_v13  ;;  %v637_v0 = vsub.f32 %v10125_v4, %v7611_v13  ;;  %v10127_v47 = vld [vmem:[#allocation83_spill] sm:$0xff]  ;;  %v641_v13 = vsub.f32 %v10129_v20, %v385_v32 }
 0x175   :  { %6219 = vrsqrt.f32 %v736_v61  ;;  %v737_v39 = vadd.f32 1e-05, %v705_v8  ;;  %v825_v14 = vmul.f32 %v6214_v62, %v633_v26  ;;  %v824_v2 = vmul.f32 %v6214_v62, %v632_v42 }
 0x177   :  { %6221 = vrsqrt.f32 %v737_v39  ;;  %v861_v59 = vpack.c.bf16 %v825_v14, %v823_v46  ;;  %v860_v21 = vpack.c.bf16 %v824_v2, %v822_v23  ;;  %v10126_v23 = vld [vmem:[#allocation82_spill] sm:$0xff]  ;;  %v639_v14 = vsub.f32 %v10127_v47, %v7619_v45  ;;  %v10128_v2 = vld [vmem:[#allocation84_spill] sm:$0xff] }
 0x178   :  { %v638_v39 = vsub.f32 %v10126_v23, %v7619_v45  ;;  %v6050_v45 = vld [vmem:[#allocation7 + $0x60] ss:$8 sps:$4 sm:$0xff]  }
 0x179   :  { %1130 = vmatprep.mubr.bf16.mxu1 %v861_v59  ;;  %v640_v59 = vsub.f32 %v10128_v2, %v385_v32  ;;  %v6065_v2 = vld [vmem:[#allocation7 + $0x10] ss:$8 sps:$4 sm:$0xff]  }
 0x17a   :  { %v6216_v44 = vpop.eup %6215 }
 0x17b   :  { %1131 = vmatmul.mubr.bf16.gmra.mxu1 %v860_v21  ;;  %v827_v3 = vmul.f32 %v6216_v44, %v635_v29  ;;  %v826_v26 = vmul.f32 %v6216_v44, %v634_v43 }
 0x17c   :  { %v6218_v24 = vpop.eup %6217 }
 0x17d   :  { %v829_v42 = vmul.f32 %v6218_v24, %v637_v0  ;;  %v828_v61 = vmul.f32 %v6218_v24, %v636_v25 }
 0x17f   :  { %v863_v8 = vpack.c.bf16 %v829_v42, %v827_v3  ;;  %v862_v62 = vpack.c.bf16 %v828_v61, %v826_v26  ;;  %v6047_v3 = vld [vmem:[#allocation7 + $0x70] ss:$8 sps:$4 sm:$0xff]   ;;  %v6049_v42 = vld [vmem:[#allocation7 + $0x74] ss:$8 sps:$4 sm:$0xff]   ;;  %v6052_v61 = vld [vmem:[#allocation7 + $0x64] ss:$8 sps:$4 sm:$0xff]  }
 0x180   :  { %1791 = vmatprep.subr.bf16.mxu1 %v6049_v42 }
 0x181   :  { %1138 = vmatprep.mubr.bf16.mxu1 %v863_v8  ;;  %1792 = vmatpush1.bf16.msra.mxu1 %v6047_v3  ;;  %v7651_v8 = vld [vmem:[#allocation13 + $0x6] ss:$0 sm:$0xff] }
 0x182   :  { %v6220_v46 = vpop.eup %6219  ;;  %1793 = vmatprep.subr.bf16.mxu1 %v6052_v61 }
 0x183   :  { %1139 = vmatmul.mubr.bf16.gmra.mxu1 %v862_v62  ;;  %v831_v29 = vmul.f32 %v6220_v46, %v639_v14  ;;  %v830_v43 = vmul.f32 %v6220_v46, %v638_v39  ;;  %v6055_v14 = vld [vmem:[#allocation7 + $0x54] ss:$8 sps:$4 sm:$0xff]   ;;  %v6053_v46 = vld [vmem:[#allocation7 + $0x50] ss:$8 sps:$4 sm:$0xff]  }
 0x184   :  { %v6222_v21 = vpop.eup %6221 }
 0x185   :  { %v833_v0 = vmul.f32 %v6222_v21, %v641_v13  ;;  %v832_v44 = vmul.f32 %v6222_v21, %v640_v59  ;;  %1794 = vmatpush1.bf16.msra.mxu1 %v6050_v45 }
 0x186   :  { %1795 = vmatprep.subr.bf16.mxu1 %v6055_v14 }
 0x187   :  { %v865_v25 = vpack.c.bf16 %v833_v0, %v831_v29  ;;  %v864_v24 = vpack.c.bf16 %v832_v44, %v830_v43  ;;  %v6058_v29 = vld [vmem:[#allocation7 + $0x44] ss:$8 sps:$4 sm:$0xff]   ;;  %v6056_v43 = vld [vmem:[#allocation7 + $0x40] ss:$8 sps:$4 sm:$0xff]  }
 0x189   :  { %1146 = vmatprep.mubr.bf16.mxu1 %v865_v25  ;;  %1796 = vmatpush1.bf16.msra.mxu1 %v6053_v46 }
 0x18a   :  { %1797 = vmatprep.subr.bf16.mxu1 %v6058_v29 }
 0x18b   :  { %1147 = vmatmul.mubr.bf16.gmra.mxu1 %v864_v24 }
 0x18d   :  { %1798 = vmatpush1.bf16.msra.mxu1 %v6056_v43 }
 0x1d3   :  { %v5789_v26 = vpop.f32.mrf.mxu0 }
 0x1d5   :  { %v5790_v32 = vpop.f32.mrf.mxu0 }
 0x1d6   :  { %v5791_v62 = vadd.f32 %v5790_v32, %v5789_v26 }
 0x1d7   :  { %v5792_v13 = vpop.f32.mrf.mxu0 }
 0x1d8   :  { %v7654_v39 = vadd.f32 %v5791_v62, %v7651_v8 }
 0x1d9   :  { %v5793_v59 = vpop.f32.mrf.mxu0 }
 0x1da   :  { %v5794_v21 = vadd.f32 %v5793_v59, %v5792_v13  ;;  %1155 = vadd.xlane.f32.xlu0 %v7654_v39  ;;  %v1252_v25 = vmul.f32 %v7654_v39, %v7654_v39 }
 0x1db   :  { %v5795_v0 = vpop.f32.mrf.mxu0 }
 0x1dc   :  { %v7658_v44 = vadd.f32 %v5794_v21, %v7651_v8 }
 0x1dd   :  { %v5796_v24 = vpop.f32.mrf.mxu0 }
 0x1de   :  { %v5797_v3 = vadd.f32 %v5796_v24, %v5795_v0  ;;  %1157 = vadd.xlane.f32.xlu1 %v7658_v44  ;;  %1284 = vadd.xlane.f32.xlu0 %v1252_v25  ;;  %v1253_v45 = vmul.f32 %v7658_v44, %v7658_v44 }
 0x1df   :  { %v5798_v42 = vpop.f32.mrf.mxu0 }
 0x1e0   :  { %v7664_v26 = vadd.f32 %v5797_v3, %v7651_v8 }
 0x1e1   :  { %v5799_v61 = vpop.f32.mrf.mxu0 }
 0x1e2   :  { %v5800_v32 = vadd.f32 %v5799_v61, %v5798_v42  ;;  %1286 = vadd.xlane.f32.xlu1 %v1253_v45  ;;  %1159 = vadd.xlane.f32.xlu0 %v7664_v26  ;;  %v1254_v13 = vmul.f32 %v7664_v26, %v7664_v26 }
 0x1e3   :  { %v5801_v62 = vpop.f32.mrf.mxu0 }
 0x1e4   :  { %v7670_v14 = vadd.f32 %v5800_v32, %v7651_v8  ;;  %v6059_v32 = vld [vmem:[#allocation7 + $0x30] ss:$8 sps:$4 sm:$0xff]  }
 0x1e5   :  { %v5802_v46 = vpop.f32.mrf.mxu0 }
 0x1e6   :  { %v5803_v59 = vadd.f32 %v5802_v46, %v5801_v62  ;;  %1161 = vadd.xlane.f32.xlu1 %v7670_v14  ;;  %1288 = vadd.xlane.f32.xlu0 %v1254_v13  ;;  %v1255_v0 = vmul.f32 %v7670_v14, %v7670_v14  ;;  %v6061_v62 = vld [vmem:[#allocation7 + $0x34] ss:$8 sps:$4 sm:$0xff]  }
 0x1e7   :  { %v5804_v21 = vpop.f32.mrf.mxu0  ;;  %1799 = vmatprep.subr.bf16.mxu1 %v6061_v62  ;;  %v6064_v62 = vld [vmem:[#allocation7 + $0x24] ss:$8 sps:$4 sm:$0xff]  }
 0x1e8   :  { %v7676_v29 = vadd.f32 %v5803_v59, %v7651_v8  ;;  %1800 = vmatpush1.bf16.msra.mxu1 %v6059_v32 }
 0x1e9   :  { %v5805_v43 = vpop.f32.mrf.mxu0  ;;  %1801 = vmatprep.subr.bf16.mxu1 %v6064_v62  ;;  %v6067_v62 = vld [vmem:[#allocation7 + $0x14] ss:$8 sps:$4 sm:$0xff]  }
 0x1ea   :  { %v5806_v25 = vadd.f32 %v5805_v43, %v5804_v21  ;;  %1290 = vadd.xlane.f32.xlu1 %v1255_v0  ;;  %1163 = vadd.xlane.f32.xlu0 %v7676_v29  ;;  %v1256_v42 = vmul.f32 %v7676_v29, %v7676_v29 }
 0x1eb   :  { %v5807_v24 = vpop.f32.mrf.mxu0 }
 0x1ec   :  { %v7682_v3 = vadd.f32 %v5806_v25, %v7651_v8 }
 0x1ed   :  { %v5808_v45 = vpop.f32.mrf.mxu0 }
 0x1ee   :  { %v5809_v61 = vadd.f32 %v5808_v45, %v5807_v24  ;;  %1165 = vadd.xlane.f32.xlu1 %v7682_v3  ;;  %1292 = vadd.xlane.f32.xlu0 %v1256_v42  ;;  %v1257_v59 = vmul.f32 %v7682_v3, %v7682_v3 }
 0x1ef   :  { %v5810_v13 = vpop.f32.mrf.mxu0 }
 0x1f0   :  { %v7688_v46 = vadd.f32 %v5809_v61, %v7651_v8  ;;  %v6062_v61 = vld [vmem:[#allocation7 + $0x20] ss:$8 sps:$4 sm:$0xff]  }
 0x1f1   :  { %v5811_v21 = vpop.f32.mrf.mxu0  ;;  %1802 = vmatpush1.bf16.msra.mxu1 %v6062_v61 }
 0x1f2   :  { %v5812_v0 = vadd.f32 %v5811_v21, %v5810_v13  ;;  %1294 = vadd.xlane.f32.xlu1 %v1257_v59  ;;  %1167 = vadd.xlane.f32.xlu0 %v7688_v46  ;;  %v1258_v24 = vmul.f32 %v7688_v46, %v7688_v46 }
 0x1f3   :  { %v5813_v43 = vpop.f32.mrf.mxu0  ;;  %1803 = vmatprep.subr.bf16.mxu1 %v6067_v62  ;;  %v6068_v62 = vld [vmem:[#allocation7] ss:$8 sps:$4 sm:$0xff]  }
 0x1f4   :  { %v7694_v25 = vadd.f32 %v5812_v0, %v7651_v8 }
 0x1f5   :  { %v5814_v42 = vpop.f32.mrf.mxu0  ;;  %1804 = vmatpush1.bf16.msra.mxu1 %v6065_v2 }
 0x1f6   :  { %v5815_v45 = vadd.f32 %v5814_v42, %v5813_v43  ;;  %1169 = vadd.xlane.f32.xlu1 %v7694_v25  ;;  %1296 = vadd.xlane.f32.xlu0 %v1258_v24  ;;  %v1259_v13 = vmul.f32 %v7694_v25, %v7694_v25 }
 0x1f7   :  { %v5816_v23 = vpop.f32.mrf.mxu0 }
 0x1f8   :  { %v7700_v32 = vadd.f32 %v5815_v45, %v7651_v8 }
 0x1f9   :  { %v5817_v59 = vpop.f32.mrf.mxu0 }
 0x1fa   :  { %v5818_v21 = vadd.f32 %v5817_v59, %v5816_v23  ;;  %1298 = vadd.xlane.f32.xlu1 %v1259_v13  ;;  %1171 = vadd.xlane.f32.xlu0 %v7700_v32  ;;  %v1260_v24 = vmul.f32 %v7700_v32, %v7700_v32 }
 0x1fb   :  { %v5819_v0 = vpop.f32.mrf.mxu0 }
 0x1fc   :  { %v7706_v43 = vadd.f32 %v5818_v21, %v7651_v8 }
 0x1fd   :  { %v5820_v42 = vpop.f32.mrf.mxu0 }
 0x1fe   :  { %v5821_v45 = vadd.f32 %v5820_v42, %v5819_v0  ;;  %1173 = vadd.xlane.f32.xlu1 %v7706_v43  ;;  %1300 = vadd.xlane.f32.xlu0 %v1260_v24  ;;  %v1261_v61 = vmul.f32 %v7706_v43, %v7706_v43 }
 0x1ff   :  { %v5822_v47 = vpop.f32.mrf.mxu0 }
 0x200   :  { %v7712_v23 = vadd.f32 %v5821_v45, %v7651_v8  ;;  %v6070_v45 = vld [vmem:[#allocation7 + $0x4] ss:$8 sps:$4 sm:$0xff]  }
 0x201   :  { %v5823_v13 = vpop.f32.mrf.mxu0  ;;  %1805 = vmatprep.subr.bf16.mxu1 %v6070_v45 }
 0x202   :  { %v5824_v59 = vadd.f32 %v5823_v13, %v5822_v47  ;;  %1302 = vadd.xlane.f32.xlu1 %v1261_v61  ;;  %1175 = vadd.xlane.f32.xlu0 %v7712_v23  ;;  %v1262_v24 = vmul.f32 %v7712_v23, %v7712_v23 }
 0x203   :  { %v5825_v21 = vpop.f32.mrf.mxu0  ;;  %1806 = vmatpush1.bf16.msra.mxu1 %v6068_v62 }
 0x204   :  { %v7718_v0 = vadd.f32 %v5824_v59, %v7651_v8 }
 0x205   :  { %v5826_v42 = vpop.f32.mrf.mxu0 }
 0x206   :  { %v5827_v7 = vadd.f32 %v5826_v42, %v5825_v21  ;;  %1177 = vadd.xlane.f32.xlu1 %v7718_v0  ;;  %1304 = vadd.xlane.f32.xlu0 %v1262_v24  ;;  %v1263_v2 = vmul.f32 %v7718_v0, %v7718_v0  ;;  %v9983_v21 = vmov 0  }
 0x207   :  { %v5828_v20 = vpop.f32.mrf.mxu0  ;;  %1823 = vmatprep.mubr.bf16.mxu1 %v9983_v21 }
 0x208   :  { %v7724_v47 = vadd.f32 %v5827_v7, %v7651_v8 }
 0x209   :  { %v5829_v61 = vpop.f32.mrf.mxu0 }
 0x20a   :  { %v5830_v13 = vadd.f32 %v5829_v61, %v5828_v20  ;;  %1306 = vadd.xlane.f32.xlu1 %v1263_v2  ;;  %1179 = vadd.xlane.f32.xlu0 %v7724_v47  ;;  %v1264_v7 = vmul.f32 %v7724_v47, %v7724_v47 }
 0x20b   :  { %v5831_v59 = vpop.f32.mrf.mxu0 }
 0x20c   :  { %v7731_v24 = vadd.f32 %v5830_v13, %v7651_v8 }
 0x20d   :  { %v5832_v42 = vpop.f32.mrf.mxu0 }
 0x20e   :  { %v5833_v45 = vadd.f32 %v5832_v42, %v5831_v59  ;;  %1181 = vadd.xlane.f32.xlu1 %v7731_v24  ;;  %1308 = vadd.xlane.f32.xlu0 %v1264_v7  ;;  %v1265_v2 = vmul.f32 %v7731_v24, %v7731_v24 }
 0x20f   :  { %v5834_v62 = vpop.f32.mrf.mxu0 }
 0x210   :  { %v7737_v20 = vadd.f32 %v5833_v45, %v7651_v8 }
 0x211   :  { %v5835_v61 = vpop.f32.mrf.mxu0 }
 0x212   :  { %v5836_v21 = vadd.f32 %v5835_v61, %v5834_v62  ;;  %1310 = vadd.xlane.f32.xlu1 %v1265_v2  ;;  %1183 = vadd.xlane.f32.xlu0 %v7737_v20  ;;  %v1266_v59 = vmul.f32 %v7737_v20, %v7737_v20 }
 0x213   :  { %v5837_v13 = vpop.f32.mrf.mxu1 }
 0x214   :  { %v7743_v50 = vadd.f32 %v5836_v21, %v7651_v8 }
 0x215   :  { %v5838_v7 = vpop.f32.mrf.mxu1 }
 0x216   :  { %v5839_v42 = vadd.f32 %v5838_v7, %v5837_v13  ;;  %1185 = vadd.xlane.f32.xlu1 %v7743_v50  ;;  %1312 = vadd.xlane.f32.xlu0 %v1266_v59  ;;  %v1267_v62 = vmul.f32 %v7743_v50, %v7743_v50 }
 0x217   :  { %v5840_v45 = vpop.f32.mrf.mxu1 }
 0x218   :  { %v7749_v58 = vadd.f32 %v5839_v42, %v7651_v8 }
 0x219   :  { %v5841_v2 = vpop.f32.mrf.mxu1 }
 0x21a   :  { %v5842_v61 = vadd.f32 %v5841_v2, %v5840_v45  ;;  %1314 = vadd.xlane.f32.xlu1 %v1267_v62  ;;  %1187 = vadd.xlane.f32.xlu0 %v7749_v58  ;;  %v1268_v13 = vmul.f32 %v7749_v58, %v7749_v58 }
 0x21b   :  { %v5843_v21 = vpop.f32.mrf.mxu1 }
 0x21c   :  { %v7755_v4 = vadd.f32 %v5842_v61, %v7651_v8 }
 0x21d   :  { %v5844_v59 = vpop.f32.mrf.mxu1 }
 0x21e   :  { %v5845_v7 = vadd.f32 %v5844_v59, %v5843_v21  ;;  %1189 = vadd.xlane.f32.xlu1 %v7755_v4  ;;  %1316 = vadd.xlane.f32.xlu0 %v1268_v13  ;;  %v1269_v45 = vmul.f32 %v7755_v4, %v7755_v4 }
 0x21f   :  { %v5846_v42 = vpop.f32.mrf.mxu1 }
 0x220   :  { %v7761_v22 = vadd.f32 %v5845_v7, %v7651_v8 }
 0x221   :  { %v5847_v62 = vpop.f32.mrf.mxu1 }
 0x222   :  { %v5848_v2 = vadd.f32 %v5847_v62, %v5846_v42  ;;  %1318 = vadd.xlane.f32.xlu1 %v1269_v45  ;;  %1191 = vadd.xlane.f32.xlu0 %v7761_v22  ;;  %v1270_v21 = vmul.f32 %v7761_v22, %v7761_v22 }
 0x223   :  { %v5849_v61 = vpop.f32.mrf.mxu1 }
 0x224   :  { %v7767_v5 = vadd.f32 %v5848_v2, %v7651_v8 }
 0x225   :  { %v5850_v13 = vpop.f32.mrf.mxu1 }
 0x226   :  { %v5851_v59 = vadd.f32 %v5850_v13, %v5849_v61  ;;  %1193 = vadd.xlane.f32.xlu1 %v7767_v5  ;;  %1320 = vadd.xlane.f32.xlu0 %v1270_v21  ;;  %v1271_v42 = vmul.f32 %v7767_v5, %v7767_v5 }
 0x227   :  { %v5852_v7 = vpop.f32.mrf.mxu1 }
 0x228   :  { %v7773_v55 = vadd.f32 %v5851_v59, %v7651_v8 }
 0x229   :  { %v5853_v45 = vpop.f32.mrf.mxu1 }
 0x22a   :  { %v5854_v62 = vadd.f32 %v5853_v45, %v5852_v7  ;;  %1322 = vadd.xlane.f32.xlu1 %v1271_v42  ;;  %1195 = vadd.xlane.f32.xlu0 %v7773_v55  ;;  %v1272_v61 = vmul.f32 %v7773_v55, %v7773_v55 }
 0x22b   :  { %v5855_v2 = vpop.f32.mrf.mxu1 }
 0x22c   :  { %v7779_v63 = vadd.f32 %v5854_v62, %v7651_v8 }
 0x22d   :  { %v5856_v21 = vpop.f32.mrf.mxu1 }
 0x22e   :  { %v5857_v13 = vadd.f32 %v5856_v21, %v5855_v2  ;;  %1197 = vadd.xlane.f32.xlu1 %v7779_v63  ;;  %1324 = vadd.xlane.f32.xlu0 %v1272_v61  ;;  %v1273_v7 = vmul.f32 %v7779_v63, %v7779_v63 }
 0x22f   :  { %v5858_v59 = vpop.f32.mrf.mxu1 }
 0x230   :  { %v7785_v60 = vadd.f32 %v5857_v13, %v7651_v8 }
 0x231   :  { %v5859_v42 = vpop.f32.mrf.mxu1 }
 0x232   :  { %v5860_v45 = vadd.f32 %v5859_v42, %v5858_v59  ;;  %1326 = vadd.xlane.f32.xlu1 %v1273_v7  ;;  %1199 = vadd.xlane.f32.xlu0 %v7785_v60  ;;  %v1274_v2 = vmul.f32 %v7785_v60, %v7785_v60 }
 0x233   :  { %v5861_v62 = vpop.f32.mrf.mxu1 }
 0x234   :  { %v7791_v40 = vadd.f32 %v5860_v45, %v7651_v8 }
 0x235   :  { %v5862_v61 = vpop.f32.mrf.mxu1 }
 0x236   :  { %v5863_v21 = vadd.f32 %v5862_v61, %v5861_v62  ;;  %1201 = vadd.xlane.f32.xlu1 %v7791_v40  ;;  %1328 = vadd.xlane.f32.xlu0 %v1274_v2  ;;  %v1275_v59 = vmul.f32 %v7791_v40, %v7791_v40 }
 0x237   :  { %v5864_v13 = vpop.f32.mrf.mxu1 }
 0x238   :  { %v7797_v33 = vadd.f32 %v5863_v21, %v7651_v8 }
 0x239   :  { %v5865_v7 = vpop.f32.mrf.mxu1 }
 0x23a   :  { %v5866_v42 = vadd.f32 %v5865_v7, %v5864_v13  ;;  %1330 = vadd.xlane.f32.xlu1 %v1275_v59  ;;  %1203 = vadd.xlane.f32.xlu0 %v7797_v33  ;;  %v1276_v62 = vmul.f32 %v7797_v33, %v7797_v33 }
 0x23b   :  { %v5867_v45 = vpop.f32.mrf.mxu1 }
 0x23c   :  { %v7803_v41 = vadd.f32 %v5866_v42, %v7651_v8 }
 0x23d   :  { %v5868_v2 = vpop.f32.mrf.mxu1 }
 0x23e   :  { %v5869_v61 = vadd.f32 %v5868_v2, %v5867_v45  ;;  %1205 = vadd.xlane.f32.xlu1 %v7803_v41  ;;  %1332 = vadd.xlane.f32.xlu0 %v1276_v62  ;;  %v1277_v13 = vmul.f32 %v7803_v41, %v7803_v41 }
 0x23f   :  { %v5870_v21 = vpop.f32.mrf.mxu1 }
 0x240   :  { %v7809_v38 = vadd.f32 %v5869_v61, %v7651_v8 }
 0x241   :  { %v5871_v59 = vpop.f32.mrf.mxu1 }
 0x242   :  { %v5872_v7 = vadd.f32 %v5871_v59, %v5870_v21  ;;  %1334 = vadd.xlane.f32.xlu1 %v1277_v13  ;;  %1207 = vadd.xlane.f32.xlu0 %v7809_v38  ;;  %v1278_v45 = vmul.f32 %v7809_v38, %v7809_v38 }
 0x243   :  { %v5873_v42 = vpop.f32.mrf.mxu1 }
 0x244   :  { %v7815_v9 = vadd.f32 %v5872_v7, %v7651_v8 }
 0x245   :  { %v5874_v62 = vpop.f32.mrf.mxu1 }
 0x246   :  { %v5875_v2 = vadd.f32 %v5874_v62, %v5873_v42  ;;  %1209 = vadd.xlane.f32.xlu1 %v7815_v9  ;;  %1336 = vadd.xlane.f32.xlu0 %v1278_v45  ;;  %v1279_v21 = vmul.f32 %v7815_v9, %v7815_v9 }
 0x247   :  { %v5876_v61 = vpop.f32.mrf.mxu1 }
 0x248   :  { %v7821_v17 = vadd.f32 %v5875_v2, %v7651_v8 }
 0x249   :  { %v5877_v13 = vpop.f32.mrf.mxu1 }
 0x24a   :  { %v5878_v59 = vadd.f32 %v5877_v13, %v5876_v61  ;;  %1338 = vadd.xlane.f32.xlu1 %v1279_v21  ;;  %1211 = vadd.xlane.f32.xlu0 %v7821_v17  ;;  %v1280_v42 = vmul.f32 %v7821_v17, %v7821_v17 }
 0x24b   :  { %v5879_v7 = vpop.f32.mrf.mxu1 }
 0x24c   :  { %v7827_v12 = vadd.f32 %v5878_v59, %v7651_v8 }
 0x24d   :  { %v5880_v45 = vpop.f32.mrf.mxu1 }
 0x24e   :  { %v5881_v62 = vadd.f32 %v5880_v45, %v5879_v7  ;;  %1213 = vadd.xlane.f32.xlu1 %v7827_v12  ;;  %1340 = vadd.xlane.f32.xlu0 %v1280_v42  ;;  %v1281_v61 = vmul.f32 %v7827_v12, %v7827_v12 }
 0x24f   :  { %v5882_v2 = vpop.f32.mrf.mxu1 }
 0x250   :  { %v7833_v56 = vadd.f32 %v5881_v62, %v7651_v8 }
 0x251   :  { %v5883_v21 = vpop.f32.mrf.mxu1 }
 0x252   :  { %v5884_v13 = vadd.f32 %v5883_v21, %v5882_v2  ;;  %1342 = vadd.xlane.f32.xlu1 %v1281_v61  ;;  %1215 = vadd.xlane.f32.xlu0 %v7833_v56  ;;  %v1282_v7 = vmul.f32 %v7833_v56, %v7833_v56 }
 0x254   :  { %v7839_v59 = vadd.f32 %v5884_v13, %v7651_v8 }
 0x256   :  { %1217 = vadd.xlane.f32.xlu1 %v7839_v59  ;;  %1344 = vadd.xlane.f32.xlu0 %v1282_v7  ;;  %v1283_v42 = vmul.f32 %v7839_v59, %v7839_v59 }
 0x25a   :  { %1346 = vadd.xlane.f32.xlu1 %v1283_v42 }
 0x263   :  { %v1156_v45 = vpop.xlane.xlu0 %1155 }
 0x264   :  { %v1220_v62 = vmul.f32 0.0078125, %v1156_v45 }
 0x266   :  { %v1412_v61 = vmul.f32 %v1220_v62, %v1220_v62 }
 0x267   :  { %v1158_v51 = vpop.xlane.xlu1 %1157  ;;  %v1285_v2 = vpop.xlane.xlu0 %1284 }
 0x268   :  { %v1221_v21 = vmul.f32 0.0078125, %v1158_v51  ;;  %v1348_v57 = vmul.f32 0.0078125, %v1285_v2 }
 0x26a   :  { %v1444_v54 = vsub.f32 %v1348_v57, %v1412_v61  ;;  %v1413_v36 = vmul.f32 %v1221_v21, %v1221_v21 }
 0x26b   :  { %v1287_v8 = vpop.xlane.xlu1 %1286  ;;  %v1160_v13 = vpop.xlane.xlu0 %1159 }
 0x26c   :  { %v1476_v27 = vadd.f32 1e-05, %v1444_v54  ;;  %v1349_v37 = vmul.f32 0.0078125, %v1287_v8  ;;  %v7846_v28 = vmul.f32 0.0078125, %v1160_v13 }
 0x26e   :  { %6223 = vrsqrt.f32 %v1476_v27  ;;  %v1445_v7 = vsub.f32 %v1349_v37, %v1413_v36  ;;  %v1414_v45 = vmul.f32 %v7846_v28, %v7846_v28 }
 0x26f   :  { %v1162_v10 = vpop.xlane.xlu1 %1161  ;;  %v1289_v1 = vpop.xlane.xlu0 %1288 }
 0x270   :  { %v1477_v42 = vadd.f32 1e-05, %v1445_v7  ;;  %v7850_v11 = vmul.f32 0.0078125, %v1162_v10  ;;  %v1350_v51 = vmul.f32 0.0078125, %v1289_v1 }
 0x272   :  { %6225 = vrsqrt.f32 %v1477_v42  ;;  %v1446_v57 = vsub.f32 %v1350_v51, %v1414_v45  ;;  %v1415_v54 = vmul.f32 %v7850_v11, %v7850_v11  ;;  %v1380_v45 = vsub.f32 %v7654_v39, %v1220_v62 }
 0x273   :  { %v1291_v2 = vpop.xlane.xlu1 %1290  ;;  %v1164_v61 = vpop.xlane.xlu0 %1163 }
 0x274   :  { %v1478_v8 = vadd.f32 1e-05, %v1446_v57  ;;  %v1351_v13 = vmul.f32 0.0078125, %v1291_v2  ;;  %v7854_v27 = vmul.f32 0.0078125, %v1164_v61 }
 0x276   :  { %6227 = vrsqrt.f32 %v1478_v8  ;;  %v1447_v36 = vsub.f32 %v1351_v13, %v1415_v54  ;;  %v1416_v10 = vmul.f32 %v7854_v27, %v7854_v27 }
 0x277   :  { %v1166_v37 = vpop.xlane.xlu1 %1165  ;;  %v1293_v7 = vpop.xlane.xlu0 %1292 }
 0x278   :  { %v1479_v6 = vadd.f32 1e-05, %v1447_v36  ;;  %v7858_v1 = vmul.f32 0.0078125, %v1166_v37  ;;  %v1352_v42 = vmul.f32 0.0078125, %v1293_v7  ;;  %v7865_v36 = vld [vmem:[#allocation13 + $0x7] ss:$0 sm:$0xff]  ;;  %v1381_v37 = vsub.f32 %v7658_v44, %v1221_v21 }
 0x27a   :  { %6229 = vrsqrt.f32 %v1479_v6  ;;  %v1448_v51 = vsub.f32 %v1352_v42, %v1416_v10  ;;  %v1417_v57 = vmul.f32 %v7858_v1, %v7858_v1 }
 0x27b   :  { %v6224_v52 = vpop.eup %6223  ;;  %v1295_v2 = vpop.xlane.xlu1 %1294 }
 0x27c   :  { %v1168_v61 = vpop.xlane.xlu0 %1167  ;;  %v1480_v54 = vadd.f32 1e-05, %v1448_v51  ;;  %v1353_v8 = vmul.f32 0.0078125, %v1295_v2  ;;  %v1540_v48 = vmul.f32 %v6224_v52, %v1380_v45  ;;  %v1382_v52 = vsub.f32 %v7664_v26, %v7846_v28  ;;  %v6076_v28 = vld [vmem:[#allocation8 + $0x64] ss:$8 sps:$4 sm:$0xff]  }
 0x27d   :  { %v7863_v13 = vmul.f32 0.0078125, %v1168_v61  ;;  %v7873_v61 = vld [vmem:[#allocation13 + $0x10] ss:$0 sm:$0xff]  ;;  %v1383_v26 = vsub.f32 %v7670_v14, %v7850_v11 }
 0x27e   :  { %6231 = vrsqrt.f32 %v1480_v54  ;;  %v1449_v7 = vsub.f32 %v1353_v8, %v1417_v57  ;;  %v1572_v42 = vmul.f32 %v1540_v48, %v7865_v36 }
 0x27f   :  { %v6226_v39 = vpop.eup %6225  ;;  %v1418_v6 = vmul.f32 %v7863_v13, %v7863_v13  ;;  %v1170_v62 = vpop.xlane.xlu1 %1169 }
 0x280   :  { %v1297_v10 = vpop.xlane.xlu0 %1296  ;;  %v1481_v53 = vadd.f32 1e-05, %v1449_v7  ;;  %v7871_v51 = vmul.f32 0.0078125, %v1170_v62  ;;  %v1541_v49 = vmul.f32 %v6226_v39, %v1381_v37  ;;  %v1604_v8 = vadd.f32 %v1572_v42, %v7873_v61  ;;  %v6071_v7 = vld [vmem:[#allocation8 + $0x70] ss:$8 sps:$4 sm:$0xff]  }
 0x281   :  { %v1354_v2 = vmul.f32 0.0078125, %v1297_v10  ;;  %v6073_v62 = vld [vmem:[#allocation8 + $0x74] ss:$8 sps:$4 sm:$0xff]  }
 0x282   :  { %6233 = vrsqrt.f32 %v1481_v53  ;;  %v1419_v45 = vmul.f32 %v7871_v51, %v7871_v51  ;;  %v1573_v48 = vmul.f32 %v1541_v49, %v7865_v36  ;;  %2806 = vmatprep.subr.bf16.mxu0 %v6073_v62  ;;  %v6074_v49 = vld [vmem:[#allocation8 + $0x60] ss:$8 sps:$4 sm:$0xff]  }
 0x283   :  { %v1450_v44 = vsub.f32 %v1354_v2, %v1418_v6  ;;  %v6228_v21 = vpop.eup %6227  ;;  %v1299_v57 = vpop.xlane.xlu1 %1298  ;;  %2807 = vmatpush1.bf16.msra.mxu0 %v6071_v7 }
 0x284   :  { %v1172_v54 = vpop.xlane.xlu0 %1171  ;;  %v1355_v34 = vmul.f32 0.0078125, %v1299_v57  ;;  %v1542_v39 = vmul.f32 %v6228_v21, %v1382_v52  ;;  %v1605_v53 = vadd.f32 %v1573_v48, %v7873_v61  ;;  %2808 = vmatprep.subr.bf16.mxu0 %v6076_v28  ;;  %v6079_v21 = vld [vmem:[#allocation8 + $0x54] ss:$8 sps:$4 sm:$0xff]  }
 0x285   :  { %v1482_v10 = vadd.f32 1e-05, %v1450_v44  ;;  %v7881_v37 = vmul.f32 0.0078125, %v1172_v54  ;;  %v1636_v54 = vmax.f32 %v1604_v8, 0.0 }
 0x286   :  { %v1451_v6 = vsub.f32 %v1355_v34, %v1419_v45  ;;  %v1637_v30 = vmax.f32 %v1605_v53, 0.0  ;;  %v1574_v52 = vmul.f32 %v1542_v39, %v7865_v36  ;;  %v1384_v45 = vsub.f32 %v7676_v29, %v7854_v27 }
 0x287   :  { %6235 = vrsqrt.f32 %v1482_v10  ;;  %v6230_v2 = vpop.eup %6229  ;;  %v1420_v42 = vmul.f32 %v7881_v37, %v7881_v37  ;;  %v1174_v44 = vpop.xlane.xlu1 %1173  ;;  %2809 = vmatpush1.bf16.msra.mxu0 %v6074_v49  ;;  %v6077_v10 = vld [vmem:[#allocation8 + $0x50] ss:$8 sps:$4 sm:$0xff]   ;;  %v10130_v27 = vmov 0  }
 0x288   :  { %v1301_v57 = vpop.xlane.xlu0 %1300  ;;  %v1483_v48 = vadd.f32 1e-05, %v1451_v6  ;;  %v7889_v62 = vmul.f32 0.0078125, %v1174_v44  ;;  %v1543_v14 = vmul.f32 %v6230_v2, %v1383_v26  ;;  %v1668_v34 = vpack.c.bf16 %v1637_v30, %v1636_v54  ;;  %2810 = vmatprep.subr.bf16.mxu0 %v6079_v21  ;;  %v6082_v30 = vld [vmem:[#allocation8 + $0x44] ss:$8 sps:$4 sm:$0xff]  }
 0x289   :  { %v1356_v11 = vmul.f32 0.0078125, %v1301_v57  ;;  %v1606_v6 = vadd.f32 %v1574_v52, %v7873_v61  ;;  %v1385_v44 = vsub.f32 %v7682_v3, %v7858_v1  ;;  %v6080_v54 = vld [vmem:[#allocation8 + $0x40] ss:$8 sps:$4 sm:$0xff]  }
 0x28a   :  { %6237 = vrsqrt.f32 %v1483_v48  ;;  %v1421_v8 = vmul.f32 %v7889_v62, %v7889_v62  ;;  %1824 = vmatmul.mubr.bf16.vlgmr.msra.gmra.mxu1 %v1668_v34  ;;  %v1575_v28 = vmul.f32 %v1543_v14, %v7865_v36 }
 0x28b   :  { %v1452_v7 = vsub.f32 %v1356_v11, %v1420_v42  ;;  %v6232_v35 = vpop.eup %6231  ;;  %v1303_v39 = vpop.xlane.xlu1 %1302  ;;  %1833 = vmatprep.mubr.bf16.mxu1 %v10130_v27  ;;  %2811 = vmatpush1.bf16.msra.mxu0 %v6077_v10  ;;  %v1638_v14 = vmax.f32 %v1606_v6, 0.0  ;;  %v1386_v10 = vsub.f32 %v7688_v46, %v7863_v13 }
 0x28c   :  { %v1176_v53 = vpop.xlane.xlu0 %1175  ;;  %v1357_v2 = vmul.f32 0.0078125, %v1303_v39  ;;  %v1544_v49 = vmul.f32 %v6232_v35, %v1384_v45  ;;  %v1607_v42 = vadd.f32 %v1575_v28, %v7873_v61  ;;  %2812 = vmatprep.subr.bf16.mxu0 %v6082_v30 }
 0x28d   :  { %v1484_v26 = vadd.f32 1e-05, %v1452_v7  ;;  %v7897_v29 = vmul.f32 0.0078125, %v1176_v53 }
 0x28e   :  { %v1453_v57 = vsub.f32 %v1357_v2, %v1421_v8  ;;  %v1639_v34 = vmax.f32 %v1607_v42, 0.0  ;;  %v1576_v7 = vmul.f32 %v1544_v49, %v7865_v36 }
 0x28f   :  { %6239 = vrsqrt.f32 %v1484_v26  ;;  %v6234_v48 = vpop.eup %6233  ;;  %v1422_v52 = vmul.f32 %v7897_v29, %v7897_v29  ;;  %v1178_v21 = vpop.xlane.xlu1 %1177  ;;  %2813 = vmatpush1.bf16.msra.mxu0 %v6080_v54 }
 0x290   :  { %v1305_v11 = vpop.xlane.xlu0 %1304  ;;  %v1485_v35 = vadd.f32 1e-05, %v1453_v57  ;;  %v7906_v45 = vmul.f32 0.0078125, %v1178_v21  ;;  %v1545_v3 = vmul.f32 %v6234_v48, %v1385_v44  ;;  %v1669_v1 = vpack.c.bf16 %v1639_v34, %v1638_v14 }
 0x291   :  { %v1358_v39 = vmul.f32 0.0078125, %v1305_v11  ;;  %v1608_v2 = vadd.f32 %v1576_v7, %v7873_v61  ;;  %v1387_v57 = vsub.f32 %v7694_v25, %v7871_v51  ;;  %v1388_v25 = vsub.f32 %v7700_v32, %v7881_v37 }
 0x292   :  { %6241 = vrsqrt.f32 %v1485_v35  ;;  %v1423_v28 = vmul.f32 %v7906_v45, %v7906_v45  ;;  %1834 = vmatmul.mubr.bf16.gmra.mxu1 %v1669_v1  ;;  %v1577_v30 = vmul.f32 %v1545_v3, %v7865_v36 }
 0x293   :  { %v1454_v8 = vsub.f32 %v1358_v39, %v1422_v52  ;;  %v1307_v6 = vpop.xlane.xlu1 %1306  ;;  %1843 = vmatprep.mubr.bf16.mxu1 %v10130_v27  ;;  %v1640_v14 = vmax.f32 %v1608_v2, 0.0 }
 0x294   :  { %v6236_v53 = vpop.eup %6235  ;;  %v1180_v26 = vpop.xlane.xlu0 %1179  ;;  %v1359_v42 = vmul.f32 0.0078125, %v1307_v6  ;;  %v1609_v13 = vadd.f32 %v1577_v30, %v7873_v61 }
 0x295   :  { %v1486_v49 = vadd.f32 1e-05, %v1454_v8  ;;  %v7914_v44 = vmul.f32 0.0078125, %v1180_v26  ;;  %v1546_v46 = vmul.f32 %v6236_v53, %v1386_v10 }
 0x296   :  { %v1455_v54 = vsub.f32 %v1359_v42, %v1423_v28  ;;  %v1641_v34 = vmax.f32 %v1609_v13, 0.0 }
 0x297   :  { %6243 = vrsqrt.f32 %v1486_v49  ;;  %v6238_v48 = vpop.eup %6237  ;;  %v1424_v52 = vmul.f32 %v7914_v44, %v7914_v44  ;;  %v1182_v21 = vpop.xlane.xlu1 %1181  ;;  %v1578_v7 = vmul.f32 %v1546_v46, %v7865_v36  ;;  %v1389_v46 = vsub.f32 %v7706_v43, %v7889_v62 }
 0x298   :  { %v1309_v11 = vpop.xlane.xlu0 %1308  ;;  %v1487_v35 = vadd.f32 1e-05, %v1455_v54  ;;  %v7923_v39 = vmul.f32 0.0078125, %v1182_v21  ;;  %v1547_v1 = vmul.f32 %v6238_v48, %v1387_v57  ;;  %v1670_v10 = vpack.c.bf16 %v1641_v34, %v1640_v14 }
 0x299   :  { %v1360_v3 = vmul.f32 0.0078125, %v1309_v11  ;;  %v1610_v30 = vadd.f32 %v1578_v7, %v7873_v61  ;;  %v1390_v43 = vsub.f32 %v7712_v23, %v7897_v29 }
 0x29a   :  { %6245 = vrsqrt.f32 %v1487_v35  ;;  %v1425_v53 = vmul.f32 %v7923_v39, %v7923_v39  ;;  %1844 = vmatmul.mubr.bf16.gmra.mxu1 %v1670_v10  ;;  %v1579_v26 = vmul.f32 %v1547_v1, %v7865_v36 }
 0x29b   :  { %v1456_v51 = vsub.f32 %v1360_v3, %v1424_v52  ;;  %v1311_v28 = vpop.xlane.xlu1 %1310  ;;  %1853 = vmatprep.mubr.bf16.mxu1 %v10130_v27  ;;  %v1642_v21 = vmax.f32 %v1610_v30, 0.0 }
 0x29c   :  { %v6240_v8 = vpop.eup %6239  ;;  %v1184_v6 = vpop.xlane.xlu0 %1183  ;;  %v1361_v49 = vmul.f32 0.0078125, %v1311_v28  ;;  %v1611_v37 = vadd.f32 %v1579_v26, %v7873_v61 }
 0x29d   :  { %v1488_v2 = vadd.f32 1e-05, %v1456_v51  ;;  %v7931_v42 = vmul.f32 0.0078125, %v1184_v6  ;;  %v1548_v32 = vmul.f32 %v6240_v8, %v1388_v25 }
 0x29e   :  { %v1457_v13 = vsub.f32 %v1361_v49, %v1425_v53  ;;  %v1643_v11 = vmax.f32 %v1611_v37, 0.0 }
 0x29f   :  { %6247 = vrsqrt.f32 %v1488_v2  ;;  %v6242_v57 = vpop.eup %6241  ;;  %v1426_v54 = vmul.f32 %v7931_v42, %v7931_v42  ;;  %v1186_v48 = vpop.xlane.xlu1 %1185  ;;  %v1580_v14 = vmul.f32 %v1548_v32, %v7865_v36  ;;  %v1391_v2 = vsub.f32 %v7718_v0, %v7906_v45 }
 0x2a0   :  { %v1313_v52 = vpop.xlane.xlu0 %1312  ;;  %v1489_v34 = vadd.f32 1e-05, %v1457_v13  ;;  %v7940_v7 = vmul.f32 0.0078125, %v1186_v48  ;;  %v1549_v3 = vmul.f32 %v6242_v57, %v1389_v46  ;;  %v1671_v1 = vpack.c.bf16 %v1643_v11, %v1642_v21 }
 0x2a1   :  { %v1362_v35 = vmul.f32 0.0078125, %v1313_v52  ;;  %v1612_v28 = vadd.f32 %v1580_v14, %v7873_v61  ;;  %v1392_v0 = vsub.f32 %v7724_v47, %v7914_v44 }
 0x2a2   :  { %6249 = vrsqrt.f32 %v1489_v34  ;;  %v1427_v25 = vmul.f32 %v7940_v7, %v7940_v7  ;;  %1854 = vmatmul.mubr.bf16.gmra.mxu1 %v1671_v1  ;;  %v1581_v53 = vmul.f32 %v1549_v3, %v7865_v36 }
 0x2a3   :  { %v1458_v62 = vsub.f32 %v1362_v35, %v1426_v54  ;;  %v1315_v51 = vpop.xlane.xlu1 %1314  ;;  %1863 = vmatprep.mubr.bf16.mxu1 %v10130_v27  ;;  %v1644_v57 = vmax.f32 %v1612_v28, 0.0 }
 0x2a4   :  { %v6244_v10 = vpop.eup %6243  ;;  %v1188_v8 = vpop.xlane.xlu0 %1187  ;;  %v1363_v26 = vmul.f32 0.0078125, %v1315_v51  ;;  %v1613_v29 = vadd.f32 %v1581_v53, %v7873_v61  ;;  %v1393_v53 = vsub.f32 %v7731_v24, %v7923_v39  ;;  %v1394_v24 = vsub.f32 %v7737_v20, %v7931_v42 }
 0x2a5   :  { %v1490_v6 = vadd.f32 1e-05, %v1458_v62  ;;  %v7948_v30 = vmul.f32 0.0078125, %v1188_v8  ;;  %v1550_v23 = vmul.f32 %v6244_v10, %v1390_v43 }
 0x2a6   :  { %v1459_v49 = vsub.f32 %v1363_v26, %v1427_v25  ;;  %v1645_v54 = vmax.f32 %v1613_v29, 0.0 }
 0x2a7   :  { %6251 = vrsqrt.f32 %v1490_v6  ;;  %v6246_v32 = vpop.eup %6245  ;;  %v1428_v37 = vmul.f32 %v7948_v30, %v7948_v30  ;;  %v1190_v46 = vpop.xlane.xlu1 %1189  ;;  %v1582_v48 = vmul.f32 %v1550_v23, %v7865_v36 }
 0x2a8   :  { %v1317_v13 = vpop.xlane.xlu0 %1316  ;;  %v1491_v52 = vadd.f32 1e-05, %v1459_v49  ;;  %v7957_v21 = vmul.f32 0.0078125, %v1190_v46  ;;  %v1551_v14 = vmul.f32 %v6246_v32, %v1391_v2  ;;  %v1672_v34 = vpack.c.bf16 %v1645_v54, %v1644_v57 }
 0x2a9   :  { %v1364_v11 = vmul.f32 0.0078125, %v1317_v13  ;;  %v1614_v10 = vadd.f32 %v1582_v48, %v7873_v61 }
 0x2aa   :  { %6253 = vrsqrt.f32 %v1491_v52  ;;  %v1429_v3 = vmul.f32 %v7957_v21, %v7957_v21  ;;  %1864 = vmatmul.mubr.bf16.gmra.mxu1 %v1672_v34  ;;  %v1583_v62 = vmul.f32 %v1551_v14, %v7865_v36 }
 0x2ab   :  { %v1460_v45 = vsub.f32 %v1364_v11, %v1428_v37  ;;  %v1319_v1 = vpop.xlane.xlu1 %1318  ;;  %1873 = vmatprep.mubr.bf16.mxu1 %v10130_v27  ;;  %v1646_v2 = vmax.f32 %v1614_v10, 0.0 }
 0x2ac   :  { %v6248_v35 = vpop.eup %6247  ;;  %v1192_v43 = vpop.xlane.xlu0 %1191  ;;  %v1365_v51 = vmul.f32 0.0078125, %v1319_v1  ;;  %v1615_v44 = vadd.f32 %v1583_v62, %v7873_v61  ;;  %v1395_v1 = vsub.f32 %v7743_v50, %v7940_v7  ;;  %v1396_v50 = vsub.f32 %v7749_v58, %v7948_v30 }
 0x2ad   :  { %v1492_v25 = vadd.f32 1e-05, %v1460_v45  ;;  %v7965_v8 = vmul.f32 0.0078125, %v1192_v43  ;;  %v1552_v47 = vmul.f32 %v6248_v35, %v1392_v0 }
 0x2ae   :  { %v1461_v28 = vsub.f32 %v1365_v51, %v1429_v3  ;;  %v1647_v49 = vmax.f32 %v1615_v44, 0.0 }
 0x2af   :  { %6255 = vrsqrt.f32 %v1492_v25  ;;  %v6250_v6 = vpop.eup %6249  ;;  %v1430_v26 = vmul.f32 %v7965_v8, %v7965_v8  ;;  %v1194_v23 = vpop.xlane.xlu1 %1193  ;;  %v1584_v32 = vmul.f32 %v1552_v47, %v7865_v36 }
 0x2b0   :  { %v1321_v29 = vpop.xlane.xlu0 %1320  ;;  %v1493_v37 = vadd.f32 1e-05, %v1461_v28  ;;  %v7974_v46 = vmul.f32 0.0078125, %v1194_v23  ;;  %v1553_v57 = vmul.f32 %v6250_v6, %v1393_v53  ;;  %v1673_v54 = vpack.c.bf16 %v1647_v49, %v1646_v2 }
 0x2b1   :  { %v1366_v13 = vmul.f32 0.0078125, %v1321_v29  ;;  %v1616_v0 = vadd.f32 %v1584_v32, %v7873_v61 }
 0x2b2   :  { %6257 = vrsqrt.f32 %v1493_v37  ;;  %v1431_v52 = vmul.f32 %v7974_v46, %v7974_v46  ;;  %1874 = vmatmul.mubr.bf16.gmra.mxu1 %v1673_v54  ;;  %v1585_v34 = vmul.f32 %v1553_v57, %v7865_v36 }
 0x2b3   :  { %v1462_v39 = vsub.f32 %v1366_v13, %v1430_v26  ;;  %v1323_v11 = vpop.xlane.xlu1 %1322  ;;  %1883 = vmatprep.mubr.bf16.mxu1 %v10130_v27  ;;  %v1648_v47 = vmax.f32 %v1616_v0, 0.0 }
 0x2b4   :  { %v6252_v48 = vpop.eup %6251  ;;  %v1196_v14 = vpop.xlane.xlu0 %1195  ;;  %v1367_v35 = vmul.f32 0.0078125, %v1323_v11  ;;  %v1617_v42 = vadd.f32 %v1585_v34, %v7873_v61 }
 0x2b5   :  { %v1494_v45 = vadd.f32 1e-05, %v1462_v39  ;;  %v7982_v3 = vmul.f32 0.0078125, %v1196_v14  ;;  %v1554_v20 = vmul.f32 %v6252_v48, %v1394_v24  ;;  %v1397_v48 = vsub.f32 %v7755_v4, %v7957_v21 }
 0x2b6   :  { %v1463_v43 = vsub.f32 %v1367_v35, %v1431_v52  ;;  %v1649_v44 = vmax.f32 %v1617_v42, 0.0  ;;  %v1398_v4 = vsub.f32 %v7761_v22, %v7965_v8 }
 0x2b7   :  { %6259 = vrsqrt.f32 %v1494_v45  ;;  %v6254_v62 = vpop.eup %6253  ;;  %v1432_v10 = vmul.f32 %v7982_v3, %v7982_v3  ;;  %v1198_v25 = vpop.xlane.xlu1 %1197  ;;  %v1586_v53 = vmul.f32 %v1554_v20, %v7865_v36 }
 0x2b8   :  { %v1325_v51 = vpop.xlane.xlu0 %1324  ;;  %v1495_v28 = vadd.f32 1e-05, %v1463_v43  ;;  %v7991_v6 = vmul.f32 0.0078125, %v1198_v25  ;;  %v1555_v23 = vmul.f32 %v6254_v62, %v1395_v1  ;;  %v1674_v29 = vpack.c.bf16 %v1649_v44, %v1648_v47 }
 0x2b9   :  { %v1368_v26 = vmul.f32 0.0078125, %v1325_v51  ;;  %v1618_v57 = vadd.f32 %v1586_v53, %v7873_v61 }
 0x2ba   :  { %6261 = vrsqrt.f32 %v1495_v28  ;;  %v1433_v49 = vmul.f32 %v7991_v6, %v7991_v6  ;;  %1884 = vmatmul.mubr.bf16.gmra.mxu1 %v1674_v29  ;;  %v1587_v13 = vmul.f32 %v1555_v23, %v7865_v36 }
 0x2bb   :  { %v1464_v7 = vsub.f32 %v1368_v26, %v1432_v10  ;;  %v1327_v32 = vpop.xlane.xlu1 %1326  ;;  %1893 = vmatprep.mubr.bf16.mxu1 %v10130_v27  ;;  %v1650_v45 = vmax.f32 %v1618_v57, 0.0 }
 0x2bc   :  { %v6256_v2 = vpop.eup %6255  ;;  %v1200_v37 = vpop.xlane.xlu0 %1199  ;;  %v1369_v24 = vmul.f32 0.0078125, %v1327_v32  ;;  %v1619_v30 = vadd.f32 %v1587_v13, %v7873_v61 }
 0x2bd   :  { %v1496_v54 = vadd.f32 1e-05, %v1464_v7  ;;  %v7999_v39 = vmul.f32 0.0078125, %v1200_v37  ;;  %v1556_v58 = vmul.f32 %v6256_v2, %v1396_v50  ;;  %v1399_v50 = vsub.f32 %v7767_v5, %v7974_v46 }
 0x2be   :  { %v1465_v52 = vsub.f32 %v1369_v24, %v1433_v49  ;;  %v1651_v35 = vmax.f32 %v1619_v30, 0.0  ;;  %v1400_v5 = vsub.f32 %v7773_v55, %v7982_v3  ;;  %v6083_v3 = vld [vmem:[#allocation8 + $0x30] ss:$8 sps:$4 sm:$0xff]  }
 0x2bf   :  { %6263 = vrsqrt.f32 %v1496_v54  ;;  %v6258_v11 = vpop.eup %6257  ;;  %v1434_v14 = vmul.f32 %v7999_v39, %v7999_v39  ;;  %v1202_v34 = vpop.xlane.xlu1 %1201  ;;  %v1588_v20 = vmul.f32 %v1556_v58, %v7865_v36 }
 0x2c0   :  { %v1329_v0 = vpop.xlane.xlu0 %1328  ;;  %v1497_v42 = vadd.f32 1e-05, %v1465_v52  ;;  %v8008_v1 = vmul.f32 0.0078125, %v1202_v34  ;;  %v1557_v62 = vmul.f32 %v6258_v11, %v1397_v48  ;;  %v1675_v10 = vpack.c.bf16 %v1651_v35, %v1650_v45 }
 0x2c1   :  { %v1370_v43 = vmul.f32 0.0078125, %v1329_v0  ;;  %v1620_v28 = vadd.f32 %v1588_v20, %v7873_v61  ;;  %v6085_v20 = vld [vmem:[#allocation8 + $0x34] ss:$8 sps:$4 sm:$0xff]  }
 0x2c2   :  { %6265 = vrsqrt.f32 %v1497_v42  ;;  %v1435_v51 = vmul.f32 %v8008_v1, %v8008_v1  ;;  %1894 = vmatmul.mubr.bf16.gmra.mxu1 %v1675_v10  ;;  %v1589_v53 = vmul.f32 %v1557_v62, %v7865_v36  ;;  %2814 = vmatprep.subr.bf16.mxu0 %v6085_v20 }
 0x2c3   :  { %v1466_v21 = vsub.f32 %v1370_v43, %v1434_v14  ;;  %v1331_v47 = vpop.xlane.xlu1 %1330  ;;  %1903 = vmatprep.mubr.bf16.mxu1 %v10130_v27  ;;  %v1652_v13 = vmax.f32 %v1620_v28, 0.0  ;;  %2815 = vmatpush1.bf16.msra.mxu0 %v6083_v3 }
 0x2c4   :  { %v6260_v25 = vpop.eup %6259  ;;  %v1204_v44 = vpop.xlane.xlu0 %1203  ;;  %v1371_v23 = vmul.f32 0.0078125, %v1331_v47  ;;  %v1621_v8 = vadd.f32 %v1589_v53, %v7873_v61 }
 0x2c5   :  { %v1498_v26 = vadd.f32 1e-05, %v1466_v21  ;;  %v8016_v29 = vmul.f32 0.0078125, %v1204_v44  ;;  %v1558_v22 = vmul.f32 %v6260_v25, %v1398_v4  ;;  %v1401_v4 = vsub.f32 %v7779_v63, %v7991_v6  ;;  %v6086_v63 = vld [vmem:[#allocation8 + $0x20] ss:$8 sps:$4 sm:$0xff]  }
 0x2c6   :  { %v1467_v7 = vsub.f32 %v1371_v23, %v1435_v51  ;;  %v1653_v57 = vmax.f32 %v1621_v8, 0.0  ;;  %v6088_v23 = vld [vmem:[#allocation8 + $0x24] ss:$8 sps:$4 sm:$0xff]  }
 0x2c7   :  { %6267 = vrsqrt.f32 %v1498_v26  ;;  %v6262_v2 = vpop.eup %6261  ;;  %v1436_v49 = vmul.f32 %v8016_v29, %v8016_v29  ;;  %v1206_v32 = vpop.xlane.xlu1 %1205  ;;  %v1590_v54 = vmul.f32 %v1558_v22, %v7865_v36  ;;  %2816 = vmatprep.subr.bf16.mxu0 %v6088_v23 }
 0x2c8   :  { %v1333_v37 = vpop.xlane.xlu0 %1332  ;;  %v1499_v24 = vadd.f32 1e-05, %v1467_v7  ;;  %v8025_v58 = vmul.f32 0.0078125, %v1206_v32  ;;  %v1559_v48 = vmul.f32 %v6262_v2, %v1399_v50  ;;  %v1676_v52 = vpack.c.bf16 %v1653_v57, %v1652_v13  ;;  %2817 = vmatpush1.bf16.msra.mxu0 %v6086_v63 }
 0x2c9   :  { %v1372_v30 = vmul.f32 0.0078125, %v1333_v37  ;;  %v1622_v35 = vadd.f32 %v1590_v54, %v7873_v61  ;;  %v1402_v2 = vsub.f32 %v7785_v60, %v7999_v39  ;;  %v6089_v39 = vld [vmem:[#allocation8 + $0x10] ss:$8 sps:$4 sm:$0xff]  }
 0x2ca   :  { %6269 = vrsqrt.f32 %v1499_v24  ;;  %v1437_v14 = vmul.f32 %v8025_v58, %v8025_v58  ;;  %1904 = vmatmul.mubr.bf16.gmra.mxu1 %v1676_v52  ;;  %v1591_v45 = vmul.f32 %v1559_v48, %v7865_v36 }
 0x2cb   :  { %v1468_v46 = vsub.f32 %v1372_v30, %v1436_v49  ;;  %v1335_v34 = vpop.xlane.xlu1 %1334  ;;  %1913 = vmatprep.mubr.bf16.mxu1 %v10130_v27  ;;  %v1654_v53 = vmax.f32 %v1622_v35, 0.0  ;;  %v6091_v30 = vld [vmem:[#allocation8 + $0x14] ss:$8 sps:$4 sm:$0xff]  }
 0x2cc   :  { %v6264_v11 = vpop.eup %6263  ;;  %v1208_v0 = vpop.xlane.xlu0 %1207  ;;  %v1373_v43 = vmul.f32 0.0078125, %v1335_v34  ;;  %v1623_v10 = vadd.f32 %v1591_v45, %v7873_v61  ;;  %2818 = vmatprep.subr.bf16.mxu0 %v6091_v30 }
 0x2cd   :  { %v1500_v42 = vadd.f32 1e-05, %v1468_v46  ;;  %v8033_v62 = vmul.f32 0.0078125, %v1208_v0  ;;  %v1560_v55 = vmul.f32 %v6264_v11, %v1400_v5  ;;  %v1403_v11 = vsub.f32 %v7791_v40, %v8008_v1  ;;  %2819 = vmatpush1.bf16.msra.mxu0 %v6089_v39  ;;  %v6092_v40 = vld [vmem:[#allocation8] ss:$8 sps:$4 sm:$0xff]  }
 0x2ce   :  { %v1469_v21 = vsub.f32 %v1373_v43, %v1437_v14  ;;  %v1655_v28 = vmax.f32 %v1623_v10, 0.0 }
 0x2cf   :  { %6271 = vrsqrt.f32 %v1500_v42  ;;  %v6266_v25 = vpop.eup %6265  ;;  %v1438_v51 = vmul.f32 %v8033_v62, %v8033_v62  ;;  %v1210_v47 = vpop.xlane.xlu1 %1209  ;;  %v1592_v26 = vmul.f32 %v1560_v55, %v7865_v36  ;;  %v6094_v55 = vld [vmem:[#allocation8 + $0x4] ss:$8 sps:$4 sm:$0xff]  }
 0x2d0   :  { %v1337_v44 = vpop.xlane.xlu0 %1336  ;;  %v1501_v22 = vadd.f32 1e-05, %v1469_v21  ;;  %v8042_v8 = vmul.f32 0.0078125, %v1210_v47  ;;  %v1561_v7 = vmul.f32 %v6266_v25, %v1401_v4  ;;  %v1677_v6 = vpack.c.bf16 %v1655_v28, %v1654_v53  ;;  %2820 = vmatprep.subr.bf16.mxu0 %v6094_v55 }
 0x2d1   :  { %v1374_v50 = vmul.f32 0.0078125, %v1337_v44  ;;  %v1624_v24 = vadd.f32 %v1592_v26, %v7873_v61  ;;  %v1404_v25 = vsub.f32 %v7797_v33, %v8016_v29  ;;  %2821 = vmatpush1.bf16.msra.mxu0 %v6092_v40  ;;  %v6097_v29 = vld [vmem:[#allocation8 + $0xf4] ss:$8 sps:$4 sm:$0xff]  }
 0x2d2   :  { %6273 = vrsqrt.f32 %v1501_v22  ;;  %v1439_v37 = vmul.f32 %v8042_v8, %v8042_v8  ;;  %1914 = vmatmul.mubr.bf16.gmra.mxu1 %v1677_v6  ;;  %v1593_v54 = vmul.f32 %v1561_v7, %v7865_v36  ;;  %v6095_v6 = vld [vmem:[#allocation8 + $0xf0] ss:$8 sps:$4 sm:$0xff]   ;;  %2822 = vmatprep.subr.bf16.mxu0 %v6097_v29  ;;  %v6109_v29 = vld [vmem:[#allocation8 + $0xb4] ss:$8 sps:$4 sm:$0xff]  }
 0x2d3   :  { %v1470_v49 = vsub.f32 %v1374_v50, %v1438_v51  ;;  %v1339_v13 = vpop.xlane.xlu1 %1338  ;;  %1923 = vmatprep.mubr.bf16.mxu1 %v10130_v27  ;;  %v1656_v20 = vmax.f32 %v1624_v24, 0.0 }
 0x2d4   :  { %v6268_v32 = vpop.eup %6267  ;;  %v1212_v57 = vpop.xlane.xlu0 %1211  ;;  %v1375_v52 = vmul.f32 0.0078125, %v1339_v13  ;;  %v1625_v46 = vadd.f32 %v1593_v54, %v7873_v61 }
 0x2d5   :  { %v1502_v48 = vadd.f32 1e-05, %v1470_v49  ;;  %v8050_v5 = vmul.f32 0.0078125, %v1212_v57  ;;  %v1562_v60 = vmul.f32 %v6268_v32, %v1402_v2  ;;  %v1405_v2 = vsub.f32 %v7803_v41, %v8025_v58  ;;  %2823 = vmatpush2.bf16.msra.mxu0 %v6095_v6  ;;  %v6100_v41 = vld [vmem:[#allocation8 + $0xe4] ss:$8 sps:$4 sm:$0xff]  }
 0x2d6   :  { %v1471_v14 = vsub.f32 %v1375_v52, %v1439_v37  ;;  %v1657_v42 = vmax.f32 %v1625_v46, 0.0  ;;  %v6098_v46 = vld [vmem:[#allocation8 + $0xe0] ss:$8 sps:$4 sm:$0xff]   ;;  %2824 = vmatprep.subr.bf16.mxu0 %v6100_v41 }
 0x2d7   :  { %6275 = vrsqrt.f32 %v1502_v48  ;;  %v6270_v34 = vpop.eup %6269  ;;  %v1440_v0 = vmul.f32 %v8050_v5, %v8050_v5  ;;  %v1214_v45 = vpop.xlane.xlu1 %1213  ;;  %v1594_v43 = vmul.f32 %v1562_v60, %v7865_v36 }
 0x2d8   :  { %v1341_v35 = vpop.xlane.xlu0 %1340  ;;  %v1503_v3 = vadd.f32 1e-05, %v1471_v14  ;;  %v8059_v10 = vmul.f32 0.0078125, %v1214_v45  ;;  %v1563_v21 = vmul.f32 %v6270_v34, %v1403_v11  ;;  %v1678_v1 = vpack.c.bf16 %v1657_v42, %v1656_v20 }
 0x2d9   :  { %v1376_v4 = vmul.f32 0.0078125, %v1341_v35  ;;  %v1626_v23 = vadd.f32 %v1594_v43, %v7873_v61  ;;  %v1406_v11 = vsub.f32 %v7809_v38, %v8033_v62  ;;  %2825 = vmatpush2.bf16.msra.mxu0 %v6098_v46  ;;  %v6103_v38 = vld [vmem:[#allocation8 + $0xd4] ss:$8 sps:$4 sm:$0xff]  }
 0x2da   :  { %6277 = vrsqrt.f32 %v1503_v3  ;;  %v1441_v44 = vmul.f32 %v8059_v10, %v8059_v10  ;;  %1924 = vmatmul.mubr.bf16.gmra.mxu1 %v1678_v1  ;;  %v1595_v26 = vmul.f32 %v1563_v21, %v7865_v36  ;;  %v6101_v3 = vld [vmem:[#allocation8 + $0xd0] ss:$8 sps:$4 sm:$0xff]   ;;  %2826 = vmatprep.subr.bf16.mxu0 %v6103_v38  ;;  %v1409_v6 = vsub.f32 %v7827_v12, %v8059_v10 }
 0x2db   :  { %v1472_v51 = vsub.f32 %v1376_v4, %v1440_v0  ;;  %v1343_v53 = vpop.xlane.xlu1 %1342  ;;  %1933 = vmatprep.mubr.bf16.mxu1 %v10130_v27  ;;  %v1658_v54 = vmax.f32 %v1626_v23, 0.0  ;;  %v1407_v4 = vsub.f32 %v7815_v9, %v8042_v8  ;;  %v1408_v23 = vsub.f32 %v7821_v17, %v8050_v5 }
 0x2dc   :  { %v6272_v47 = vpop.eup %6271  ;;  %v1216_v28 = vpop.xlane.xlu0 %1215  ;;  %v1377_v50 = vmul.f32 0.0078125, %v1343_v53  ;;  %v1627_v63 = vadd.f32 %v1595_v26, %v7873_v61  ;;  %v6106_v53 = vld [vmem:[#allocation8 + $0xc4] ss:$8 sps:$4 sm:$0xff]   ;;  %v6104_v26 = vld [vmem:[#allocation8 + $0xc0] ss:$8 sps:$4 sm:$0xff]  }
 0x2dd   :  { %v1504_v22 = vadd.f32 1e-05, %v1472_v51  ;;  %v8067_v7 = vmul.f32 0.0078125, %v1216_v28  ;;  %v1564_v33 = vmul.f32 %v6272_v47, %v1404_v25  ;;  %2827 = vmatpush2.bf16.msra.mxu0 %v6101_v3 }
 0x2de   :  { %v1473_v49 = vsub.f32 %v1377_v50, %v1441_v44  ;;  %v1659_v24 = vmax.f32 %v1627_v63, 0.0  ;;  %2828 = vmatprep.subr.bf16.mxu0 %v6106_v53  ;;  %v6107_v63 = vld [vmem:[#allocation8 + $0xb0] ss:$8 sps:$4 sm:$0xff]  }
 0x2df   :  { %6279 = vrsqrt.f32 %v1504_v22  ;;  %v6274_v32 = vpop.eup %6273  ;;  %v1442_v37 = vmul.f32 %v8067_v7, %v8067_v7  ;;  %v1218_v13 = vpop.xlane.xlu1 %1217  ;;  %v1596_v30 = vmul.f32 %v1564_v33, %v7865_v36 }
 0x2e0   :  { %v1345_v57 = vpop.xlane.xlu0 %1344  ;;  %v1505_v48 = vadd.f32 1e-05, %v1473_v49  ;;  %v8076_v52 = vmul.f32 0.0078125, %v1218_v13  ;;  %v1565_v39 = vmul.f32 %v6274_v32, %v1405_v2  ;;  %v1679_v58 = vpack.c.bf16 %v1659_v24, %v1658_v54  ;;  %v6112_v13 = vld [vmem:[#allocation8 + $0xa4] ss:$8 sps:$4 sm:$0xff]  }
 0x2e1   :  { %v1378_v60 = vmul.f32 0.0078125, %v1345_v57  ;;  %v1628_v35 = vadd.f32 %v1596_v30, %v7873_v61  ;;  %2829 = vmatpush2.bf16.msra.mxu0 %v6104_v26  ;;  %v6110_v57 = vld [vmem:[#allocation8 + $0xa0] ss:$8 sps:$4 sm:$0xff]   ;;  %v1410_v54 = vsub.f32 %v7833_v56, %v8067_v7 }
 0x2e2   :  { %6281 = vrsqrt.f32 %v1505_v48  ;;  %1934 = vmatmul.mubr.bf16.gmra.mxu1 %v1679_v58  ;;  %v1597_v45 = vmul.f32 %v1565_v39, %v7865_v36  ;;  %v1443_v20 = vmul.f32 %v8076_v52, %v8076_v52  ;;  %2830 = vmatprep.subr.bf16.mxu0 %v6109_v29  ;;  %v6113_v39 = vld [vmem:[#allocation8 + $0x90] ss:$8 sps:$4 sm:$0xff]   ;;  %v1411_v41 = vsub.f32 %v7839_v59, %v8076_v52 }
 0x2e3   :  { %v1474_v14 = vsub.f32 %v1378_v60, %v1442_v37  ;;  %v1347_v0 = vpop.xlane.xlu1 %1346  ;;  %1943 = vmatprep.mubr.bf16.mxu1 %v10130_v27  ;;  %v1660_v25 = vmax.f32 %v1628_v35, 0.0  ;;  %v6115_v60 = vld [vmem:[#allocation8 + $0x94] ss:$8 sps:$4 sm:$0xff]  }
 0x2e4   :  { %v6276_v34 = vpop.eup %6275  ;;  %v1379_v43 = vmul.f32 0.0078125, %v1347_v0  ;;  %v1629_v62 = vadd.f32 %v1597_v45, %v7873_v61  ;;  %v6116_v0 = vld [vmem:[#allocation8 + $0x80] ss:$8 sps:$4 sm:$0xff]  }
 0x2e5   :  { %v1506_v42 = vadd.f32 1e-05, %v1474_v14  ;;  %v1566_v55 = vmul.f32 %v6276_v34, %v1406_v11  ;;  %2831 = vmatpush2.bf16.msra.mxu0 %v6107_v63  ;;  %v6118_v34 = vld [vmem:[#allocation8 + $0x84] ss:$8 sps:$4 sm:$0xff]  }
 0x2e6   :  { %v1475_v21 = vsub.f32 %v1379_v43, %v1443_v20  ;;  %v1661_v51 = vmax.f32 %v1629_v62, 0.0  ;;  %2832 = vmatprep.subr.bf16.mxu0 %v6112_v13  ;;  %v1701_v43 = vlaneseq  ;;  %v242_v62 = vld [vmem:[#allocation13 + $0x1] ss:$8 sm:$0x3] }
 0x2e7   :  { %6283 = vrsqrt.f32 %v1506_v42  ;;  %v1598_v40 = vmul.f32 %v1566_v55, %v7865_v36  ;;  %v6278_v1 = vpop.eup %6277 }
 0x2e8   :  { %v1507_v47 = vadd.f32 1e-05, %v1475_v21  ;;  %v1567_v44 = vmul.f32 %v6278_v1, %v1407_v4  ;;  %v1680_v28 = vpack.c.bf16 %v1661_v51, %v1660_v25  ;;  %v1702_v55 = vshrl.u32 %v1701_v43, 7  ;;  %v240_v43 = vld [vmem:[#allocation13] ss:$8 sm:$0x3] }
 0x2e9   :  { %v1630_v8 = vadd.f32 %v1598_v40, %v7873_v61  ;;  %2833 = vmatpush2.bf16.msra.mxu0 %v6110_v57 }
 0x2ea   :  { %6285 = vrsqrt.f32 %v1507_v47  ;;  %v1599_v9 = vmul.f32 %v1567_v44, %v7865_v36  ;;  %1944 = vmatmul.mubr.bf16.gmra.mxu1 %v1680_v28  ;;  %2834 = vmatprep.subr.bf16.mxu0 %v6115_v60  ;;  %v8111_v38 = vsub.s32 0, %v1702_v55  ;;  %v8113_v3 = vsub.s32 1, %v1702_v55 }
 0x2eb   :  { %1953 = vmatprep.mubr.bf16.mxu1 %v10130_v27  ;;  %v1662_v17 = vmax.f32 %v1630_v8, 0.0 }
 0x2ec   :  { %v6280_v22 = vpop.eup %6279  ;;  %v1631_v50 = vadd.f32 %v1599_v9, %v7873_v61  ;;  %10131 = vst [vmem:[#allocation86_spill] sm:$0xff] %v8111_v38  ;;  %10132 = vst [vmem:[#allocation87_spill] sm:$0xff] %v8113_v3  ;;  %v8119_v4 = vrot.slane %v242_v62, %v8113_v3 }
 0x2ed   :  { %v1568_v33 = vmul.f32 %v6280_v22, %v1408_v23  ;;  %2835 = vmatpush2.bf16.msra.mxu0 %v6113_v39 }
 0x2ee   :  { %v1663_v5 = vmax.f32 %v1631_v50, 0.0  ;;  %2836 = vmatprep.subr.bf16.mxu0 %v6118_v34 }
 0x2ef   :  { %v1600_v2 = vmul.f32 %v1568_v33, %v7865_v36  ;;  %v6282_v49 = vpop.eup %6281 }
 0x2f0   :  { %v1681_v32 = vpack.c.bf16 %v1663_v5, %v1662_v17  ;;  %v1569_v37 = vmul.f32 %v6282_v49, %v1409_v6 }
 0x2f1   :  { %v1632_v30 = vadd.f32 %v1600_v2, %v7873_v61  ;;  %2837 = vmatpush2.bf16.msra.mxu0 %v6116_v0 }
 0x2f2   :  { %v1601_v24 = vmul.f32 %v1569_v37, %v7865_v36  ;;  %1954 = vmatmul.mubr.bf16.gmra.mxu1 %v1681_v32 }
 0x2f3   :  { %1963 = vmatprep.mubr.bf16.mxu1 %v10130_v27  ;;  %v1664_v58 = vmax.f32 %v1632_v30, 0.0 }
 0x2f4   :  { %v6284_v12 = vpop.eup %6283  ;;  %v1633_v10 = vadd.f32 %v1601_v24, %v7873_v61 }
 0x2f5   :  { %v1570_v48 = vmul.f32 %v6284_v12, %v1410_v54 }
 0x2f6   :  { %v1665_v56 = vmax.f32 %v1633_v10, 0.0 }
 0x2f7   :  { %v1602_v7 = vmul.f32 %v1570_v48, %v7865_v36  ;;  %v6286_v46 = vpop.eup %6285 }
 0x2f8   :  { %v1682_v11 = vpack.c.bf16 %v1665_v56, %v1664_v58  ;;  %v1571_v14 = vmul.f32 %v6286_v46, %v1411_v41 }
 0x2f9   :  { %v1634_v35 = vadd.f32 %v1602_v7, %v7873_v61 }
 0x2fa   :  { %v1603_v45 = vmul.f32 %v1571_v14, %v7865_v36  ;;  %1964 = vmatmul.mubr.bf16.gmra.mxu1 %v1682_v11  ;;  %v8116_v36 = vrot.slane %v242_v62, %v8111_v38 }
 0x2fb   :  { %1973 = vmatprep.mubr.bf16.mxu1 %v10130_v27  ;;  %v1666_v52 = vmax.f32 %v1634_v35, 0.0 }
 0x2fc   :  { %v1635_v59 = vadd.f32 %v1603_v45, %v7873_v61 }
 0x2fe   :  { %v1667_v20 = vmax.f32 %v1635_v59, 0.0 }
 0x300   :  { %v1683_v42 = vpack.c.bf16 %v1667_v20, %v1666_v52 }
 0x302   :  { %1974 = vmatmul.mubr.bf16.gmra.mxu1 %v1683_v42 }
 0x34a   :  { %v1825_v21 = vpop.f32.mrf.mxu1 }
 0x34b   :  { %v1826_v61 = vadd.f32 %v1825_v21, %v8116_v36 }
 0x34c   :  { %v1827_v40 = vpop.f32.mrf.mxu1 }
 0x34d   :  { %v5502_v1 = vmul.f32 -1.442695, %v1826_v61  ;;  %v1828_v25 = vadd.f32 %v1827_v40, %v8119_v4 }
 0x34e   :  { %v1829_v51 = vpop.f32.mrf.mxu1 }
 0x34f   :  { %6287 = vpow2.f32 %v5502_v1  ;;  %v5503_v47 = vmul.f32 -1.442695, %v1828_v25  ;;  %v1830_v44 = vadd.f32 %v1829_v51, %v8116_v36  ;;  %v8137_v51 = vrot.slane %v240_v43, %v8111_v38 }
 0x350   :  { %v1831_v53 = vpop.f32.mrf.mxu1 }
 0x351   :  { %6289 = vpow2.f32 %v5503_v47  ;;  %v5504_v28 = vmul.f32 -1.442695, %v1830_v44  ;;  %v1832_v26 = vadd.f32 %v1831_v53, %v8119_v4 }
 0x352   :  { %v1835_v23 = vpop.f32.mrf.mxu1 }
 0x353   :  { %6291 = vpow2.f32 %v5504_v28  ;;  %v5505_v9 = vmul.f32 -1.442695, %v1832_v26  ;;  %v1836_v8 = vadd.f32 %v1835_v23, %v8116_v36  ;;  %v8141_v23 = vrot.slane %v240_v43, %v8113_v3 }
 0x354   :  { %v1837_v22 = vpop.f32.mrf.mxu1 }
 0x355   :  { %6293 = vpow2.f32 %v5505_v9  ;;  %v5506_v50 = vmul.f32 -1.442695, %v1836_v8  ;;  %v1838_v33 = vadd.f32 %v1837_v22, %v8119_v4 }
 0x356   :  { %v1839_v29 = vpop.f32.mrf.mxu1 }
 0x357   :  { %6295 = vpow2.f32 %v5506_v50  ;;  %v5507_v63 = vmul.f32 -1.442695, %v1838_v33  ;;  %v1840_v6 = vadd.f32 %v1839_v29, %v8116_v36 }
 0x358   :  { %v1841_v17 = vpop.f32.mrf.mxu1 }
 0x359   :  { %6297 = vpow2.f32 %v5507_v63  ;;  %v5508_v5 = vmul.f32 -1.442695, %v1840_v6  ;;  %v1842_v2 = vadd.f32 %v1841_v17, %v8119_v4 }
 0x35a   :  { %v1845_v49 = vpop.f32.mrf.mxu1 }
 0x35b   :  { %6299 = vpow2.f32 %v5508_v5  ;;  %v5509_v32 = vmul.f32 -1.442695, %v1842_v2  ;;  %v1846_v37 = vadd.f32 %v1845_v49, %v8116_v36 }
 0x35c   :  { %v6288_v13 = vpop.eup %6287  ;;  %v1847_v57 = vpop.f32.mrf.mxu1 }
 0x35d   :  { %v2176_v54 = vadd.f32 1.0, %v6288_v13  ;;  %6301 = vpow2.f32 %v5509_v32  ;;  %v5510_v24 = vmul.f32 -1.442695, %v1846_v37  ;;  %v1848_v30 = vadd.f32 %v1847_v57, %v8119_v4 }
 0x35e   :  { %v6290_v12 = vpop.eup %6289  ;;  %v1849_v10 = vpop.f32.mrf.mxu1 }
 0x35f   :  { %6303 = vrcp.f32 %v2176_v54  ;;  %v2177_v48 = vadd.f32 1.0, %v6290_v12  ;;  %v5511_v60 = vmul.f32 -1.442695, %v1848_v30  ;;  %v1850_v39 = vadd.f32 %v1849_v10, %v8116_v36 }
 0x360   :  { %v6292_v41 = vpop.eup %6291  ;;  %6305 = vpow2.f32 %v5510_v24  ;;  %v1851_v58 = vpop.f32.mrf.mxu1 }
 0x361   :  { %6307 = vrcp.f32 %v2177_v48  ;;  %v2178_v56 = vadd.f32 1.0, %v6292_v41  ;;  %v5512_v7 = vmul.f32 -1.442695, %v1850_v39  ;;  %v1852_v46 = vadd.f32 %v1851_v58, %v8119_v4 }
 0x362   :  { %v6294_v11 = vpop.eup %6293  ;;  %6309 = vpow2.f32 %v5511_v60  ;;  %v1855_v14 = vpop.f32.mrf.mxu1 }
 0x363   :  { %6311 = vrcp.f32 %v2178_v56  ;;  %v2179_v34 = vadd.f32 1.0, %v6294_v11  ;;  %v5513_v0 = vmul.f32 -1.442695, %v1852_v46  ;;  %v1856_v45 = vadd.f32 %v1855_v14, %v8116_v36  ;;  %v10133_v46 = vld [vmem:[#allocation27_spill] sm:$0xff] }
 0x364   :  { %v6296_v35 = vpop.eup %6295  ;;  %6313 = vpow2.f32 %v5512_v7  ;;  %v1857_v59 = vpop.f32.mrf.mxu1 }
 0x365   :  { %6315 = vrcp.f32 %v2179_v34  ;;  %v2180_v52 = vadd.f32 1.0, %v6296_v35  ;;  %v5514_v20 = vmul.f32 -1.442695, %v1856_v45  ;;  %v1858_v42 = vadd.f32 %v1857_v59, %v8119_v4 }
 0x366   :  { %v6298_v55 = vpop.eup %6297  ;;  %6317 = vpow2.f32 %v5513_v0  ;;  %v1859_v62 = vpop.f32.mrf.mxu1 }
 0x367   :  { %6319 = vrcp.f32 %v2180_v52  ;;  %v2181_v21 = vadd.f32 1.0, %v6298_v55  ;;  %v5515_v61 = vmul.f32 -1.442695, %v1858_v42  ;;  %v1860_v40 = vadd.f32 %v1859_v62, %v8116_v36 }
 0x368   :  { %v6300_v1 = vpop.eup %6299  ;;  %6321 = vpow2.f32 %v5514_v20  ;;  %v1861_v25 = vpop.f32.mrf.mxu1  ;;  %v10134_v20 = vld [vmem:[#allocation28_spill] sm:$0xff] }
 0x369   :  { %6323 = vrcp.f32 %v2181_v21  ;;  %v2182_v47 = vadd.f32 1.0, %v6300_v1  ;;  %v5516_v44 = vmul.f32 -1.442695, %v1860_v40  ;;  %v1862_v53 = vadd.f32 %v1861_v25, %v8119_v4 }
 0x36a   :  { %v6302_v28 = vpop.eup %6301  ;;  %6325 = vpow2.f32 %v5515_v61  ;;  %v1865_v26 = vpop.f32.mrf.mxu1 }
 0x36b   :  { %6327 = vrcp.f32 %v2182_v47  ;;  %v2183_v9 = vadd.f32 1.0, %v6302_v28  ;;  %v5517_v8 = vmul.f32 -1.442695, %v1862_v53  ;;  %v1866_v22 = vadd.f32 %v1865_v26, %v8116_v36  ;;  %v10135_v47 = vld [vmem:[#allocation29_spill] sm:$0xff] }
 0x36c   :  { %v6304_v50 = vpop.eup %6303  ;;  %6329 = vpow2.f32 %v5516_v44  ;;  %v1867_v33 = vpop.f32.mrf.mxu1 }
 0x36d   :  { %v6306_v29 = vpop.eup %6305  ;;  %6331 = vrcp.f32 %v2183_v9  ;;  %v5518_v63 = vmul.f32 -1.442695, %v1866_v22  ;;  %v1868_v6 = vadd.f32 %v1867_v33, %v8119_v4  ;;  %v2379_v17 = vmul.f32 %v6304_v50, %v8137_v51 }
 0x36e   :  { %v6308_v5 = vpop.eup %6307  ;;  %v2184_v2 = vadd.f32 1.0, %v6306_v29  ;;  %6333 = vpow2.f32 %v5517_v8  ;;  %v1869_v49 = vpop.f32.mrf.mxu1  ;;  %v10136_v8 = vld [vmem:[#allocation30_spill] sm:$0xff] }
 0x36f   :  { %v6310_v32 = vpop.eup %6309  ;;  %6335 = vpow2.f32 %v5518_v63  ;;  %v5519_v37 = vmul.f32 -1.442695, %v1868_v6  ;;  %v1870_v13 = vadd.f32 %v1869_v49, %v8116_v36  ;;  %v2380_v57 = vmul.f32 %v6308_v5, %v8141_v23 }
 0x370   :  { %v6312_v54 = vpop.eup %6311  ;;  %6337 = vrcp.f32 %v2184_v2  ;;  %v2185_v24 = vadd.f32 1.0, %v6310_v32  ;;  %v1871_v30 = vpop.f32.mrf.mxu1  ;;  %v2443_v12 = vadd.f32 1.0, %v2379_v17 }
 0x371   :  { %v6314_v10 = vpop.eup %6313  ;;  %6339 = vpow2.f32 %v5519_v37  ;;  %v5520_v48 = vmul.f32 -1.442695, %v1870_v13  ;;  %v1872_v60 = vadd.f32 %v1871_v30, %v8119_v4  ;;  %v2444_v39 = vadd.f32 1.0, %v2380_v57 }
 0x372   :  { %v6316_v41 = vpop.eup %6315  ;;  %6341 = vrcp.f32 %v2185_v24  ;;  %v2186_v58 = vadd.f32 1.0, %v6314_v10  ;;  %v1875_v56 = vpop.f32.mrf.mxu1  ;;  %v2381_v7 = vmul.f32 %v6312_v54, %v8137_v51  ;;  %v2507_v11 = vmul.f32 %v2443_v12, %v10133_v46 }
 0x373   :  { %v6318_v14 = vpop.eup %6317  ;;  %6343 = vpow2.f32 %v5520_v48  ;;  %v5521_v34 = vmul.f32 -1.442695, %v1872_v60  ;;  %v1876_v0 = vadd.f32 %v1875_v56, %v8116_v36  ;;  %v2382_v45 = vmul.f32 %v6316_v41, %v8141_v23 }
 0x374   :  { %v6320_v35 = vpop.eup %6319  ;;  %6345 = vrcp.f32 %v2186_v58  ;;  %v2187_v59 = vadd.f32 1.0, %v6318_v14  ;;  %v1877_v52 = vpop.f32.mrf.mxu1  ;;  %v2508_v42 = vmul.f32 %v2444_v39, %v10134_v20  ;;  %v2445_v43 = vadd.f32 1.0, %v2381_v7 }
 0x375   :  { %v6322_v55 = vpop.eup %6321  ;;  %6347 = vpow2.f32 %v5521_v34  ;;  %v5522_v62 = vmul.f32 -1.442695, %v1876_v0  ;;  %v1878_v21 = vadd.f32 %v1877_v52, %v8119_v4  ;;  %v2446_v61 = vadd.f32 1.0, %v2382_v45 }
 0x376   :  { %v6324_v40 = vpop.eup %6323  ;;  %6349 = vrcp.f32 %v2187_v59  ;;  %v2188_v1 = vadd.f32 1.0, %v6322_v55  ;;  %v1879_v25 = vpop.f32.mrf.mxu1  ;;  %v2509_v44 = vmul.f32 %v2445_v43, %v10135_v47  ;;  %v2383_v53 = vmul.f32 %v6320_v35, %v8137_v51 }
 0x377   :  { %v6326_v28 = vpop.eup %6325  ;;  %6351 = vpow2.f32 %v5522_v62  ;;  %v5523_v26 = vmul.f32 -1.442695, %v1878_v21  ;;  %v1880_v9 = vadd.f32 %v1879_v25, %v8116_v36  ;;  %v2510_v22 = vmul.f32 %v2446_v61, %v10136_v8 }
 0x378   :  { %v6328_v50 = vpop.eup %6327  ;;  %6353 = vrcp.f32 %v2188_v1  ;;  %v2189_v33 = vadd.f32 1.0, %v6326_v28  ;;  %v1881_v29 = vpop.f32.mrf.mxu1  ;;  %v2571_v63 = vpack.c.bf16 %v2509_v44, %v2507_v11  ;;  %v2384_v6 = vmul.f32 %v6324_v40, %v8141_v23 }
 0x379   :  { %v6330_v17 = vpop.eup %6329  ;;  %6355 = vpow2.f32 %v5523_v26  ;;  %v5524_v5 = vmul.f32 -1.442695, %v1880_v9  ;;  %v1882_v2 = vadd.f32 %v1881_v29, %v8119_v4  ;;  %v2572_v49 = vpack.c.bf16 %v2510_v22, %v2508_v42 }
 0x37a   :  { %v6332_v32 = vpop.eup %6331  ;;  %6357 = vrcp.f32 %v2189_v33  ;;  %v2190_v37 = vadd.f32 1.0, %v6330_v17  ;;  %v1885_v13 = vpop.f32.mrf.mxu1  ;;  %v2448_v57 = vadd.f32 1.0, %v2384_v6  ;;  %v2385_v54 = vmul.f32 %v6328_v50, %v8137_v51 }
 0x37b   :  { %v6334_v24 = vpop.eup %6333  ;;  %6359 = vpow2.f32 %v5524_v5  ;;  %v5525_v30 = vmul.f32 -1.442695, %v1882_v2  ;;  %v1886_v12 = vadd.f32 %v1885_v13, %v8116_v36  ;;  %2838 = vmatprep.mubr.bf16.mxu0 %v2572_v49  ;;  %v2386_v10 = vmul.f32 %v6332_v32, %v8141_v23 }
 0x37c   :  { %v6336_v48 = vpop.eup %6335  ;;  %6361 = vrcp.f32 %v2190_v37  ;;  %v2191_v60 = vadd.f32 1.0, %v6334_v24  ;;  %v1887_v39 = vpop.f32.mrf.mxu1  ;;  %2839 = vmatmul.mubr.bf16.vlgmr.msra.gmra.mxu0 %v2571_v63  ;;  %v2512_v41 = vmul.f32 %v2448_v57, %v7109_v16  ;;  %v2447_v58 = vadd.f32 1.0, %v2383_v53 }
 0x37d   :  { %v6338_v56 = vpop.eup %6337  ;;  %v2192_v7 = vadd.f32 1.0, %v6336_v48  ;;  %6363 = vpow2.f32 %v5525_v30  ;;  %v5526_v46 = vmul.f32 -1.442695, %v1886_v12  ;;  %v1888_v11 = vadd.f32 %v1887_v39, %v8119_v4  ;;  %v10138_v39 = vld [vmem:[#allocation31_spill] sm:$0xff] }
 0x37e   :  { %v6340_v14 = vpop.eup %6339  ;;  %6365 = vrcp.f32 %v2191_v60  ;;  %v1889_v34 = vpop.f32.mrf.mxu1  ;;  %v2450_v0 = vadd.f32 1.0, %v2386_v10  ;;  %v2449_v45 = vadd.f32 1.0, %v2385_v54  ;;  %v2511_v35 = vmul.f32 %v2447_v58, %v7107_v15  ;;  %v10137_v10 = vld [vmem:[#allocation33_spill] sm:$0xff] }
 0x37f   :  { %v6342_v59 = vpop.eup %6341  ;;  %6367 = vrcp.f32 %v2192_v7  ;;  %v2193_v52 = vadd.f32 1.0, %v6340_v14  ;;  %v5527_v20 = vmul.f32 -1.442695, %v1888_v11  ;;  %v1890_v16 = vadd.f32 %v1889_v34, %v8116_v36 }
 0x380   :  { %v6344_v42 = vpop.eup %6343  ;;  %6369 = vpow2.f32 %v5526_v46  ;;  %v1891_v43 = vpop.f32.mrf.mxu1  ;;  %v2514_v55 = vmul.f32 %v2450_v0, %v7113_v19  ;;  %v2513_v62 = vmul.f32 %v2449_v45, %v7111_v18  ;;  %v2388_v21 = vmul.f32 %v6342_v59, %v8141_v23  ;;  %v10139_v0 = vld [vmem:[#allocation32_spill] sm:$0xff] }
 0x381   :  { %v6346_v61 = vpop.eup %6345  ;;  %6371 = vrcp.f32 %v2193_v52  ;;  %v2194_v40 = vadd.f32 1.0, %v6344_v42  ;;  %v5528_v1 = vmul.f32 -1.442695, %v1890_v16  ;;  %v1892_v15 = vadd.f32 %v1891_v43, %v8119_v4 }
 0x382   :  { %v6348_v25 = vpop.eup %6347  ;;  %6373 = vpow2.f32 %v5527_v20  ;;  %v1895_v47 = vpop.f32.mrf.mxu1  ;;  %v2574_v44 = vpack.c.bf16 %v2514_v55, %v2512_v41  ;;  %v2573_v53 = vpack.c.bf16 %v2513_v62, %v2511_v35  ;;  %v2452_v28 = vadd.f32 1.0, %v2388_v21 }
 0x383   :  { %v6350_v26 = vpop.eup %6349  ;;  %6375 = vrcp.f32 %v2194_v40  ;;  %v2195_v9 = vadd.f32 1.0, %v6348_v25  ;;  %v5529_v19 = vmul.f32 -1.442695, %v1892_v15  ;;  %v1896_v18 = vadd.f32 %v1895_v47, %v8116_v36 }
 0x384   :  { %v6352_v8 = vpop.eup %6351  ;;  %6377 = vpow2.f32 %v5528_v1  ;;  %2848 = vmatprep.mubr.bf16.mxu0 %v2574_v44  ;;  %v1897_v22 = vpop.f32.mrf.mxu1  ;;  %v2390_v50 = vmul.f32 %v6350_v26, %v8141_v23  ;;  %v2516_v33 = vmul.f32 %v2452_v28, %v7129_v31  ;;  %v2387_v29 = vmul.f32 %v6338_v56, %v8137_v51  ;;  %v10140_v28 = vld [vmem:[#allocation35_spill] sm:$0xff] }
 0x385   :  { %v6354_v63 = vpop.eup %6353  ;;  %6379 = vrcp.f32 %v2195_v9  ;;  %v2196_v6 = vadd.f32 1.0, %v6352_v8  ;;  %v5530_v17 = vmul.f32 -1.442695, %v1896_v18  ;;  %v1898_v5 = vadd.f32 %v1897_v22, %v8119_v4  ;;  %2849 = vmatmul.mubr.bf16.gmra.mxu0 %v2573_v53 }
 0x386   :  { %v6356_v2 = vpop.eup %6355  ;;  %6381 = vpow2.f32 %v5529_v19  ;;  %v1899_v49 = vpop.f32.mrf.mxu1  ;;  %v2454_v32 = vadd.f32 1.0, %v2390_v50  ;;  %v2389_v37 = vmul.f32 %v6346_v61, %v8137_v51  ;;  %v2451_v13 = vadd.f32 1.0, %v2387_v29  ;;  %v10141_v29 = vld [vmem:[#allocation37_spill] sm:$0xff] }
 0x387   :  { %v6358_v57 = vpop.eup %6357  ;;  %6383 = vrcp.f32 %v2196_v6  ;;  %v2197_v54 = vadd.f32 1.0, %v6356_v2  ;;  %v5531_v31 = vmul.f32 -1.442695, %v1898_v5  ;;  %v1900_v24 = vadd.f32 %v1899_v49, %v8116_v36 }
 0x388   :  { %v6360_v30 = vpop.eup %6359  ;;  %6385 = vpow2.f32 %v5530_v17  ;;  %v1901_v12 = vpop.f32.mrf.mxu1  ;;  %v2518_v48 = vmul.f32 %v2454_v32, %v10137_v10  ;;  %v2453_v60 = vadd.f32 1.0, %v2389_v37  ;;  %v2515_v41 = vmul.f32 %v2451_v13, %v10138_v39  ;;  %v10143_v10 = vld [vmem:[#allocation36_spill] sm:$0xff] }
 0x389   :  { %v6362_v58 = vpop.eup %6361  ;;  %6387 = vrcp.f32 %v2197_v54  ;;  %v2198_v56 = vadd.f32 1.0, %v6360_v30  ;;  %v5532_v7 = vmul.f32 -1.442695, %v1900_v24  ;;  %v1902_v46 = vadd.f32 %v1901_v12, %v8119_v4  ;;  %v10142_v54 = vld [vmem:[#allocation34_spill] sm:$0xff] }
 0x38a   :  { %v6364_v11 = vpop.eup %6363  ;;  %6389 = vpow2.f32 %v5531_v31  ;;  %v1905_v14 = vpop.f32.mrf.mxu1  ;;  %v2576_v34 = vpack.c.bf16 %v2518_v48, %v2516_v33  ;;  %v2517_v45 = vmul.f32 %v2453_v60, %v10139_v0  ;;  %v2392_v35 = vmul.f32 %v6358_v57, %v8141_v23 }
 0x38b   :  { %v6366_v59 = vpop.eup %6365  ;;  %6391 = vrcp.f32 %v2198_v56  ;;  %v2199_v52 = vadd.f32 1.0, %v6364_v11  ;;  %v5533_v20 = vmul.f32 -1.442695, %v1902_v46  ;;  %v1906_v16 = vadd.f32 %v1905_v14, %v8116_v36 }
 0x38c   :  { %v8185_v42 = vpop.eup %6367  ;;  %6393 = vpow2.f32 %v5532_v7  ;;  %2858 = vmatprep.mubr.bf16.mxu0 %v2576_v34  ;;  %v1907_v43 = vpop.f32.mrf.mxu1  ;;  %v2575_v55 = vpack.c.bf16 %v2517_v45, %v2515_v41  ;;  %v2394_v62 = vmul.f32 %v6366_v59, %v8141_v23  ;;  %v2456_v21 = vadd.f32 1.0, %v2392_v35 }
 0x38d   :  { %v6370_v61 = vpop.eup %6369  ;;  %6395 = vrcp.f32 %v2199_v52  ;;  %v5534_v40 = vmul.f32 -1.442695, %v1906_v16  ;;  %v1908_v1 = vadd.f32 %v1907_v43, %v8119_v4  ;;  %v2391_v15 = vmul.f32 %v6354_v63, %v8137_v51 }
 0x38e   :  { %v6372_v25 = vpop.eup %6371  ;;  %v2200_v47 = vadd.f32 1.0, %v6370_v61  ;;  %6397 = vpow2.f32 %v5533_v20  ;;  %2859 = vmatmul.mubr.bf16.gmra.mxu0 %v2575_v55  ;;  %v1909_v44 = vpop.f32.mrf.mxu1  ;;  %v2458_v53 = vadd.f32 1.0, %v2394_v62  ;;  %v2520_v26 = vmul.f32 %v2456_v21, %v10140_v28  ;;  %v10144_v61 = vld [vmem:[#allocation39_spill] sm:$0xff] }
 0x38f   :  { %v6374_v9 = vpop.eup %6373  ;;  %6399 = vpow2.f32 %v5534_v40  ;;  %v5535_v19 = vmul.f32 -1.442695, %v1908_v1  ;;  %v1910_v18 = vadd.f32 %v1909_v44, %v8116_v36  ;;  %v2393_v8 = vmul.f32 %v6362_v58, %v8137_v51  ;;  %v10145_v1 = vld [vmem:[#allocation41_spill] sm:$0xff] }
 0x390   :  { %v6376_v22 = vpop.eup %6375  ;;  %6401 = vrcp.f32 %v2200_v47  ;;  %v2201_v50 = vadd.f32 1.0, %v6374_v9  ;;  %v1911_v33 = vpop.f32.mrf.mxu1  ;;  %v2522_v63 = vmul.f32 %v2458_v53, %v10141_v29  ;;  %v2455_v6 = vadd.f32 1.0, %v2391_v15 }
 0x391   :  { %v6378_v17 = vpop.eup %6377  ;;  %6403 = vpow2.f32 %v5535_v19  ;;  %v5536_v5 = vmul.f32 -1.442695, %v1910_v18  ;;  %v1912_v2 = vadd.f32 %v1911_v33, %v8119_v4  ;;  %v2457_v49 = vadd.f32 1.0, %v2393_v8 }
 0x392   :  { %v6380_v32 = vpop.eup %6379  ;;  %6405 = vrcp.f32 %v2201_v50  ;;  %v2202_v37 = vadd.f32 1.0, %v6378_v17  ;;  %v1915_v13 = vpop.f32.mrf.mxu1  ;;  %v2578_v57 = vpack.c.bf16 %v2522_v63, %v2520_v26  ;;  %v2519_v31 = vmul.f32 %v2455_v6, %v10142_v54  ;;  %v10146_v17 = vld [vmem:[#allocation38_spill] sm:$0xff] }
 0x393   :  { %v6382_v24 = vpop.eup %6381  ;;  %6407 = vpow2.f32 %v5536_v5  ;;  %v5537_v30 = vmul.f32 -1.442695, %v1912_v2  ;;  %v1916_v12 = vadd.f32 %v1915_v13, %v8116_v36  ;;  %v2521_v48 = vmul.f32 %v2457_v49, %v10143_v10 }
 0x394   :  { %v8198_v60 = vpop.eup %6383  ;;  %6409 = vrcp.f32 %v2202_v37  ;;  %v2203_v39 = vadd.f32 1.0, %v6382_v24  ;;  %2868 = vmatprep.mubr.bf16.mxu0 %v2578_v57  ;;  %v1917_v41 = vpop.f32.mrf.mxu1  ;;  %v2396_v58 = vmul.f32 %v6372_v25, %v8141_v23  ;;  %v2398_v56 = vmul.f32 %v6380_v32, %v8141_v23  ;;  %v10147_v57 = vld [vmem:[#allocation40_spill] sm:$0xff] }
 0x395   :  { %v6386_v7 = vpop.eup %6385  ;;  %6411 = vpow2.f32 %v5537_v30  ;;  %v5538_v46 = vmul.f32 -1.442695, %v1916_v12  ;;  %v1918_v11 = vadd.f32 %v1917_v41, %v8119_v4  ;;  %v2577_v14 = vpack.c.bf16 %v2521_v48, %v2519_v31 }
 0x396   :  { %v6388_v34 = vpop.eup %6387  ;;  %6413 = vrcp.f32 %v2203_v39  ;;  %v2204_v0 = vadd.f32 1.0, %v6386_v7  ;;  %v1919_v45 = vpop.f32.mrf.mxu1  ;;  %v2460_v35 = vadd.f32 1.0, %v2396_v58  ;;  %v2462_v59 = vadd.f32 1.0, %v2398_v56 }
 0x397   :  { %v6390_v52 = vpop.eup %6389  ;;  %6415 = vpow2.f32 %v5538_v46  ;;  %v5539_v20 = vmul.f32 -1.442695, %v1918_v11  ;;  %2869 = vmatmul.mubr.bf16.gmra.mxu0 %v2577_v14  ;;  %v1920_v16 = vadd.f32 %v1919_v45, %v8116_v36  ;;  %v2395_v43 = vmul.f32 %v8185_v42, %v8137_v51  ;;  %v10148_v46 = vld [vmem:[#allocation43_spill] sm:$0xff] }
 0x398   :  { %v6392_v55 = vpop.eup %6391  ;;  %6417 = vrcp.f32 %v2204_v0  ;;  %v2205_v62 = vadd.f32 1.0, %v6390_v52  ;;  %v1921_v21 = vpop.f32.mrf.mxu1  ;;  %v2524_v40 = vmul.f32 %v2460_v35, %v10144_v61  ;;  %v2526_v15 = vmul.f32 %v2462_v59, %v10145_v1  ;;  %v10149_v52 = vld [vmem:[#allocation45_spill] sm:$0xff] }
 0x399   :  { %v6394_v25 = vpop.eup %6393  ;;  %6419 = vpow2.f32 %v5539_v20  ;;  %v5540_v47 = vmul.f32 -1.442695, %v1920_v16  ;;  %v1922_v44 = vadd.f32 %v1921_v21, %v8119_v4  ;;  %v2397_v53 = vmul.f32 %v6376_v22, %v8137_v51 }
 0x39a   :  { %v6396_v28 = vpop.eup %6395  ;;  %6421 = vrcp.f32 %v2205_v62  ;;  %v2206_v26 = vadd.f32 1.0, %v6394_v25  ;;  %v1925_v9 = vpop.f32.mrf.mxu1  ;;  %v2580_v42 = vpack.c.bf16 %v2526_v15, %v2524_v40  ;;  %v2459_v19 = vadd.f32 1.0, %v2395_v43 }
 0x39b   :  { %v6398_v18 = vpop.eup %6397  ;;  %6423 = vpow2.f32 %v5540_v47  ;;  %v5541_v8 = vmul.f32 -1.442695, %v1922_v44  ;;  %v1926_v50 = vadd.f32 %v1925_v9, %v8116_v36  ;;  %v2461_v33 = vadd.f32 1.0, %v2397_v53  ;;  %v10150_v9 = vld [vmem:[#allocation42_spill] sm:$0xff] }
 0x39c   :  { %v6400_v29 = vpop.eup %6399  ;;  %6425 = vrcp.f32 %v2206_v26  ;;  %v2207_v63 = vadd.f32 1.0, %v6398_v18  ;;  %2878 = vmatprep.mubr.bf16.mxu0 %v2580_v42  ;;  %v1927_v6 = vpop.f32.mrf.mxu1  ;;  %v2523_v5 = vmul.f32 %v2459_v19, %v10146_v17  ;;  %v2400_v22 = vmul.f32 %v6388_v34, %v8141_v23  ;;  %v10151_v19 = vld [vmem:[#allocation44_spill] sm:$0xff] }
 0x39d   :  { %v8213_v2 = vpop.eup %6401  ;;  %v2208_v49 = vadd.f32 1.0, %v6400_v29  ;;  %6427 = vpow2.f32 %v5541_v8  ;;  %v5542_v32 = vmul.f32 -1.442695, %v1926_v50  ;;  %v1928_v37 = vadd.f32 %v1927_v6, %v8119_v4 }
 0x39e   :  { %v6404_v13 = vpop.eup %6403  ;;  %6429 = vrcp.f32 %v2207_v63  ;;  %v2525_v54 = vmul.f32 %v2461_v33, %v10147_v57  ;;  %v1929_v31 = vpop.f32.mrf.mxu1  ;;  %v2402_v24 = vmul.f32 %v6396_v28, %v8141_v23  ;;  %v2464_v30 = vadd.f32 1.0, %v2400_v22 }
 0x39f   :  { %v6406_v12 = vpop.eup %6405  ;;  %6431 = vrcp.f32 %v2208_v49  ;;  %v2209_v10 = vadd.f32 1.0, %v6404_v13  ;;  %v5543_v48 = vmul.f32 -1.442695, %v1928_v37  ;;  %v1930_v39 = vadd.f32 %v1929_v31, %v8116_v36 }
 0x3a0   :  { %v6408_v41 = vpop.eup %6407  ;;  %6433 = vpow2.f32 %v5542_v32  ;;  %v2579_v58 = vpack.c.bf16 %v2525_v54, %v2523_v5  ;;  %v1931_v56 = vpop.f32.mrf.mxu1  ;;  %v2466_v7 = vadd.f32 1.0, %v2402_v24  ;;  %v2528_v11 = vmul.f32 %v2464_v30, %v10148_v46  ;;  %v10153_v46 = vld [vmem:[#allocation49_spill] sm:$0xff] }
 0x3a1   :  { %v8220_v14 = vpop.eup %6409  ;;  %6435 = vrcp.f32 %v2209_v10  ;;  %v2210_v34 = vadd.f32 1.0, %v6408_v41  ;;  %v5544_v0 = vmul.f32 -1.442695, %v1930_v39  ;;  %v1932_v45 = vadd.f32 %v1931_v56, %v8119_v4 }
 0x3a2   :  { %v6412_v35 = vpop.eup %6411  ;;  %6437 = vpow2.f32 %v5543_v48  ;;  %2879 = vmatmul.mubr.bf16.gmra.mxu0 %v2579_v58  ;;  %v1935_v59 = vpop.f32.mrf.mxu1  ;;  %v2530_v20 = vmul.f32 %v2466_v7, %v10149_v52  ;;  %v2399_v16 = vmul.f32 %v8198_v60, %v8137_v51  ;;  %v2401_v43 = vmul.f32 %v6392_v55, %v8137_v51 }
 0x3a3   :  { %v6414_v62 = vpop.eup %6413  ;;  %6439 = vrcp.f32 %v2210_v34  ;;  %v2211_v21 = vadd.f32 1.0, %v6412_v35  ;;  %v5545_v61 = vmul.f32 -1.442695, %v1932_v45  ;;  %v1936_v40 = vadd.f32 %v1935_v59, %v8116_v36 }
 0x3a4   :  { %v6416_v1 = vpop.eup %6415  ;;  %6441 = vpow2.f32 %v5544_v0  ;;  %v2582_v15 = vpack.c.bf16 %v2530_v20, %v2528_v11  ;;  %v1937_v25 = vpop.f32.mrf.mxu1  ;;  %v2463_v47 = vadd.f32 1.0, %v2399_v16  ;;  %v2465_v44 = vadd.f32 1.0, %v2401_v43 }
 0x3a5   :  { %v8228_v53 = vpop.eup %6417  ;;  %6443 = vrcp.f32 %v2211_v21  ;;  %v2212_v28 = vadd.f32 1.0, %v6416_v1  ;;  %v5546_v26 = vmul.f32 -1.442695, %v1936_v40  ;;  %v1938_v60 = vadd.f32 %v1937_v25, %v8119_v4  ;;  %v10154_v1 = vld [vmem:[#allocation46_spill] sm:$0xff] }
 0x3a6   :  { %v6420_v55 = vpop.eup %6419  ;;  %6445 = vpow2.f32 %v5545_v61  ;;  %2888 = vmatprep.mubr.bf16.mxu0 %v2582_v15  ;;  %v2527_v42 = vmul.f32 %v2463_v47, %v10150_v9  ;;  %v2529_v18 = vmul.f32 %v2465_v44, %v10151_v19  ;;  %v1939_v8 = vpop.f32.mrf.mxu1  ;;  %v2404_v50 = vmul.f32 %v6406_v12, %v8141_v23  ;;  %v10152_v12 = vld [vmem:[#allocation47_spill] sm:$0xff]  ;;  %v10155_v44 = vld [vmem:[#allocation48_spill] sm:$0xff] }
 0x3a7   :  { %v6422_v33 = vpop.eup %6421  ;;  %6447 = vrcp.f32 %v2212_v28  ;;  %v2213_v29 = vadd.f32 1.0, %v6420_v55  ;;  %v5547_v63 = vmul.f32 -1.442695, %v1938_v60  ;;  %v1940_v6 = vadd.f32 %v1939_v8, %v8116_v36 }
 0x3a8   :  { %v6424_v17 = vpop.eup %6423  ;;  %6449 = vpow2.f32 %v5546_v26  ;;  %v2581_v5 = vpack.c.bf16 %v2529_v18, %v2527_v42  ;;  %v1941_v22 = vpop.f32.mrf.mxu1  ;;  %v2406_v49 = vmul.f32 %v6414_v62, %v8141_v23  ;;  %v2468_v32 = vadd.f32 1.0, %v2404_v50 }
 0x3a9   :  { %v8236_v37 = vpop.eup %6425  ;;  %6451 = vrcp.f32 %v2213_v29  ;;  %v2214_v13 = vadd.f32 1.0, %v6424_v17  ;;  %v5548_v57 = vmul.f32 -1.442695, %v1940_v6  ;;  %v1942_v54 = vadd.f32 %v1941_v22, %v8119_v4 }
 0x3aa   :  { %v6428_v31 = vpop.eup %6427  ;;  %6453 = vpow2.f32 %v5547_v63  ;;  %2889 = vmatmul.mubr.bf16.gmra.mxu0 %v2581_v5  ;;  %v1945_v24 = vpop.f32.mrf.mxu1  ;;  %v2470_v30 = vadd.f32 1.0, %v2406_v49  ;;  %v2532_v10 = vmul.f32 %v2468_v32, %v10152_v12  ;;  %v2403_v48 = vmul.f32 %v8213_v2, %v8137_v51  ;;  %v10156_v5 = vld [vmem:[#allocation51_spill] sm:$0xff] }
 0x3ab   :  { %v6430_v39 = vpop.eup %6429  ;;  %6455 = vrcp.f32 %v2214_v13  ;;  %v2215_v41 = vadd.f32 1.0, %v6428_v31  ;;  %v5549_v58 = vmul.f32 -1.442695, %v1942_v54  ;;  %v1946_v56 = vadd.f32 %v1945_v24, %v8116_v36  ;;  %v10157_v13 = vld [vmem:[#allocation53_spill] sm:$0xff] }
 0x3ac   :  { %v8243_v7 = vpop.eup %6431  ;;  %6457 = vpow2.f32 %v5548_v57  ;;  %v2534_v11 = vmul.f32 %v2470_v30, %v10153_v46  ;;  %v1947_v34 = vpop.f32.mrf.mxu1  ;;  %v2405_v0 = vmul.f32 %v8220_v14, %v8137_v51  ;;  %v2467_v45 = vadd.f32 1.0, %v2403_v48 }
 0x3ad   :  { %v6434_v35 = vpop.eup %6433  ;;  %6459 = vrcp.f32 %v2215_v41  ;;  %v5550_v59 = vmul.f32 -1.442695, %v1946_v56  ;;  %v1948_v2 = vadd.f32 %v1947_v34, %v8119_v4  ;;  %v2408_v52 = vmul.f32 %v6422_v33, %v8141_v23 }
 0x3ae   :  { %v8250_v20 = vpop.eup %6435  ;;  %v2216_v16 = vadd.f32 1.0, %v6434_v35  ;;  %6461 = vpow2.f32 %v5549_v58  ;;  %v2584_v43 = vpack.c.bf16 %v2534_v11, %v2532_v10  ;;  %v2469_v62 = vadd.f32 1.0, %v2405_v0  ;;  %v1949_v21 = vpop.f32.mrf.mxu1  ;;  %v10158_v35 = vld [vmem:[#allocation50_spill] sm:$0xff] }
 0x3af   :  { %v6438_v61 = vpop.eup %6437  ;;  %6463 = vpow2.f32 %v5550_v59  ;;  %v5551_v40 = vmul.f32 -1.442695, %v1948_v2  ;;  %v2531_v14 = vmul.f32 %v2467_v45, %v10154_v1  ;;  %v1950_v15 = vadd.f32 %v1949_v21, %v8116_v36 }
 0x3b0   :  { %v8254_v25 = vpop.eup %6439  ;;  %6465 = vrcp.f32 %v2216_v16  ;;  %v2217_v47 = vadd.f32 1.0, %v6438_v61  ;;  %2898 = vmatprep.mubr.bf16.mxu0 %v2584_v43  ;;  %v2533_v28 = vmul.f32 %v2469_v62, %v10155_v44  ;;  %v1951_v26 = vpop.f32.mrf.mxu1  ;;  %v2410_v60 = vmul.f32 %v6430_v39, %v8141_v23  ;;  %v10159_v16 = vld [vmem:[#allocation52_spill] sm:$0xff] }
 0x3b1   :  { %v6442_v55 = vpop.eup %6441  ;;  %6467 = vpow2.f32 %v5551_v40  ;;  %v5552_v9 = vmul.f32 -1.442695, %v1950_v15  ;;  %v1952_v42 = vadd.f32 %v1951_v26, %v8119_v4  ;;  %v2472_v19 = vadd.f32 1.0, %v2408_v52 }
 0x3b2   :  { %v6444_v18 = vpop.eup %6443  ;;  %6469 = vrcp.f32 %v2217_v47  ;;  %v2218_v8 = vadd.f32 1.0, %v6442_v55  ;;  %v2583_v50 = vpack.c.bf16 %v2533_v28, %v2531_v14  ;;  %v1955_v33 = vpop.f32.mrf.mxu1  ;;  %v2474_v29 = vadd.f32 1.0, %v2410_v60 }
 0x3b3   :  { %v6446_v63 = vpop.eup %6445  ;;  %6471 = vpow2.f32 %v5552_v9  ;;  %v5553_v6 = vmul.f32 -1.442695, %v1952_v42  ;;  %v1956_v17 = vadd.f32 %v1955_v33, %v8116_v36  ;;  %v2536_v22 = vmul.f32 %v2472_v19, %v10156_v5  ;;  %v10160_v9 = vld [vmem:[#allocation55_spill] sm:$0xff] }
 0x3b4   :  { %v8261_v49 = vpop.eup %6447  ;;  %6473 = vrcp.f32 %v2218_v8  ;;  %v2219_v32 = vadd.f32 1.0, %v6446_v63  ;;  %2899 = vmatmul.mubr.bf16.gmra.mxu0 %v2583_v50  ;;  %v2538_v57 = vmul.f32 %v2474_v29, %v10157_v13  ;;  %v1957_v54 = vpop.f32.mrf.mxu1  ;;  %v2407_v31 = vmul.f32 %v8228_v53, %v8137_v51  ;;  %v10161_v63 = vld [vmem:[#allocation57_spill] sm:$0xff] }
 0x3b5   :  { %v6450_v24 = vpop.eup %6449  ;;  %6475 = vpow2.f32 %v5553_v6  ;;  %v5554_v30 = vmul.f32 -1.442695, %v1956_v17  ;;  %v1958_v12 = vadd.f32 %v1957_v54, %v8119_v4  ;;  %v2409_v10 = vmul.f32 %v8236_v37, %v8137_v51 }
 0x3b6   :  { %v8269_v48 = vpop.eup %6451  ;;  %6477 = vrcp.f32 %v2219_v32  ;;  %v2220_v39 = vadd.f32 1.0, %v6450_v24  ;;  %v2586_v41 = vpack.c.bf16 %v2538_v57, %v2536_v22  ;;  %v2471_v58 = vadd.f32 1.0, %v2407_v31  ;;  %v1959_v56 = vpop.f32.mrf.mxu1 }
 0x3b7   :  { %v6454_v46 = vpop.eup %6453  ;;  %6479 = vpow2.f32 %v5554_v30  ;;  %v5555_v11 = vmul.f32 -1.442695, %v1958_v12  ;;  %v2473_v34 = vadd.f32 1.0, %v2409_v10  ;;  %v1960_v53 = vadd.f32 %v1959_v56, %v8116_v36  ;;  %v10162_v56 = vld [vmem:[#allocation54_spill] sm:$0xff] }
 0x3b8   :  { %v8272_v0 = vpop.eup %6455  ;;  %6481 = vrcp.f32 %v2220_v39  ;;  %v2221_v45 = vadd.f32 1.0, %v6454_v46  ;;  %2908 = vmatprep.mubr.bf16.mxu0 %v2586_v41  ;;  %v2535_v37 = vmul.f32 %v2471_v58, %v10158_v35  ;;  %v1961_v59 = vpop.f32.mrf.mxu1  ;;  %v2412_v2 = vmul.f32 %v8250_v20, %v8141_v23 }
 0x3b9   :  { %v6458_v52 = vpop.eup %6457  ;;  %6483 = vpow2.f32 %v5555_v11  ;;  %v2537_v43 = vmul.f32 %v2473_v34, %v10159_v16  ;;  %v5556_v62 = vmul.f32 -1.442695, %v1960_v53  ;;  %v1962_v21 = vadd.f32 %v1961_v59, %v8119_v4  ;;  %v10163_v11 = vld [vmem:[#allocation56_spill] sm:$0xff] }
 0x3ba   :  { %v6460_v61 = vpop.eup %6459  ;;  %6485 = vrcp.f32 %v2221_v45  ;;  %v2222_v40 = vadd.f32 1.0, %v6458_v52  ;;  %v1965_v1 = vpop.f32.mrf.mxu1  ;;  %v2414_v14 = vmul.f32 %v6444_v18, %v8141_v23  ;;  %v2476_v15 = vadd.f32 1.0, %v2412_v2 }
 0x3bb   :  { %v6462_v47 = vpop.eup %6461  ;;  %v2585_v44 = vpack.c.bf16 %v2537_v43, %v2535_v37  ;;  %6487 = vpow2.f32 %v5556_v62  ;;  %v5557_v28 = vmul.f32 -1.442695, %v1962_v21  ;;  %v1966_v20 = vadd.f32 %v1965_v1, %v8116_v36 }
 0x3bc   :  { %v6464_v26 = vpop.eup %6463  ;;  %6489 = vrcp.f32 %v2222_v40  ;;  %v2223_v60 = vadd.f32 1.0, %v6462_v47  ;;  %v2478_v55 = vadd.f32 1.0, %v2414_v14  ;;  %v2540_v42 = vmul.f32 %v2476_v15, %v10160_v9  ;;  %v1967_v19 = vpop.f32.mrf.mxu1 }
 0x3bd   :  { %v8282_v8 = vpop.eup %6465  ;;  %v2224_v50 = vadd.f32 1.0, %v6464_v26  ;;  %2909 = vmatmul.mubr.bf16.gmra.mxu0 %v2585_v44  ;;  %6491 = vpow2.f32 %v5557_v28  ;;  %v5558_v18 = vmul.f32 -1.442695, %v1966_v20  ;;  %v1968_v33 = vadd.f32 %v1967_v19, %v8119_v4  ;;  %v10164_v26 = vld [vmem:[#allocation59_spill] sm:$0xff] }
 0x3be   :  { %v6468_v29 = vpop.eup %6467  ;;  %6493 = vrcp.f32 %v2223_v60  ;;  %v2542_v6 = vmul.f32 %v2478_v55, %v10161_v63  ;;  %v2411_v17 = vmul.f32 %v8243_v7, %v8137_v51  ;;  %v2413_v5 = vmul.f32 %v8254_v25, %v8137_v51  ;;  %v1969_v22 = vpop.f32.mrf.mxu1 }
 0x3bf   :  { %v8290_v32 = vpop.eup %6469  ;;  %6495 = vrcp.f32 %v2224_v50  ;;  %v2225_v13 = vadd.f32 1.0, %v6468_v29  ;;  %v5559_v57 = vmul.f32 -1.442695, %v1968_v33  ;;  %v1970_v54 = vadd.f32 %v1969_v22, %v8116_v36 }
 0x3c0   :  { %v6472_v31 = vpop.eup %6471  ;;  %6497 = vpow2.f32 %v5558_v18  ;;  %v2588_v24 = vpack.c.bf16 %v2542_v6, %v2540_v42  ;;  %v2475_v30 = vadd.f32 1.0, %v2411_v17  ;;  %v2477_v12 = vadd.f32 1.0, %v2413_v5  ;;  %v1971_v10 = vpop.f32.mrf.mxu1  ;;  %v10165_v42 = vld [vmem:[#allocation61_spill] sm:$0xff] }
 0x3c1   :  { %v8293_v39 = vpop.eup %6473  ;;  %6499 = vrcp.f32 %v2225_v13  ;;  %v2226_v7 = vadd.f32 1.0, %v6472_v31  ;;  %v5560_v41 = vmul.f32 -1.442695, %v1970_v54  ;;  %v1972_v25 = vadd.f32 %v1971_v10, %v8119_v4  ;;  %v10166_v54 = vld [vmem:[#allocation58_spill] sm:$0xff] }
 0x3c2   :  { %v6476_v58 = vpop.eup %6475  ;;  %2918 = vmatprep.mubr.bf16.mxu0 %v2588_v24  ;;  %6501 = vpow2.f32 %v5559_v57  ;;  %v2539_v46 = vmul.f32 %v2475_v30, %v10162_v56  ;;  %v2541_v34 = vmul.f32 %v2477_v12, %v10163_v11  ;;  %v1975_v53 = vpop.f32.mrf.mxu1  ;;  %v2416_v45 = vmul.f32 %v8269_v48, %v8141_v23  ;;  %v10167_v24 = vld [vmem:[#allocation60_spill] sm:$0xff] }
 0x3c3   :  { %v6478_v35 = vpop.eup %6477  ;;  %6503 = vrcp.f32 %v2226_v7  ;;  %v2227_v37 = vadd.f32 1.0, %v6476_v58  ;;  %v5561_v59 = vmul.f32 -1.442695, %v1972_v25  ;;  %v1976_v2 = vadd.f32 %v1975_v53, %v8116_v36 }
 0x3c4   :  { %v6480_v52 = vpop.eup %6479  ;;  %v2587_v16 = vpack.c.bf16 %v2541_v34, %v2539_v46  ;;  %6505 = vpow2.f32 %v5560_v41  ;;  %v2418_v43 = vmul.f32 %v6460_v61, %v8141_v23  ;;  %v2480_v62 = vadd.f32 1.0, %v2416_v45  ;;  %v1977_v21 = vpop.f32.mrf.mxu1 }
 0x3c5   :  { %v8302_v40 = vpop.eup %6481  ;;  %6507 = vrcp.f32 %v2227_v37  ;;  %v5562_v1 = vmul.f32 -1.442695, %v1976_v2  ;;  %v1978_v14 = vadd.f32 %v1977_v21, %v8119_v4  ;;  %v2415_v47 = vmul.f32 %v8261_v49, %v8137_v51  ;;  %v10168_v2 = vld [vmem:[#allocation63_spill] sm:$0xff] }
 0x3c6   :  { %v6484_v48 = vpop.eup %6483  ;;  %2919 = vmatmul.mubr.bf16.gmra.mxu0 %v2587_v16  ;;  %6509 = vpow2.f32 %v5561_v59  ;;  %v2482_v15 = vadd.f32 1.0, %v2418_v43  ;;  %v1979_v44 = vpop.f32.mrf.mxu1  ;;  %v2544_v61 = vmul.f32 %v2480_v62, %v10164_v26  ;;  %v2417_v55 = vmul.f32 %v8272_v0, %v8137_v51  ;;  %v10169_v16 = vld [vmem:[#allocation65_spill] sm:$0xff]  ;;  %v10170_v62 = vld [vmem:[#allocation64_spill] sm:$0xff] }
 0x3c7   :  { %v6486_v28 = vpop.eup %6485  ;;  %v2229_v20 = vadd.f32 1.0, %v6484_v48  ;;  %v5563_v60 = vmul.f32 -1.442695, %v1978_v14  ;;  %6511 = vpow2.f32 %v5562_v1  ;;  %v2479_v50 = vadd.f32 1.0, %v2415_v47  ;;  %v10173_v26 = vld [vmem:[#allocation69_spill] sm:$0xff] }
 0x3c8   :  { %v6488_v9 = vpop.eup %6487  ;;  %v2546_v19 = vmul.f32 %v2482_v15, %v10165_v42  ;;  %v1980_v18 = vadd.f32 %v1979_v44, %v8116_v36  ;;  %v1981_v33 = vpop.f32.mrf.mxu1  ;;  %v2228_v63 = vadd.f32 1.0, %v6480_v52  ;;  %v2481_v49 = vadd.f32 1.0, %v2417_v55  ;;  %v10171_v15 = vld [vmem:[#allocation62_spill] sm:$0xff]  ;;  %v10172_v44 = vld [vmem:[#allocation67_spill] sm:$0xff] }
 0x3c9   :  { %v6490_v29 = vpop.eup %6489  ;;  %6513 = vrcp.f32 %v2229_v20  ;;  %v1982_v6 = vadd.f32 %v1981_v33, %v8119_v4  ;;  %v2230_v5 = vadd.f32 1.0, %v6488_v9  ;;  %v2543_v31 = vmul.f32 %v2479_v50, %v10166_v54 }
 0x3ca   :  { %v6492_v17 = vpop.eup %6491  ;;  %v2590_v22 = vpack.c.bf16 %v2546_v19, %v2544_v61  ;;  %6515 = vpow2.f32 %v5563_v60  ;;  %v5564_v13 = vmul.f32 -1.442695, %v1980_v18  ;;  %v2545_v30 = vmul.f32 %v2481_v49, %v10167_v24 }
 0x3cb   :  { %v6494_v0 = vpop.eup %6493  ;;  %v2231_v57 = vadd.f32 1.0, %v6492_v17  ;;  %v5565_v12 = vmul.f32 -1.442695, %v1982_v6  ;;  %v2420_v10 = vmul.f32 %v8290_v32, %v8141_v23  ;;  %v2422_v4 = vmul.f32 %v6478_v35, %v8141_v23 }
 0x3cc   :  { %v8315_v36 = vpop.eup %6495  ;;  %2928 = vmatprep.mubr.bf16.mxu0 %v2590_v22  ;;  %6517 = vpow2.f32 %v5564_v13  ;;  %v2419_v7 = vmul.f32 %v8282_v8, %v8137_v51  ;;  %v2589_v25 = vpack.c.bf16 %v2545_v30, %v2543_v31  ;;  %v2421_v58 = vmul.f32 %v8293_v39, %v8137_v51  ;;  %v10175_v31 = vld [vmem:[#allocation68_spill] sm:$0xff] }
 0x3cd   :  { %v6498_v41 = vpop.eup %6497  ;;  %6519 = vrcp.f32 %v2231_v57  ;;  %v2424_v56 = vmul.f32 %v6486_v28, %v8141_v23  ;;  %v2484_v11 = vadd.f32 1.0, %v2420_v10  ;;  %v2486_v34 = vadd.f32 1.0, %v2422_v4  ;;  %v10176_v10 = vld [vmem:[#allocation71_spill] sm:$0xff] }
 0x3ce   :  { %v6500_v46 = vpop.eup %6499  ;;  %6521 = vpow2.f32 %v5565_v12  ;;  %2929 = vmatmul.mubr.bf16.gmra.mxu0 %v2589_v25  ;;  %v2483_v32 = vadd.f32 1.0, %v2419_v7  ;;  %v2485_v45 = vadd.f32 1.0, %v2421_v58  ;;  %v2426_v35 = vmul.f32 %v6494_v0, %v8141_v23  ;;  %v10174_v0 = vld [vmem:[#allocation73_spill] sm:$0xff] }
 0x3cf   :  { %v6502_v53 = vpop.eup %6501  ;;  %v2488_v37 = vadd.f32 1.0, %v2424_v56  ;;  %6523 = vrcp.f32 %v2228_v63  ;;  %v2548_v52 = vmul.f32 %v2484_v11, %v10168_v2  ;;  %v2550_v39 = vmul.f32 %v2486_v34, %v10169_v16 }
 0x3d0   :  { %v6504_v8 = vpop.eup %6503  ;;  %v2233_v59 = vadd.f32 1.0, %v6502_v53  ;;  %6525 = vrcp.f32 %v2230_v5  ;;  %v2549_v21 = vmul.f32 %v2485_v45, %v10170_v62  ;;  %v2490_v1 = vadd.f32 1.0, %v2426_v35 }
 0x3d1   :  { %v6506_v43 = vpop.eup %6505  ;;  %v2592_v48 = vpack.c.bf16 %v2550_v39, %v2548_v52  ;;  %v2547_v47 = vmul.f32 %v2483_v32, %v10171_v15  ;;  %v2552_v28 = vmul.f32 %v2488_v37, %v10172_v44  ;;  %v2423_v60 = vmul.f32 %v8302_v40, %v8137_v51  ;;  %v10178_v39 = vld [vmem:[#allocation77_spill] sm:$0xff] }
 0x3d2   :  { %v6508_v14 = vpop.eup %6507  ;;  %6527 = vrcp.f32 %v2233_v59  ;;  %v2554_v61 = vmul.f32 %v2490_v1, %v10173_v26  ;;  %v2425_v55 = vmul.f32 %v6490_v29, %v8137_v51  ;;  %v2428_v9 = vmul.f32 %v6500_v46, %v8141_v23  ;;  %v10180_v1 = vld [vmem:[#allocation75_spill] sm:$0xff] }
 0x3d3   :  { %v6510_v20 = vpop.eup %6509  ;;  %2938 = vmatprep.mubr.bf16.mxu0 %v2592_v48  ;;  %v2430_v19 = vmul.f32 %v6508_v14, %v8141_v23  ;;  %v2234_v18 = vadd.f32 1.0, %v6506_v43  ;;  %v2591_v33 = vpack.c.bf16 %v2549_v21, %v2547_v47  ;;  %v2232_v13 = vadd.f32 1.0, %v6498_v41  ;;  %v10177_v41 = vld [vmem:[#allocation66_spill] sm:$0xff] }
 0x3d4   :  { %v2235_v42 = vadd.f32 1.0, %v6510_v20  ;;  %v6512_v50 = vpop.eup %6511  ;;  %v2594_v63 = vpack.c.bf16 %v2554_v61, %v2552_v28  ;;  %v2489_v49 = vadd.f32 1.0, %v2425_v55  ;;  %v2492_v17 = vadd.f32 1.0, %v2428_v9  ;;  %v10181_v47 = vld [vmem:[#allocation70_spill] sm:$0xff] }
 0x3d5   :  { %v2494_v5 = vadd.f32 1.0, %v2430_v19  ;;  %v2487_v40 = vadd.f32 1.0, %v2423_v60  ;;  %v2429_v30 = vmul.f32 %v6504_v8, %v8137_v51  ;;  %v2427_v56 = vmul.f32 %v8315_v36, %v8137_v51  ;;  %v10179_v36 = vld [vmem:[#allocation72_spill] sm:$0xff] }
 0x3d6   :  { %v6514_v6 = vpop.eup %6513  ;;  %6529 = vrcp.f32 %v2235_v42  ;;  %2939 = vmatmul.mubr.bf16.gmra.mxu0 %v2591_v33  ;;  %v2553_v24 = vmul.f32 %v2489_v49, %v10175_v31  ;;  %v2556_v4 = vmul.f32 %v2492_v17, %v10176_v10  ;;  %v2236_v52 = vadd.f32 1.0, %v6512_v50  ;;  %v10182_v33 = vld [vmem:[#allocation81_spill] sm:$0xff]  ;;  %v10183_v49 = vld [vmem:[#allocation76_spill] sm:$0xff] }
 0x3d7   :  { %v6516_v22 = vpop.eup %6515  ;;  %2948 = vmatprep.mubr.bf16.mxu0 %v2594_v63  ;;  %v2558_v57 = vmul.f32 %v2494_v5, %v10174_v0  ;;  %6531 = vrcp.f32 %v2234_v18  ;;  %v2432_v7 = vmul.f32 %v6514_v6, %v8141_v23  ;;  %v2551_v58 = vmul.f32 %v2487_v40, %v10177_v41  ;;  %v10184_v5 = vld [vmem:[#allocation79_spill] sm:$0xff]  ;;  %v10186_v41 = vld [vmem:[#allocation85_spill] sm:$0xff] }
 0x3d8   :  { %v2237_v29 = vadd.f32 1.0, %v6516_v22  ;;  %v2493_v35 = vadd.f32 1.0, %v2429_v30  ;;  %v2491_v16 = vadd.f32 1.0, %v2427_v56  ;;  %v10187_v56 = vld [vmem:[#allocation80_spill] sm:$0xff] }
 0x3d9   :  { %v6518_v54 = vpop.eup %6517  ;;  %v2596_v34 = vpack.c.bf16 %v2558_v57, %v2556_v4  ;;  %v2593_v45 = vpack.c.bf16 %v2553_v24, %v2551_v58  ;;  %v2496_v59 = vadd.f32 1.0, %v2432_v7 }
 0x3da   :  { %v6520_v12 = vpop.eup %6519  ;;  %6533 = vrcp.f32 %v2237_v29  ;;  %v2238_v32 = vadd.f32 1.0, %v6518_v54  ;;  %v2557_v62 = vmul.f32 %v2493_v35, %v10179_v36  ;;  %v2555_v44 = vmul.f32 %v2491_v16, %v10181_v47  ;;  %v10185_v29 = vld [vmem:[#allocation74_spill] sm:$0xff]  ;;  %v244_v47 = vld [vmem:[#allocation13 + $0x2] ss:$8 sm:$0x3] }
 0x3db   :  { %v6522_v25 = vpop.eup %6521  ;;  %6535 = vrcp.f32 %v2232_v13  ;;  %v2434_v46 = vmul.f32 %v6520_v12, %v8141_v23  ;;  %v2560_v14 = vmul.f32 %v2496_v59, %v10180_v1  ;;  %v10191_v16 = vld [vmem:[#allocation82_spill] sm:$0xff]  ;;  %v6123_v1 = vld [vmem:[#allocation10 + $0x68] sm:$0xff]  }
 0x3dc   :  { %v2239_v11 = vadd.f32 1.0, %v6522_v25  ;;  %v6524_v53 = vpop.eup %6523  ;;  %v2595_v61 = vpack.c.bf16 %v2557_v62, %v2555_v44  ;;  %v6119_v36 = vld [vmem:[#allocation10 + $0x78] sm:$0xff]   ;;  %v8372_v44 = vrot.slane %v244_v47, %v8111_v38 }
 0x3dd   :  { %v2498_v37 = vadd.f32 1.0, %v2434_v46  ;;  %v6526_v8 = vpop.eup %6525  ;;  %v2431_v28 = vmul.f32 %v6524_v53, %v8137_v51  ;;  %5885 = vmatprep.subr.bf16.mxu1 %v6119_v36  ;;  %v6120_v62 = vld [vmem:[#allocation10 + $0x38] sm:$0xff]  }
 0x3de   :  { %6537 = vrcp.f32 %v2239_v11  ;;  %2949 = vmatmul.mubr.bf16.gmra.mxu0 %v2593_v45  ;;  %v2433_v21 = vmul.f32 %v6526_v8, %v8137_v51  ;;  %5886 = vmatpush3.bf16.msra.mxu1 %v6120_v62  ;;  %v6131_v62 = vld [vmem:[#allocation10 + $0x48] sm:$0xff]  }
 0x3df   :  { %v6528_v2 = vpop.eup %6527  ;;  %2958 = vmatprep.mubr.bf16.mxu0 %v2596_v34  ;;  %v2562_v43 = vmul.f32 %v2498_v37, %v10178_v39  ;;  %6539 = vrcp.f32 %v2238_v32  ;;  %v2495_v50 = vadd.f32 1.0, %v2431_v28  ;;  %v10188_v34 = vld [vmem:[#allocation83_spill] sm:$0xff]  ;;  %v10189_v32 = vld [vmem:[#allocation78_spill] sm:$0xff]  ;;  %v8375_v28 = vrot.slane %v244_v47, %v8113_v3 }
 0x3e0   :  { %v2436_v48 = vmul.f32 %v6528_v2, %v8141_v23  ;;  %6541 = vrcp.f32 %v2236_v52  ;;  %v2497_v60 = vadd.f32 1.0, %v2433_v21  ;;  %v10190_v2 = vld [vmem:[#allocation84_spill] sm:$0xff]  ;;  %v6121_v21 = vld [vmem:[#allocation10 + $0x70] sm:$0xff]  }
 0x3e1   :  { %v2598_v20 = vpack.c.bf16 %v2562_v43, %v2560_v14  ;;  %v2559_v0 = vmul.f32 %v2495_v50, %v10185_v29  ;;  %5887 = vmatprep.subr.bf16.mxu1 %v6121_v21  ;;  %v6124_v14 = vld [vmem:[#allocation10 + $0x28] sm:$0xff]  }
 0x3e2   :  { %v2500_v9 = vadd.f32 1.0, %v2436_v48  ;;  %v2561_v6 = vmul.f32 %v2497_v60, %v10183_v49  ;;  %v6125_v48 = vld [vmem:[#allocation10 + $0x60] sm:$0xff]   ;;  %v6132_v21 = vld [vmem:[#allocation10 + $0x8] sm:$0xff]  }
 0x3e3   :  { %v6530_v15 = vpop.eup %6529 }
 0x3e4   :  { %v2438_v26 = vmul.f32 %v6530_v15, %v8141_v23  ;;  %v6532_v55 = vpop.eup %6531  ;;  %v2564_v22 = vmul.f32 %v2500_v9, %v10184_v5  ;;  %v2597_v24 = vpack.c.bf16 %v2561_v6, %v2559_v0  ;;  %v6126_v15 = vld [vmem:[#allocation10 + $0x20] sm:$0xff]   ;;  %v6127_v9 = vld [vmem:[#allocation10 + $0x58] sm:$0xff]  }
 0x3e5   :  { %v2437_v17 = vmul.f32 %v6532_v55, %v8137_v51 }
 0x3e6   :  { %v2502_v42 = vadd.f32 1.0, %v2438_v26  ;;  %2959 = vmatmul.mubr.bf16.gmra.mxu0 %v2595_v61 }
 0x3e7   :  { %v6534_v19 = vpop.eup %6533  ;;  %2968 = vmatprep.mubr.bf16.mxu0 %v2598_v20  ;;  %v2501_v30 = vadd.f32 1.0, %v2437_v17 }
 0x3e8   :  { %v6536_v18 = vpop.eup %6535  ;;  %v2566_v63 = vmul.f32 %v2502_v42, %v10182_v33  ;;  %v2440_v13 = vmul.f32 %v6534_v19, %v8141_v23 }
 0x3e9   :  { %v2435_v57 = vmul.f32 %v6536_v18, %v8137_v51  ;;  %v2565_v46 = vmul.f32 %v2501_v30, %v10187_v56  ;;  %v6128_v18 = vld [vmem:[#allocation10 + $0x18] sm:$0xff]   ;;  %v6129_v30 = vld [vmem:[#allocation10 + $0x50] sm:$0xff]  }
 0x3ea   :  { %v2600_v54 = vpack.c.bf16 %v2566_v63, %v2564_v22  ;;  %v2504_v10 = vadd.f32 1.0, %v2440_v13 }
 0x3eb   :  { %v6538_v40 = vpop.eup %6537  ;;  %v2499_v7 = vadd.f32 1.0, %v2435_v57 }
 0x3ec   :  { %v2442_v31 = vmul.f32 %v6538_v40, %v8141_v23  ;;  %v6540_v12 = vpop.eup %6539  ;;  %v2568_v53 = vmul.f32 %v2504_v10, %v10188_v34 }
 0x3ed   :  { %v6542_v25 = vpop.eup %6541  ;;  %v2441_v11 = vmul.f32 %v6540_v12, %v8137_v51  ;;  %v2563_v45 = vmul.f32 %v2499_v7, %v10189_v32 }
 0x3ee   :  { %v2506_v4 = vadd.f32 1.0, %v2442_v31  ;;  %2969 = vmatmul.mubr.bf16.gmra.mxu0 %v2597_v24  ;;  %v2439_v23 = vmul.f32 %v6542_v25, %v8137_v51  ;;  %v6122_v51 = vld [vmem:[#allocation10 + $0x30] sm:$0xff]  }
 0x3ef   :  { %2978 = vmatprep.mubr.bf16.mxu0 %v2600_v54  ;;  %v2599_v37 = vpack.c.bf16 %v2565_v46, %v2563_v45  ;;  %v2505_v8 = vadd.f32 1.0, %v2441_v11  ;;  %5888 = vmatpush3.bf16.msra.mxu1 %v6122_v51  ;;  %v6130_v46 = vld [vmem:[#allocation10 + $0x10] sm:$0xff]  }
 0x3f0   :  { %v2570_v58 = vmul.f32 %v2506_v4, %v10186_v41  ;;  %v2503_v59 = vadd.f32 1.0, %v2439_v23  ;;  %5889 = vmatprep.subr.bf16.mxu1 %v6123_v1 }
 0x3f1   :  { %v2569_v52 = vmul.f32 %v2505_v8, %v10190_v2 }
 0x3f2   :  { %v2602_v35 = vpack.c.bf16 %v2570_v58, %v2568_v53  ;;  %v2567_v39 = vmul.f32 %v2503_v59, %v10191_v16 }
 0x3f3   :  { %5890 = vmatpush3.bf16.msra.mxu1 %v6124_v14 }
 0x3f4   :  { %v2601_v43 = vpack.c.bf16 %v2569_v52, %v2567_v39  ;;  %5891 = vmatprep.subr.bf16.mxu1 %v6125_v48 }
 0x3f6   :  { %2979 = vmatmul.mubr.bf16.gmra.mxu0 %v2599_v37 }
 0x3f7   :  { %2988 = vmatprep.mubr.bf16.mxu0 %v2602_v35  ;;  %5892 = vmatpush3.bf16.msra.mxu1 %v6126_v15 }
 0x3f8   :  { %5893 = vmatprep.subr.bf16.mxu1 %v6127_v9 }
 0x3fb   :  { %5894 = vmatpush3.bf16.msra.mxu1 %v6128_v18 }
 0x3fc   :  { %5895 = vmatprep.subr.bf16.mxu1 %v6129_v30 }
 0x3fe   :  { %2989 = vmatmul.mubr.bf16.gmra.mxu0 %v2601_v43 }
 0x3ff   :  { %4777 = vmatprep.mubr.bf16.mxu0 %v10130_v27  ;;  %5896 = vmatpush3.bf16.msra.mxu1 %v6130_v46 }
 0x400   :  { %5897 = vmatprep.subr.bf16.mxu1 %v6131_v62 }
 0x403   :  { %5898 = vmatpush3.bf16.msra.mxu1 %v6132_v21 }
 0x43c   :  { %v2840_v20 = vpop.f32.mrf.mxu0 }
 0x43d   :  { %v8378_v61 = vadd.f32 %v2840_v20, %v8372_v44 }
 0x43e   :  { %v2842_v26 = vpop.f32.mrf.mxu0 }
 0x43f   :  { %v8381_v60 = vadd.f32 %v2842_v26, %v8375_v28  ;;  %v3127_v33 = vmul.f32 %v8378_v61, %v8378_v61 }
 0x440   :  { %v2844_v55 = vpop.f32.mrf.mxu0 }
 0x441   :  { %v3128_v42 = vmul.f32 %v8381_v60, %v8381_v60  ;;  %v2999_v19 = vadd.f32 %v8381_v60, %v8378_v61  ;;  %v8390_v63 = vadd.f32 %v2844_v55, %v8372_v44 }
 0x442   :  { %v2846_v50 = vpop.f32.mrf.mxu0 }
 0x443   :  { %v8393_v49 = vadd.f32 %v2846_v50, %v8375_v28  ;;  %3000 = vadd.xlane.f32.xlu0 %v2999_v19  ;;  %v3191_v5 = vadd.f32 %v3128_v42, %v3127_v33  ;;  %v3129_v13 = vmul.f32 %v8390_v63, %v8390_v63 }
 0x445   :  { %v2850_v6 = vpop.f32.mrf.mxu0  ;;  %v3002_v17 = vadd.f32 %v8393_v49, %v8390_v63  ;;  %v3130_v22 = vmul.f32 %v8393_v49, %v8393_v49 }
 0x446   :  { %v8402_v29 = vadd.f32 %v2850_v6, %v8372_v44 }
 0x447   :  { %v2852_v40 = vpop.f32.mrf.mxu0  ;;  %3003 = vadd.xlane.f32.xlu1 %v3002_v17  ;;  %3192 = vadd.xlane.f32.xlu0 %v3191_v5  ;;  %v3194_v54 = vadd.f32 %v3130_v22, %v3129_v13 }
 0x448   :  { %v8405_v0 = vadd.f32 %v2852_v40, %v8375_v28  ;;  %v3131_v10 = vmul.f32 %v8402_v29, %v8402_v29 }
 0x449   :  { %v2854_v57 = vpop.f32.mrf.mxu0 }
 0x44a   :  { %v3132_v31 = vmul.f32 %v8405_v0, %v8405_v0  ;;  %v3005_v24 = vadd.f32 %v8405_v0, %v8402_v29  ;;  %v8414_v4 = vadd.f32 %v2854_v57, %v8372_v44 }
 0x44b   :  { %v2856_v12 = vpop.f32.mrf.mxu0  ;;  %3195 = vadd.xlane.f32.xlu1 %v3194_v54 }
 0x44c   :  { %v8417_v7 = vadd.f32 %v2856_v12, %v8375_v28  ;;  %3006 = vadd.xlane.f32.xlu0 %v3005_v24  ;;  %v3197_v58 = vadd.f32 %v3132_v31, %v3131_v10  ;;  %v3133_v11 = vmul.f32 %v8414_v4, %v8414_v4 }
 0x44e   :  { %v2860_v25 = vpop.f32.mrf.mxu0  ;;  %v3008_v41 = vadd.f32 %v8417_v7, %v8414_v4  ;;  %v3134_v56 = vmul.f32 %v8417_v7, %v8417_v7 }
 0x44f   :  { %v8426_v53 = vadd.f32 %v2860_v25, %v8372_v44  ;;  %v6133_v25 = vld [vmem:[#allocation10 + $0x40] sm:$0xff]  }
 0x450   :  { %v2862_v34 = vpop.f32.mrf.mxu0  ;;  %3009 = vadd.xlane.f32.xlu1 %v3008_v41  ;;  %3198 = vadd.xlane.f32.xlu0 %v3197_v58  ;;  %v3200_v23 = vadd.f32 %v3134_v56, %v3133_v11  ;;  %v6134_v41 = vld [vmem:[#allocation10] sm:$0xff]  }
 0x451   :  { %v8429_v32 = vadd.f32 %v2862_v34, %v8375_v28  ;;  %v3135_v59 = vmul.f32 %v8426_v53, %v8426_v53  ;;  %5899 = vmatprep.subr.bf16.mxu1 %v6133_v25 }
 0x452   :  { %v2864_v45 = vpop.f32.mrf.mxu0  ;;  %5900 = vmatpush3.bf16.msra.mxu1 %v6134_v41 }
 0x453   :  { %v3136_v35 = vmul.f32 %v8429_v32, %v8429_v32  ;;  %v3011_v37 = vadd.f32 %v8429_v32, %v8426_v53  ;;  %v8438_v2 = vadd.f32 %v2864_v45, %v8372_v44 }
 0x454   :  { %v2866_v8 = vpop.f32.mrf.mxu0  ;;  %3201 = vadd.xlane.f32.xlu1 %v3200_v23 }
 0x455   :  { %v8441_v52 = vadd.f32 %v2866_v8, %v8375_v28  ;;  %3012 = vadd.xlane.f32.xlu0 %v3011_v37  ;;  %v3203_v43 = vadd.f32 %v3136_v35, %v3135_v59  ;;  %v3137_v51 = vmul.f32 %v8438_v2, %v8438_v2 }
 0x457   :  { %v2870_v16 = vpop.f32.mrf.mxu0  ;;  %v3014_v39 = vadd.f32 %v8441_v52, %v8438_v2  ;;  %v3138_v36 = vmul.f32 %v8441_v52, %v8441_v52 }
 0x458   :  { %v8450_v14 = vadd.f32 %v2870_v16, %v8372_v44 }
 0x459   :  { %v2872_v1 = vpop.f32.mrf.mxu0  ;;  %3015 = vadd.xlane.f32.xlu1 %v3014_v39  ;;  %3204 = vadd.xlane.f32.xlu0 %v3203_v43  ;;  %v3206_v47 = vadd.f32 %v3138_v36, %v3137_v51 }
 0x45a   :  { %v8453_v48 = vadd.f32 %v2872_v1, %v8375_v28  ;;  %v3139_v9 = vmul.f32 %v8450_v14, %v8450_v14 }
 0x45b   :  { %v2874_v15 = vpop.f32.mrf.mxu0 }
 0x45c   :  { %v3140_v20 = vmul.f32 %v8453_v48, %v8453_v48  ;;  %v3017_v26 = vadd.f32 %v8453_v48, %v8450_v14  ;;  %v8462_v42 = vadd.f32 %v2874_v15, %v8372_v44 }
 0x45d   :  { %v2876_v55 = vpop.f32.mrf.mxu0  ;;  %3207 = vadd.xlane.f32.xlu1 %v3206_v47 }
 0x45e   :  { %v8465_v19 = vadd.f32 %v2876_v55, %v8375_v28  ;;  %3018 = vadd.xlane.f32.xlu0 %v3017_v26  ;;  %v3209_v18 = vadd.f32 %v3140_v20, %v3139_v9  ;;  %v3141_v6 = vmul.f32 %v8462_v42, %v8462_v42 }
 0x460   :  { %v3020_v50 = vadd.f32 %v8465_v19, %v8462_v42  ;;  %v3142_v33 = vmul.f32 %v8465_v19, %v8465_v19 }
 0x462   :  { %v2880_v17 = vpop.f32.mrf.mxu0  ;;  %3021 = vadd.xlane.f32.xlu1 %v3020_v50  ;;  %3210 = vadd.xlane.f32.xlu0 %v3209_v18  ;;  %v3212_v22 = vadd.f32 %v3142_v33, %v3141_v6 }
 0x463   :  { %v8474_v13 = vadd.f32 %v2880_v17, %v8372_v44 }
 0x464   :  { %v2882_v5 = vpop.f32.mrf.mxu0 }
 0x465   :  { %v8477_v40 = vadd.f32 %v2882_v5, %v8375_v28  ;;  %v3143_v30 = vmul.f32 %v8474_v13, %v8474_v13 }
 0x466   :  { %v2884_v57 = vpop.f32.mrf.mxu0  ;;  %3213 = vadd.xlane.f32.xlu1 %v3212_v22 }
 0x467   :  { %v3144_v54 = vmul.f32 %v8477_v40, %v8477_v40  ;;  %v3023_v31 = vadd.f32 %v8477_v40, %v8474_v13  ;;  %v8486_v12 = vadd.f32 %v2884_v57, %v8372_v44 }
 0x468   :  { %v2886_v24 = vpop.f32.mrf.mxu0 }
 0x469   :  { %v8489_v10 = vadd.f32 %v2886_v24, %v8375_v28  ;;  %3024 = vadd.xlane.f32.xlu0 %v3023_v31  ;;  %v3215_v11 = vadd.f32 %v3144_v54, %v3143_v30  ;;  %v3145_v45 = vmul.f32 %v8486_v12, %v8486_v12 }
 0x46a   :  { %v2890_v58 = vpop.f32.mrf.mxu0 }
 0x46b   :  { %v3146_v56 = vmul.f32 %v8489_v10, %v8489_v10  ;;  %v3026_v46 = vadd.f32 %v8489_v10, %v8486_v12  ;;  %v8498_v23 = vadd.f32 %v2890_v58, %v8372_v44 }
 0x46c   :  { %v2892_v34 = vpop.f32.mrf.mxu0 }
 0x46d   :  { %v8501_v35 = vadd.f32 %v2892_v34, %v8375_v28  ;;  %3027 = vadd.xlane.f32.xlu1 %v3026_v46  ;;  %3216 = vadd.xlane.f32.xlu0 %v3215_v11  ;;  %v3218_v59 = vadd.f32 %v3146_v56, %v3145_v45  ;;  %v3147_v43 = vmul.f32 %v8498_v23, %v8498_v23 }
 0x46e   :  { %v2894_v37 = vpop.f32.mrf.mxu0 }
 0x46f   :  { %v3148_v8 = vmul.f32 %v8501_v35, %v8501_v35  ;;  %v3029_v16 = vadd.f32 %v8501_v35, %v8498_v23  ;;  %v8510_v36 = vadd.f32 %v2894_v37, %v8372_v44 }
 0x470   :  { %v2896_v39 = vpop.f32.mrf.mxu0 }
 0x471   :  { %v8513_v62 = vadd.f32 %v2896_v39, %v8375_v28  ;;  %3219 = vadd.xlane.f32.xlu1 %v3218_v59  ;;  %3030 = vadd.xlane.f32.xlu0 %v3029_v16  ;;  %v3221_v1 = vadd.f32 %v3148_v8, %v3147_v43  ;;  %v3149_v47 = vmul.f32 %v8510_v36, %v8510_v36 }
 0x473   :  { %v3150_v21 = vmul.f32 %v8513_v62, %v8513_v62  ;;  %v3032_v51 = vadd.f32 %v8513_v62, %v8510_v36 }
 0x474   :  { %v2900_v15 = vpop.f32.mrf.mxu0 }
 0x475   :  { %3033 = vadd.xlane.f32.xlu1 %v3032_v51  ;;  %3222 = vadd.xlane.f32.xlu0 %v3221_v1  ;;  %v8522_v26 = vadd.f32 %v2900_v15, %v8372_v44  ;;  %v3224_v9 = vadd.f32 %v3150_v21, %v3149_v47 }
 0x476   :  { %v2902_v20 = vpop.f32.mrf.mxu0 }
 0x477   :  { %v8525_v55 = vadd.f32 %v2902_v20, %v8375_v28  ;;  %v3151_v17 = vmul.f32 %v8522_v26, %v8522_v26 }
 0x478   :  { %v2904_v50 = vpop.f32.mrf.mxu0 }
 0x479   :  { %v3152_v18 = vmul.f32 %v8525_v55, %v8525_v55  ;;  %3225 = vadd.xlane.f32.xlu1 %v3224_v9  ;;  %v3035_v33 = vadd.f32 %v8525_v55, %v8522_v26  ;;  %v8534_v5 = vadd.f32 %v2904_v50, %v8372_v44 }
 0x47a   :  { %v2906_v6 = vpop.f32.mrf.mxu0 }
 0x47b   :  { %v8537_v22 = vadd.f32 %v2906_v6, %v8375_v28  ;;  %3036 = vadd.xlane.f32.xlu0 %v3035_v33  ;;  %v3227_v24 = vadd.f32 %v3152_v18, %v3151_v17  ;;  %v3153_v30 = vmul.f32 %v8534_v5, %v8534_v5 }
 0x47d   :  { %v3154_v57 = vmul.f32 %v8537_v22, %v8537_v22  ;;  %v2910_v54 = vpop.f32.mrf.mxu0  ;;  %v3038_v31 = vadd.f32 %v8537_v22, %v8534_v5 }
 0x47e   :  { %v8546_v41 = vadd.f32 %v2910_v54, %v8372_v44 }
 0x47f   :  { %v2912_v25 = vpop.f32.mrf.mxu0  ;;  %3039 = vadd.xlane.f32.xlu1 %v3038_v31  ;;  %3228 = vadd.xlane.f32.xlu0 %v3227_v24  ;;  %v3230_v46 = vadd.f32 %v3154_v57, %v3153_v30 }
 0x480   :  { %v8549_v58 = vadd.f32 %v2912_v25, %v8375_v28  ;;  %v3155_v37 = vmul.f32 %v8546_v41, %v8546_v41 }
 0x481   :  { %v2914_v56 = vpop.f32.mrf.mxu0 }
 0x482   :  { %v3156_v11 = vmul.f32 %v8549_v58, %v8549_v58  ;;  %v3041_v34 = vadd.f32 %v8549_v58, %v8546_v41  ;;  %v8558_v8 = vadd.f32 %v2914_v56, %v8372_v44 }
 0x483   :  { %v2916_v45 = vpop.f32.mrf.mxu0  ;;  %3231 = vadd.xlane.f32.xlu1 %v3230_v46 }
 0x484   :  { %v8561_v59 = vadd.f32 %v2916_v45, %v8375_v28  ;;  %3042 = vadd.xlane.f32.xlu0 %v3041_v34  ;;  %v3233_v21 = vadd.f32 %v3156_v11, %v3155_v37  ;;  %v3157_v51 = vmul.f32 %v8558_v8, %v8558_v8 }
 0x486   :  { %v3158_v16 = vmul.f32 %v8561_v59, %v8561_v59  ;;  %v2920_v39 = vpop.f32.mrf.mxu0  ;;  %v3044_v43 = vadd.f32 %v8561_v59, %v8558_v8 }
 0x487   :  { %v8570_v15 = vadd.f32 %v2920_v39, %v8372_v44 }
 0x488   :  { %v2922_v1 = vpop.f32.mrf.mxu0  ;;  %3045 = vadd.xlane.f32.xlu1 %v3044_v43  ;;  %3234 = vadd.xlane.f32.xlu0 %v3233_v21  ;;  %v3236_v9 = vadd.f32 %v3158_v16, %v3157_v51 }
 0x489   :  { %v8573_v47 = vadd.f32 %v2922_v1, %v8375_v28  ;;  %v3159_v6 = vmul.f32 %v8570_v15, %v8570_v15 }
 0x48a   :  { %v2924_v20 = vpop.f32.mrf.mxu0 }
 0x48b   :  { %v3160_v50 = vmul.f32 %v8573_v47, %v8573_v47  ;;  %v3047_v18 = vadd.f32 %v8573_v47, %v8570_v15  ;;  %v8582_v17 = vadd.f32 %v2924_v20, %v8372_v44 }
 0x48c   :  { %v2926_v33 = vpop.f32.mrf.mxu0  ;;  %3237 = vadd.xlane.f32.xlu1 %v3236_v9 }
 0x48d   :  { %v8585_v57 = vadd.f32 %v2926_v33, %v8375_v28  ;;  %3048 = vadd.xlane.f32.xlu0 %v3047_v18  ;;  %v3239_v30 = vadd.f32 %v3160_v50, %v3159_v6  ;;  %v3161_v25 = vmul.f32 %v8582_v17, %v8582_v17 }
 0x48e   :  { %v2930_v31 = vpop.f32.mrf.mxu0 }
 0x48f   :  { %v3162_v54 = vmul.f32 %v8585_v57, %v8585_v57  ;;  %v3050_v24 = vadd.f32 %v8585_v57, %v8582_v17  ;;  %v8594_v46 = vadd.f32 %v2930_v31, %v8372_v44 }
 0x490   :  { %v2932_v56 = vpop.f32.mrf.mxu0 }
 0x491   :  { %3051 = vadd.xlane.f32.xlu1 %v3050_v24  ;;  %3240 = vadd.xlane.f32.xlu0 %v3239_v30  ;;  %10192 = vst [vmem:[#allocation27_spill] sm:$0xff] %v8594_v46  ;;  %v8597_v11 = vadd.f32 %v2932_v56, %v8375_v28  ;;  %v3242_v45 = vadd.f32 %v3162_v54, %v3161_v25 }
 0x492   :  { %v2934_v34 = vpop.f32.mrf.mxu0  ;;  %v3163_v43 = vmul.f32 %v8594_v46, %v8594_v46 }
 0x493   :  { %10193 = vst [vmem:[#allocation28_spill] sm:$0xff] %v8597_v11  ;;  %v3164_v37 = vmul.f32 %v8597_v11, %v8597_v11  ;;  %v3053_v16 = vadd.f32 %v8597_v11, %v8594_v46  ;;  %v8606_v21 = vadd.f32 %v2934_v34, %v8372_v44 }
 0x494   :  { %v2936_v39 = vpop.f32.mrf.mxu0 }
 0x495   :  { %3243 = vadd.xlane.f32.xlu1 %v3242_v45  ;;  %10194 = vst [vmem:[#allocation29_spill] sm:$0xff] %v8606_v21  ;;  %v8609_v51 = vadd.f32 %v2936_v39, %v8375_v28  ;;  %3054 = vadd.xlane.f32.xlu0 %v3053_v16  ;;  %v3245_v50 = vadd.f32 %v3164_v37, %v3163_v43 }
 0x496   :  { %v2940_v1 = vpop.f32.mrf.mxu0  ;;  %v3165_v33 = vmul.f32 %v8606_v21, %v8606_v21 }
 0x497   :  { %10195 = vst [vmem:[#allocation30_spill] sm:$0xff] %v8609_v51  ;;  %v3166_v20 = vmul.f32 %v8609_v51, %v8609_v51  ;;  %v3056_v9 = vadd.f32 %v8609_v51, %v8606_v21  ;;  %v8618_v6 = vadd.f32 %v2940_v1, %v8372_v44 }
 0x498   :  { %v2942_v18 = vpop.f32.mrf.mxu0 }
 0x499   :  { %10196 = vst [vmem:[#allocation33_spill] sm:$0xff] %v8618_v6  ;;  %v8621_v54 = vadd.f32 %v2942_v18, %v8375_v28  ;;  %3057 = vadd.xlane.f32.xlu1 %v3056_v9  ;;  %3246 = vadd.xlane.f32.xlu0 %v3245_v50  ;;  %v3248_v30 = vadd.f32 %v3166_v20, %v3165_v33 }
 0x49a   :  { %v2944_v31 = vpop.f32.mrf.mxu0  ;;  %v3167_v34 = vmul.f32 %v8618_v6, %v8618_v6 }
 0x49b   :  { %10197 = vst [vmem:[#allocation31_spill] sm:$0xff] %v8621_v54  ;;  %v3168_v24 = vmul.f32 %v8621_v54, %v8621_v54  ;;  %v3059_v25 = vadd.f32 %v8621_v54, %v8618_v6  ;;  %v8630_v45 = vadd.f32 %v2944_v31, %v8372_v44  ;;  %v248_v54 = vld [vmem:[#allocation13 + $0x4] ss:$8 sm:$0x3] }
 0x49c   :  { %v2946_v56 = vpop.f32.mrf.mxu0 }
 0x49d   :  { %10198 = vst [vmem:[#allocation32_spill] sm:$0xff] %v8630_v45  ;;  %v8633_v37 = vadd.f32 %v2946_v56, %v8375_v28  ;;  %3249 = vadd.xlane.f32.xlu1 %v3248_v30  ;;  %3060 = vadd.xlane.f32.xlu0 %v3059_v25  ;;  %v3251_v1 = vadd.f32 %v3168_v24, %v3167_v34 }
 0x49e   :  { %v2950_v16 = vpop.f32.mrf.mxu0  ;;  %v3169_v9 = vmul.f32 %v8630_v45, %v8630_v45 }
 0x49f   :  { %10199 = vst [vmem:[#allocation35_spill] sm:$0xff] %v8633_v37  ;;  %v3170_v39 = vmul.f32 %v8633_v37, %v8633_v37  ;;  %v3062_v43 = vadd.f32 %v8633_v37, %v8630_v45  ;;  %v8642_v50 = vadd.f32 %v2950_v16, %v8372_v44 }
 0x4a0   :  { %v2952_v20 = vpop.f32.mrf.mxu0 }
 0x4a1   :  { %10200 = vst [vmem:[#allocation37_spill] sm:$0xff] %v8642_v50  ;;  %v8645_v18 = vadd.f32 %v2952_v20, %v8375_v28  ;;  %3063 = vadd.xlane.f32.xlu1 %v3062_v43  ;;  %3252 = vadd.xlane.f32.xlu0 %v3251_v1  ;;  %v3254_v30 = vadd.f32 %v3170_v39, %v3169_v9 }
 0x4a2   :  { %v2954_v33 = vpop.f32.mrf.mxu0  ;;  %v3171_v56 = vmul.f32 %v8642_v50, %v8642_v50 }
 0x4a3   :  { %10201 = vst [vmem:[#allocation34_spill] sm:$0xff] %v8645_v18  ;;  %v3172_v31 = vmul.f32 %v8645_v18, %v8645_v18  ;;  %v3065_v24 = vadd.f32 %v8645_v18, %v8642_v50  ;;  %v8654_v34 = vadd.f32 %v2954_v33, %v8372_v44 }
 0x4a4   :  { %v2956_v25 = vpop.f32.mrf.mxu0 }
 0x4a5   :  { %10202 = vst [vmem:[#allocation36_spill] sm:$0xff] %v8654_v34  ;;  %v8657_v16 = vadd.f32 %v2956_v25, %v8375_v28  ;;  %3255 = vadd.xlane.f32.xlu1 %v3254_v30  ;;  %3066 = vadd.xlane.f32.xlu0 %v3065_v24  ;;  %v3257_v20 = vadd.f32 %v3172_v31, %v3171_v56 }
 0x4a6   :  { %v2960_v43 = vpop.f32.mrf.mxu0  ;;  %v3173_v27 = vmul.f32 %v8654_v34, %v8654_v34 }
 0x4a7   :  { %10203 = vst [vmem:[#allocation39_spill] sm:$0xff] %v8657_v16  ;;  %v3174_v1 = vmul.f32 %v8657_v16, %v8657_v16  ;;  %v3068_v39 = vadd.f32 %v8657_v16, %v8654_v34  ;;  %v8666_v33 = vadd.f32 %v2960_v43, %v8372_v44 }
 0x4a8   :  { %v2962_v9 = vpop.f32.mrf.mxu0 }
 0x4a9   :  { %10204 = vst [vmem:[#allocation41_spill] sm:$0xff] %v8666_v33  ;;  %v8669_v25 = vadd.f32 %v2962_v9, %v8375_v28  ;;  %3069 = vadd.xlane.f32.xlu1 %v3068_v39  ;;  %3258 = vadd.xlane.f32.xlu0 %v3257_v20  ;;  %v3260_v18 = vadd.f32 %v3174_v1, %v3173_v27 }
 0x4aa   :  { %v2964_v30 = vpop.f32.mrf.mxu0  ;;  %v3175_v16 = vmul.f32 %v8666_v33, %v8666_v33 }
 0x4ab   :  { %10205 = vst [vmem:[#allocation38_spill] sm:$0xff] %v8669_v25  ;;  %v3176_v24 = vmul.f32 %v8669_v25, %v8669_v25  ;;  %v3071_v31 = vadd.f32 %v8669_v25, %v8666_v33  ;;  %v8678_v43 = vadd.f32 %v2964_v30, %v8372_v44 }
 0x4ac   :  { %v2966_v56 = vpop.f32.mrf.mxu0 }
 0x4ad   :  { %10206 = vst [vmem:[#allocation40_spill] sm:$0xff] %v8678_v43  ;;  %v8681_v9 = vadd.f32 %v2966_v56, %v8375_v28  ;;  %3261 = vadd.xlane.f32.xlu1 %v3260_v18  ;;  %3072 = vadd.xlane.f32.xlu0 %v3071_v31  ;;  %v3263_v1 = vadd.f32 %v3176_v24, %v3175_v16 }
 0x4ae   :  { %v2970_v39 = vpop.f32.mrf.mxu0  ;;  %v3177_v33 = vmul.f32 %v8678_v43, %v8678_v43 }
 0x4af   :  { %10207 = vst [vmem:[#allocation43_spill] sm:$0xff] %v8681_v9  ;;  %v3178_v20 = vmul.f32 %v8681_v9, %v8681_v9  ;;  %v3074_v27 = vadd.f32 %v8681_v9, %v8678_v43  ;;  %v8690_v30 = vadd.f32 %v2970_v39, %v8372_v44 }
 0x4b0   :  { %v2972_v25 = vpop.f32.mrf.mxu0 }
 0x4b1   :  { %10208 = vst [vmem:[#allocation45_spill] sm:$0xff] %v8690_v30  ;;  %v8693_v56 = vadd.f32 %v2972_v25, %v8375_v28  ;;  %3075 = vadd.xlane.f32.xlu1 %v3074_v27  ;;  %3264 = vadd.xlane.f32.xlu0 %v3263_v1  ;;  %v3266_v34 = vadd.f32 %v3178_v20, %v3177_v33 }
 0x4b2   :  { %v2974_v18 = vpop.f32.mrf.mxu0  ;;  %v3179_v9 = vmul.f32 %v8690_v30, %v8690_v30 }
 0x4b3   :  { %10209 = vst [vmem:[#allocation42_spill] sm:$0xff] %v8693_v56  ;;  %v3180_v31 = vmul.f32 %v8693_v56, %v8693_v56  ;;  %v3077_v16 = vadd.f32 %v8693_v56, %v8690_v30  ;;  %v8702_v39 = vadd.f32 %v2974_v18, %v8372_v44 }
 0x4b4   :  { %v2976_v24 = vpop.f32.mrf.mxu0 }
 0x4b5   :  { %10210 = vst [vmem:[#allocation44_spill] sm:$0xff] %v8702_v39  ;;  %v8705_v25 = vadd.f32 %v2976_v24, %v8375_v28  ;;  %3267 = vadd.xlane.f32.xlu1 %v3266_v34  ;;  %3078 = vadd.xlane.f32.xlu0 %v3077_v16  ;;  %v3269_v20 = vadd.f32 %v3180_v31, %v3179_v9 }
 0x4b6   :  { %v2980_v27 = vpop.f32.mrf.mxu0  ;;  %v3181_v30 = vmul.f32 %v8702_v39, %v8702_v39 }
 0x4b7   :  { %10211 = vst [vmem:[#allocation47_spill] sm:$0xff] %v8705_v25  ;;  %v3182_v1 = vmul.f32 %v8705_v25, %v8705_v25  ;;  %v3080_v33 = vadd.f32 %v8705_v25, %v8702_v39  ;;  %v8714_v18 = vadd.f32 %v2980_v27, %v8372_v44 }
 0x4b8   :  { %v2982_v56 = vpop.f32.mrf.mxu0 }
 0x4b9   :  { %10212 = vst [vmem:[#allocation49_spill] sm:$0xff] %v8714_v18  ;;  %v8717_v24 = vadd.f32 %v2982_v56, %v8375_v28  ;;  %3081 = vadd.xlane.f32.xlu1 %v3080_v33  ;;  %3270 = vadd.xlane.f32.xlu0 %v3269_v20  ;;  %v3272_v43 = vadd.f32 %v3182_v1, %v3181_v30 }
 0x4ba   :  { %v2984_v34 = vpop.f32.mrf.mxu0  ;;  %v3183_v25 = vmul.f32 %v8714_v18, %v8714_v18 }
 0x4bb   :  { %10213 = vst [vmem:[#allocation46_spill] sm:$0xff] %v8717_v24  ;;  %v3184_v16 = vmul.f32 %v8717_v24, %v8717_v24  ;;  %v3083_v9 = vadd.f32 %v8717_v24, %v8714_v18  ;;  %v8726_v27 = vadd.f32 %v2984_v34, %v8372_v44 }
 0x4bc   :  { %v2986_v31 = vpop.f32.mrf.mxu0 }
 0x4bd   :  { %10214 = vst [vmem:[#allocation48_spill] sm:$0xff] %v8726_v27  ;;  %v8729_v56 = vadd.f32 %v2986_v31, %v8375_v28  ;;  %3273 = vadd.xlane.f32.xlu1 %v3272_v43  ;;  %3084 = vadd.xlane.f32.xlu0 %v3083_v9  ;;  %v3275_v1 = vadd.f32 %v3184_v16, %v3183_v25 }
 0x4be   :  { %v2990_v33 = vpop.f32.mrf.mxu0  ;;  %v3185_v18 = vmul.f32 %v8726_v27, %v8726_v27 }
 0x4bf   :  { %10215 = vst [vmem:[#allocation51_spill] sm:$0xff] %v8729_v56  ;;  %v3186_v20 = vmul.f32 %v8729_v56, %v8729_v56  ;;  %v3086_v30 = vadd.f32 %v8729_v56, %v8726_v27  ;;  %v8738_v34 = vadd.f32 %v2990_v33, %v8372_v44 }
 0x4c0   :  { %v2992_v24 = vpop.f32.mrf.mxu0 }
 0x4c1   :  { %10216 = vst [vmem:[#allocation53_spill] sm:$0xff] %v8738_v34  ;;  %v8741_v31 = vadd.f32 %v2992_v24, %v8375_v28  ;;  %3087 = vadd.xlane.f32.xlu1 %v3086_v30  ;;  %3276 = vadd.xlane.f32.xlu0 %v3275_v1  ;;  %v3278_v39 = vadd.f32 %v3186_v20, %v3185_v18 }
 0x4c2   :  { %v2994_v43 = vpop.f32.mrf.mxu0  ;;  %v3187_v56 = vmul.f32 %v8738_v34, %v8738_v34 }
 0x4c3   :  { %10217 = vst [vmem:[#allocation50_spill] sm:$0xff] %v8741_v31  ;;  %v3188_v9 = vmul.f32 %v8741_v31, %v8741_v31  ;;  %v3089_v25 = vadd.f32 %v8741_v31, %v8738_v34  ;;  %v8750_v33 = vadd.f32 %v2994_v43, %v8372_v44 }
 0x4c4   :  { %v2996_v16 = vpop.f32.mrf.mxu0 }
 0x4c5   :  { %10218 = vst [vmem:[#allocation52_spill] sm:$0xff] %v8750_v33  ;;  %v8753_v24 = vadd.f32 %v2996_v16, %v8375_v28  ;;  %3279 = vadd.xlane.f32.xlu1 %v3278_v39  ;;  %3090 = vadd.xlane.f32.xlu0 %v3089_v25  ;;  %v3281_v20 = vadd.f32 %v3188_v9, %v3187_v56 }
 0x4c6   :  { %v3189_v1 = vmul.f32 %v8750_v33, %v8750_v33 }
 0x4c7   :  { %10219 = vst [vmem:[#allocation55_spill] sm:$0xff] %v8753_v24  ;;  %v3190_v30 = vmul.f32 %v8753_v24, %v8753_v24  ;;  %v3092_v18 = vadd.f32 %v8753_v24, %v8750_v33 }
 0x4c9   :  { %3093 = vadd.xlane.f32.xlu1 %v3092_v18  ;;  %3282 = vadd.xlane.f32.xlu0 %v3281_v20  ;;  %v3284_v34 = vadd.f32 %v3190_v30, %v3189_v1 }
 0x4cc   :  { %v3001_v44 = vpop.xlane.xlu0 %3000 }
 0x4cd   :  { %v3095_v43 = vmul.f32 0.00390625, %v3001_v44  ;;  %3285 = vadd.xlane.f32.xlu1 %v3284_v34 }
 0x4cf   :  { %v3383_v25 = vmul.f32 %v3095_v43, %v3095_v43 }
 0x4d0   :  { %v3004_v28 = vpop.xlane.xlu1 %3003  ;;  %v3193_v16 = vpop.xlane.xlu0 %3192 }
 0x4d1   :  { %v3096_v39 = vmul.f32 0.00390625, %v3004_v28  ;;  %v3287_v31 = vmul.f32 0.00390625, %v3193_v16 }
 0x4d3   :  { %v3415_v27 = vsub.f32 %v3287_v31, %v3383_v25  ;;  %v3384_v45 = vmul.f32 %v3096_v39, %v3096_v39 }
 0x4d4   :  { %v3196_v50 = vpop.xlane.xlu1 %3195 }
 0x4d5   :  { %v3447_v37 = vadd.f32 1e-05, %v3415_v27  ;;  %v3288_v24 = vmul.f32 0.00390625, %v3196_v50  ;;  %v3007_v56 = vpop.xlane.xlu0 %3006 }
 0x4d6   :  { %v8761_v9 = vmul.f32 0.00390625, %v3007_v56 }
 0x4d7   :  { %6543 = vrsqrt.f32 %v3447_v37  ;;  %v3416_v18 = vsub.f32 %v3288_v24, %v3384_v45  ;;  %v246_v24 = vld [vmem:[#allocation13 + $0x3] ss:$8 sm:$0x3] }
 0x4d8   :  { %v3385_v34 = vmul.f32 %v8761_v9, %v8761_v9 }
 0x4d9   :  { %v3448_v20 = vadd.f32 1e-05, %v3416_v18  ;;  %v3010_v30 = vpop.xlane.xlu1 %3009  ;;  %v3199_v1 = vpop.xlane.xlu0 %3198 }
 0x4da   :  { %v8763_v44 = vmul.f32 0.00390625, %v3010_v30  ;;  %v3289_v28 = vmul.f32 0.00390625, %v3199_v1 }
 0x4db   :  { %6545 = vrsqrt.f32 %v3448_v20 }
 0x4dc   :  { %v3417_v31 = vsub.f32 %v3289_v28, %v3385_v34  ;;  %v3386_v50 = vmul.f32 %v8763_v44, %v8763_v44  ;;  %v8776_v34 = vrot.slane %v246_v24, %v8111_v38  ;;  %v3326_v11 = vsub.f32 %v8417_v7, %v8763_v44 }
 0x4dd   :  { %v3202_v16 = vpop.xlane.xlu1 %3201 }
 0x4de   :  { %v3449_v27 = vadd.f32 1e-05, %v3417_v31  ;;  %v3290_v25 = vmul.f32 0.00390625, %v3202_v16  ;;  %v3013_v56 = vpop.xlane.xlu0 %3012  ;;  %v3319_v31 = vsub.f32 %v8378_v61, %v3095_v43  ;;  %v3320_v16 = vsub.f32 %v8381_v60, %v3095_v43 }
 0x4df   :  { %v8769_v37 = vmul.f32 0.00390625, %v3013_v56  ;;  %v3321_v56 = vsub.f32 %v8390_v63, %v3096_v39  ;;  %v3322_v61 = vsub.f32 %v8393_v49, %v3096_v39 }
 0x4e0   :  { %6547 = vrsqrt.f32 %v3449_v27  ;;  %v3418_v45 = vsub.f32 %v3290_v25, %v3386_v50  ;;  %v8781_v27 = vrot.slane %v246_v24, %v8113_v3  ;;  %v8784_v25 = vrot.slane %v248_v54, %v8111_v38 }
 0x4e1   :  { %v3387_v20 = vmul.f32 %v8769_v37, %v8769_v37 }
 0x4e2   :  { %v3450_v18 = vadd.f32 1e-05, %v3418_v45  ;;  %v3016_v30 = vpop.xlane.xlu1 %3015  ;;  %v3205_v33 = vpop.xlane.xlu0 %3204 }
 0x4e3   :  { %v8771_v6 = vmul.f32 0.00390625, %v3016_v30  ;;  %v3291_v1 = vmul.f32 0.00390625, %v3205_v33  ;;  %v8788_v30 = vrot.slane %v248_v54, %v8113_v3 }
 0x4e4   :  { %v6544_v28 = vpop.eup %6543  ;;  %6549 = vrsqrt.f32 %v3450_v18 }
 0x4e5   :  { %v3419_v50 = vsub.f32 %v3291_v1, %v3387_v20  ;;  %v3512_v33 = vmul.f32 %v6544_v28, %v3320_v16  ;;  %v3511_v51 = vmul.f32 %v6544_v28, %v3319_v31  ;;  %v3388_v60 = vmul.f32 %v8771_v6, %v8771_v6 }
 0x4e6   :  { %v3208_v45 = vpop.xlane.xlu1 %3207 }
 0x4e7   :  { %v3451_v21 = vadd.f32 1e-05, %v3419_v50  ;;  %v3292_v43 = vmul.f32 0.00390625, %v3208_v45  ;;  %v3019_v24 = vpop.xlane.xlu0 %3018  ;;  %v3587_v1 = vmul.f32 %v8781_v27, %v3512_v33  ;;  %v3586_v63 = vmul.f32 %v8776_v34, %v3511_v51 }
 0x4e8   :  { %v6546_v18 = vpop.eup %6545  ;;  %v8793_v20 = vmul.f32 0.00390625, %v3019_v24  ;;  %v3323_v33 = vsub.f32 %v8402_v29, %v8761_v9 }
 0x4e9   :  { %6551 = vrsqrt.f32 %v3451_v21  ;;  %v3420_v16 = vsub.f32 %v3292_v43, %v3388_v60  ;;  %v3514_v54 = vmul.f32 %v6546_v18, %v3322_v61  ;;  %v3513_v3 = vmul.f32 %v6546_v18, %v3321_v56 }
 0x4ea   :  { %v3662_v28 = vadd.f32 %v8788_v30, %v3587_v1  ;;  %v3661_v24 = vadd.f32 %v8784_v25, %v3586_v63  ;;  %v3389_v21 = vmul.f32 %v8793_v20, %v8793_v20  ;;  %v3324_v61 = vsub.f32 %v8405_v0, %v8761_v9 }
 0x4eb   :  { %v3452_v49 = vadd.f32 1e-05, %v3420_v16  ;;  %v3022_v39 = vpop.xlane.xlu1 %3021  ;;  %v3211_v31 = vpop.xlane.xlu0 %3210  ;;  %v3589_v50 = vmul.f32 %v8781_v27, %v3514_v54  ;;  %v3588_v45 = vmul.f32 %v8776_v34, %v3513_v3  ;;  %v3325_v43 = vsub.f32 %v8414_v4, %v8763_v44 }
 0x4ec   :  { %v8803_v38 = vmul.f32 0.00390625, %v3022_v39  ;;  %v3293_v51 = vmul.f32 0.00390625, %v3211_v31  ;;  %v3726_v29 = vmax.f32 %v3662_v28, 0.0  ;;  %v3725_v1 = vmax.f32 %v3661_v24, 0.0 }
 0x4ed   :  { %v6548_v56 = vpop.eup %6547  ;;  %6553 = vrsqrt.f32 %v3452_v49  ;;  %v3664_v60 = vadd.f32 %v8788_v30, %v3589_v50  ;;  %v3663_v3 = vadd.f32 %v8784_v25, %v3588_v45 }
 0x4ee   :  { %v3421_v18 = vsub.f32 %v3293_v51, %v3389_v21  ;;  %v3516_v39 = vmul.f32 %v6548_v56, %v3324_v61  ;;  %v3515_v31 = vmul.f32 %v6548_v56, %v3323_v33  ;;  %v3390_v9 = vmul.f32 %v8803_v38, %v8803_v38 }
 0x4ef   :  { %v3214_v63 = vpop.xlane.xlu1 %3213  ;;  %v3728_v16 = vmax.f32 %v3664_v60, 0.0  ;;  %v3727_v54 = vmax.f32 %v3663_v3, 0.0 }
 0x4f0   :  { %v3453_v0 = vadd.f32 1e-05, %v3421_v18  ;;  %v3294_v49 = vmul.f32 0.00390625, %v3214_v63  ;;  %v3591_v4 = vmul.f32 %v8781_v27, %v3516_v39  ;;  %v3590_v28 = vmul.f32 %v8776_v34, %v3515_v31 }
 0x4f1   :  { %v6550_v50 = vpop.eup %6549  ;;  %v3790_v45 = vpack.c.bf16 %v3728_v16, %v3726_v29  ;;  %v3789_v46 = vpack.c.bf16 %v3727_v54, %v3725_v1  ;;  %v3327_v18 = vsub.f32 %v8426_v53, %v8769_v37 }
 0x4f2   :  { %6555 = vrsqrt.f32 %v3453_v0  ;;  %v3422_v24 = vsub.f32 %v3294_v49, %v3390_v9  ;;  %v3025_v21 = vpop.xlane.xlu0 %3024  ;;  %v3518_v51 = vmul.f32 %v6550_v50, %v3326_v11  ;;  %v3517_v33 = vmul.f32 %v6550_v50, %v3325_v43 }
 0x4f3   :  { %v8819_v56 = vmul.f32 0.00390625, %v3025_v21  ;;  %3981 = vmatprep.mubr.bf16.mxu1 %v3790_v45  ;;  %v3666_v7 = vadd.f32 %v8788_v30, %v3591_v4  ;;  %v3665_v3 = vadd.f32 %v8784_v25, %v3590_v28  ;;  %v3328_v11 = vsub.f32 %v8429_v32, %v8769_v37 }
 0x4f4   :  { %v3454_v44 = vadd.f32 1e-05, %v3422_v24  ;;  %3982 = vmatmul.mubr.bf16.vlgmr.msra.gmra.mxu1 %v3789_v46  ;;  %v3593_v61 = vmul.f32 %v8781_v27, %v3518_v51  ;;  %v3592_v60 = vmul.f32 %v8776_v34, %v3517_v33  ;;  %v3329_v37 = vsub.f32 %v8438_v2, %v8771_v6 }
 0x4f5   :  { %v3391_v1 = vmul.f32 %v8819_v56, %v8819_v56  ;;  %v3730_v53 = vmax.f32 %v3666_v7, 0.0  ;;  %v3729_v49 = vmax.f32 %v3665_v3, 0.0  ;;  %v3330_v50 = vsub.f32 %v8441_v52, %v8771_v6 }
 0x4f6   :  { %v6552_v43 = vpop.eup %6551  ;;  %6557 = vrsqrt.f32 %v3454_v44  ;;  %v3028_v29 = vpop.xlane.xlu1 %3027  ;;  %v3668_v46 = vadd.f32 %v8788_v30, %v3593_v61  ;;  %v3667_v16 = vadd.f32 %v8784_v25, %v3592_v60  ;;  %v3331_v52 = vsub.f32 %v8450_v14, %v8793_v20 }
 0x4f7   :  { %v3217_v63 = vpop.xlane.xlu0 %3216  ;;  %v8833_v54 = vmul.f32 0.00390625, %v3028_v29  ;;  %v3520_v31 = vmul.f32 %v6552_v43, %v3328_v11  ;;  %v3519_v0 = vmul.f32 %v6552_v43, %v3327_v18  ;;  %v3332_v18 = vsub.f32 %v8453_v48, %v8793_v20 }
 0x4f8   :  { %v3295_v39 = vmul.f32 0.00390625, %v3217_v63  ;;  %v3732_v9 = vmax.f32 %v3668_v46, 0.0  ;;  %v3731_v32 = vmax.f32 %v3667_v16, 0.0  ;;  %v3333_v29 = vsub.f32 %v8462_v42, %v8803_v38 }
 0x4f9   :  { %v3392_v4 = vmul.f32 %v8833_v54, %v8833_v54  ;;  %v3595_v7 = vmul.f32 %v8781_v27, %v3520_v31  ;;  %v3594_v44 = vmul.f32 %v8776_v34, %v3519_v0 }
 0x4fa   :  { %v3423_v45 = vsub.f32 %v3295_v39, %v3391_v1  ;;  %v6554_v28 = vpop.eup %6553  ;;  %v3220_v24 = vpop.xlane.xlu1 %3219  ;;  %v3792_v51 = vpack.c.bf16 %v3732_v9, %v3730_v53  ;;  %v3791_v33 = vpack.c.bf16 %v3731_v32, %v3729_v49  ;;  %v3334_v32 = vsub.f32 %v8465_v19, %v8803_v38 }
 0x4fb   :  { %v3031_v21 = vpop.xlane.xlu0 %3030  ;;  %v3296_v60 = vmul.f32 0.00390625, %v3220_v24  ;;  %v3522_v2 = vmul.f32 %v6554_v28, %v3330_v50  ;;  %v3521_v6 = vmul.f32 %v6554_v28, %v3329_v37  ;;  %v3670_v43 = vadd.f32 %v8788_v30, %v3595_v7 }
 0x4fc   :  { %v3455_v61 = vadd.f32 1e-05, %v3423_v45  ;;  %v8843_v3 = vmul.f32 0.00390625, %v3031_v21  ;;  %3989 = vmatprep.mubr.bf16.mxu1 %v3792_v51  ;;  %v3669_v14 = vadd.f32 %v8784_v25, %v3594_v44 }
 0x4fd   :  { %v3424_v11 = vsub.f32 %v3296_v60, %v3392_v4  ;;  %3990 = vmatmul.mubr.bf16.gmra.mxu1 %v3791_v33  ;;  %v3597_v46 = vmul.f32 %v8781_v27, %v3522_v2  ;;  %v3596_v16 = vmul.f32 %v8776_v34, %v3521_v6  ;;  %v3734_v50 = vmax.f32 %v3670_v43, 0.0 }
 0x4fe   :  { %6559 = vrsqrt.f32 %v3455_v61  ;;  %v3034_v1 = vpop.xlane.xlu1 %3033  ;;  %v3393_v48 = vmul.f32 %v8843_v3, %v8843_v3  ;;  %v3733_v28 = vmax.f32 %v3669_v14, 0.0 }
 0x4ff   :  { %v3223_v63 = vpop.xlane.xlu0 %3222  ;;  %v6556_v39 = vpop.eup %6555  ;;  %v3456_v31 = vadd.f32 1e-05, %v3424_v11  ;;  %v8855_v0 = vmul.f32 0.00390625, %v3034_v1  ;;  %v3672_v53 = vadd.f32 %v8788_v30, %v3597_v46  ;;  %v3671_v42 = vadd.f32 %v8784_v25, %v3596_v16 }
 0x500   :  { %v3297_v20 = vmul.f32 0.00390625, %v3223_v63  ;;  %v3524_v9 = vmul.f32 %v6556_v39, %v3332_v18  ;;  %v3523_v49 = vmul.f32 %v6556_v39, %v3331_v52  ;;  %v3335_v46 = vsub.f32 %v8474_v13, %v8819_v56 }
 0x501   :  { %6561 = vrsqrt.f32 %v3456_v31  ;;  %v3736_v4 = vmax.f32 %v3672_v53, 0.0  ;;  %v3735_v24 = vmax.f32 %v3671_v42, 0.0  ;;  %v3394_v7 = vmul.f32 %v8855_v0, %v8855_v0 }
 0x502   :  { %v3425_v37 = vsub.f32 %v3297_v20, %v3393_v48  ;;  %v3226_v45 = vpop.xlane.xlu1 %3225  ;;  %v3599_v21 = vmul.f32 %v8781_v27, %v3524_v9  ;;  %v3598_v61 = vmul.f32 %v8776_v34, %v3523_v49  ;;  %v3336_v42 = vsub.f32 %v8477_v40, %v8819_v56 }
 0x503   :  { %v6558_v51 = vpop.eup %6557  ;;  %v3298_v44 = vmul.f32 0.00390625, %v3226_v45  ;;  %v3794_v2 = vpack.c.bf16 %v3736_v4, %v3734_v50  ;;  %v3793_v38 = vpack.c.bf16 %v3735_v24, %v3733_v28 }
 0x504   :  { %v3457_v33 = vadd.f32 1e-05, %v3425_v37  ;;  %v3037_v60 = vpop.xlane.xlu0 %3036  ;;  %v3526_v19 = vmul.f32 %v6558_v51, %v3334_v32  ;;  %v3525_v18 = vmul.f32 %v6558_v51, %v3333_v29  ;;  %v3674_v43 = vadd.f32 %v8788_v30, %v3599_v21 }
 0x505   :  { %v3426_v52 = vsub.f32 %v3298_v44, %v3394_v7  ;;  %v8867_v6 = vmul.f32 0.00390625, %v3037_v60  ;;  %3997 = vmatprep.mubr.bf16.mxu1 %v3794_v2  ;;  %v3673_v63 = vadd.f32 %v8784_v25, %v3598_v61  ;;  %v3337_v32 = vsub.f32 %v8486_v12, %v8833_v54 }
 0x506   :  { %6563 = vrsqrt.f32 %v3457_v33  ;;  %v3601_v11 = vmul.f32 %v8781_v27, %v3526_v19  ;;  %3998 = vmatmul.mubr.bf16.gmra.mxu1 %v3793_v38  ;;  %v3600_v31 = vmul.f32 %v8776_v34, %v3525_v18  ;;  %v3738_v9 = vmax.f32 %v3674_v43, 0.0 }
 0x507   :  { %v3458_v1 = vadd.f32 1e-05, %v3426_v52  ;;  %v3395_v48 = vmul.f32 %v8867_v6, %v8867_v6  ;;  %v3737_v50 = vmax.f32 %v3673_v63, 0.0  ;;  %v3338_v51 = vsub.f32 %v8489_v10, %v8833_v54 }
 0x508   :  { %v3040_v16 = vpop.xlane.xlu1 %3039  ;;  %v3229_v14 = vpop.xlane.xlu0 %3228  ;;  %v3676_v39 = vadd.f32 %v8788_v30, %v3601_v11  ;;  %v3675_v13 = vadd.f32 %v8784_v25, %v3600_v31 }
 0x509   :  { %6565 = vrsqrt.f32 %v3458_v1  ;;  %v8876_v29 = vmul.f32 0.00390625, %v3040_v16  ;;  %v3299_v20 = vmul.f32 0.00390625, %v3229_v14  ;;  %v3339_v16 = vsub.f32 %v8498_v23, %v8843_v3 }
 0x50a   :  { %v3740_v49 = vmax.f32 %v3676_v39, 0.0  ;;  %v3739_v28 = vmax.f32 %v3675_v13, 0.0  ;;  %v3342_v23 = vsub.f32 %v8513_v62, %v8855_v0 }
 0x50b   :  { %v6560_v53 = vpop.eup %6559  ;;  %v3427_v37 = vsub.f32 %v3299_v20, %v3395_v48  ;;  %v3396_v40 = vmul.f32 %v8876_v29, %v8876_v29  ;;  %v3340_v48 = vsub.f32 %v8501_v35, %v8843_v3 }
 0x50c   :  { %v3232_v45 = vpop.xlane.xlu1 %3231  ;;  %v3796_v4 = vpack.c.bf16 %v3740_v49, %v3738_v9  ;;  %v3528_v24 = vmul.f32 %v6560_v53, %v3336_v42  ;;  %v3527_v21 = vmul.f32 %v6560_v53, %v3335_v46  ;;  %v3795_v12 = vpack.c.bf16 %v3739_v28, %v3737_v50 }
 0x50d   :  { %v3459_v33 = vadd.f32 1e-05, %v3427_v37  ;;  %v3300_v56 = vmul.f32 0.00390625, %v3232_v45  ;;  %v3043_v7 = vpop.xlane.xlu0 %3042  ;;  %v3341_v42 = vsub.f32 %v8510_v36, %v8855_v0 }
 0x50e   :  { %v6562_v44 = vpop.eup %6561  ;;  %v8889_v61 = vmul.f32 0.00390625, %v3043_v7  ;;  %4005 = vmatprep.mubr.bf16.mxu1 %v3796_v4  ;;  %v3603_v60 = vmul.f32 %v8781_v27, %v3528_v24  ;;  %v3602_v2 = vmul.f32 %v8776_v34, %v3527_v21  ;;  %v3343_v7 = vsub.f32 %v8522_v26, %v8867_v6 }
 0x50f   :  { %6567 = vrsqrt.f32 %v3459_v33  ;;  %v3428_v38 = vsub.f32 %v3300_v56, %v3396_v40  ;;  %v3530_v19 = vmul.f32 %v6562_v44, %v3338_v51  ;;  %v3529_v52 = vmul.f32 %v6562_v44, %v3337_v32  ;;  %4006 = vmatmul.mubr.bf16.gmra.mxu1 %v3795_v12 }
 0x510   :  { %v3678_v10 = vadd.f32 %v8788_v30, %v3603_v60  ;;  %v3677_v63 = vadd.f32 %v8784_v25, %v3602_v2  ;;  %v3397_v39 = vmul.f32 %v8889_v61, %v8889_v61 }
 0x511   :  { %v3460_v54 = vadd.f32 1e-05, %v3428_v38  ;;  %v3046_v18 = vpop.xlane.xlu1 %3045  ;;  %v3235_v11 = vpop.xlane.xlu0 %3234  ;;  %v3605_v43 = vmul.f32 %v8781_v27, %v3530_v19  ;;  %v3604_v1 = vmul.f32 %v8776_v34, %v3529_v52 }
 0x512   :  { %v8899_v14 = vmul.f32 0.00390625, %v3046_v18  ;;  %v3301_v31 = vmul.f32 0.00390625, %v3235_v11  ;;  %v3742_v49 = vmax.f32 %v3678_v10, 0.0  ;;  %v3741_v37 = vmax.f32 %v3677_v63, 0.0 }
 0x513   :  { %v6564_v46 = vpop.eup %6563  ;;  %6569 = vrsqrt.f32 %v3460_v54  ;;  %v3680_v20 = vadd.f32 %v8788_v30, %v3605_v43  ;;  %v3679_v53 = vadd.f32 %v8784_v25, %v3604_v1  ;;  %v3344_v43 = vsub.f32 %v8525_v55, %v8867_v6 }
 0x514   :  { %v3429_v9 = vsub.f32 %v3301_v31, %v3397_v39  ;;  %v3532_v45 = vmul.f32 %v6564_v46, %v3340_v48  ;;  %v3398_v3 = vmul.f32 %v8899_v14, %v8899_v14  ;;  %v3531_v21 = vmul.f32 %v6564_v46, %v3339_v16 }
 0x515   :  { %v3238_v13 = vpop.xlane.xlu1 %3237  ;;  %v3744_v32 = vmax.f32 %v3680_v20, 0.0  ;;  %v3743_v50 = vmax.f32 %v3679_v53, 0.0  ;;  %v3345_v46 = vsub.f32 %v8534_v5, %v8876_v29  ;;  %v3346_v16 = vsub.f32 %v8537_v22, %v8876_v29 }
 0x516   :  { %v6566_v4 = vpop.eup %6565  ;;  %v3461_v35 = vadd.f32 1e-05, %v3429_v9  ;;  %v3302_v28 = vmul.f32 0.00390625, %v3238_v13  ;;  %v3049_v24 = vpop.xlane.xlu0 %3048  ;;  %v3607_v40 = vmul.f32 %v8781_v27, %v3532_v45  ;;  %v3606_v19 = vmul.f32 %v8776_v34, %v3531_v21 }
 0x517   :  { %v8913_v51 = vmul.f32 0.00390625, %v3049_v24  ;;  %v3798_v36 = vpack.c.bf16 %v3744_v32, %v3742_v49  ;;  %v3797_v33 = vpack.c.bf16 %v3743_v50, %v3741_v37  ;;  %v3534_v62 = vmul.f32 %v6566_v4, %v3342_v23 }
 0x518   :  { %6571 = vrsqrt.f32 %v3461_v35  ;;  %v3430_v0 = vsub.f32 %v3302_v28, %v3398_v3  ;;  %v3533_v56 = vmul.f32 %v6566_v4, %v3341_v42  ;;  %v3682_v38 = vadd.f32 %v8788_v30, %v3607_v40 }
 0x519   :  { %4013 = vmatprep.mubr.bf16.mxu1 %v3798_v36  ;;  %v3609_v44 = vmul.f32 %v8781_v27, %v3534_v62  ;;  %v3399_v54 = vmul.f32 %v8913_v51, %v8913_v51  ;;  %v3681_v1 = vadd.f32 %v8784_v25, %v3606_v19  ;;  %v3347_v35 = vsub.f32 %v8546_v41, %v8889_v61 }
 0x51a   :  { %v3462_v12 = vadd.f32 1e-05, %v3430_v0  ;;  %v3052_v60 = vpop.xlane.xlu1 %3051  ;;  %v3241_v2 = vpop.xlane.xlu0 %3240  ;;  %4014 = vmatmul.mubr.bf16.gmra.mxu1 %v3797_v33  ;;  %v3608_v52 = vmul.f32 %v8776_v34, %v3533_v56  ;;  %v3746_v31 = vmax.f32 %v3682_v38, 0.0  ;;  %v3348_v0 = vsub.f32 %v8549_v58, %v8889_v61 }
 0x51b   :  { %v8922_v10 = vmul.f32 0.00390625, %v3052_v60  ;;  %v3303_v18 = vmul.f32 0.00390625, %v3241_v2  ;;  %v3684_v26 = vadd.f32 %v8788_v30, %v3609_v44  ;;  %v3745_v53 = vmax.f32 %v3681_v1, 0.0 }
 0x51c   :  { %v6568_v11 = vpop.eup %6567  ;;  %6573 = vrsqrt.f32 %v3462_v12  ;;  %v3683_v63 = vadd.f32 %v8784_v25, %v3608_v52  ;;  %v3349_v2 = vsub.f32 %v8558_v8, %v8899_v14  ;;  %v3350_v8 = vsub.f32 %v8561_v59, %v8899_v14 }
 0x51d   :  { %v3431_v39 = vsub.f32 %v3303_v18, %v3399_v54  ;;  %v3748_v20 = vmax.f32 %v3684_v26, 0.0  ;;  %v3536_v23 = vmul.f32 %v6568_v11, %v3344_v43  ;;  %v3400_v55 = vmul.f32 %v8922_v10, %v8922_v10 }
 0x51e   :  { %v3244_v48 = vpop.xlane.xlu1 %3243  ;;  %v3747_v42 = vmax.f32 %v3683_v63, 0.0  ;;  %v3055_v49 = vpop.xlane.xlu0 %3054  ;;  %v3535_v13 = vmul.f32 %v6568_v11, %v3343_v7 }
 0x51f   :  { %v3463_v9 = vadd.f32 1e-05, %v3431_v39  ;;  %v3304_v6 = vmul.f32 0.00390625, %v3244_v48  ;;  %v8937_v37 = vmul.f32 0.00390625, %v3055_v49  ;;  %v3800_v5 = vpack.c.bf16 %v3748_v20, %v3746_v31 }
 0x520   :  { %v6570_v32 = vpop.eup %6569  ;;  %v3799_v50 = vpack.c.bf16 %v3747_v42, %v3745_v53  ;;  %v3611_v22 = vmul.f32 %v8781_v27, %v3536_v23  ;;  %v3610_v33 = vmul.f32 %v8776_v34, %v3535_v13 }
 0x521   :  { %6575 = vrsqrt.f32 %v3463_v9  ;;  %v3432_v29 = vsub.f32 %v3304_v6, %v3400_v55  ;;  %v3538_v45 = vmul.f32 %v6570_v32, %v3346_v16  ;;  %v3537_v4 = vmul.f32 %v6570_v32, %v3345_v46  ;;  %4021 = vmatprep.mubr.bf16.mxu1 %v3800_v5 }
 0x522   :  { %v3686_v3 = vadd.f32 %v8788_v30, %v3611_v22  ;;  %v3058_v24 = vpop.xlane.xlu1 %3057  ;;  %v3247_v21 = vpop.xlane.xlu0 %3246  ;;  %4022 = vmatmul.mubr.bf16.gmra.mxu1 %v3799_v50  ;;  %v3401_v41 = vmul.f32 %v8937_v37, %v8937_v37  ;;  %v3685_v12 = vadd.f32 %v8784_v25, %v3610_v33  ;;  %v3351_v32 = vsub.f32 %v8570_v15, %v8913_v51 }
 0x523   :  { %v3464_v28 = vadd.f32 1e-05, %v3432_v29  ;;  %v3613_v36 = vmul.f32 %v8781_v27, %v3538_v45  ;;  %v3612_v62 = vmul.f32 %v8776_v34, %v3537_v4  ;;  %v8948_v40 = vmul.f32 0.00390625, %v3058_v24 }
 0x524   :  { %v3305_v56 = vmul.f32 0.00390625, %v3247_v21  ;;  %v3750_v61 = vmax.f32 %v3686_v3, 0.0  ;;  %v3749_v18 = vmax.f32 %v3685_v12, 0.0  ;;  %v3352_v5 = vsub.f32 %v8573_v47, %v8913_v51  ;;  %v10220_v12 = vld [vmem:[#allocation27_spill] sm:$0xff] }
 0x525   :  { %v6572_v7 = vpop.eup %6571  ;;  %6577 = vrsqrt.f32 %v3464_v28  ;;  %v3688_v44 = vadd.f32 %v8788_v30, %v3613_v36  ;;  %v3687_v60 = vadd.f32 %v8784_v25, %v3612_v62  ;;  %v3402_v58 = vmul.f32 %v8948_v40, %v8948_v40 }
 0x526   :  { %v3433_v38 = vsub.f32 %v3305_v56, %v3401_v41  ;;  %v3250_v19 = vpop.xlane.xlu1 %3249  ;;  %v3061_v52 = vpop.xlane.xlu0 %3060  ;;  %v3540_v11 = vmul.f32 %v6572_v7, %v3348_v0  ;;  %v3539_v46 = vmul.f32 %v6572_v7, %v3347_v35  ;;  %v3354_v45 = vsub.f32 %v8585_v57, %v8922_v10 }
 0x527   :  { %v3752_v54 = vmax.f32 %v3688_v44, 0.0  ;;  %v3751_v26 = vmax.f32 %v3687_v60, 0.0  ;;  %v3306_v1 = vmul.f32 0.00390625, %v3250_v19  ;;  %v8959_v63 = vmul.f32 0.00390625, %v3061_v52 }
 0x528   :  { %v3465_v43 = vadd.f32 1e-05, %v3433_v38  ;;  %v3615_v48 = vmul.f32 %v8781_v27, %v3540_v11  ;;  %v3614_v14 = vmul.f32 %v8776_v34, %v3539_v46  ;;  %v3353_v44 = vsub.f32 %v8582_v17, %v8922_v10  ;;  %v10221_v17 = vld [vmem:[#allocation28_spill] sm:$0xff] }
 0x529   :  { %v6574_v16 = vpop.eup %6573  ;;  %v3802_v39 = vpack.c.bf16 %v3752_v54, %v3750_v61  ;;  %v3801_v31 = vpack.c.bf16 %v3751_v26, %v3749_v18  ;;  %v3434_v20 = vsub.f32 %v3306_v1, %v3402_v58  ;;  %v3403_v42 = vmul.f32 %v8959_v63, %v8959_v63 }
 0x52a   :  { %6579 = vrsqrt.f32 %v3465_v43  ;;  %v3064_v53 = vpop.xlane.xlu1 %3063  ;;  %v3253_v23 = vpop.xlane.xlu0 %3252  ;;  %v3542_v9 = vmul.f32 %v6574_v16, %v3350_v8  ;;  %v3690_v55 = vadd.f32 %v8788_v30, %v3615_v48  ;;  %v3541_v6 = vmul.f32 %v6574_v16, %v3349_v2  ;;  %v10222_v8 = vld [vmem:[#allocation29_spill] sm:$0xff] }
 0x52b   :  { %4029 = vmatprep.mubr.bf16.mxu1 %v3802_v39  ;;  %v3466_v49 = vadd.f32 1e-05, %v3434_v20  ;;  %v8967_v13 = vmul.f32 0.00390625, %v3064_v53  ;;  %v3307_v59 = vmul.f32 0.00390625, %v3253_v23  ;;  %v3689_v47 = vadd.f32 %v8784_v25, %v3614_v14 }
 0x52c   :  { %4030 = vmatmul.mubr.bf16.gmra.mxu1 %v3801_v31  ;;  %v3617_v50 = vmul.f32 %v8781_v27, %v3542_v9  ;;  %v3616_v22 = vmul.f32 %v8776_v34, %v3541_v6  ;;  %v3754_v35 = vmax.f32 %v3690_v55, 0.0  ;;  %v3355_v60 = vsub.f32 %v10220_v12, %v8937_v37  ;;  %v10223_v31 = vld [vmem:[#allocation30_spill] sm:$0xff]  ;;  %v10226_v12 = vld [vmem:[#allocation32_spill] sm:$0xff] }
 0x52d   :  { %6581 = vrsqrt.f32 %v3466_v49  ;;  %v3435_v4 = vsub.f32 %v3307_v59, %v3403_v42  ;;  %v3404_v3 = vmul.f32 %v8967_v13, %v8967_v13  ;;  %v3753_v0 = vmax.f32 %v3689_v47, 0.0 }
 0x52e   :  { %v6576_v29 = vpop.eup %6575  ;;  %v3256_v28 = vpop.xlane.xlu1 %3255  ;;  %v3692_v15 = vadd.f32 %v8788_v30, %v3617_v50  ;;  %v3691_v51 = vadd.f32 %v8784_v25, %v3616_v22  ;;  %v3356_v10 = vsub.f32 %v10221_v17, %v8937_v37  ;;  %v3357_v39 = vsub.f32 %v10222_v8, %v8948_v40 }
 0x52f   :  { %v3067_v24 = vpop.xlane.xlu0 %3066  ;;  %v3467_v21 = vadd.f32 1e-05, %v3435_v4  ;;  %v3308_v36 = vmul.f32 0.00390625, %v3256_v28  ;;  %v3544_v62 = vmul.f32 %v6576_v29, %v3352_v5  ;;  %v3543_v56 = vmul.f32 %v6576_v29, %v3351_v32  ;;  %v10224_v29 = vld [vmem:[#allocation33_spill] sm:$0xff]  ;;  %v10225_v4 = vld [vmem:[#allocation31_spill] sm:$0xff] }
 0x530   :  { %v8983_v33 = vmul.f32 0.00390625, %v3067_v24  ;;  %v3756_v57 = vmax.f32 %v3692_v15, 0.0  ;;  %v3755_v41 = vmax.f32 %v3691_v51, 0.0  ;;  %v3358_v48 = vsub.f32 %v10223_v31, %v8948_v40 }
 0x531   :  { %6583 = vrsqrt.f32 %v3467_v21  ;;  %v3436_v2 = vsub.f32 %v3308_v36, %v3404_v3  ;;  %v3619_v43 = vmul.f32 %v8781_v27, %v3544_v62  ;;  %v3618_v16 = vmul.f32 %v8776_v34, %v3543_v56 }
 0x532   :  { %v6578_v7 = vpop.eup %6577  ;;  %v3070_v38 = vpop.xlane.xlu1 %3069  ;;  %v3405_v58 = vmul.f32 %v8983_v33, %v8983_v33  ;;  %v3804_v19 = vpack.c.bf16 %v3756_v57, %v3754_v35  ;;  %v3803_v52 = vpack.c.bf16 %v3755_v41, %v3753_v0  ;;  %v3360_v35 = vsub.f32 %v10225_v4, %v8959_v63 }
 0x533   :  { %v3259_v61 = vpop.xlane.xlu0 %3258  ;;  %v3546_v54 = vmul.f32 %v6578_v7, %v3354_v45  ;;  %v3468_v18 = vadd.f32 1e-05, %v3436_v2  ;;  %v8991_v26 = vmul.f32 0.00390625, %v3070_v38  ;;  %v3545_v46 = vmul.f32 %v6578_v7, %v3353_v44  ;;  %v10227_v38 = vld [vmem:[#allocation35_spill] sm:$0xff] }
 0x534   :  { %v3309_v11 = vmul.f32 0.00390625, %v3259_v61  ;;  %4037 = vmatprep.mubr.bf16.mxu1 %v3804_v19  ;;  %v3694_v9 = vadd.f32 %v8788_v30, %v3619_v43  ;;  %v3693_v40 = vadd.f32 %v8784_v25, %v3618_v16  ;;  %v3359_v45 = vsub.f32 %v10224_v29, %v8959_v63 }
 0x535   :  { %v3621_v1 = vmul.f32 %v8781_v27, %v3546_v54  ;;  %6585 = vrsqrt.f32 %v3468_v18  ;;  %4038 = vmatmul.mubr.bf16.gmra.mxu1 %v3803_v52  ;;  %v3406_v42 = vmul.f32 %v8991_v26, %v8991_v26  ;;  %v3620_v6 = vmul.f32 %v8776_v34, %v3545_v46  ;;  %v10228_v46 = vld [vmem:[#allocation37_spill] sm:$0xff] }
 0x536   :  { %v3437_v20 = vsub.f32 %v3309_v11, %v3405_v58  ;;  %v3262_v37 = vpop.xlane.xlu1 %3261  ;;  %v3758_v32 = vmax.f32 %v3694_v9, 0.0  ;;  %v3757_v21 = vmax.f32 %v3693_v40, 0.0  ;;  %v3361_v2 = vsub.f32 %v10226_v12, %v8967_v13 }
 0x537   :  { %v6580_v53 = vpop.eup %6579  ;;  %v3073_v23 = vpop.xlane.xlu0 %3072  ;;  %v3696_v55 = vadd.f32 %v8788_v30, %v3621_v1  ;;  %v3310_v59 = vmul.f32 0.00390625, %v3262_v37  ;;  %v3695_v50 = vadd.f32 %v8784_v25, %v3620_v6  ;;  %v3362_v58 = vsub.f32 %v10227_v38, %v8967_v13 }
 0x538   :  { %v3469_v49 = vadd.f32 1e-05, %v3437_v20  ;;  %v9007_v14 = vmul.f32 0.00390625, %v3073_v23  ;;  %v3548_v22 = vmul.f32 %v6580_v53, %v3356_v10  ;;  %v3547_v7 = vmul.f32 %v6580_v53, %v3355_v60 }
 0x539   :  { %v3760_v5 = vmax.f32 %v3696_v55, 0.0  ;;  %v3438_v3 = vsub.f32 %v3310_v59, %v3406_v42  ;;  %v3759_v36 = vmax.f32 %v3695_v50, 0.0  ;;  %v3363_v16 = vsub.f32 %v10228_v46, %v8983_v33 }
 0x53a   :  { %6587 = vrsqrt.f32 %v3469_v49  ;;  %v6582_v28 = vpop.eup %6581  ;;  %v3076_v24 = vpop.xlane.xlu1 %3075  ;;  %v3407_v15 = vmul.f32 %v9007_v14, %v9007_v14  ;;  %v3623_v63 = vmul.f32 %v8781_v27, %v3548_v22  ;;  %v3622_v43 = vmul.f32 %v8776_v34, %v3547_v7 }
 0x53b   :  { %v3265_v47 = vpop.xlane.xlu0 %3264  ;;  %v3806_v51 = vpack.c.bf16 %v3760_v5, %v3758_v32  ;;  %v3470_v62 = vadd.f32 1e-05, %v3438_v3  ;;  %v9017_v57 = vmul.f32 0.00390625, %v3076_v24  ;;  %v3550_v41 = vmul.f32 %v6582_v28, %v3358_v48  ;;  %v10229_v48 = vld [vmem:[#allocation34_spill] sm:$0xff]  ;;  %v10230_v3 = vld [vmem:[#allocation36_spill] sm:$0xff]  ;;  %v10231_v24 = vld [vmem:[#allocation39_spill] sm:$0xff] }
 0x53c   :  { %v3311_v0 = vmul.f32 0.00390625, %v3265_v47  ;;  %v3805_v56 = vpack.c.bf16 %v3759_v36, %v3757_v21  ;;  %v3549_v44 = vmul.f32 %v6582_v28, %v3357_v39  ;;  %v3698_v60 = vadd.f32 %v8788_v30, %v3623_v63 }
 0x53d   :  { %4045 = vmatprep.mubr.bf16.mxu1 %v3806_v51  ;;  %6589 = vrsqrt.f32 %v3470_v62  ;;  %v3408_v52 = vmul.f32 %v9017_v57, %v9017_v57  ;;  %v3625_v11 = vmul.f32 %v8781_v27, %v3550_v41  ;;  %v3697_v39 = vadd.f32 %v8784_v25, %v3622_v43 }
 0x53e   :  { %v3439_v61 = vsub.f32 %v3311_v0, %v3407_v15  ;;  %v6584_v19 = vpop.eup %6583  ;;  %v3268_v54 = vpop.xlane.xlu1 %3267  ;;  %4046 = vmatmul.mubr.bf16.gmra.mxu1 %v3805_v56  ;;  %v3624_v13 = vmul.f32 %v8776_v34, %v3549_v44  ;;  %v3364_v20 = vsub.f32 %v10229_v48, %v8983_v33  ;;  %v3762_v42 = vmax.f32 %v3698_v60, 0.0 }
 0x53f   :  { %v3079_v18 = vpop.xlane.xlu0 %3078  ;;  %v3312_v10 = vmul.f32 0.00390625, %v3268_v54  ;;  %v3700_v8 = vadd.f32 %v8788_v30, %v3625_v11  ;;  %v3552_v31 = vmul.f32 %v6584_v19, %v3360_v35  ;;  %v3761_v59 = vmax.f32 %v3697_v39, 0.0 }
 0x540   :  { %v3471_v17 = vadd.f32 1e-05, %v3439_v61  ;;  %v9029_v1 = vmul.f32 0.00390625, %v3079_v18  ;;  %v3699_v49 = vadd.f32 %v8784_v25, %v3624_v13  ;;  %v3551_v35 = vmul.f32 %v6584_v19, %v3359_v45  ;;  %v10233_v19 = vld [vmem:[#allocation38_spill] sm:$0xff] }
 0x541   :  { %v3440_v53 = vsub.f32 %v3312_v10, %v3408_v52  ;;  %v3764_v6 = vmax.f32 %v3700_v8, 0.0  ;;  %v3627_v4 = vmul.f32 %v8781_v27, %v3552_v31  ;;  %v3365_v28 = vsub.f32 %v10230_v3, %v8991_v26 }
 0x542   :  { %6591 = vrsqrt.f32 %v3471_v17  ;;  %v6586_v37 = vpop.eup %6585  ;;  %v3082_v23 = vpop.xlane.xlu1 %3081  ;;  %v3409_v9 = vmul.f32 %v9029_v1, %v9029_v1  ;;  %v3763_v29 = vmax.f32 %v3699_v49, 0.0  ;;  %v3366_v15 = vsub.f32 %v10231_v24, %v8991_v26  ;;  %v10232_v26 = vld [vmem:[#allocation41_spill] sm:$0xff] }
 0x543   :  { %v3271_v55 = vpop.xlane.xlu0 %3270  ;;  %v3472_v40 = vadd.f32 1e-05, %v3440_v53  ;;  %v9041_v32 = vmul.f32 0.00390625, %v3082_v23  ;;  %v3554_v50 = vmul.f32 %v6586_v37, %v3362_v58  ;;  %v3808_v22 = vpack.c.bf16 %v3764_v6, %v3762_v42 }
 0x544   :  { %v3313_v5 = vmul.f32 0.00390625, %v3271_v55  ;;  %v3807_v62 = vpack.c.bf16 %v3763_v29, %v3761_v59  ;;  %v3702_v45 = vadd.f32 %v8788_v30, %v3627_v4  ;;  %v3553_v44 = vmul.f32 %v6586_v37, %v3361_v2 }
 0x545   :  { %6593 = vrsqrt.f32 %v3472_v40  ;;  %4053 = vmatprep.mubr.bf16.mxu1 %v3808_v22  ;;  %v3410_v21 = vmul.f32 %v9041_v32, %v9041_v32  ;;  %v3629_v41 = vmul.f32 %v8781_v27, %v3554_v50  ;;  %v3367_v12 = vsub.f32 %v10232_v26, %v9007_v14 }
 0x546   :  { %v3441_v47 = vsub.f32 %v3313_v5, %v3409_v9  ;;  %v3274_v36 = vpop.xlane.xlu1 %3273  ;;  %4054 = vmatmul.mubr.bf16.gmra.mxu1 %v3807_v62  ;;  %v3626_v58 = vmul.f32 %v8776_v34, %v3551_v35  ;;  %v3368_v52 = vsub.f32 %v10233_v19, %v9007_v14  ;;  %v3766_v18 = vmax.f32 %v3702_v45, 0.0  ;;  %v10235_v9 = vld [vmem:[#allocation43_spill] sm:$0xff] }
 0x547   :  { %v6588_v51 = vpop.eup %6587  ;;  %v3085_v0 = vpop.xlane.xlu0 %3084  ;;  %v3314_v63 = vmul.f32 0.00390625, %v3274_v36  ;;  %v3704_v38 = vadd.f32 %v8788_v30, %v3629_v41  ;;  %v3628_v10 = vmul.f32 %v8776_v34, %v3553_v44  ;;  %v3370_v55 = vsub.f32 %v10235_v9, %v9017_v57 }
 0x548   :  { %v3473_v56 = vadd.f32 1e-05, %v3441_v47  ;;  %v9052_v7 = vmul.f32 0.00390625, %v3085_v0  ;;  %v3556_v61 = vmul.f32 %v6588_v51, %v3364_v20  ;;  %v3701_v13 = vadd.f32 %v8784_v25, %v3626_v58  ;;  %v10234_v20 = vld [vmem:[#allocation40_spill] sm:$0xff]  ;;  %v10237_v0 = vld [vmem:[#allocation42_spill] sm:$0xff] }
 0x549   :  { %v3442_v54 = vsub.f32 %v3314_v63, %v3410_v21  ;;  %v3768_v17 = vmax.f32 %v3704_v38, 0.0  ;;  %v3369_v53 = vsub.f32 %v10234_v20, %v9017_v57  ;;  %v3703_v37 = vadd.f32 %v8784_v25, %v3628_v10 }
 0x54a   :  { %6595 = vrsqrt.f32 %v3473_v56  ;;  %v6590_v11 = vpop.eup %6589  ;;  %v3088_v60 = vpop.xlane.xlu1 %3087  ;;  %v3411_v2 = vmul.f32 %v9052_v7, %v9052_v7  ;;  %v3631_v23 = vmul.f32 %v8781_v27, %v3556_v61  ;;  %v3765_v49 = vmax.f32 %v3701_v13, 0.0 }
 0x54b   :  { %v3277_v43 = vpop.xlane.xlu0 %3276  ;;  %v3474_v8 = vadd.f32 1e-05, %v3442_v54  ;;  %v9064_v39 = vmul.f32 0.00390625, %v3088_v60  ;;  %v3558_v48 = vmul.f32 %v6590_v11, %v3366_v15  ;;  %v3810_v42 = vpack.c.bf16 %v3768_v17, %v3766_v18  ;;  %v10236_v15 = vld [vmem:[#allocation45_spill] sm:$0xff]  ;;  %v10238_v60 = vld [vmem:[#allocation44_spill] sm:$0xff] }
 0x54c   :  { %v3315_v31 = vmul.f32 0.00390625, %v3277_v43  ;;  %v3767_v50 = vmax.f32 %v3703_v37, 0.0  ;;  %v3706_v4 = vadd.f32 %v8788_v30, %v3631_v23  ;;  %v3555_v57 = vmul.f32 %v6588_v51, %v3363_v16  ;;  %v10239_v43 = vld [vmem:[#allocation47_spill] sm:$0xff] }
 0x54d   :  { %6597 = vrsqrt.f32 %v3474_v8  ;;  %4061 = vmatprep.mubr.bf16.mxu1 %v3810_v42  ;;  %v3412_v40 = vmul.f32 %v9064_v39, %v9064_v39  ;;  %v3633_v29 = vmul.f32 %v8781_v27, %v3558_v48  ;;  %v3371_v47 = vsub.f32 %v10236_v15, %v9029_v1 }
 0x54e   :  { %v3443_v6 = vsub.f32 %v3315_v31, %v3411_v2  ;;  %v3280_v5 = vpop.xlane.xlu1 %3279  ;;  %v3809_v21 = vpack.c.bf16 %v3767_v50, %v3765_v49  ;;  %v3557_v62 = vmul.f32 %v6590_v11, %v3365_v28  ;;  %v3372_v41 = vsub.f32 %v10237_v0, %v9029_v1 }
 0x54f   :  { %v6592_v59 = vpop.eup %6591  ;;  %v3091_v22 = vpop.xlane.xlu0 %3090  ;;  %v3316_v3 = vmul.f32 0.00390625, %v3280_v5  ;;  %v3708_v36 = vadd.f32 %v8788_v30, %v3633_v29  ;;  %v3770_v56 = vmax.f32 %v3706_v4, 0.0  ;;  %v3630_v51 = vmul.f32 %v8776_v34, %v3555_v57 }
 0x550   :  { %v3475_v35 = vadd.f32 1e-05, %v3443_v6  ;;  %v9076_v24 = vmul.f32 0.00390625, %v3091_v22  ;;  %4062 = vmatmul.mubr.bf16.gmra.mxu1 %v3809_v21  ;;  %v3632_v38 = vmul.f32 %v8776_v34, %v3557_v62  ;;  %v3560_v1 = vmul.f32 %v6592_v59, %v3368_v52 }
 0x551   :  { %v3444_v45 = vsub.f32 %v3316_v3, %v3412_v40  ;;  %v3772_v16 = vmax.f32 %v3708_v36, 0.0  ;;  %v3705_v54 = vadd.f32 %v8784_v25, %v3630_v51  ;;  %v3373_v2 = vsub.f32 %v10238_v60, %v9041_v32  ;;  %v10240_v3 = vld [vmem:[#allocation46_spill] sm:$0xff] }
 0x552   :  { %6599 = vrsqrt.f32 %v3475_v35  ;;  %v6594_v63 = vpop.eup %6593  ;;  %v3094_v44 = vpop.xlane.xlu1 %3093  ;;  %v3413_v33 = vmul.f32 %v9076_v24, %v9076_v24  ;;  %v3707_v18 = vadd.f32 %v8784_v25, %v3632_v38  ;;  %v3374_v17 = vsub.f32 %v10239_v43, %v9041_v32 }
 0x553   :  { %v3283_v46 = vpop.xlane.xlu0 %3282  ;;  %v3476_v58 = vadd.f32 1e-05, %v3444_v45  ;;  %v9090_v28 = vmul.f32 0.00390625, %v3094_v44  ;;  %v3812_v19 = vpack.c.bf16 %v3772_v16, %v3770_v56  ;;  %v3562_v11 = vmul.f32 %v6594_v63, %v3370_v55  ;;  %v10241_v45 = vld [vmem:[#allocation49_spill] sm:$0xff] }
 0x554   :  { %v3317_v61 = vmul.f32 0.00390625, %v3283_v46  ;;  %v3769_v31 = vmax.f32 %v3705_v54, 0.0  ;;  %v3771_v48 = vmax.f32 %v3707_v18, 0.0  ;;  %v3635_v20 = vmul.f32 %v8781_v27, %v3560_v1  ;;  %v10242_v46 = vld [vmem:[#allocation48_spill] sm:$0xff]  ;;  %v10243_v54 = vld [vmem:[#allocation51_spill] sm:$0xff] }
 0x555   :  { %6601 = vrsqrt.f32 %v3476_v58  ;;  %4069 = vmatprep.mubr.bf16.mxu1 %v3812_v19  ;;  %v3414_v8 = vmul.f32 %v9090_v28, %v9090_v28  ;;  %v3637_v23 = vmul.f32 %v8781_v27, %v3562_v11  ;;  %v3559_v32 = vmul.f32 %v6592_v59, %v3367_v12 }
 0x556   :  { %v3445_v10 = vsub.f32 %v3317_v61, %v3413_v33  ;;  %v3286_v52 = vpop.xlane.xlu1 %3285  ;;  %v3811_v9 = vpack.c.bf16 %v3771_v48, %v3769_v31  ;;  %v3710_v55 = vadd.f32 %v8788_v30, %v3635_v20  ;;  %v3561_v6 = vmul.f32 %v6594_v63, %v3369_v53  ;;  %v10244_v31 = vld [vmem:[#allocation50_spill] sm:$0xff] }
 0x557   :  { %v6596_v13 = vpop.eup %6595  ;;  %v3318_v37 = vmul.f32 0.00390625, %v3286_v52  ;;  %v3712_v5 = vadd.f32 %v8788_v30, %v3637_v23  ;;  %v3634_v50 = vmul.f32 %v8776_v34, %v3559_v32  ;;  %v3376_v57 = vsub.f32 %v10240_v3, %v9052_v7  ;;  %v10245_v23 = vld [vmem:[#allocation53_spill] sm:$0xff] }
 0x558   :  { %v3477_v42 = vadd.f32 1e-05, %v3445_v10  ;;  %v3564_v49 = vmul.f32 %v6596_v13, %v3372_v41  ;;  %4070 = vmatmul.mubr.bf16.gmra.mxu1 %v3811_v9  ;;  %v3774_v29 = vmax.f32 %v3710_v55, 0.0  ;;  %v3636_v4 = vmul.f32 %v8776_v34, %v3561_v6 }
 0x559   :  { %v3446_v40 = vsub.f32 %v3318_v37, %v3414_v8  ;;  %v3563_v14 = vmul.f32 %v6596_v13, %v3371_v47  ;;  %v3776_v12 = vmax.f32 %v3712_v5, 0.0  ;;  %v3709_v59 = vadd.f32 %v8784_v25, %v3634_v50  ;;  %v10246_v50 = vld [vmem:[#allocation55_spill] sm:$0xff] }
 0x55a   :  { %6603 = vrsqrt.f32 %v3477_v42  ;;  %v6598_v22 = vpop.eup %6597  ;;  %v3639_v35 = vmul.f32 %v8781_v27, %v3564_v49  ;;  %v3711_v15 = vadd.f32 %v8784_v25, %v3636_v4  ;;  %v3375_v56 = vsub.f32 %v10241_v45, %v9052_v7 }
 0x55b   :  { %v3478_v26 = vadd.f32 1e-05, %v3446_v40  ;;  %v3566_v53 = vmul.f32 %v6598_v22, %v3374_v17  ;;  %v3565_v21 = vmul.f32 %v6598_v22, %v3373_v2  ;;  %v3638_v36 = vmul.f32 %v8776_v34, %v3563_v14 }
 0x55c   :  { %v3814_v62 = vpack.c.bf16 %v3776_v12, %v3774_v29  ;;  %v3714_v41 = vadd.f32 %v8788_v30, %v3639_v35  ;;  %v3773_v63 = vmax.f32 %v3709_v59, 0.0  ;;  %v3775_v44 = vmax.f32 %v3711_v15, 0.0 }
 0x55d   :  { %6605 = vrsqrt.f32 %v3478_v26  ;;  %v3641_v0 = vmul.f32 %v8781_v27, %v3566_v53  ;;  %v3640_v33 = vmul.f32 %v8776_v34, %v3565_v21  ;;  %v3377_v16 = vsub.f32 %v10242_v46, %v9064_v39  ;;  %v10247_v26 = vld [vmem:[#allocation52_spill] sm:$0xff]  ;;  %v6135_v46 = vld [vmem:[#allocation11 + $0x70] ss:$8 sps:$4 sm:$0xff]  }
 0x55e   :  { %4077 = vmatprep.mubr.bf16.mxu1 %v3814_v62  ;;  %v3813_v58 = vpack.c.bf16 %v3775_v44, %v3773_v63  ;;  %v3713_v61 = vadd.f32 %v8784_v25, %v3638_v36  ;;  %v3378_v7 = vsub.f32 %v10243_v54, %v9064_v39  ;;  %v3778_v18 = vmax.f32 %v3714_v41, 0.0 }
 0x55f   :  { %v6600_v47 = vpop.eup %6599  ;;  %v3716_v51 = vadd.f32 %v8788_v30, %v3641_v0  ;;  %v3715_v1 = vadd.f32 %v8784_v25, %v3640_v33  ;;  %v3380_v48 = vsub.f32 %v10244_v31, %v9076_v24  ;;  %v3379_v32 = vsub.f32 %v10245_v23, %v9076_v24 }
 0x560   :  { %v3568_v38 = vmul.f32 %v6600_v47, %v3376_v57  ;;  %v3567_v19 = vmul.f32 %v6600_v47, %v3375_v56  ;;  %4078 = vmatmul.mubr.bf16.gmra.mxu1 %v3813_v58  ;;  %v3777_v8 = vmax.f32 %v3713_v61, 0.0  ;;  %v3382_v22 = vsub.f32 %v10246_v50, %v9090_v28  ;;  %v6146_v58 = vld [vmem:[#allocation11 + $0x44] ss:$8 sps:$4 sm:$0xff]  }
 0x561   :  { %v3780_v11 = vmax.f32 %v3716_v51, 0.0  ;;  %v3779_v43 = vmax.f32 %v3715_v1, 0.0  ;;  %v3381_v24 = vsub.f32 %v10247_v26, %v9090_v28  ;;  %v6140_v51 = vld [vmem:[#allocation11 + $0x64] ss:$8 sps:$4 sm:$0xff]   ;;  %v9151_v1 = vld [vmem:[#allocation13 + $0x11] ss:$0 sm:$0xff] }
 0x562   :  { %v3643_v60 = vmul.f32 %v8781_v27, %v3568_v38  ;;  %v6602_v2 = vpop.eup %6601  ;;  %v3642_v52 = vmul.f32 %v8776_v34, %v3567_v19  ;;  %v6143_v38 = vld [vmem:[#allocation11 + $0x54] ss:$8 sps:$4 sm:$0xff]  }
 0x563   :  { %v3816_v17 = vpack.c.bf16 %v3780_v11, %v3778_v18  ;;  %v3570_v10 = vmul.f32 %v6602_v2, %v3378_v7  ;;  %v3569_v13 = vmul.f32 %v6602_v2, %v3377_v16  ;;  %v3815_v9 = vpack.c.bf16 %v3779_v43, %v3777_v8  ;;  %v6137_v16 = vld [vmem:[#allocation11 + $0x74] ss:$8 sps:$4 sm:$0xff]   ;;  %v6147_v2 = vld [vmem:[#allocation11 + $0x30] ss:$8 sps:$4 sm:$0xff]  }
 0x564   :  { %v3718_v39 = vadd.f32 %v8788_v30, %v3643_v60  ;;  %v3717_v40 = vadd.f32 %v8784_v25, %v3642_v52  ;;  %4745 = vmatprep.subr.bf16.mxu0 %v6137_v16  ;;  %v6149_v43 = vld [vmem:[#allocation11 + $0x34] ss:$8 sps:$4 sm:$0xff]  }
 0x565   :  { %4085 = vmatprep.mubr.bf16.mxu1 %v3816_v17  ;;  %v3645_v20 = vmul.f32 %v8781_v27, %v3570_v10  ;;  %v3644_v42 = vmul.f32 %v8776_v34, %v3569_v13  ;;  %4746 = vmatpush1.bf16.msra.mxu0 %v6135_v46  ;;  %v6158_v46 = vld [vmem:[#allocation11 + $0x4] ss:$8 sps:$4 sm:$0xff]  }
 0x566   :  { %v3782_v29 = vmax.f32 %v3718_v39, 0.0  ;;  %v3781_v3 = vmax.f32 %v3717_v40, 0.0  ;;  %4747 = vmatprep.subr.bf16.mxu0 %v6140_v51 }
 0x567   :  { %v6604_v37 = vpop.eup %6603  ;;  %v3720_v55 = vadd.f32 %v8788_v30, %v3645_v20  ;;  %v3719_v6 = vadd.f32 %v8784_v25, %v3644_v42 }
 0x568   :  { %v3572_v49 = vmul.f32 %v6604_v37, %v3380_v48  ;;  %v3571_v5 = vmul.f32 %v6604_v37, %v3379_v32  ;;  %4086 = vmatmul.mubr.bf16.gmra.mxu1 %v3815_v9  ;;  %v6150_v32 = vld [vmem:[#allocation11 + $0x20] ss:$8 sps:$4 sm:$0xff]   ;;  %v6152_v9 = vld [vmem:[#allocation11 + $0x24] ss:$8 sps:$4 sm:$0xff]  }
 0x569   :  { %v3784_v4 = vmax.f32 %v3720_v55, 0.0  ;;  %v3783_v12 = vmax.f32 %v3719_v6, 0.0 }
 0x56a   :  { %v3647_v35 = vmul.f32 %v8781_v27, %v3572_v49  ;;  %v6606_v14 = vpop.eup %6605  ;;  %v3646_v15 = vmul.f32 %v8776_v34, %v3571_v5 }
 0x56b   :  { %v3818_v59 = vpack.c.bf16 %v3784_v4, %v3782_v29  ;;  %v3574_v53 = vmul.f32 %v6606_v14, %v3382_v22  ;;  %v3573_v57 = vmul.f32 %v6606_v14, %v3381_v24  ;;  %v3817_v62 = vpack.c.bf16 %v3783_v12, %v3781_v3 }
 0x56c   :  { %v3722_v36 = vadd.f32 %v8788_v30, %v3647_v35  ;;  %v3721_v28 = vadd.f32 %v8784_v25, %v3646_v15 }
 0x56d   :  { %4093 = vmatprep.mubr.bf16.mxu1 %v3818_v59  ;;  %v3649_v21 = vmul.f32 %v8781_v27, %v3574_v53  ;;  %v3648_v0 = vmul.f32 %v8776_v34, %v3573_v57  ;;  %v6138_v34 = vld [vmem:[#allocation11 + $0x60] ss:$8 sps:$4 sm:$0xff]  }
 0x56e   :  { %v3786_v45 = vmax.f32 %v3722_v36, 0.0  ;;  %v3785_v33 = vmax.f32 %v3721_v28, 0.0  ;;  %4748 = vmatpush1.bf16.msra.mxu0 %v6138_v34  ;;  %v6153_v28 = vld [vmem:[#allocation11 + $0x10] ss:$8 sps:$4 sm:$0xff]  }
 0x56f   :  { %v3724_v41 = vadd.f32 %v8788_v30, %v3649_v21  ;;  %v3723_v47 = vadd.f32 %v8784_v25, %v3648_v0  ;;  %v6141_v30 = vld [vmem:[#allocation11 + $0x50] ss:$8 sps:$4 sm:$0xff]   ;;  %4749 = vmatprep.subr.bf16.mxu0 %v6143_v38  ;;  %v6144_v25 = vld [vmem:[#allocation11 + $0x40] ss:$8 sps:$4 sm:$0xff]  }
 0x570   :  { %4094 = vmatmul.mubr.bf16.gmra.mxu1 %v3817_v62 }
 0x571   :  { %v3788_v56 = vmax.f32 %v3724_v41, 0.0  ;;  %v3787_v63 = vmax.f32 %v3723_v47, 0.0  ;;  %v6155_v47 = vld [vmem:[#allocation11 + $0x14] ss:$8 sps:$4 sm:$0xff]  }
 0x572   :  { %4750 = vmatpush1.bf16.msra.mxu0 %v6141_v30 }
 0x573   :  { %v3820_v44 = vpack.c.bf16 %v3788_v56, %v3786_v45  ;;  %v3819_v27 = vpack.c.bf16 %v3787_v63, %v3785_v33  ;;  %4751 = vmatprep.subr.bf16.mxu0 %v6146_v58  ;;  %v6156_v33 = vld [vmem:[#allocation11] ss:$8 sps:$4 sm:$0xff]  }
 0x575   :  { %4101 = vmatprep.mubr.bf16.mxu1 %v3820_v44 }
 0x576   :  { %4752 = vmatpush1.bf16.msra.mxu0 %v6144_v25 }
 0x577   :  { %4753 = vmatprep.subr.bf16.mxu0 %v6149_v43 }
 0x578   :  { %4102 = vmatmul.mubr.bf16.gmra.mxu1 %v3819_v27 }
 0x57a   :  { %4754 = vmatpush1.bf16.msra.mxu0 %v6147_v2 }
 0x57b   :  { %4755 = vmatprep.subr.bf16.mxu0 %v6152_v9 }
 0x57e   :  { %4756 = vmatpush1.bf16.msra.mxu0 %v6150_v32 }
 0x57f   :  { %4757 = vmatprep.subr.bf16.mxu0 %v6155_v47 }
 0x582   :  { %4758 = vmatpush1.bf16.msra.mxu0 %v6153_v28 }
 0x583   :  { %4759 = vmatprep.subr.bf16.mxu0 %v6158_v46 }
 0x586   :  { %4760 = vmatpush1.bf16.msra.mxu0 %v6156_v33 }
 0x5b4   :  { %v5901_v61 = vpop.f32.mrf.mxu1 }
 0x5b6   :  { %v5902_v19 = vpop.f32.mrf.mxu1 }
 0x5b7   :  { %v5903_v54 = vadd.f32 %v5902_v19, %v5901_v61 }
 0x5b8   :  { %v5904_v7 = vpop.f32.mrf.mxu1 }
 0x5b9   :  { %v9154_v18 = vadd.f32 %v5903_v54, %v9151_v1 }
 0x5ba   :  { %v5905_v11 = vpop.f32.mrf.mxu1 }
 0x5bb   :  { %v5906_v60 = vadd.f32 %v5905_v11, %v5904_v7  ;;  %4110 = vadd.xlane.f32.xlu0 %v9154_v18  ;;  %v4206_v13 = vmul.f32 %v9154_v18, %v9154_v18 }
 0x5bd   :  { %v9158_v17 = vadd.f32 %v5906_v60, %v9151_v1  ;;  %v5907_v10 = vpop.f32.mrf.mxu1 }
 0x5bf   :  { %v5908_v8 = vpop.f32.mrf.mxu1  ;;  %4112 = vadd.xlane.f32.xlu1 %v9158_v17  ;;  %4238 = vadd.xlane.f32.xlu0 %v4206_v13  ;;  %v4207_v48 = vmul.f32 %v9158_v17, %v9158_v17 }
 0x5c0   :  { %v5909_v52 = vadd.f32 %v5908_v8, %v5907_v10 }
 0x5c1   :  { %v5910_v31 = vpop.f32.mrf.mxu1 }
 0x5c2   :  { %v9166_v20 = vadd.f32 %v5909_v52, %v9151_v1 }
 0x5c3   :  { %v5911_v39 = vpop.f32.mrf.mxu1  ;;  %4240 = vadd.xlane.f32.xlu1 %v4207_v48 }
 0x5c4   :  { %v5912_v42 = vadd.f32 %v5911_v39, %v5910_v31  ;;  %4114 = vadd.xlane.f32.xlu0 %v9166_v20  ;;  %v4208_v23 = vmul.f32 %v9166_v20, %v9166_v20 }
 0x5c6   :  { %v9170_v37 = vadd.f32 %v5912_v42, %v9151_v1  ;;  %v5913_v55 = vpop.f32.mrf.mxu1 }
 0x5c8   :  { %4116 = vadd.xlane.f32.xlu1 %v9170_v37  ;;  %4242 = vadd.xlane.f32.xlu0 %v4208_v23  ;;  %v5914_v6 = vpop.f32.mrf.mxu1  ;;  %v4209_v40 = vmul.f32 %v9170_v37, %v9170_v37 }
 0x5c9   :  { %v5915_v49 = vadd.f32 %v5914_v6, %v5913_v55 }
 0x5ca   :  { %v5916_v5 = vpop.f32.mrf.mxu1 }
 0x5cb   :  { %v9178_v50 = vadd.f32 %v5915_v49, %v9151_v1 }
 0x5cc   :  { %4244 = vadd.xlane.f32.xlu1 %v4209_v40  ;;  %v5917_v22 = vpop.f32.mrf.mxu1 }
 0x5cd   :  { %v5918_v29 = vadd.f32 %v5917_v22, %v5916_v5  ;;  %4118 = vadd.xlane.f32.xlu0 %v9178_v50  ;;  %v4210_v14 = vmul.f32 %v9178_v50, %v9178_v50 }
 0x5cf   :  { %v9182_v4 = vadd.f32 %v5918_v29, %v9151_v1  ;;  %v5919_v35 = vpop.f32.mrf.mxu1 }
 0x5d1   :  { %v5920_v26 = vpop.f32.mrf.mxu1  ;;  %4120 = vadd.xlane.f32.xlu1 %v9182_v4  ;;  %4246 = vadd.xlane.f32.xlu0 %v4210_v14  ;;  %v4211_v59 = vmul.f32 %v9182_v4, %v9182_v4 }
 0x5d2   :  { %v5921_v24 = vadd.f32 %v5920_v26, %v5919_v35 }
 0x5d3   :  { %v5922_v12 = vpop.f32.mrf.mxu1 }
 0x5d4   :  { %v9190_v53 = vadd.f32 %v5921_v24, %v9151_v1 }
 0x5d5   :  { %v5923_v3 = vpop.f32.mrf.mxu1  ;;  %4248 = vadd.xlane.f32.xlu1 %v4211_v59 }
 0x5d6   :  { %v5924_v57 = vadd.f32 %v5923_v3, %v5922_v12  ;;  %4122 = vadd.xlane.f32.xlu0 %v9190_v53  ;;  %v4212_v21 = vmul.f32 %v9190_v53, %v9190_v53 }
 0x5d8   :  { %v9194_v15 = vadd.f32 %v5924_v57, %v9151_v1 }
 0x5da   :  { %v5925_v36 = vpop.f32.mrf.mxu1  ;;  %4124 = vadd.xlane.f32.xlu1 %v9194_v15  ;;  %4250 = vadd.xlane.f32.xlu0 %v4212_v21  ;;  %v4213_v41 = vmul.f32 %v9194_v15, %v9194_v15 }
 0x5dc   :  { %v5926_v62 = vpop.f32.mrf.mxu1 }
 0x5dd   :  { %v5927_v0 = vadd.f32 %v5926_v62, %v5925_v36 }
 0x5de   :  { %v5928_v45 = vpop.f32.mrf.mxu1  ;;  %4252 = vadd.xlane.f32.xlu1 %v4213_v41 }
 0x5df   :  { %v9202_v56 = vadd.f32 %v5927_v0, %v9151_v1 }
 0x5e0   :  { %v5929_v63 = vpop.f32.mrf.mxu1 }
 0x5e1   :  { %v5930_v44 = vadd.f32 %v5929_v63, %v5928_v45  ;;  %4126 = vadd.xlane.f32.xlu0 %v9202_v56  ;;  %v4214_v34 = vmul.f32 %v9202_v56, %v9202_v56 }
 0x5e2   :  { %v5931_v27 = vpop.f32.mrf.mxu1 }
 0x5e3   :  { %v9206_v16 = vadd.f32 %v5930_v44, %v9151_v1 }
 0x5e4   :  { %v5932_v51 = vpop.f32.mrf.mxu1 }
 0x5e5   :  { %4128 = vadd.xlane.f32.xlu1 %v9206_v16  ;;  %4254 = vadd.xlane.f32.xlu0 %v4214_v34  ;;  %v5933_v30 = vadd.f32 %v5932_v51, %v5931_v27  ;;  %v4215_v25 = vmul.f32 %v9206_v16, %v9206_v16 }
 0x5e6   :  { %v5934_v38 = vpop.f32.mrf.mxu1 }
 0x5e7   :  { %v9214_v58 = vadd.f32 %v5933_v30, %v9151_v1 }
 0x5e8   :  { %v5935_v61 = vpop.f32.mrf.mxu1 }
 0x5e9   :  { %4256 = vadd.xlane.f32.xlu1 %v4215_v25  ;;  %v5936_v19 = vadd.f32 %v5935_v61, %v5934_v38  ;;  %4130 = vadd.xlane.f32.xlu0 %v9214_v58  ;;  %v4216_v11 = vmul.f32 %v9214_v58, %v9214_v58 }
 0x5eb   :  { %v9218_v54 = vadd.f32 %v5936_v19, %v9151_v1 }
 0x5ec   :  { %v5937_v7 = vpop.f32.mrf.mxu1 }
 0x5ed   :  { %4132 = vadd.xlane.f32.xlu1 %v9218_v54  ;;  %4258 = vadd.xlane.f32.xlu0 %v4216_v11  ;;  %v4217_v10 = vmul.f32 %v9218_v54, %v9218_v54 }
 0x5ee   :  { %v5938_v60 = vpop.f32.mrf.mxu1 }
 0x5ef   :  { %v5939_v2 = vadd.f32 %v5938_v60, %v5937_v7 }
 0x5f0   :  { %v5940_v43 = vpop.f32.mrf.mxu1 }
 0x5f1   :  { %v9226_v13 = vadd.f32 %v5939_v2, %v9151_v1  ;;  %4260 = vadd.xlane.f32.xlu1 %v4217_v10 }
 0x5f2   :  { %v5941_v8 = vpop.f32.mrf.mxu1 }
 0x5f3   :  { %v5942_v52 = vadd.f32 %v5941_v8, %v5940_v43  ;;  %4134 = vadd.xlane.f32.xlu0 %v9226_v13  ;;  %v4218_v48 = vmul.f32 %v9226_v13, %v9226_v13 }
 0x5f5   :  { %v9230_v31 = vadd.f32 %v5942_v52, %v9151_v1  ;;  %v5943_v39 = vpop.f32.mrf.mxu1 }
 0x5f7   :  { %4136 = vadd.xlane.f32.xlu1 %v9230_v31  ;;  %4262 = vadd.xlane.f32.xlu0 %v4218_v48  ;;  %v5944_v42 = vpop.f32.mrf.mxu1  ;;  %v4219_v32 = vmul.f32 %v9230_v31, %v9230_v31 }
 0x5f8   :  { %v5945_v23 = vadd.f32 %v5944_v42, %v5943_v39 }
 0x5f9   :  { %v5946_v9 = vpop.f32.mrf.mxu1 }
 0x5fa   :  { %v9238_v55 = vadd.f32 %v5945_v23, %v9151_v1 }
 0x5fb   :  { %4264 = vadd.xlane.f32.xlu1 %v4219_v32  ;;  %v5947_v6 = vpop.f32.mrf.mxu1 }
 0x5fc   :  { %v5948_v49 = vadd.f32 %v5947_v6, %v5946_v9  ;;  %4138 = vadd.xlane.f32.xlu0 %v9238_v55  ;;  %v4220_v22 = vmul.f32 %v9238_v55, %v9238_v55 }
 0x5fe   :  { %v9242_v40 = vadd.f32 %v5948_v49, %v9151_v1  ;;  %v5949_v5 = vpop.f32.mrf.mxu1 }
 0x600   :  { %v5950_v29 = vpop.f32.mrf.mxu1  ;;  %4140 = vadd.xlane.f32.xlu1 %v9242_v40  ;;  %4266 = vadd.xlane.f32.xlu0 %v4220_v22  ;;  %v4221_v26 = vmul.f32 %v9242_v40, %v9242_v40 }
 0x601   :  { %v5951_v35 = vadd.f32 %v5950_v29, %v5949_v5 }
 0x602   :  { %v5952_v14 = vpop.f32.mrf.mxu1 }
 0x603   :  { %v9250_v24 = vadd.f32 %v5951_v35, %v9151_v1 }
 0x604   :  { %v5953_v12 = vpop.f32.mrf.mxu1  ;;  %4268 = vadd.xlane.f32.xlu1 %v4221_v26 }
 0x605   :  { %v5954_v59 = vadd.f32 %v5953_v12, %v5952_v14  ;;  %4142 = vadd.xlane.f32.xlu0 %v9250_v24  ;;  %v4222_v57 = vmul.f32 %v9250_v24, %v9250_v24 }
 0x606   :  { %v5955_v21 = vpop.f32.mrf.mxu1 }
 0x607   :  { %v9254_v3 = vadd.f32 %v5954_v59, %v9151_v1 }
 0x608   :  { %v5956_v36 = vpop.f32.mrf.mxu1 }
 0x609   :  { %4144 = vadd.xlane.f32.xlu1 %v9254_v3  ;;  %4270 = vadd.xlane.f32.xlu0 %v4222_v57  ;;  %v5957_v62 = vadd.f32 %v5956_v36, %v5955_v21  ;;  %v4223_v0 = vmul.f32 %v9254_v3, %v9254_v3 }
 0x60a   :  { %v5958_v41 = vpop.f32.mrf.mxu1 }
 0x60b   :  { %v9262_v28 = vadd.f32 %v5957_v62, %v9151_v1 }
 0x60c   :  { %v5959_v47 = vpop.f32.mrf.mxu1 }
 0x60d   :  { %4272 = vadd.xlane.f32.xlu1 %v4223_v0  ;;  %v5960_v45 = vadd.f32 %v5959_v47, %v5958_v41  ;;  %4146 = vadd.xlane.f32.xlu0 %v9262_v28  ;;  %v4224_v44 = vmul.f32 %v9262_v28, %v9262_v28 }
 0x60f   :  { %v9266_v63 = vadd.f32 %v5960_v45, %v9151_v1 }
 0x610   :  { %v5961_v33 = vpop.f32.mrf.mxu1 }
 0x611   :  { %4148 = vadd.xlane.f32.xlu1 %v9266_v63  ;;  %4274 = vadd.xlane.f32.xlu0 %v4224_v44  ;;  %v4225_v34 = vmul.f32 %v9266_v63, %v9266_v63 }
 0x612   :  { %v5962_v46 = vpop.f32.mrf.mxu1 }
 0x613   :  { %v5963_v27 = vadd.f32 %v5962_v46, %v5961_v33 }
 0x614   :  { %v5964_v51 = vpop.f32.mrf.mxu1 }
 0x615   :  { %v9274_v30 = vadd.f32 %v5963_v27, %v9151_v1  ;;  %4276 = vadd.xlane.f32.xlu1 %v4225_v34 }
 0x616   :  { %v5965_v38 = vpop.f32.mrf.mxu1 }
 0x617   :  { %v5966_v25 = vadd.f32 %v5965_v38, %v5964_v51  ;;  %4150 = vadd.xlane.f32.xlu0 %v9274_v30  ;;  %v4226_v7 = vmul.f32 %v9274_v30, %v9274_v30 }
 0x618   :  { %v5967_v61 = vpop.f32.mrf.mxu1 }
 0x619   :  { %v9278_v19 = vadd.f32 %v5966_v25, %v9151_v1 }
 0x61a   :  { %v5968_v11 = vpop.f32.mrf.mxu1 }
 0x61b   :  { %v5969_v60 = vadd.f32 %v5968_v11, %v5967_v61  ;;  %4152 = vadd.xlane.f32.xlu1 %v9278_v19  ;;  %4278 = vadd.xlane.f32.xlu0 %v4226_v7  ;;  %v4227_v10 = vmul.f32 %v9278_v19, %v9278_v19 }
 0x61c   :  { %v5970_v2 = vpop.f32.mrf.mxu1 }
 0x61d   :  { %v9284_v43 = vadd.f32 %v5969_v60, %v9151_v1 }
 0x61e   :  { %v5971_v8 = vpop.f32.mrf.mxu1 }
 0x61f   :  { %v5972_v52 = vadd.f32 %v5971_v8, %v5970_v2  ;;  %4280 = vadd.xlane.f32.xlu1 %v4227_v10  ;;  %4154 = vadd.xlane.f32.xlu0 %v9284_v43  ;;  %v4228_v42 = vmul.f32 %v9284_v43, %v9284_v43 }
 0x620   :  { %v5973_v48 = vpop.f32.mrf.mxu1 }
 0x621   :  { %v9290_v39 = vadd.f32 %v5972_v52, %v9151_v1 }
 0x622   :  { %v5974_v23 = vpop.f32.mrf.mxu1 }
 0x623   :  { %v5975_v32 = vadd.f32 %v5974_v23, %v5973_v48  ;;  %4156 = vadd.xlane.f32.xlu1 %v9290_v39  ;;  %4282 = vadd.xlane.f32.xlu0 %v4228_v42  ;;  %v4229_v49 = vmul.f32 %v9290_v39, %v9290_v39 }
 0x624   :  { %v5976_v9 = vpop.f32.mrf.mxu1 }
 0x625   :  { %v9296_v6 = vadd.f32 %v5975_v32, %v9151_v1 }
 0x626   :  { %v5977_v5 = vpop.f32.mrf.mxu1 }
 0x627   :  { %v5978_v22 = vadd.f32 %v5977_v5, %v5976_v9  ;;  %4284 = vadd.xlane.f32.xlu1 %v4229_v49  ;;  %4158 = vadd.xlane.f32.xlu0 %v9296_v6  ;;  %v4230_v14 = vmul.f32 %v9296_v6, %v9296_v6 }
 0x628   :  { %v5979_v29 = vpop.f32.mrf.mxu1 }
 0x629   :  { %v9302_v35 = vadd.f32 %v5978_v22, %v9151_v1 }
 0x62a   :  { %v5980_v26 = vpop.f32.mrf.mxu1 }
 0x62b   :  { %v5981_v12 = vadd.f32 %v5980_v26, %v5979_v29  ;;  %4160 = vadd.xlane.f32.xlu1 %v9302_v35  ;;  %4286 = vadd.xlane.f32.xlu0 %v4230_v14  ;;  %v4231_v21 = vmul.f32 %v9302_v35, %v9302_v35 }
 0x62c   :  { %v5982_v59 = vpop.f32.mrf.mxu1 }
 0x62d   :  { %v9308_v57 = vadd.f32 %v5981_v12, %v9151_v1 }
 0x62e   :  { %v5983_v36 = vpop.f32.mrf.mxu1 }
 0x62f   :  { %v5984_v62 = vadd.f32 %v5983_v36, %v5982_v59  ;;  %4288 = vadd.xlane.f32.xlu1 %v4231_v21  ;;  %4162 = vadd.xlane.f32.xlu0 %v9308_v57  ;;  %v4232_v47 = vmul.f32 %v9308_v57, %v9308_v57 }
 0x630   :  { %v5985_v0 = vpop.f32.mrf.mxu1 }
 0x631   :  { %v9314_v41 = vadd.f32 %v5984_v62, %v9151_v1 }
 0x632   :  { %v5986_v45 = vpop.f32.mrf.mxu1 }
 0x633   :  { %v5987_v44 = vadd.f32 %v5986_v45, %v5985_v0  ;;  %4164 = vadd.xlane.f32.xlu1 %v9314_v41  ;;  %4290 = vadd.xlane.f32.xlu0 %v4232_v47  ;;  %v4233_v27 = vmul.f32 %v9314_v41, %v9314_v41 }
 0x634   :  { %v5988_v33 = vpop.f32.mrf.mxu1 }
 0x635   :  { %v9320_v46 = vadd.f32 %v5987_v44, %v9151_v1 }
 0x636   :  { %v5989_v34 = vpop.f32.mrf.mxu1 }
 0x637   :  { %v5990_v51 = vadd.f32 %v5989_v34, %v5988_v33  ;;  %4292 = vadd.xlane.f32.xlu1 %v4233_v27  ;;  %4166 = vadd.xlane.f32.xlu0 %v9320_v46  ;;  %v4234_v61 = vmul.f32 %v9320_v46, %v9320_v46 }
 0x638   :  { %v5991_v38 = vpop.f32.mrf.mxu1 }
 0x639   :  { %v9326_v25 = vadd.f32 %v5990_v51, %v9151_v1 }
 0x63a   :  { %v5992_v7 = vpop.f32.mrf.mxu1 }
 0x63b   :  { %v5993_v11 = vadd.f32 %v5992_v7, %v5991_v38  ;;  %4168 = vadd.xlane.f32.xlu1 %v9326_v25  ;;  %4294 = vadd.xlane.f32.xlu0 %v4234_v61  ;;  %v4235_v10 = vmul.f32 %v9326_v25, %v9326_v25 }
 0x63c   :  { %v5994_v60 = vpop.f32.mrf.mxu1 }
 0x63d   :  { %v9332_v2 = vadd.f32 %v5993_v11, %v9151_v1 }
 0x63e   :  { %v5995_v8 = vpop.f32.mrf.mxu1 }
 0x63f   :  { %v5996_v52 = vadd.f32 %v5995_v8, %v5994_v60  ;;  %4296 = vadd.xlane.f32.xlu1 %v4235_v10  ;;  %4170 = vadd.xlane.f32.xlu0 %v9332_v2  ;;  %v4236_v42 = vmul.f32 %v9332_v2, %v9332_v2 }
 0x641   :  { %v9338_v48 = vadd.f32 %v5996_v52, %v9151_v1 }
 0x643   :  { %4172 = vadd.xlane.f32.xlu1 %v9338_v48  ;;  %4298 = vadd.xlane.f32.xlu0 %v4236_v42  ;;  %v4237_v9 = vmul.f32 %v9338_v48, %v9338_v48 }
 0x644   :  { %v4111_v23 = vpop.xlane.xlu0 %4110 }
 0x645   :  { %v4174_v32 = vmul.f32 0.0078125, %v4111_v23 }
 0x647   :  { %v4366_v22 = vmul.f32 %v4174_v32, %v4174_v32  ;;  %4300 = vadd.xlane.f32.xlu1 %v4237_v9  ;;  %v4334_v42 = vsub.f32 %v9154_v18, %v4174_v32 }
 0x648   :  { %v4113_v49 = vpop.xlane.xlu1 %4112  ;;  %v4239_v5 = vpop.xlane.xlu0 %4238 }
 0x649   :  { %v4175_v29 = vmul.f32 0.0078125, %v4113_v49  ;;  %v4302_v14 = vmul.f32 0.0078125, %v4239_v5 }
 0x64b   :  { %v4398_v26 = vsub.f32 %v4302_v14, %v4366_v22  ;;  %v4367_v12 = vmul.f32 %v4175_v29, %v4175_v29 }
 0x64c   :  { %v4241_v1 = vpop.xlane.xlu1 %4240 }
 0x64d   :  { %v4430_v59 = vadd.f32 1e-05, %v4398_v26  ;;  %v4303_v21 = vmul.f32 0.0078125, %v4241_v1  ;;  %v4115_v36 = vpop.xlane.xlu0 %4114  ;;  %v9356_v26 = vld [vmem:[#allocation13 + $0x12] ss:$0 sm:$0xff] }
 0x64e   :  { %v4176_v62 = vmul.f32 0.0078125, %v4115_v36 }
 0x64f   :  { %6607 = vrsqrt.f32 %v4430_v59  ;;  %v4399_v0 = vsub.f32 %v4303_v21, %v4367_v12  ;;  %v4335_v59 = vsub.f32 %v9158_v17, %v4175_v29 }
 0x650   :  { %v4368_v33 = vmul.f32 %v4176_v62, %v4176_v62  ;;  %v4336_v29 = vsub.f32 %v9166_v20, %v4176_v62 }
 0x651   :  { %v4431_v47 = vadd.f32 1e-05, %v4399_v0  ;;  %v4117_v45 = vpop.xlane.xlu1 %4116  ;;  %v4243_v44 = vpop.xlane.xlu0 %4242 }
 0x652   :  { %v9345_v27 = vmul.f32 0.0078125, %v4117_v45  ;;  %v4304_v34 = vmul.f32 0.0078125, %v4243_v44  ;;  %v9362_v44 = vld [vmem:[#allocation13 + $0x13] ss:$0 sm:$0xff] }
 0x653   :  { %6609 = vrsqrt.f32 %v4431_v47 }
 0x654   :  { %v4400_v51 = vsub.f32 %v4304_v34, %v4368_v33  ;;  %v4369_v61 = vmul.f32 %v9345_v27, %v9345_v27  ;;  %v4337_v20 = vsub.f32 %v9170_v37, %v9345_v27 }
 0x655   :  { %v4245_v38 = vpop.xlane.xlu1 %4244 }
 0x656   :  { %v4432_v7 = vadd.f32 1e-05, %v4400_v51  ;;  %v4305_v11 = vmul.f32 0.0078125, %v4245_v38  ;;  %v4119_v60 = vpop.xlane.xlu0 %4118 }
 0x657   :  { %v9349_v8 = vmul.f32 0.0078125, %v4119_v60 }
 0x658   :  { %6611 = vrsqrt.f32 %v4432_v7  ;;  %v4401_v10 = vsub.f32 %v4305_v11, %v4369_v61 }
 0x659   :  { %v4370_v5 = vmul.f32 %v9349_v8, %v9349_v8 }
 0x65a   :  { %v4433_v52 = vadd.f32 1e-05, %v4401_v10  ;;  %v4121_v23 = vpop.xlane.xlu1 %4120  ;;  %v4247_v9 = vpop.xlane.xlu0 %4246 }
 0x65b   :  { %v9354_v22 = vmul.f32 0.0078125, %v4121_v23  ;;  %v4306_v14 = vmul.f32 0.0078125, %v4247_v9 }
 0x65c   :  { %v6608_v49 = vpop.eup %6607  ;;  %6613 = vrsqrt.f32 %v4433_v52 }
 0x65d   :  { %v4494_v1 = vmul.f32 %v6608_v49, %v4334_v42  ;;  %v4402_v12 = vsub.f32 %v4306_v14, %v4370_v5  ;;  %v4371_v32 = vmul.f32 %v9354_v22, %v9354_v22 }
 0x65e   :  { %v4249_v21 = vpop.xlane.xlu1 %4248 }
 0x65f   :  { %v4526_v36 = vmul.f32 %v4494_v1, %v9356_v26  ;;  %v4434_v0 = vadd.f32 1e-05, %v4402_v12  ;;  %v4307_v47 = vmul.f32 0.0078125, %v4249_v21  ;;  %v4123_v45 = vpop.xlane.xlu0 %4122 }
 0x660   :  { %v6610_v18 = vpop.eup %6609  ;;  %v9364_v34 = vmul.f32 0.0078125, %v4123_v45 }
 0x661   :  { %v4495_v33 = vmul.f32 %v6610_v18, %v4335_v59  ;;  %6615 = vrsqrt.f32 %v4434_v0  ;;  %v4403_v51 = vsub.f32 %v4307_v47, %v4371_v32  ;;  %v4558_v17 = vadd.f32 %v4526_v36, %v9362_v44 }
 0x662   :  { %v4372_v10 = vmul.f32 %v9364_v34, %v9364_v34 }
 0x663   :  { %v4527_v38 = vmul.f32 %v4495_v33, %v9356_v26  ;;  %v4435_v61 = vadd.f32 1e-05, %v4403_v51  ;;  %v4125_v7 = vpop.xlane.xlu1 %4124  ;;  %v4251_v11 = vpop.xlane.xlu0 %4250  ;;  %v4590_v5 = vmax.f32 %v4558_v17, 0.0  ;;  %v10248_v33 = vmov 0  }
 0x664   :  { %v9371_v52 = vmul.f32 0.0078125, %v4125_v7  ;;  %v4308_v42 = vmul.f32 0.0078125, %v4251_v11 }
 0x665   :  { %v6612_v60 = vpop.eup %6611  ;;  %v4559_v23 = vadd.f32 %v4527_v38, %v9362_v44  ;;  %6617 = vrsqrt.f32 %v4435_v61  ;;  %v4338_v38 = vsub.f32 %v9178_v50, %v9349_v8 }
 0x666   :  { %v4496_v9 = vmul.f32 %v6612_v60, %v4336_v29  ;;  %v4404_v49 = vsub.f32 %v4308_v42, %v4372_v10  ;;  %v4373_v59 = vmul.f32 %v9371_v52, %v9371_v52 }
 0x667   :  { %v4591_v14 = vmax.f32 %v4559_v23, 0.0  ;;  %v4253_v62 = vpop.xlane.xlu1 %4252 }
 0x668   :  { %v4528_v1 = vmul.f32 %v4496_v9, %v9356_v26  ;;  %v4436_v21 = vadd.f32 1e-05, %v4404_v49  ;;  %v4309_v36 = vmul.f32 0.0078125, %v4253_v62 }
 0x669   :  { %v6614_v12 = vpop.eup %6613  ;;  %v4622_v18 = vpack.c.bf16 %v4591_v14, %v4590_v5  ;;  %v4339_v5 = vsub.f32 %v9182_v4, %v9354_v22 }
 0x66a   :  { %v4127_v32 = vpop.xlane.xlu0 %4126  ;;  %v4497_v0 = vmul.f32 %v6614_v12, %v4337_v20  ;;  %6619 = vrsqrt.f32 %v4436_v21  ;;  %v4405_v47 = vsub.f32 %v4309_v36, %v4373_v59  ;;  %v4560_v27 = vadd.f32 %v4528_v1, %v9362_v44 }
 0x66b   :  { %v9379_v45 = vmul.f32 0.0078125, %v4127_v32  ;;  %4778 = vmatmul.mubr.bf16.vlgmr.msra.gmra.mxu0 %v4622_v18  ;;  %v4340_v32 = vsub.f32 %v9190_v53, %v9364_v34  ;;  %v4341_v53 = vsub.f32 %v9194_v15, %v9371_v52 }
 0x66c   :  { %4787 = vmatprep.mubr.bf16.mxu0 %v10248_v33  ;;  %v4529_v37 = vmul.f32 %v4497_v0, %v9356_v26  ;;  %v4437_v51 = vadd.f32 1e-05, %v4405_v47  ;;  %v4592_v42 = vmax.f32 %v4560_v27, 0.0 }
 0x66d   :  { %v4374_v11 = vmul.f32 %v9379_v45, %v9379_v45 }
 0x66e   :  { %v4129_v17 = vpop.xlane.xlu1 %4128  ;;  %v4255_v29 = vpop.xlane.xlu0 %4254  ;;  %v4561_v61 = vadd.f32 %v4529_v37, %v9362_v44  ;;  %6621 = vrsqrt.f32 %v4437_v51 }
 0x66f   :  { %v6616_v7 = vpop.eup %6615  ;;  %v9389_v60 = vmul.f32 0.0078125, %v4129_v17  ;;  %v4310_v10 = vmul.f32 0.0078125, %v4255_v29 }
 0x670   :  { %v4593_v23 = vmax.f32 %v4561_v61, 0.0  ;;  %v4498_v9 = vmul.f32 %v6616_v7, %v4338_v38 }
 0x671   :  { %v4406_v49 = vsub.f32 %v4310_v10, %v4374_v11  ;;  %v4375_v62 = vmul.f32 %v9389_v60, %v9389_v60 }
 0x672   :  { %v4257_v50 = vpop.xlane.xlu1 %4256  ;;  %v4623_v8 = vpack.c.bf16 %v4593_v23, %v4592_v42  ;;  %v4530_v14 = vmul.f32 %v4498_v9, %v9356_v26  ;;  %v6618_v20 = vpop.eup %6617 }
 0x673   :  { %v4438_v1 = vadd.f32 1e-05, %v4406_v49  ;;  %v4311_v12 = vmul.f32 0.0078125, %v4257_v50  ;;  %v4131_v59 = vpop.xlane.xlu0 %4130  ;;  %v4499_v36 = vmul.f32 %v6618_v20, %v4339_v5 }
 0x674   :  { %v9396_v21 = vmul.f32 0.0078125, %v4131_v59  ;;  %4788 = vmatmul.mubr.bf16.gmra.mxu0 %v4623_v8  ;;  %v4562_v22 = vadd.f32 %v4530_v14, %v9362_v44 }
 0x675   :  { %6623 = vrsqrt.f32 %v4438_v1  ;;  %v4407_v18 = vsub.f32 %v4311_v12, %v4375_v62  ;;  %4797 = vmatprep.mubr.bf16.mxu0 %v10248_v33  ;;  %v4531_v4 = vmul.f32 %v4499_v36, %v9356_v26 }
 0x676   :  { %v4133_v47 = vpop.xlane.xlu1 %4132  ;;  %v4376_v51 = vmul.f32 %v9396_v21, %v9396_v21  ;;  %v4594_v11 = vmax.f32 %v4562_v22, 0.0 }
 0x677   :  { %v4439_v0 = vadd.f32 1e-05, %v4407_v18  ;;  %v4259_v37 = vpop.xlane.xlu0 %4258  ;;  %v6620_v27 = vpop.eup %6619  ;;  %v9405_v38 = vmul.f32 0.0078125, %v4133_v47  ;;  %v4563_v29 = vadd.f32 %v4531_v4, %v9362_v44 }
 0x678   :  { %v4312_v17 = vmul.f32 0.0078125, %v4259_v37  ;;  %v4500_v61 = vmul.f32 %v6620_v27, %v4340_v32 }
 0x679   :  { %6625 = vrsqrt.f32 %v4439_v0  ;;  %v4595_v10 = vmax.f32 %v4563_v29, 0.0  ;;  %v4377_v9 = vmul.f32 %v9405_v38, %v9405_v38  ;;  %v4342_v0 = vsub.f32 %v9202_v56, %v9379_v45 }
 0x67a   :  { %v4408_v7 = vsub.f32 %v4312_v17, %v4376_v51  ;;  %v4261_v34 = vpop.xlane.xlu1 %4260  ;;  %v4532_v42 = vmul.f32 %v4500_v61, %v9356_v26  ;;  %v4343_v51 = vsub.f32 %v9206_v16, %v9389_v60 }
 0x67b   :  { %v6622_v23 = vpop.eup %6621  ;;  %v4313_v5 = vmul.f32 0.0078125, %v4261_v34  ;;  %v4624_v8 = vpack.c.bf16 %v4595_v10, %v4594_v11 }
 0x67c   :  { %v4440_v49 = vadd.f32 1e-05, %v4408_v7  ;;  %v4135_v50 = vpop.xlane.xlu0 %4134  ;;  %v4501_v20 = vmul.f32 %v6622_v23, %v4341_v53  ;;  %v4564_v52 = vadd.f32 %v4532_v42, %v9362_v44 }
 0x67d   :  { %v9413_v14 = vmul.f32 0.0078125, %v4135_v50  ;;  %v4409_v62 = vsub.f32 %v4313_v5, %v4377_v9  ;;  %4798 = vmatmul.mubr.bf16.gmra.mxu0 %v4624_v8 }
 0x67e   :  { %6627 = vrsqrt.f32 %v4440_v49  ;;  %4807 = vmatprep.mubr.bf16.mxu0 %v10248_v33  ;;  %v4533_v15 = vmul.f32 %v4501_v20, %v9356_v26  ;;  %v4596_v37 = vmax.f32 %v4564_v52, 0.0  ;;  %v4344_v49 = vsub.f32 %v9214_v58, %v9396_v21 }
 0x67f   :  { %v4441_v1 = vadd.f32 1e-05, %v4409_v62  ;;  %v4378_v36 = vmul.f32 %v9413_v14, %v9413_v14 }
 0x680   :  { %v4137_v12 = vpop.xlane.xlu1 %4136  ;;  %v4263_v59 = vpop.xlane.xlu0 %4262  ;;  %v4565_v22 = vadd.f32 %v4533_v15, %v9362_v44 }
 0x681   :  { %v9420_v18 = vmul.f32 0.0078125, %v4137_v12  ;;  %v4314_v4 = vmul.f32 0.0078125, %v4263_v59  ;;  %6629 = vrsqrt.f32 %v4441_v1 }
 0x682   :  { %v6624_v32 = vpop.eup %6623  ;;  %v4597_v27 = vmax.f32 %v4565_v22, 0.0 }
 0x683   :  { %v4410_v47 = vsub.f32 %v4314_v4, %v4378_v36  ;;  %v4502_v29 = vmul.f32 %v6624_v32, %v4342_v0  ;;  %v4379_v61 = vmul.f32 %v9420_v18, %v9420_v18  ;;  %v4345_v4 = vsub.f32 %v9218_v54, %v9405_v38 }
 0x684   :  { %v4265_v17 = vpop.xlane.xlu1 %4264  ;;  %v4625_v10 = vpack.c.bf16 %v4597_v27, %v4596_v37 }
 0x685   :  { %v4442_v7 = vadd.f32 1e-05, %v4410_v47  ;;  %v4315_v11 = vmul.f32 0.0078125, %v4265_v17  ;;  %v4139_v34 = vpop.xlane.xlu0 %4138  ;;  %v4534_v42 = vmul.f32 %v4502_v29, %v9356_v26 }
 0x686   :  { %v6626_v53 = vpop.eup %6625  ;;  %v9430_v45 = vmul.f32 0.0078125, %v4139_v34  ;;  %4808 = vmatmul.mubr.bf16.gmra.mxu0 %v4625_v10 }
 0x687   :  { %6631 = vrsqrt.f32 %v4442_v7  ;;  %v4411_v56 = vsub.f32 %v4315_v11, %v4379_v61  ;;  %v4503_v23 = vmul.f32 %v6626_v53, %v4343_v51  ;;  %4817 = vmatprep.mubr.bf16.mxu0 %v10248_v33  ;;  %v4566_v9 = vadd.f32 %v4534_v42, %v9362_v44 }
 0x688   :  { %v4380_v5 = vmul.f32 %v9430_v45, %v9430_v45  ;;  %v4346_v61 = vsub.f32 %v9226_v13, %v9413_v14  ;;  %v4347_v13 = vsub.f32 %v9230_v31, %v9420_v18 }
 0x689   :  { %v4443_v16 = vadd.f32 1e-05, %v4411_v56  ;;  %v4535_v60 = vmul.f32 %v4503_v23, %v9356_v26  ;;  %v4141_v50 = vpop.xlane.xlu1 %4140  ;;  %v4267_v8 = vpop.xlane.xlu0 %4266  ;;  %v4598_v59 = vmax.f32 %v4566_v9, 0.0 }
 0x68a   :  { %v9439_v62 = vmul.f32 0.0078125, %v4141_v50  ;;  %v4316_v15 = vmul.f32 0.0078125, %v4267_v8 }
 0x68b   :  { %v6628_v20 = vpop.eup %6627  ;;  %6633 = vrsqrt.f32 %v4443_v16  ;;  %v4567_v52 = vadd.f32 %v4535_v60, %v9362_v44 }
 0x68c   :  { %v4504_v1 = vmul.f32 %v6628_v20, %v4344_v49  ;;  %v4412_v12 = vsub.f32 %v4316_v15, %v4380_v5  ;;  %v4381_v32 = vmul.f32 %v9439_v62, %v9439_v62 }
 0x68d   :  { %v4599_v36 = vmax.f32 %v4567_v52, 0.0  ;;  %v4269_v58 = vpop.xlane.xlu1 %4268 }
 0x68e   :  { %v4536_v21 = vmul.f32 %v4504_v1, %v9356_v26  ;;  %v6630_v22 = vpop.eup %6629  ;;  %v4444_v0 = vadd.f32 1e-05, %v4412_v12  ;;  %v4317_v47 = vmul.f32 0.0078125, %v4269_v58  ;;  %v4143_v37 = vpop.xlane.xlu0 %4142  ;;  %v4348_v58 = vsub.f32 %v9238_v55, %v9430_v45 }
 0x68f   :  { %v4626_v27 = vpack.c.bf16 %v4599_v36, %v4598_v59  ;;  %v9447_v51 = vmul.f32 0.0078125, %v4143_v37  ;;  %v4505_v17 = vmul.f32 %v6630_v22, %v4345_v4 }
 0x690   :  { %6635 = vrsqrt.f32 %v4444_v0  ;;  %v4413_v29 = vsub.f32 %v4317_v47, %v4381_v32  ;;  %v4568_v38 = vadd.f32 %v4536_v21, %v9362_v44 }
 0x691   :  { %4818 = vmatmul.mubr.bf16.gmra.mxu0 %v4626_v27  ;;  %v4537_v54 = vmul.f32 %v4505_v17, %v9356_v26  ;;  %v4382_v34 = vmul.f32 %v9447_v51, %v9447_v51 }
 0x692   :  { %4827 = vmatprep.mubr.bf16.mxu0 %v10248_v33  ;;  %v4445_v7 = vadd.f32 1e-05, %v4413_v29  ;;  %v4145_v11 = vpop.xlane.xlu1 %4144  ;;  %v4271_v10 = vpop.xlane.xlu0 %4270  ;;  %v4600_v9 = vmax.f32 %v4568_v38, 0.0 }
 0x693   :  { %v9456_v42 = vmul.f32 0.0078125, %v4145_v11  ;;  %v4318_v56 = vmul.f32 0.0078125, %v4271_v10  ;;  %v4569_v23 = vadd.f32 %v4537_v54, %v9362_v44 }
 0x694   :  { %v6632_v53 = vpop.eup %6631  ;;  %6637 = vrsqrt.f32 %v4445_v7 }
 0x695   :  { %v4506_v16 = vmul.f32 %v6632_v53, %v4346_v61  ;;  %v4414_v60 = vsub.f32 %v4318_v56, %v4382_v34  ;;  %v4601_v49 = vmax.f32 %v4569_v23, 0.0  ;;  %v4383_v8 = vmul.f32 %v9456_v42, %v9456_v42 }
 0x696   :  { %v4273_v14 = vpop.xlane.xlu1 %4272  ;;  %v4147_v1 = vpop.xlane.xlu0 %4146  ;;  %v4349_v61 = vsub.f32 %v9242_v40, %v9439_v62 }
 0x697   :  { %v4538_v5 = vmul.f32 %v4506_v16, %v9356_v26  ;;  %v4446_v20 = vadd.f32 1e-05, %v4414_v60  ;;  %v4319_v15 = vmul.f32 0.0078125, %v4273_v14  ;;  %v4627_v52 = vpack.c.bf16 %v4601_v49, %v4600_v9 }
 0x698   :  { %v6634_v50 = vpop.eup %6633  ;;  %v9464_v36 = vmul.f32 0.0078125, %v4147_v1  ;;  %v4350_v9 = vsub.f32 %v9250_v24, %v9447_v51 }
 0x699   :  { %v4507_v12 = vmul.f32 %v6634_v50, %v4347_v13  ;;  %6639 = vrsqrt.f32 %v4446_v20  ;;  %v4415_v59 = vsub.f32 %v4319_v15, %v4383_v8  ;;  %4828 = vmatmul.mubr.bf16.gmra.mxu0 %v4627_v52  ;;  %v4570_v18 = vadd.f32 %v4538_v5, %v9362_v44 }
 0x69a   :  { %4837 = vmatprep.mubr.bf16.mxu0 %v10248_v33  ;;  %v4149_v21 = vpop.xlane.xlu1 %4148  ;;  %v4275_v22 = vpop.xlane.xlu0 %4274  ;;  %v4384_v47 = vmul.f32 %v9464_v36, %v9464_v36 }
 0x69b   :  { %v4539_v31 = vmul.f32 %v4507_v12, %v9356_v26  ;;  %v4447_v4 = vadd.f32 1e-05, %v4415_v59  ;;  %v9474_v37 = vmul.f32 0.0078125, %v4149_v21  ;;  %v4320_v27 = vmul.f32 0.0078125, %v4275_v22 }
 0x69c   :  { %v4602_v17 = vmax.f32 %v4570_v18, 0.0  ;;  %v4351_v59 = vsub.f32 %v9254_v3, %v9456_v42 }
 0x69d   :  { %v4571_v32 = vadd.f32 %v4539_v31, %v9362_v44  ;;  %v6636_v0 = vpop.eup %6635  ;;  %6641 = vrsqrt.f32 %v4447_v4  ;;  %v4416_v38 = vsub.f32 %v4320_v27, %v4384_v47  ;;  %v4385_v10 = vmul.f32 %v9474_v37, %v9474_v37 }
 0x69e   :  { %v4508_v54 = vmul.f32 %v6636_v0, %v4348_v58  ;;  %v4277_v55 = vpop.xlane.xlu1 %4276 }
 0x69f   :  { %v4603_v29 = vmax.f32 %v4571_v32, 0.0  ;;  %v4448_v53 = vadd.f32 1e-05, %v4416_v38  ;;  %v4321_v34 = vmul.f32 0.0078125, %v4277_v55 }
 0x6a0   :  { %v4540_v7 = vmul.f32 %v4508_v54, %v9356_v26  ;;  %v4151_v56 = vpop.xlane.xlu0 %4150 }
 0x6a1   :  { %v4628_v45 = vpack.c.bf16 %v4603_v29, %v4602_v17  ;;  %v6638_v11 = vpop.eup %6637  ;;  %6643 = vrsqrt.f32 %v4448_v53  ;;  %v4417_v16 = vsub.f32 %v4321_v34, %v4385_v10  ;;  %v9481_v60 = vmul.f32 0.0078125, %v4151_v56 }
 0x6a2   :  { %v4509_v23 = vmul.f32 %v6638_v11, %v4349_v61  ;;  %v4572_v62 = vadd.f32 %v4540_v7, %v9362_v44  ;;  %v4352_v7 = vsub.f32 %v9262_v28, %v9464_v36  ;;  %v4353_v28 = vsub.f32 %v9266_v63, %v9474_v37 }
 0x6a3   :  { %4838 = vmatmul.mubr.bf16.gmra.mxu0 %v4628_v45  ;;  %v4449_v49 = vadd.f32 1e-05, %v4417_v16  ;;  %v4386_v14 = vmul.f32 %v9481_v60, %v9481_v60 }
 0x6a4   :  { %4847 = vmatprep.mubr.bf16.mxu0 %v10248_v33  ;;  %v4541_v40 = vmul.f32 %v4509_v23, %v9356_v26  ;;  %v4153_v5 = vpop.xlane.xlu1 %4152  ;;  %v4279_v50 = vpop.xlane.xlu0 %4278  ;;  %v4604_v1 = vmax.f32 %v4572_v62, 0.0 }
 0x6a5   :  { %6645 = vrsqrt.f32 %v4449_v49  ;;  %v9491_v20 = vmul.f32 0.0078125, %v4153_v5  ;;  %v4322_v15 = vmul.f32 0.0078125, %v4279_v50 }
 0x6a6   :  { %v6640_v13 = vpop.eup %6639  ;;  %v4573_v8 = vadd.f32 %v4541_v40, %v9362_v44 }
 0x6a7   :  { %v4510_v52 = vmul.f32 %v6640_v13, %v4350_v9  ;;  %v4418_v24 = vsub.f32 %v4322_v15, %v4386_v14  ;;  %v4387_v31 = vmul.f32 %v9491_v20, %v9491_v20 }
 0x6a8   :  { %v4605_v12 = vmax.f32 %v4573_v8, 0.0  ;;  %v4281_v18 = vpop.xlane.xlu1 %4280  ;;  %v4155_v4 = vpop.xlane.xlu0 %4154 }
 0x6a9   :  { %v4542_v21 = vmul.f32 %v4510_v52, %v9356_v26  ;;  %v4450_v22 = vadd.f32 1e-05, %v4418_v24  ;;  %v4323_v32 = vmul.f32 0.0078125, %v4281_v18  ;;  %v9498_v0 = vmul.f32 0.0078125, %v4155_v4 }
 0x6aa   :  { %v6642_v51 = vpop.eup %6641  ;;  %v4629_v58 = vpack.c.bf16 %v4605_v12, %v4604_v1  ;;  %v4354_v24 = vsub.f32 %v9274_v30, %v9481_v60  ;;  %v4355_v30 = vsub.f32 %v9278_v19, %v9491_v20 }
 0x6ab   :  { %v4511_v47 = vmul.f32 %v6642_v51, %v4351_v59  ;;  %6647 = vrsqrt.f32 %v4450_v22  ;;  %v4419_v27 = vsub.f32 %v4323_v32, %v4387_v31  ;;  %v4574_v29 = vadd.f32 %v4542_v21, %v9362_v44 }
 0x6ac   :  { %4848 = vmatmul.mubr.bf16.gmra.mxu0 %v4629_v58  ;;  %v4157_v3 = vpop.xlane.xlu1 %4156  ;;  %v4283_v42 = vpop.xlane.xlu0 %4282  ;;  %v4388_v38 = vmul.f32 %v9498_v0, %v9498_v0  ;;  %v4356_v19 = vsub.f32 %v9284_v43, %v9498_v0 }
 0x6ad   :  { %4857 = vmatprep.mubr.bf16.mxu0 %v10248_v33  ;;  %v4543_v17 = vmul.f32 %v4511_v47, %v9356_v26  ;;  %v4451_v54 = vadd.f32 1e-05, %v4419_v27  ;;  %v9505_v61 = vmul.f32 0.0078125, %v4157_v3  ;;  %v4324_v55 = vmul.f32 0.0078125, %v4283_v42 }
 0x6ae   :  { %v6644_v45 = vpop.eup %6643  ;;  %v4606_v56 = vmax.f32 %v4574_v29, 0.0 }
 0x6af   :  { %v4575_v11 = vadd.f32 %v4543_v17, %v9362_v44  ;;  %6649 = vrsqrt.f32 %v4451_v54  ;;  %v4420_v10 = vsub.f32 %v4324_v55, %v4388_v38  ;;  %v4512_v16 = vmul.f32 %v6644_v45, %v4352_v7 }
 0x6b0   :  { %v4285_v53 = vpop.xlane.xlu1 %4284  ;;  %v4159_v34 = vpop.xlane.xlu0 %4158  ;;  %v4389_v40 = vmul.f32 %v9505_v61, %v9505_v61  ;;  %v4357_v0 = vsub.f32 %v9290_v39, %v9505_v61 }
 0x6b1   :  { %v4607_v23 = vmax.f32 %v4575_v11, 0.0  ;;  %v4452_v62 = vadd.f32 1e-05, %v4420_v10  ;;  %v4325_v9 = vmul.f32 0.0078125, %v4285_v53  ;;  %v9512_v49 = vmul.f32 0.0078125, %v4159_v34 }
 0x6b2   :  { %v6646_v13 = vpop.eup %6645  ;;  %v4544_v14 = vmul.f32 %v4512_v16, %v9356_v26 }
 0x6b3   :  { %v4630_v36 = vpack.c.bf16 %v4607_v23, %v4606_v56  ;;  %6651 = vrsqrt.f32 %v4452_v62  ;;  %v4421_v5 = vsub.f32 %v4325_v9, %v4389_v40  ;;  %v4513_v15 = vmul.f32 %v6646_v13, %v4353_v28 }
 0x6b4   :  { %v4161_v50 = vpop.xlane.xlu1 %4160  ;;  %v4287_v8 = vpop.xlane.xlu0 %4286  ;;  %v4390_v1 = vmul.f32 %v9512_v49, %v9512_v49  ;;  %v4576_v37 = vadd.f32 %v4544_v14, %v9362_v44  ;;  %v4358_v39 = vsub.f32 %v9296_v6, %v9512_v49 }
 0x6b5   :  { %4858 = vmatmul.mubr.bf16.gmra.mxu0 %v4630_v36  ;;  %v4453_v52 = vadd.f32 1e-05, %v4421_v5  ;;  %v9519_v12 = vmul.f32 0.0078125, %v4161_v50  ;;  %v4326_v59 = vmul.f32 0.0078125, %v4287_v8  ;;  %v4545_v63 = vmul.f32 %v4513_v15, %v9356_v26 }
 0x6b6   :  { %4867 = vmatprep.mubr.bf16.mxu0 %v10248_v33  ;;  %v4608_v3 = vmax.f32 %v4576_v37, 0.0 }
 0x6b7   :  { %6653 = vrsqrt.f32 %v4453_v52  ;;  %v4422_v51 = vsub.f32 %v4326_v59, %v4390_v1  ;;  %v4391_v18 = vmul.f32 %v9519_v12, %v9519_v12  ;;  %v4577_v21 = vadd.f32 %v4545_v63, %v9362_v44 }
 0x6b8   :  { %v6648_v31 = vpop.eup %6647  ;;  %v4289_v4 = vpop.xlane.xlu1 %4288 }
 0x6b9   :  { %v4163_v58 = vpop.xlane.xlu0 %4162  ;;  %v4454_v22 = vadd.f32 1e-05, %v4422_v51  ;;  %v4327_v32 = vmul.f32 0.0078125, %v4289_v4  ;;  %v4514_v27 = vmul.f32 %v6648_v31, %v4354_v24  ;;  %v4609_v42 = vmax.f32 %v4577_v21, 0.0 }
 0x6ba   :  { %v9529_v47 = vmul.f32 0.0078125, %v4163_v58 }
 0x6bb   :  { %6655 = vrsqrt.f32 %v4454_v22  ;;  %v4423_v60 = vsub.f32 %v4327_v32, %v4391_v18  ;;  %v4631_v55 = vpack.c.bf16 %v4609_v42, %v4608_v3  ;;  %v4546_v45 = vmul.f32 %v4514_v27, %v9356_v26 }
 0x6bc   :  { %v6650_v17 = vpop.eup %6649  ;;  %v4392_v29 = vmul.f32 %v9529_v47, %v9529_v47  ;;  %v4165_v54 = vpop.xlane.xlu1 %4164 }
 0x6bd   :  { %v4291_v38 = vpop.xlane.xlu0 %4290  ;;  %v4455_v7 = vadd.f32 1e-05, %v4423_v60  ;;  %v9536_v11 = vmul.f32 0.0078125, %v4165_v54  ;;  %v4515_v53 = vmul.f32 %v6650_v17, %v4355_v30  ;;  %4868 = vmatmul.mubr.bf16.gmra.mxu0 %v4631_v55  ;;  %v4578_v62 = vadd.f32 %v4546_v45, %v9362_v44 }
 0x6be   :  { %v4328_v10 = vmul.f32 0.0078125, %v4291_v38  ;;  %4877 = vmatprep.mubr.bf16.mxu0 %v10248_v33  ;;  %v4359_v30 = vsub.f32 %v9302_v35, %v9519_v12  ;;  %v4360_v35 = vsub.f32 %v9308_v57, %v9529_v47 }
 0x6bf   :  { %6657 = vrsqrt.f32 %v4455_v7  ;;  %v4393_v56 = vmul.f32 %v9536_v11, %v9536_v11  ;;  %v4547_v40 = vmul.f32 %v4515_v53, %v9356_v26  ;;  %v4610_v52 = vmax.f32 %v4578_v62, 0.0 }
 0x6c0   :  { %v4424_v20 = vsub.f32 %v4328_v10, %v4392_v29  ;;  %v6652_v34 = vpop.eup %6651  ;;  %v4293_v23 = vpop.xlane.xlu1 %4292  ;;  %v4361_v57 = vsub.f32 %v9314_v41, %v9536_v11 }
 0x6c1   :  { %v4167_v16 = vpop.xlane.xlu0 %4166  ;;  %v4329_v13 = vmul.f32 0.0078125, %v4293_v23  ;;  %v4516_v36 = vmul.f32 %v6652_v34, %v4356_v19  ;;  %v4579_v43 = vadd.f32 %v4547_v40, %v9362_v44 }
 0x6c2   :  { %v4456_v9 = vadd.f32 1e-05, %v4424_v20  ;;  %v9545_v28 = vmul.f32 0.0078125, %v4167_v16 }
 0x6c3   :  { %v4425_v14 = vsub.f32 %v4329_v13, %v4393_v56  ;;  %v4611_v1 = vmax.f32 %v4579_v43, 0.0  ;;  %v4548_v59 = vmul.f32 %v4516_v36, %v9356_v26 }
 0x6c4   :  { %6659 = vrsqrt.f32 %v4456_v9  ;;  %v6654_v5 = vpop.eup %6653  ;;  %v4394_v50 = vmul.f32 %v9545_v28, %v9545_v28  ;;  %v4169_v8 = vpop.xlane.xlu1 %4168 }
 0x6c5   :  { %v4295_v15 = vpop.xlane.xlu0 %4294  ;;  %v4457_v63 = vadd.f32 1e-05, %v4425_v14  ;;  %v9553_v37 = vmul.f32 0.0078125, %v4169_v8  ;;  %v4517_v51 = vmul.f32 %v6654_v5, %v4357_v0  ;;  %v4632_v31 = vpack.c.bf16 %v4611_v1, %v4610_v52 }
 0x6c6   :  { %v4330_v24 = vmul.f32 0.0078125, %v4295_v15  ;;  %v4580_v32 = vadd.f32 %v4548_v59, %v9362_v44  ;;  %v4362_v1 = vsub.f32 %v9320_v46, %v9545_v28 }
 0x6c7   :  { %6661 = vrsqrt.f32 %v4457_v63  ;;  %v4395_v4 = vmul.f32 %v9553_v37, %v9553_v37  ;;  %4878 = vmatmul.mubr.bf16.gmra.mxu0 %v4632_v31  ;;  %v4549_v22 = vmul.f32 %v4517_v51, %v9356_v26  ;;  %v4363_v51 = vsub.f32 %v9326_v25, %v9553_v37 }
 0x6c8   :  { %v4426_v61 = vsub.f32 %v4330_v24, %v4394_v50  ;;  %v6656_v18 = vpop.eup %6655  ;;  %v4297_v58 = vpop.xlane.xlu1 %4296  ;;  %4887 = vmatprep.mubr.bf16.mxu0 %v10248_v33  ;;  %v4612_v55 = vmax.f32 %v4580_v32, 0.0 }
 0x6c9   :  { %v4171_v21 = vpop.xlane.xlu0 %4170  ;;  %v4331_v3 = vmul.f32 0.0078125, %v4297_v58  ;;  %v4518_v6 = vmul.f32 %v6656_v18, %v4358_v39  ;;  %v4581_v49 = vadd.f32 %v4549_v22, %v9362_v44 }
 0x6ca   :  { %v4458_v27 = vadd.f32 1e-05, %v4426_v61  ;;  %v9561_v42 = vmul.f32 0.0078125, %v4171_v21 }
 0x6cb   :  { %v4427_v60 = vsub.f32 %v4331_v3, %v4395_v4  ;;  %v4613_v45 = vmax.f32 %v4581_v49, 0.0  ;;  %v4550_v7 = vmul.f32 %v4518_v6, %v9356_v26 }
 0x6cc   :  { %6663 = vrsqrt.f32 %v4458_v27  ;;  %v6658_v17 = vpop.eup %6657  ;;  %v4396_v29 = vmul.f32 %v9561_v42, %v9561_v42  ;;  %v4173_v54 = vpop.xlane.xlu1 %4172  ;;  %v4364_v4 = vsub.f32 %v9332_v2, %v9561_v42 }
 0x6cd   :  { %v4299_v38 = vpop.xlane.xlu0 %4298  ;;  %v4459_v10 = vadd.f32 1e-05, %v4427_v60  ;;  %v4205_v53 = vmul.f32 0.0078125, %v4173_v54  ;;  %v4519_v20 = vmul.f32 %v6658_v17, %v4359_v30  ;;  %v4633_v34 = vpack.c.bf16 %v4613_v45, %v4612_v55  ;;  %v10249_v55 = vld [vmem:[#allocation86_spill] sm:$0xff] }
 0x6ce   :  { %v4332_v19 = vmul.f32 0.0078125, %v4299_v38  ;;  %v4582_v40 = vadd.f32 %v4550_v7, %v9362_v44  ;;  %v10250_v7 = vld [vmem:[#allocation87_spill] sm:$0xff] }
 0x6cf   :  { %6665 = vrsqrt.f32 %v4459_v10  ;;  %4888 = vmatmul.mubr.bf16.gmra.mxu0 %v4633_v34  ;;  %v4551_v16 = vmul.f32 %v4519_v20, %v9356_v26  ;;  %v4397_v62 = vmul.f32 %v4205_v53, %v4205_v53  ;;  %v4365_v32 = vsub.f32 %v9338_v48, %v4205_v53  ;;  %v250_v48 = vld [vmem:[#allocation13 + $0x5] ss:$8 sm:$0x3] }
 0x6d0   :  { %v4428_v12 = vsub.f32 %v4332_v19, %v4396_v29  ;;  %v4301_v23 = vpop.xlane.xlu1 %4300  ;;  %4897 = vmatprep.mubr.bf16.mxu0 %v10248_v33  ;;  %v4614_v5 = vmax.f32 %v4582_v40, 0.0  ;;  %v9601_v45 = vrot.slane %v250_v48, %v10249_v55  ;;  %v9604_v10 = vrot.slane %v250_v48, %v10250_v7 }
 0x6d1   :  { %v6660_v56 = vpop.eup %6659  ;;  %v4333_v13 = vmul.f32 0.0078125, %v4301_v23  ;;  %v4583_v43 = vadd.f32 %v4551_v16, %v9362_v44 }
 0x6d2   :  { %v4460_v9 = vadd.f32 1e-05, %v4428_v12  ;;  %v4520_v36 = vmul.f32 %v6660_v56, %v4360_v35 }
 0x6d3   :  { %v4429_v47 = vsub.f32 %v4333_v13, %v4397_v62  ;;  %v4615_v50 = vmax.f32 %v4583_v43, 0.0 }
 0x6d4   :  { %6667 = vrsqrt.f32 %v4460_v9  ;;  %v4552_v0 = vmul.f32 %v4520_v36, %v9356_v26  ;;  %v6662_v14 = vpop.eup %6661 }
 0x6d5   :  { %v4461_v8 = vadd.f32 1e-05, %v4429_v47  ;;  %v4521_v15 = vmul.f32 %v6662_v14, %v4361_v57  ;;  %v4634_v52 = vpack.c.bf16 %v4615_v50, %v4614_v5 }
 0x6d6   :  { %v4584_v63 = vadd.f32 %v4552_v0, %v9362_v44 }
 0x6d7   :  { %6669 = vrsqrt.f32 %v4461_v8  ;;  %v4553_v59 = vmul.f32 %v4521_v15, %v9356_v26  ;;  %4898 = vmatmul.mubr.bf16.gmra.mxu0 %v4634_v52 }
 0x6d8   :  { %4907 = vmatprep.mubr.bf16.mxu0 %v10248_v33  ;;  %v4616_v31 = vmax.f32 %v4584_v63, 0.0 }
 0x6d9   :  { %v6664_v24 = vpop.eup %6663  ;;  %v4585_v41 = vadd.f32 %v4553_v59, %v9362_v44 }
 0x6da   :  { %v4522_v11 = vmul.f32 %v6664_v24, %v4362_v1 }
 0x6db   :  { %v4617_v39 = vmax.f32 %v4585_v41, 0.0 }
 0x6dc   :  { %v4554_v61 = vmul.f32 %v4522_v11, %v9356_v26  ;;  %v6666_v46 = vpop.eup %6665 }
 0x6dd   :  { %v4635_v28 = vpack.c.bf16 %v4617_v39, %v4616_v31  ;;  %v4523_v18 = vmul.f32 %v6666_v46, %v4363_v51  ;;  %v5695_v51 = vld [vmem:[#allocation14] sm:$0xff]  }
 0x6de   :  { %v4586_v21 = vadd.f32 %v4554_v61, %v9362_v44 }
 0x6df   :  { %v4555_v58 = vmul.f32 %v4523_v18, %v9356_v26  ;;  %4908 = vmatmul.mubr.bf16.gmra.mxu0 %v4635_v28 }
 0x6e0   :  { %4917 = vmatprep.mubr.bf16.mxu0 %v10248_v33  ;;  %v4618_v27 = vmax.f32 %v4586_v21, 0.0 }
 0x6e1   :  { %v6668_v22 = vpop.eup %6667  ;;  %v4587_v25 = vadd.f32 %v4555_v58, %v9362_v44  ;;  %v5696_v58 = vunpack.c.l.bf16 %v5695_v51 }
 0x6e2   :  { %v4524_v37 = vmul.f32 %v6668_v22, %v4364_v4 }
 0x6e3   :  { %v4619_v3 = vmax.f32 %v4587_v25, 0.0 }
 0x6e4   :  { %v4556_v6 = vmul.f32 %v4524_v37, %v9356_v26  ;;  %v6670_v49 = vpop.eup %6669 }
 0x6e5   :  { %v4636_v30 = vpack.c.bf16 %v4619_v3, %v4618_v27  ;;  %v4525_v2 = vmul.f32 %v6670_v49, %v4365_v32 }
 0x6e6   :  { %v4588_v60 = vadd.f32 %v4556_v6, %v9362_v44 }
 0x6e7   :  { %v4557_v42 = vmul.f32 %v4525_v2, %v9356_v26  ;;  %4918 = vmatmul.mubr.bf16.gmra.mxu0 %v4636_v30  ;;  %v5697_v2 = vunpack.c.h.bf16 %v5695_v51 }
 0x6e8   :  { %4927 = vmatprep.mubr.bf16.mxu0 %v10248_v33  ;;  %v4620_v29 = vmax.f32 %v4588_v60, 0.0 }
 0x6e9   :  { %v4589_v17 = vadd.f32 %v4557_v42, %v9362_v44 }
 0x6eb   :  { %v4621_v54 = vmax.f32 %v4589_v17, 0.0 }
 0x6ed   :  { %v4637_v38 = vpack.c.bf16 %v4621_v54, %v4620_v29  ;;  %v5758_v54 = vld [vmem:[#allocation14 + $0x8] sm:$0xff]  }
 0x6ef   :  { %4928 = vmatmul.mubr.bf16.gmra.mxu0 %v4637_v38 }
 0x72b   :  { %v4779_v53 = vpop.f32.mrf.mxu0 }
 0x72c   :  { %v9607_v26 = vadd.f32 %v4779_v53, %v9601_v45 }
 0x72d   :  { %v4781_v19 = vpop.f32.mrf.mxu0 }
 0x72e   :  { %v5630_v33 = vclamps-f32 %v9607_v26, 20.0  ;;  %v4782_v44 = vadd.f32 %v4781_v19, %v9604_v10 }
 0x72f   :  { %v4783_v20 = vpop.f32.mrf.mxu0 }
 0x730   :  { %5322 = vst [vmem:[#allocation16] sm:$0xff] %v5630_v33  ;;  %v5662_v34 = vclamps-f32 %v4782_v44, 20.0  ;;  %v9614_v35 = vadd.f32 %v4783_v20, %v9601_v45 }
 0x731   :  { %v4785_v12 = vpop.f32.mrf.mxu0 }
 0x732   :  { %v5066_v56 = vmin.f32 %v5662_v34, 2.0  ;;  %5354 = vst [vmem:[#allocation17] sm:$0xff] %v5662_v34  ;;  %v5631_v23 = vclamps-f32 %v9614_v35, 20.0  ;;  %v4786_v16 = vadd.f32 %v4785_v12, %v9604_v10  ;;  %v5700_v34 = vunpack.c.l.bf16 %v5758_v54 }
 0x733   :  { %v5701_v35 = vunpack.c.h.bf16 %v5758_v54 }
 0x734   :  { %v5098_v40 = vmul.f32 0.5, %v5066_v56  ;;  %5323 = vst [vmem:[#allocation16 + $0x8] sm:$0xff] %v5631_v23  ;;  %v5663_v62 = vclamps-f32 %v4786_v16, 20.0  ;;  %v4789_v9 = vpop.f32.mrf.mxu0 }
 0x735   :  { %v9621_v13 = vadd.f32 %v4789_v9, %v9601_v45 }
 0x736   :  { %v5130_v36 = vmul.f32 1.442695, %v5098_v40  ;;  %v5067_v43 = vmin.f32 %v5663_v62, 2.0  ;;  %5355 = vst [vmem:[#allocation17 + $0x8] sm:$0xff] %v5663_v62  ;;  %v4791_v57 = vpop.f32.mrf.mxu0 }
 0x737   :  { %v5632_v47 = vclamps-f32 %v9621_v13, 20.0  ;;  %v4792_v0 = vadd.f32 %v4791_v57, %v9604_v10 }
 0x738   :  { %6671 = vpow2.f32 %v5130_v36  ;;  %v5099_v14 = vmul.f32 0.5, %v5067_v43  ;;  %v4793_v5 = vpop.f32.mrf.mxu0 }
 0x739   :  { %5324 = vst [vmem:[#allocation16 + $0x10] sm:$0xff] %v5632_v47  ;;  %v5664_v50 = vclamps-f32 %v4792_v0, 20.0  ;;  %v9628_v8 = vadd.f32 %v4793_v5, %v9601_v45 }
 0x73a   :  { %v5132_v15 = vmul.f32 1.442695, %v5099_v14  ;;  %v4795_v52 = vpop.f32.mrf.mxu0 }
 0x73b   :  { %v5068_v1 = vmin.f32 %v5664_v50, 2.0  ;;  %5356 = vst [vmem:[#allocation17 + $0x10] sm:$0xff] %v5664_v50  ;;  %v5633_v59 = vclamps-f32 %v9628_v8, 20.0  ;;  %v4796_v63 = vadd.f32 %v4795_v52, %v9604_v10  ;;  %v5759_v52 = vld [vmem:[#allocation14 + $0x10] sm:$0xff]  }
 0x73c   :  { %6673 = vpow2.f32 %v5132_v15 }
 0x73d   :  { %v5100_v24 = vmul.f32 0.5, %v5068_v1  ;;  %5325 = vst [vmem:[#allocation16 + $0x18] sm:$0xff] %v5633_v59  ;;  %v5665_v41 = vclamps-f32 %v4796_v63, 20.0  ;;  %v4799_v11 = vpop.f32.mrf.mxu0 }
 0x73e   :  { %v9635_v61 = vadd.f32 %v4799_v11, %v9601_v45 }
 0x73f   :  { %v5134_v31 = vmul.f32 1.442695, %v5100_v24  ;;  %v5069_v39 = vmin.f32 %v5665_v41, 2.0  ;;  %5357 = vst [vmem:[#allocation17 + $0x18] sm:$0xff] %v5665_v41  ;;  %v4801_v46 = vpop.f32.mrf.mxu0 }
 0x740   :  { %v5634_v18 = vclamps-f32 %v9635_v61, 20.0  ;;  %v4802_v4 = vadd.f32 %v4801_v46, %v9604_v10 }
 0x741   :  { %6675 = vpow2.f32 %v5134_v31  ;;  %v5101_v28 = vmul.f32 0.5, %v5069_v39  ;;  %v4803_v21 = vpop.f32.mrf.mxu0 }
 0x742   :  { %5326 = vst [vmem:[#allocation16 + $0x20] sm:$0xff] %v5634_v18  ;;  %v5666_v25 = vclamps-f32 %v4802_v4, 20.0  ;;  %v9642_v37 = vadd.f32 %v4803_v21, %v9601_v45 }
 0x743   :  { %v5136_v22 = vmul.f32 1.442695, %v5101_v28  ;;  %v4805_v32 = vpop.f32.mrf.mxu0 }
 0x744   :  { %v5070_v3 = vmin.f32 %v5666_v25, 2.0  ;;  %5358 = vst [vmem:[#allocation17 + $0x20] sm:$0xff] %v5666_v25  ;;  %v5635_v6 = vclamps-f32 %v9642_v37, 20.0  ;;  %v4806_v49 = vadd.f32 %v4805_v32, %v9604_v10 }
 0x745   :  { %v6672_v27 = vpop.eup %6671  ;;  %6677 = vpow2.f32 %v5136_v22 }
 0x746   :  { %v5258_v30 = vmul.f32 %v6672_v27, %v5696_v58  ;;  %v5102_v42 = vmul.f32 0.5, %v5070_v3  ;;  %5327 = vst [vmem:[#allocation16 + $0x28] sm:$0xff] %v5635_v6  ;;  %v5667_v60 = vclamps-f32 %v4806_v49, 20.0  ;;  %v4809_v17 = vpop.f32.mrf.mxu0  ;;  %v5705_v27 = vunpack.c.h.bf16 %v5759_v52 }
 0x747   :  { %v9651_v38 = vadd.f32 %v4809_v17, %v9601_v45 }
 0x748   :  { %v5290_v29 = vadd.f32 %v5630_v33, %v5258_v30  ;;  %v5138_v55 = vmul.f32 1.442695, %v5102_v42  ;;  %v5071_v7 = vmin.f32 %v5667_v60, 2.0  ;;  %5359 = vst [vmem:[#allocation17 + $0x28] sm:$0xff] %v5667_v60  ;;  %v4811_v53 = vpop.f32.mrf.mxu0  ;;  %v5760_v42 = vld [vmem:[#allocation14 + $0x18] sm:$0xff]  }
 0x749   :  { %v6674_v48 = vpop.eup %6673  ;;  %v5636_v44 = vclamps-f32 %v9651_v38, 20.0  ;;  %v4812_v20 = vadd.f32 %v4811_v53, %v9604_v10  ;;  %v5709_v37 = vunpack.c.h.bf16 %v5760_v42 }
 0x74a   :  { %5386 = vst [vmem:[#allocation19] sm:$0xff] %v5290_v29  ;;  %v5259_v19 = vmul.f32 %v6674_v48, %v5697_v2  ;;  %6679 = vpow2.f32 %v5138_v55  ;;  %v5103_v12 = vmul.f32 0.5, %v5071_v7  ;;  %v4813_v26 = vpop.f32.mrf.mxu0 }
 0x74b   :  { %5328 = vst [vmem:[#allocation16 + $0x30] sm:$0xff] %v5636_v44  ;;  %v5668_v56 = vclamps-f32 %v4812_v20, 20.0  ;;  %v9660_v16 = vadd.f32 %v4813_v26, %v9601_v45 }
 0x74c   :  { %v5291_v33 = vadd.f32 %v5631_v23, %v5259_v19  ;;  %v5140_v40 = vmul.f32 1.442695, %v5103_v12  ;;  %v4815_v62 = vpop.f32.mrf.mxu0  ;;  %v5708_v19 = vunpack.c.l.bf16 %v5760_v42 }
 0x74d   :  { %v5072_v36 = vmin.f32 %v5668_v56, 2.0  ;;  %5360 = vst [vmem:[#allocation17 + $0x30] sm:$0xff] %v5668_v56  ;;  %v5637_v43 = vclamps-f32 %v9660_v16, 20.0  ;;  %v4816_v57 = vadd.f32 %v4815_v62, %v9604_v10 }
 0x74e   :  { %v6676_v9 = vpop.eup %6675  ;;  %5387 = vst [vmem:[#allocation19 + $0x8] sm:$0xff] %v5291_v33  ;;  %6681 = vpow2.f32 %v5140_v40 }
 0x74f   :  { %v5260_v0 = vmul.f32 %v6676_v9, %v5700_v34  ;;  %v5104_v23 = vmul.f32 0.5, %v5072_v36  ;;  %5329 = vst [vmem:[#allocation16 + $0x38] sm:$0xff] %v5637_v43  ;;  %v5669_v14 = vclamps-f32 %v4816_v57, 20.0 }
 0x751   :  { %v5292_v5 = vadd.f32 %v5632_v47, %v5260_v0  ;;  %v4819_v50 = vpop.f32.mrf.mxu0  ;;  %v5142_v1 = vmul.f32 1.442695, %v5104_v23  ;;  %v5073_v63 = vmin.f32 %v5669_v14, 2.0  ;;  %5361 = vst [vmem:[#allocation17 + $0x38] sm:$0xff] %v5669_v14  ;;  %v5704_v47 = vunpack.c.l.bf16 %v5759_v52 }
 0x752   :  { %v6678_v15 = vpop.eup %6677  ;;  %v9669_v24 = vadd.f32 %v4819_v50, %v9601_v45 }
 0x753   :  { %5388 = vst [vmem:[#allocation19 + $0x10] sm:$0xff] %v5292_v5  ;;  %v5261_v41 = vmul.f32 %v6678_v15, %v5701_v35  ;;  %v4821_v11 = vpop.f32.mrf.mxu0  ;;  %6683 = vpow2.f32 %v5142_v1  ;;  %v5105_v51 = vmul.f32 0.5, %v5073_v63  ;;  %v5761_v5 = vld [vmem:[#allocation14 + $0x20] sm:$0xff]  }
 0x754   :  { %v5638_v31 = vclamps-f32 %v9669_v24, 20.0  ;;  %v4822_v39 = vadd.f32 %v4821_v11, %v9604_v10 }
 0x755   :  { %v5293_v13 = vadd.f32 %v5633_v59, %v5261_v41  ;;  %v4823_v46 = vpop.f32.mrf.mxu0  ;;  %v5144_v28 = vmul.f32 1.442695, %v5105_v51 }
 0x756   :  { %5330 = vst [vmem:[#allocation16 + $0x40] sm:$0xff] %v5638_v31  ;;  %v5670_v4 = vclamps-f32 %v4822_v39, 20.0  ;;  %v9678_v58 = vadd.f32 %v4823_v46, %v9601_v45 }
 0x757   :  { %5389 = vst [vmem:[#allocation19 + $0x18] sm:$0xff] %v5293_v13  ;;  %v4825_v21 = vpop.f32.mrf.mxu0  ;;  %v6680_v22 = vpop.eup %6679  ;;  %6685 = vpow2.f32 %v5144_v28 }
 0x758   :  { %v5074_v25 = vmin.f32 %v5670_v4, 2.0  ;;  %5362 = vst [vmem:[#allocation17 + $0x40] sm:$0xff] %v5670_v4  ;;  %v5639_v32 = vclamps-f32 %v9678_v58, 20.0  ;;  %v4826_v8 = vadd.f32 %v4825_v21, %v9604_v10  ;;  %v5262_v59 = vmul.f32 %v6680_v22, %v5704_v47 }
 0x759   :  { %v4829_v30 = vpop.f32.mrf.mxu0 }
 0x75a   :  { %v5106_v3 = vmul.f32 0.5, %v5074_v25  ;;  %5331 = vst [vmem:[#allocation16 + $0x48] sm:$0xff] %v5639_v32  ;;  %v5671_v49 = vclamps-f32 %v4826_v8, 20.0  ;;  %v5294_v2 = vadd.f32 %v5634_v18, %v5262_v59  ;;  %v9687_v60 = vadd.f32 %v4829_v30, %v9601_v45 }
 0x75b   :  { %v6682_v17 = vpop.eup %6681  ;;  %v4831_v48 = vpop.f32.mrf.mxu0 }
 0x75c   :  { %v5146_v29 = vmul.f32 1.442695, %v5106_v3  ;;  %v5075_v54 = vmin.f32 %v5671_v49, 2.0  ;;  %5363 = vst [vmem:[#allocation17 + $0x48] sm:$0xff] %v5671_v49  ;;  %5390 = vst [vmem:[#allocation19 + $0x20] sm:$0xff] %v5294_v2  ;;  %v5263_v55 = vmul.f32 %v6682_v17, %v5705_v27  ;;  %v5640_v7 = vclamps-f32 %v9687_v60, 20.0 }
 0x75d   :  { %v4832_v53 = vadd.f32 %v4831_v48, %v9604_v10  ;;  %v4833_v61 = vpop.f32.mrf.mxu0  ;;  %v5762_v3 = vld [vmem:[#allocation14 + $0x28] sm:$0xff]  }
 0x75e   :  { %6687 = vpow2.f32 %v5146_v29  ;;  %v5107_v20 = vmul.f32 0.5, %v5075_v54  ;;  %v5295_v18 = vadd.f32 %v5635_v6, %v5263_v55  ;;  %5332 = vst [vmem:[#allocation16 + $0x50] sm:$0xff] %v5640_v7  ;;  %v9696_v12 = vadd.f32 %v4833_v61, %v9601_v45 }
 0x75f   :  { %v5672_v34 = vclamps-f32 %v4832_v53, 20.0  ;;  %v4835_v33 = vpop.f32.mrf.mxu0  ;;  %v5716_v55 = vunpack.c.l.bf16 %v5762_v3 }
 0x760   :  { %v5148_v26 = vmul.f32 1.442695, %v5107_v20  ;;  %v6684_v56 = vpop.eup %6683  ;;  %5391 = vst [vmem:[#allocation19 + $0x28] sm:$0xff] %v5295_v18  ;;  %v5641_v62 = vclamps-f32 %v9696_v12, 20.0  ;;  %v4836_v9 = vadd.f32 %v4835_v33, %v9604_v10 }
 0x761   :  { %v5076_v40 = vmin.f32 %v5672_v34, 2.0  ;;  %5364 = vst [vmem:[#allocation17 + $0x50] sm:$0xff] %v5672_v34  ;;  %v5264_v36 = vmul.f32 %v6684_v56, %v5708_v19 }
 0x762   :  { %6689 = vpow2.f32 %v5148_v26  ;;  %5333 = vst [vmem:[#allocation16 + $0x58] sm:$0xff] %v5641_v62  ;;  %v5673_v57 = vclamps-f32 %v4836_v9, 20.0 }
 0x763   :  { %v5108_v6 = vmul.f32 0.5, %v5076_v40  ;;  %v4839_v0 = vpop.f32.mrf.mxu0  ;;  %v5296_v35 = vadd.f32 %v5636_v44, %v5264_v36  ;;  %v5712_v44 = vunpack.c.l.bf16 %v5761_v5  ;;  %v5717_v40 = vunpack.c.h.bf16 %v5762_v3  ;;  %v5763_v36 = vld [vmem:[#allocation14 + $0x30] sm:$0xff]  }
 0x764   :  { %v9705_v23 = vadd.f32 %v4839_v0, %v9601_v45  ;;  %v6686_v14 = vpop.eup %6685  ;;  %v5077_v15 = vmin.f32 %v5673_v57, 2.0  ;;  %5365 = vst [vmem:[#allocation17 + $0x58] sm:$0xff] %v5673_v57 }
 0x765   :  { %v5150_v50 = vmul.f32 1.442695, %v5108_v6  ;;  %v4841_v52 = vpop.f32.mrf.mxu0  ;;  %5392 = vst [vmem:[#allocation19 + $0x30] sm:$0xff] %v5296_v35  ;;  %v5265_v1 = vmul.f32 %v6686_v14, %v5709_v37 }
 0x766   :  { %v5642_v63 = vclamps-f32 %v9705_v23, 20.0  ;;  %v4842_v41 = vadd.f32 %v4841_v52, %v9604_v10  ;;  %v5109_v11 = vmul.f32 0.5, %v5077_v15  ;;  %v5720_v15 = vunpack.c.l.bf16 %v5763_v36 }
 0x767   :  { %6691 = vpow2.f32 %v5150_v50  ;;  %v4843_v51 = vpop.f32.mrf.mxu0  ;;  %v5297_v38 = vadd.f32 %v5637_v43, %v5265_v1  ;;  %v5713_v43 = vunpack.c.h.bf16 %v5761_v5 }
 0x768   :  { %5334 = vst [vmem:[#allocation16 + $0x60] sm:$0xff] %v5642_v63  ;;  %v5674_v39 = vclamps-f32 %v4842_v41, 20.0  ;;  %v9714_v13 = vadd.f32 %v4843_v51, %v9601_v45  ;;  %v5152_v47 = vmul.f32 1.442695, %v5109_v11 }
 0x769   :  { %v4845_v46 = vpop.f32.mrf.mxu0  ;;  %5393 = vst [vmem:[#allocation19 + $0x38] sm:$0xff] %v5297_v38 }
 0x76a   :  { %v5078_v28 = vmin.f32 %v5674_v39, 2.0  ;;  %5366 = vst [vmem:[#allocation17 + $0x60] sm:$0xff] %v5674_v39  ;;  %v5643_v4 = vclamps-f32 %v9714_v13, 20.0  ;;  %v4846_v21 = vadd.f32 %v4845_v46, %v9604_v10  ;;  %6693 = vpow2.f32 %v5152_v47 }
 0x76b   :  { %v6688_v22 = vpop.eup %6687  ;;  %v5721_v39 = vunpack.c.h.bf16 %v5763_v36 }
 0x76c   :  { %v5266_v16 = vmul.f32 %v6688_v22, %v5712_v44  ;;  %v5110_v25 = vmul.f32 0.5, %v5078_v28  ;;  %5335 = vst [vmem:[#allocation16 + $0x68] sm:$0xff] %v5643_v4  ;;  %v5675_v8 = vclamps-f32 %v4846_v21, 20.0  ;;  %v4849_v59 = vpop.f32.mrf.mxu0 }
 0x76d   :  { %v9723_v2 = vadd.f32 %v4849_v59, %v9601_v45  ;;  %v5764_v59 = vld [vmem:[#allocation14 + $0x38] sm:$0xff]  }
 0x76e   :  { %v5298_v27 = vadd.f32 %v5638_v31, %v5266_v16  ;;  %v5154_v49 = vmul.f32 1.442695, %v5110_v25  ;;  %v5079_v30 = vmin.f32 %v5675_v8, 2.0  ;;  %5367 = vst [vmem:[#allocation17 + $0x68] sm:$0xff] %v5675_v8  ;;  %v4851_v17 = vpop.f32.mrf.mxu0 }
 0x76f   :  { %v6690_v42 = vpop.eup %6689  ;;  %v5644_v48 = vclamps-f32 %v9723_v2, 20.0  ;;  %v4852_v53 = vadd.f32 %v4851_v17, %v9604_v10  ;;  %v5724_v17 = vunpack.c.l.bf16 %v5764_v59 }
 0x770   :  { %5394 = vst [vmem:[#allocation19 + $0x40] sm:$0xff] %v5298_v27  ;;  %v5267_v29 = vmul.f32 %v6690_v42, %v5713_v43  ;;  %6695 = vpow2.f32 %v5154_v49  ;;  %v5111_v54 = vmul.f32 0.5, %v5079_v30  ;;  %v4853_v24 = vpop.f32.mrf.mxu0 }
 0x771   :  { %5336 = vst [vmem:[#allocation16 + $0x70] sm:$0xff] %v5644_v48  ;;  %v9732_v20 = vadd.f32 %v4853_v24, %v9601_v45  ;;  %v5676_v61 = vclamps-f32 %v4852_v53, 20.0 }
 0x772   :  { %v5299_v31 = vadd.f32 %v5639_v32, %v5267_v29  ;;  %v5156_v19 = vmul.f32 1.442695, %v5111_v54  ;;  %v4855_v18 = vpop.f32.mrf.mxu0 }
 0x773   :  { %v5645_v26 = vclamps-f32 %v9732_v20, 20.0  ;;  %v4856_v33 = vadd.f32 %v4855_v18, %v9604_v10  ;;  %v5080_v58 = vmin.f32 %v5676_v61, 2.0  ;;  %5368 = vst [vmem:[#allocation17 + $0x70] sm:$0xff] %v5676_v61 }
 0x774   :  { %v6692_v34 = vpop.eup %6691  ;;  %5395 = vst [vmem:[#allocation19 + $0x48] sm:$0xff] %v5299_v31  ;;  %6697 = vpow2.f32 %v5156_v19 }
 0x775   :  { %v5268_v56 = vmul.f32 %v6692_v34, %v5716_v55  ;;  %5337 = vst [vmem:[#allocation16 + $0x78] sm:$0xff] %v5645_v26  ;;  %v5677_v32 = vclamps-f32 %v4856_v33, 20.0  ;;  %v5112_v37 = vmul.f32 0.5, %v5080_v58  ;;  %v4859_v6 = vpop.f32.mrf.mxu0  ;;  %v5765_v33 = vld [vmem:[#allocation14 + $0x40] sm:$0xff]  }
 0x776   :  { %v9741_v35 = vadd.f32 %v4859_v6, %v9601_v45 }
 0x777   :  { %v5300_v9 = vadd.f32 %v5640_v7, %v5268_v56  ;;  %v6694_v57 = vpop.eup %6693  ;;  %v5081_v0 = vmin.f32 %v5677_v32, 2.0  ;;  %5369 = vst [vmem:[#allocation17 + $0x78] sm:$0xff] %v5677_v32  ;;  %v5158_v5 = vmul.f32 1.442695, %v5112_v37  ;;  %v4861_v50 = vpop.f32.mrf.mxu0 }
 0x778   :  { %v5269_v14 = vmul.f32 %v6694_v57, %v5717_v40  ;;  %v5646_v1 = vclamps-f32 %v9741_v35, 20.0  ;;  %v4862_v60 = vadd.f32 %v4861_v50, %v9604_v10 }
 0x779   :  { %5396 = vst [vmem:[#allocation19 + $0x50] sm:$0xff] %v5300_v9  ;;  %v5113_v52 = vmul.f32 0.5, %v5081_v0  ;;  %6699 = vpow2.f32 %v5158_v5  ;;  %v4863_v41 = vpop.f32.mrf.mxu0  ;;  %v5728_v0 = vunpack.c.l.bf16 %v5765_v33 }
 0x77a   :  { %v5301_v7 = vadd.f32 %v5641_v62, %v5269_v14  ;;  %5338 = vst [vmem:[#allocation16 + $0x80] sm:$0xff] %v5646_v1  ;;  %v5678_v51 = vclamps-f32 %v4862_v60, 20.0  ;;  %v9750_v38 = vadd.f32 %v4863_v41, %v9601_v45 }
 0x77b   :  { %v5160_v11 = vmul.f32 1.442695, %v5113_v52  ;;  %v4865_v47 = vpop.f32.mrf.mxu0 }
 0x77c   :  { %5397 = vst [vmem:[#allocation19 + $0x58] sm:$0xff] %v5301_v7  ;;  %v5082_v28 = vmin.f32 %v5678_v51, 2.0  ;;  %5370 = vst [vmem:[#allocation17 + $0x80] sm:$0xff] %v5678_v51  ;;  %v5647_v12 = vclamps-f32 %v9750_v38, 20.0  ;;  %v4866_v62 = vadd.f32 %v4865_v47, %v9604_v10 }
 0x77d   :  { %v6696_v44 = vpop.eup %6695  ;;  %6701 = vpow2.f32 %v5160_v11  ;;  %v4869_v25 = vpop.f32.mrf.mxu0 }
 0x77e   :  { %v5270_v46 = vmul.f32 %v6696_v44, %v5720_v15  ;;  %v5114_v22 = vmul.f32 0.5, %v5082_v28  ;;  %5339 = vst [vmem:[#allocation16 + $0x88] sm:$0xff] %v5647_v12  ;;  %v5679_v43 = vclamps-f32 %v4866_v62, 20.0  ;;  %v9759_v3 = vadd.f32 %v4869_v25, %v9601_v45 }
 0x77f   :  { %v4871_v30 = vpop.f32.mrf.mxu0  ;;  %v5729_v44 = vunpack.c.h.bf16 %v5765_v33 }
 0x780   :  { %v5302_v21 = vadd.f32 %v5642_v63, %v5270_v46  ;;  %v5162_v27 = vmul.f32 1.442695, %v5114_v22  ;;  %v5083_v49 = vmin.f32 %v5679_v43, 2.0  ;;  %5371 = vst [vmem:[#allocation17 + $0x88] sm:$0xff] %v5679_v43  ;;  %v5648_v63 = vclamps-f32 %v9759_v3, 20.0 }
 0x781   :  { %v6698_v16 = vpop.eup %6697  ;;  %v4872_v42 = vadd.f32 %v4871_v30, %v9604_v10  ;;  %v4873_v54 = vpop.f32.mrf.mxu0 }
 0x782   :  { %5398 = vst [vmem:[#allocation19 + $0x60] sm:$0xff] %v5302_v21  ;;  %v5271_v8 = vmul.f32 %v6698_v16, %v5721_v39  ;;  %6703 = vpow2.f32 %v5162_v27  ;;  %v5115_v29 = vmul.f32 0.5, %v5083_v49  ;;  %5340 = vst [vmem:[#allocation16 + $0x90] sm:$0xff] %v5648_v63  ;;  %v9768_v53 = vadd.f32 %v4873_v54, %v9601_v45  ;;  %v5766_v21 = vld [vmem:[#allocation14 + $0x48] sm:$0xff]  }
 0x783   :  { %v5680_v55 = vclamps-f32 %v4872_v42, 20.0  ;;  %v4875_v31 = vpop.f32.mrf.mxu0  ;;  %v5732_v49 = vunpack.c.l.bf16 %v5766_v21 }
 0x784   :  { %v5303_v23 = vadd.f32 %v5643_v4, %v5271_v8  ;;  %v5164_v24 = vmul.f32 1.442695, %v5115_v29  ;;  %v5725_v4 = vunpack.c.h.bf16 %v5764_v59  ;;  %v5649_v61 = vclamps-f32 %v9768_v53, 20.0 }
 0x785   :  { %v5084_v19 = vmin.f32 %v5680_v55, 2.0  ;;  %5372 = vst [vmem:[#allocation17 + $0x90] sm:$0xff] %v5680_v55  ;;  %v4876_v18 = vadd.f32 %v4875_v31, %v9604_v10 }
 0x786   :  { %5399 = vst [vmem:[#allocation19 + $0x68] sm:$0xff] %v5303_v23  ;;  %v6700_v13 = vpop.eup %6699  ;;  %6705 = vpow2.f32 %v5164_v24  ;;  %5341 = vst [vmem:[#allocation16 + $0x98] sm:$0xff] %v5649_v61 }
 0x787   :  { %v5272_v34 = vmul.f32 %v6700_v13, %v5724_v17  ;;  %v5116_v56 = vmul.f32 0.5, %v5084_v19  ;;  %v5681_v40 = vclamps-f32 %v4876_v18, 20.0  ;;  %v4879_v9 = vpop.f32.mrf.mxu0 }
 0x788   :  { %v9777_v57 = vadd.f32 %v4879_v9, %v9601_v45 }
 0x789   :  { %v5304_v32 = vadd.f32 %v5644_v48, %v5272_v34  ;;  %v5166_v37 = vmul.f32 1.442695, %v5116_v56  ;;  %v5085_v6 = vmin.f32 %v5681_v40, 2.0  ;;  %5373 = vst [vmem:[#allocation17 + $0x98] sm:$0xff] %v5681_v40  ;;  %v4881_v14 = vpop.f32.mrf.mxu0 }
 0x78a   :  { %v6702_v58 = vpop.eup %6701  ;;  %v5650_v15 = vclamps-f32 %v9777_v57, 20.0  ;;  %v4882_v2 = vadd.f32 %v4881_v14, %v9604_v10 }
 0x78b   :  { %v5273_v36 = vmul.f32 %v6702_v58, %v5725_v4  ;;  %5400 = vst [vmem:[#allocation19 + $0x70] sm:$0xff] %v5304_v32  ;;  %6707 = vpow2.f32 %v5166_v37  ;;  %v5117_v50 = vmul.f32 0.5, %v5085_v6  ;;  %v4883_v48 = vpop.f32.mrf.mxu0  ;;  %v5733_v4 = vunpack.c.h.bf16 %v5766_v21 }
 0x78c   :  { %5342 = vst [vmem:[#allocation16 + $0xa0] sm:$0xff] %v5650_v15  ;;  %v9786_v60 = vadd.f32 %v4883_v48, %v9601_v45  ;;  %v5682_v41 = vclamps-f32 %v4882_v2, 20.0 }
 0x78d   :  { %v5305_v5 = vadd.f32 %v5645_v26, %v5273_v36  ;;  %v5168_v52 = vmul.f32 1.442695, %v5117_v50  ;;  %v4885_v11 = vpop.f32.mrf.mxu0 }
 0x78e   :  { %v5651_v26 = vclamps-f32 %v9786_v60, 20.0  ;;  %v4886_v51 = vadd.f32 %v4885_v11, %v9604_v10  ;;  %v5086_v39 = vmin.f32 %v5682_v41, 2.0  ;;  %5374 = vst [vmem:[#allocation17 + $0xa0] sm:$0xff] %v5682_v41 }
 0x78f   :  { %5401 = vst [vmem:[#allocation19 + $0x78] sm:$0xff] %v5305_v5  ;;  %v6704_v7 = vpop.eup %6703  ;;  %6709 = vpow2.f32 %v5168_v52  ;;  %v4889_v47 = vpop.f32.mrf.mxu0 }
 0x790   :  { %v5274_v20 = vmul.f32 %v6704_v7, %v5728_v0  ;;  %5343 = vst [vmem:[#allocation16 + $0xa8] sm:$0xff] %v5651_v26  ;;  %v5683_v28 = vclamps-f32 %v4886_v51, 20.0  ;;  %v9795_v62 = vadd.f32 %v4889_v47, %v9601_v45  ;;  %v5118_v22 = vmul.f32 0.5, %v5086_v39  ;;  %v5767_v0 = vld [vmem:[#allocation14 + $0x50] sm:$0xff]   ;;  %v5768_v47 = vld [vmem:[#allocation14 + $0x58] sm:$0xff]  }
 0x791   :  { %v4891_v16 = vpop.f32.mrf.mxu0  ;;  %v5736_v7 = vunpack.c.l.bf16 %v5767_v0  ;;  %v5737_v39 = vunpack.c.h.bf16 %v5767_v0 }
 0x792   :  { %v5306_v46 = vadd.f32 %v5646_v1, %v5274_v20  ;;  %v5087_v25 = vmin.f32 %v5683_v28, 2.0  ;;  %5375 = vst [vmem:[#allocation17 + $0xa8] sm:$0xff] %v5683_v28  ;;  %v5652_v8 = vclamps-f32 %v9795_v62, 20.0  ;;  %v4892_v59 = vadd.f32 %v4891_v16, %v9604_v10 }
 0x793   :  { %v6706_v43 = vpop.eup %6705  ;;  %v5170_v1 = vmul.f32 1.442695, %v5118_v22  ;;  %v4893_v27 = vpop.f32.mrf.mxu0 }
 0x794   :  { %5402 = vst [vmem:[#allocation19 + $0x80] sm:$0xff] %v5306_v46  ;;  %v5275_v35 = vmul.f32 %v6706_v43, %v5729_v44  ;;  %v5119_v30 = vmul.f32 0.5, %v5087_v25  ;;  %5344 = vst [vmem:[#allocation16 + $0xb0] sm:$0xff] %v5652_v8  ;;  %v5684_v23 = vclamps-f32 %v4892_v59, 20.0  ;;  %v9802_v42 = vadd.f32 %v4893_v27, %v9601_v45 }
 0x795   :  { %6711 = vpow2.f32 %v5170_v1  ;;  %v4895_v29 = vpop.f32.mrf.mxu0 }
 0x796   :  { %v5307_v17 = vadd.f32 %v5647_v12, %v5275_v35  ;;  %v5172_v54 = vmul.f32 1.442695, %v5119_v30  ;;  %v5088_v55 = vmin.f32 %v5684_v23, 2.0  ;;  %5376 = vst [vmem:[#allocation17 + $0xb0] sm:$0xff] %v5684_v23  ;;  %v5653_v24 = vclamps-f32 %v9802_v42, 20.0 }
 0x797   :  { %v4896_v31 = vadd.f32 %v4895_v29, %v9604_v10  ;;  %v4899_v19 = vpop.f32.mrf.mxu0 }
 0x798   :  { %v6708_v13 = vpop.eup %6707  ;;  %5403 = vst [vmem:[#allocation19 + $0x88] sm:$0xff] %v5307_v17  ;;  %6713 = vpow2.f32 %v5172_v54  ;;  %v5120_v34 = vmul.f32 0.5, %v5088_v55  ;;  %5345 = vst [vmem:[#allocation16 + $0xb8] sm:$0xff] %v5653_v24  ;;  %v9811_v12 = vadd.f32 %v4899_v19, %v9601_v45  ;;  %v5741_v19 = vunpack.c.h.bf16 %v5768_v47 }
 0x799   :  { %v5276_v18 = vmul.f32 %v6708_v13, %v5732_v49  ;;  %v5685_v38 = vclamps-f32 %v4896_v31, 20.0  ;;  %v4901_v33 = vpop.f32.mrf.mxu0  ;;  %v5740_v49 = vunpack.c.l.bf16 %v5768_v47  ;;  %v9867_v47 = vld [vmem:[#allocation14 + $0x68] sm:$0xff]  }
 0x79a   :  { %v5174_v40 = vmul.f32 1.442695, %v5120_v34  ;;  %v4902_v32 = vadd.f32 %v4901_v33, %v9604_v10  ;;  %v5654_v36 = vclamps-f32 %v9811_v12, 20.0  ;;  %v5769_v33 = vld [vmem:[#allocation14 + $0x60] sm:$0xff]  }
 0x79b   :  { %v5308_v56 = vadd.f32 %v5648_v63, %v5276_v18  ;;  %v5089_v58 = vmin.f32 %v5685_v38, 2.0  ;;  %5377 = vst [vmem:[#allocation17 + $0xb8] sm:$0xff] %v5685_v38  ;;  %v4903_v37 = vpop.f32.mrf.mxu0  ;;  %v5744_v0 = vunpack.c.l.bf16 %v5769_v33 }
 0x79c   :  { %v6710_v9 = vpop.eup %6709  ;;  %6715 = vpow2.f32 %v5174_v40  ;;  %v5686_v5 = vclamps-f32 %v4902_v32, 20.0  ;;  %5346 = vst [vmem:[#allocation16 + $0xc0] sm:$0xff] %v5654_v36  ;;  %v9820_v3 = vadd.f32 %v4903_v37, %v9601_v45 }
 0x79d   :  { %5404 = vst [vmem:[#allocation19 + $0x90] sm:$0xff] %v5308_v56  ;;  %v5277_v6 = vmul.f32 %v6710_v9, %v5733_v4  ;;  %v5121_v14 = vmul.f32 0.5, %v5089_v58  ;;  %v4905_v63 = vpop.f32.mrf.mxu0 }
 0x79e   :  { %v5090_v48 = vmin.f32 %v5686_v5, 2.0  ;;  %5378 = vst [vmem:[#allocation17 + $0xc0] sm:$0xff] %v5686_v5  ;;  %v4906_v52 = vadd.f32 %v4905_v63, %v9604_v10  ;;  %v5655_v41 = vclamps-f32 %v9820_v3, 20.0 }
 0x79f   :  { %v5309_v50 = vadd.f32 %v5649_v61, %v5277_v6  ;;  %v5176_v2 = vmul.f32 1.442695, %v5121_v14  ;;  %v4909_v11 = vpop.f32.mrf.mxu0 }
 0x7a0   :  { %v5122_v20 = vmul.f32 0.5, %v5090_v48  ;;  %v5687_v51 = vclamps-f32 %v4906_v52, 20.0  ;;  %v9827_v44 = vadd.f32 %v4909_v11, %v9601_v45  ;;  %5347 = vst [vmem:[#allocation16 + $0xc8] sm:$0xff] %v5655_v41 }
 0x7a1   :  { %5405 = vst [vmem:[#allocation19 + $0x98] sm:$0xff] %v5309_v50  ;;  %6717 = vpow2.f32 %v5176_v2  ;;  %v4911_v53 = vpop.f32.mrf.mxu0 }
 0x7a2   :  { %v6712_v61 = vpop.eup %6711  ;;  %v5178_v46 = vmul.f32 1.442695, %v5122_v20  ;;  %v5091_v28 = vmin.f32 %v5687_v51, 2.0  ;;  %5379 = vst [vmem:[#allocation17 + $0xc8] sm:$0xff] %v5687_v51  ;;  %v5656_v21 = vclamps-f32 %v9827_v44, 20.0  ;;  %v4912_v22 = vadd.f32 %v4911_v53, %v9604_v10 }
 0x7a3   :  { %v5278_v16 = vmul.f32 %v6712_v61, %v5736_v7  ;;  %v4913_v43 = vpop.f32.mrf.mxu0 }
 0x7a4   :  { %6719 = vpow2.f32 %v5178_v46  ;;  %v5123_v25 = vmul.f32 0.5, %v5091_v28  ;;  %5348 = vst [vmem:[#allocation16 + $0xd0] sm:$0xff] %v5656_v21  ;;  %v5688_v59 = vclamps-f32 %v4912_v22, 20.0  ;;  %v9836_v35 = vadd.f32 %v4913_v43, %v9601_v45 }
 0x7a5   :  { %v6714_v1 = vpop.eup %6713  ;;  %v5310_v27 = vadd.f32 %v5650_v15, %v5278_v16  ;;  %v4915_v30 = vpop.f32.mrf.mxu0 }
 0x7a6   :  { %v5279_v23 = vmul.f32 %v6714_v1, %v5737_v39  ;;  %v5180_v17 = vmul.f32 1.442695, %v5123_v25  ;;  %v5092_v29 = vmin.f32 %v5688_v59, 2.0  ;;  %5380 = vst [vmem:[#allocation17 + $0xd0] sm:$0xff] %v5688_v59  ;;  %v5657_v54 = vclamps-f32 %v9836_v35, 20.0 }
 0x7a7   :  { %5406 = vst [vmem:[#allocation19 + $0xa0] sm:$0xff] %v5310_v27  ;;  %v4916_v55 = vadd.f32 %v4915_v30, %v9604_v10  ;;  %v4919_v31 = vpop.f32.mrf.mxu0  ;;  %v5745_v39 = vunpack.c.h.bf16 %v5769_v33  ;;  %v5748_v1 = vunpack.c.l.bf16 %v9867_v47 }
 0x7a8   :  { %v5311_v13 = vadd.f32 %v5651_v26, %v5279_v23  ;;  %6721 = vpow2.f32 %v5180_v17  ;;  %v5124_v4 = vmul.f32 0.5, %v5092_v29  ;;  %5349 = vst [vmem:[#allocation16 + $0xd8] sm:$0xff] %v5657_v54  ;;  %v9847_v57 = vadd.f32 %v4919_v31, %v9601_v45 }
 0x7a9   :  { %v6716_v15 = vpop.eup %6715  ;;  %v5689_v18 = vclamps-f32 %v4916_v55, 20.0  ;;  %v4921_v34 = vpop.f32.mrf.mxu0 }
 0x7aa   :  { %5407 = vst [vmem:[#allocation19 + $0xa8] sm:$0xff] %v5311_v13  ;;  %v5280_v38 = vmul.f32 %v6716_v15, %v5740_v49  ;;  %v5182_v56 = vmul.f32 1.442695, %v5124_v4  ;;  %v5658_v40 = vclamps-f32 %v9847_v57, 20.0  ;;  %v4922_v60 = vadd.f32 %v4921_v34, %v9604_v10 }
 0x7ab   :  { %v5093_v26 = vmin.f32 %v5689_v18, 2.0  ;;  %5381 = vst [vmem:[#allocation17 + $0xd8] sm:$0xff] %v5689_v18  ;;  %v4923_v58 = vpop.f32.mrf.mxu0 }
 0x7ac   :  { %v5312_v32 = vadd.f32 %v5652_v8, %v5280_v38  ;;  %6723 = vpow2.f32 %v5182_v56  ;;  %5350 = vst [vmem:[#allocation16 + $0xe0] sm:$0xff] %v5658_v40  ;;  %v5690_v9 = vclamps-f32 %v4922_v60, 20.0  ;;  %v9856_v37 = vadd.f32 %v4923_v58, %v9601_v45 }
 0x7ad   :  { %v5125_v14 = vmul.f32 0.5, %v5093_v26  ;;  %v4925_v5 = vpop.f32.mrf.mxu0 }
 0x7ae   :  { %v6718_v6 = vpop.eup %6717  ;;  %5408 = vst [vmem:[#allocation19 + $0xb0] sm:$0xff] %v5312_v32  ;;  %v5094_v50 = vmin.f32 %v5690_v9, 2.0  ;;  %5382 = vst [vmem:[#allocation17 + $0xe0] sm:$0xff] %v5690_v9  ;;  %v5659_v2 = vclamps-f32 %v9856_v37, 20.0  ;;  %v4926_v62 = vadd.f32 %v4925_v5, %v9604_v10 }
 0x7af   :  { %v5281_v63 = vmul.f32 %v6718_v6, %v5741_v19  ;;  %v5184_v8 = vmul.f32 1.442695, %v5125_v14  ;;  %v4929_v48 = vpop.f32.mrf.mxu0 }
 0x7b0   :  { %v5126_v7 = vmul.f32 0.5, %v5094_v50  ;;  %5351 = vst [vmem:[#allocation16 + $0xe8] sm:$0xff] %v5659_v2  ;;  %v5691_v11 = vclamps-f32 %v4926_v62, 20.0  ;;  %v9865_v20 = vadd.f32 %v4929_v48, %v9601_v45 }
 0x7b1   :  { %v5313_v52 = vadd.f32 %v5653_v24, %v5281_v63  ;;  %v6720_v51 = vpop.eup %6719  ;;  %6725 = vpow2.f32 %v5184_v8  ;;  %v4931_v53 = vpop.f32.mrf.mxu0 }
 0x7b2   :  { %v5282_v61 = vmul.f32 %v6720_v51, %v5744_v0  ;;  %v5186_v46 = vmul.f32 1.442695, %v5126_v7  ;;  %v5095_v28 = vmin.f32 %v5691_v11, 2.0  ;;  %5383 = vst [vmem:[#allocation17 + $0xe8] sm:$0xff] %v5691_v11  ;;  %v5660_v42 = vclamps-f32 %v9865_v20, 20.0 }
 0x7b3   :  { %5409 = vst [vmem:[#allocation19 + $0xb8] sm:$0xff] %v5313_v52  ;;  %v4932_v24 = vadd.f32 %v4931_v53, %v9604_v10  ;;  %v4933_v22 = vpop.f32.mrf.mxu0 }
 0x7b4   :  { %v5314_v16 = vadd.f32 %v5654_v36, %v5282_v61  ;;  %6727 = vpow2.f32 %v5186_v46  ;;  %v5127_v43 = vmul.f32 0.5, %v5095_v28  ;;  %5352 = vst [vmem:[#allocation16 + $0xf0] sm:$0xff] %v5660_v42  ;;  %v9876_v25 = vadd.f32 %v4933_v22, %v9601_v45 }
 0x7b5   :  { %v6722_v59 = vpop.eup %6721  ;;  %v5692_v27 = vclamps-f32 %v4932_v24, 20.0  ;;  %v4935_v49 = vpop.f32.mrf.mxu0 }
 0x7b6   :  { %5410 = vst [vmem:[#allocation19 + $0xc0] sm:$0xff] %v5314_v16  ;;  %v5283_v30 = vmul.f32 %v6722_v59, %v5745_v39  ;;  %v5188_v23 = vmul.f32 1.442695, %v5127_v43  ;;  %v5661_v12 = vclamps-f32 %v9876_v25, 20.0  ;;  %v4936_v36 = vadd.f32 %v4935_v49, %v9604_v10 }
 0x7b7   :  { %v5096_v17 = vmin.f32 %v5692_v27, 2.0  ;;  %5384 = vst [vmem:[#allocation17 + $0xf0] sm:$0xff] %v5692_v27 }
 0x7b8   :  { %v5315_v45 = vadd.f32 %v5655_v41, %v5283_v30  ;;  %6729 = vpow2.f32 %v5188_v23  ;;  %5353 = vst [vmem:[#allocation16 + $0xf8] sm:$0xff] %v5661_v12  ;;  %v5693_v29 = vclamps-f32 %v4936_v36, 20.0 }
 0x7b9   :  { %v6724_v55 = vpop.eup %6723  ;;  %v5128_v31 = vmul.f32 0.5, %v5096_v17 }
 0x7ba   :  { %6906 = shalt.err (!%p6903_p2)
}
 0x7bb   :  { %5429 = dma.vmem_to_hbm [thread:$0]  %s5424_s7, 4096, %s9924_s8, [#allocation4], %s6974_s25, %s6974_s25, %s6975_s26   ;;  %5411 = vst [vmem:[#allocation19 + $0xc8] sm:$0xff] %v5315_v45  ;;  %v5284_v10 = vmul.f32 %v6724_v55, %v5748_v1  ;;  %v5097_v3 = vmin.f32 %v5693_v29, 2.0  ;;  %5385 = vst [vmem:[#allocation17 + $0xf8] sm:$0xff] %v5693_v29  ;;  %v5749_v41 = vunpack.c.h.bf16 %v9867_v47  ;;  %v5771_v13 = vld [vmem:[#allocation14 + $0x70] sm:$0xff]  }
 0x7bc   :  { %v5190_v4 = vmul.f32 1.442695, %v5128_v31  ;;  %s6915_s19 = scalar_lea.vmem %s5436_s17, 4096  ;;  %p6920_p4 = scmp.lt.s32.totalorder %s5436_s17, %s5436_s17 }
 0x7bd   :  { %p6916_p3 = scmp.ne.s32.totalorder %s5436_s17, %s6915_s19  ;;  %p6921_p5 = scmp.lt.s32.totalorder %s6915_s19, %s6915_s19 }
 0x7bf   :  { %p6922_p6 = por %p6921_p5, %p6920_p4 }
 0x7c1   :  { %p6923_p7 = pnand %p6922_p6, %p6916_p3 }
 0x7c3   :  { %6926 = shalt.err (!%p6923_p7)
}
 0x7c4   :  { %5441 = dma.vmem_to_hbm [thread:$0]  %s5436_s17, 4096, %s9925_s9, [#allocation18], %s6974_s25, %s6974_s25, %s6975_s26   ;;  %v5316_v15 = vadd.f32 %v5656_v21, %v5284_v10  ;;  %v5129_v19 = vmul.f32 0.5, %v5097_v3  ;;  %6731 = vpow2.f32 %v5190_v4  ;;  %v6726_v18 = vpop.eup %6725  ;;  %v5752_v34 = vunpack.c.l.bf16 %v5771_v13  ;;  %v5772_v44 = vld [vmem:[#allocation14 + $0x78] sm:$0xff]  }
 0x7c5   :  { %v5285_v33 = vmul.f32 %v6726_v18, %v5749_v41  ;;  %v6728_v56 = vpop.eup %6727  ;;  %v5753_v58 = vunpack.c.h.bf16 %v5771_v13  ;;  %v5756_v6 = vunpack.c.l.bf16 %v5772_v44  ;;  %v5757_v5 = vunpack.c.h.bf16 %v5772_v44  ;;  %s6986_s9 = smov [#allocation19]  }
 0x7c6   :  { %5412 = vst [vmem:[#allocation19 + $0xd0] sm:$0xff] %v5316_v15  ;;  %v5192_v38 = vmul.f32 1.442695, %v5129_v19  ;;  %v5286_v26 = vmul.f32 %v6728_v56, %v5752_v34  ;;  %v6730_v21 = vpop.eup %6729  ;;  %s5447_s21 = sshll.u32 %s6986_s9, 4  ;;  %s5448_s21 = int_to_ptr.vmem [resolvable:$true] %s5447_s21 }
 0x7c7   :  { %v5317_v60 = vadd.f32 %v5657_v54, %v5285_v33  ;;  %v5287_v9 = vmul.f32 %v6730_v21, %v5753_v58  ;;  %s6935_s22 = scalar_lea.vmem %s5448_s21, 4096  ;;  %p6940_p9 = scmp.lt.s32.totalorder %s5448_s21, %s5448_s21 }
 0x7c8   :  { %6733 = vpow2.f32 %v5192_v38  ;;  %v5318_v32 = vadd.f32 %v5658_v40, %v5286_v26  ;;  %p6936_p8 = scmp.ne.s32.totalorder %s5448_s21, %s6935_s22  ;;  %p6941_p10 = scmp.lt.s32.totalorder %s6935_s22, %s6935_s22 }
 0x7c9   :  { %5413 = vst [vmem:[#allocation19 + $0xd8] sm:$0xff] %v5317_v60  ;;  %v5319_v0 = vadd.f32 %v5659_v2, %v5287_v9 }
 0x7ca   :  { %5414 = vst [vmem:[#allocation19 + $0xe0] sm:$0xff] %v5318_v32  ;;  %p6942_p11 = por %p6941_p10, %p6940_p9 }
 0x7cb   :  { %5415 = vst [vmem:[#allocation19 + $0xe8] sm:$0xff] %v5319_v0 }
 0x7cc   :  { %p6943_p12 = pnand %p6942_p11, %p6936_p8 }
 0x7d1   :  { %v6732_v14 = vpop.eup %6731 }
 0x7d2   :  { %v5288_v63 = vmul.f32 %v6732_v14, %v5756_v6 }
 0x7d4   :  { %v5320_v54 = vadd.f32 %v5660_v42, %v5288_v63 }
 0x7d5   :  { %v6734_v35 = vpop.eup %6733 }
 0x7d6   :  { %v5289_v57 = vmul.f32 %v6734_v35, %v5757_v5  ;;  %5416 = vst [vmem:[#allocation19 + $0xf0] sm:$0xff] %v5320_v54 }
 0x7d8   :  { %v5321_v40 = vadd.f32 %v5661_v12, %v5289_v57 }
 0x7da   :  { %5417 = vst [vmem:[#allocation19 + $0xf8] sm:$0xff] %v5321_v40 }
 0x7db   :  { %6946 = shalt.err (!%p6943_p12)
}
 0x7dc   :  { %5453 = dma.vmem_to_hbm [thread:$0]  %s5448_s21, 4096, %s9926_s10, [#allocation18], %s6974_s25, %s6974_s25, %s6975_s26  }
 0x7dd   :  { %6965 = dma.done.wait [#allocation4], 4096  }
 0x7de   :  { %6966 = vsyncadd [#allocation4], 4294963200 }
 0x7df   :  { %6967 = dma.done.wait [#allocation18], 8192  }
 0x7e0   :  { %6968 = vsyncadd [#allocation18], 4294959104 }
 0x7e1   :  { %5463 = vsyncpa [#allocation3], 1 }
 0x7e2   :  { %5464 = vsyncpa [#allocation6], 1 }
 0x7e3   :  { %5465 = vsyncpa [#allocation9], 1 }
 0x7e4   :  { %5466 = vsyncpa [#allocation12], 1 }
 0x7e5   :  { %5467 = vsyncpa [#allocation15], 1 }
 0x7e6   :  { %5468 = vsyncpa [#allocation4], 1 }
 0x7e7   :  { %5469 = vsyncpa [#allocation18], 1 }

</bundles_post_ra>
